<compile_context>
chip_gen: v7x
topology: tpu7x:2x2x1
jax: 0.10.0
libtpu: 0.0.40
codegen_flags: <defaults>
</compile_context>

<pallas_src>
import math

import jax
import jax.numpy as jnp
from jax.experimental import pallas as pl
from jax.experimental.pallas import tpu as pltpu

_BN_EPS = 1e-5


def _cdiv(a, b):
    return -(-a // b)


def _round_up(a, m):
    return _cdiv(a, m) * m


def _vmem_budget():
    """(compiler vmem limit, per-step tile budget) from the actual chip."""
    try:
        cap = int(pltpu.get_tpu_info().vmem_capacity_bytes)
    except Exception:
        cap = 64 * 1024 * 1024            # conservative fallback (v7x-sized)
    vmem_limit = min(cap * 3 // 4, 100 * 1024 * 1024)
    tile_budget = cap * 9 // 16           # working-set target, below the limit
    return vmem_limit, tile_budget


# ---------------------------------------------------------------------------
# 1x1 conv (+ folded BN, ReLU, optional fused lateral add)
#   == single-K-step tiled matmul with a fused epilogue.
# ---------------------------------------------------------------------------
def _mm_kernel(x_ref, w_ref, b_ref, o_ref):
    y = jnp.dot(x_ref[...], w_ref[...], preferred_element_type=jnp.float32)
    y = jnp.maximum(y + b_ref[...], 0.0)
    o_ref[...] = y.astype(o_ref.dtype)


def _mm_add_kernel(x_ref, w_ref, b_ref, a_ref, o_ref):
    # relu(x @ w + b) + addend   (addend = upsampled coarser pyramid level)
    y = jnp.dot(x_ref[...], w_ref[...], preferred_element_type=jnp.float32)
    y = jnp.maximum(y + b_ref[...], 0.0) + a_ref[...].astype(jnp.float32)
    o_ref[...] = y.astype(o_ref.dtype)


def _pick_tm(M, K, cout, budget):
    per_row = 4 * K + 8 * cout                 # bf16 x (dbl-buf) + bf16 out/addend (dbl-buf)
    fixed = 4 * K * cout + (2 << 20)           # dbl-buffered bf16 weights + slack
    cap_rows = max(8, (budget - fixed) // per_row)
    # cap at ceil(M/2) so the parallel axis has >= 2 steps when M allows (v7x)
    tm = min(1024, cap_rows, _round_up(_cdiv(M, 2), 8), _round_up(M, 8))
    return max(8, (tm // 8) * 8)


def matmul_bias_relu(x2d, w2d, bias, addend2d, vmem_limit, budget):
    M, K = x2d.shape
    cout = w2d.shape[1]
    tm = _pick_tm(M, K, cout, budget)
    Mp = _round_up(M, tm)
    nm = Mp // tm

    # Wrapper-side bf16 cast fuses with the surrounding transpose/reshape/pad.
    x2d = x2d.astype(jnp.bfloat16)
    if Mp != M:
        x2d = jnp.pad(x2d, ((0, Mp - M), (0, 0)))
    bias2 = bias.reshape(1, cout).astype(jnp.float32)

    in_specs = [
        pl.BlockSpec((tm, K), lambda m: (m, 0)),
        pl.BlockSpec((K, cout), lambda m: (0, 0)),
        pl.BlockSpec((1, cout), lambda m: (0, 0)),
    ]
    args = [x2d, w2d.astype(jnp.bfloat16), bias2]
    kernel = _mm_kernel
    if addend2d is not None:
        a = addend2d.astype(jnp.bfloat16)
        if Mp != M:
            a = jnp.pad(a, ((0, Mp - M), (0, 0)))
        in_specs.append(pl.BlockSpec((tm, cout), lambda m: (m, 0)))
        args.append(a)
        kernel = _mm_add_kernel

    out = pl.pallas_call(
        kernel,
        out_shape=jax.ShapeDtypeStruct((Mp, cout), jnp.bfloat16),
        grid_spec=pltpu.PrefetchScalarGridSpec(
            num_scalar_prefetch=0,
            grid=(nm,),
            in_specs=in_specs,
            out_specs=pl.BlockSpec((tm, cout), lambda m: (m, 0)),
        ),
        compiler_params=pltpu.CompilerParams(
            dimension_semantics=("parallel",),
            vmem_limit_bytes=vmem_limit),
    )(*args)
    return out[:M] if Mp != M else out


def conv1x1_bn_relu(x_nhwc, layer, addend_nhwc, vmem_limit, budget):
    N, H, W, C = x_nhwc.shape
    cout = layer["w"].shape[1]
    a2d = None if addend_nhwc is None else addend_nhwc.reshape(N * H * W, cout)
    out = matmul_bias_relu(x_nhwc.reshape(N * H * W, C), layer["w"], layer["b"],
                           a2d, vmem_limit, budget)
    return out.reshape(N, H, W, cout)


# ---------------------------------------------------------------------------
# 3x3 'same' conv (+ folded BN, ReLU) without HBM im2col and without dy copies
# ---------------------------------------------------------------------------
def _conv3x3_kernel(x_ref, w_ref, b_ref, o_ref, acc_ref):
    # x_ref : (1, th+2, Wp, C) bf16   (Wp = W8 + 2, halo'd row tile)
    # w_ref : (3, 3, C, cout)  bf16
    # b_ref : (1, cout)        f32
    # o_ref : (1, th, W, cout) bf16
    # acc_ref: (th*W8, cout)   f32 scratch
    _, th, W, cout = o_ref.shape
    Wp, C = x_ref.shape[2], x_ref.shape[3]
    W8 = Wp - 2

    first = True
    for dx in range(3):
        # dx shift hoisted out of the dy loop: at most 2 misaligned views/step.
        cols = x_ref[0, :, dx:dx + W8, :]                  # (th+2, W8, C)
        for dy in range(3):
            # outer-dim slice + sublane-aligned flatten (W8 % 8 == 0): no relayout
            patch = cols[dy:dy + th].reshape(th * W8, C)
            prod = jnp.dot(patch, w_ref[dy, dx],
                           preferred_element_type=jnp.float32)
            if first:
                acc_ref[...] = prod
                first = False
            else:
                acc_ref[...] += prod                       # in-place f32 VMEM accumulate

    y = jnp.maximum(acc_ref[...] + b_ref[...], 0.0)
    y = y.reshape(th, W8, cout)[:, :W, :]                  # drop padded columns in VMEM
    o_ref[...] = y.reshape(1, th, W, cout).astype(o_ref.dtype)


def _pick_row_tile(H, Wp, W8, C, cout, budget):
    fixed = 36 * C * cout + (2 << 20)          # dbl-buffered bf16 3x3 weights + slack
    halo = 8 * Wp * C                          # the two halo rows (dbl-buffered bf16)
    per_row = (4 * Wp * C                      # bf16 input rows, double-buffered
               + 4 * W8 * cout                 # f32 accumulator scratch
               + 4 * W8 * cout)                # bf16 output rows, double-buffered
    cap_rows = max(8, (budget - fixed - halo) // per_row)
    # cap at ceil(H/2) so there are >= 2 parallel grid steps when H allows (v7x)
    th = min(256, cap_rows, _round_up(_cdiv(H, 2), 8), _round_up(H, 8))
    return max(8, (th // 8) * 8)


def conv3x3_bn_relu(x_nhwc, layer, vmem_limit, budget):
    w4d, bias = layer["w"], layer["b"]
    N, H, W, C = x_nhwc.shape
    cout = w4d.shape[-1]

    W8 = _round_up(W, 8)                       # aligned flatten width
    Wp = W8 + 2                                # +2 for the dx taps (left zero col)
    th = _pick_row_tile(H, Wp, W8, C, cout, budget)
    Hpad = _round_up(H, th)
    nh = Hpad // th

    # Single padded bf16 copy of the activation (pad + cast fuse into one pass);
    # the per-tile stack only duplicates the 2 halo rows of each row tile.
    xp = jnp.pad(x_nhwc.astype(jnp.bfloat16),
                 ((0, 0), (1, 1 + Hpad - H), (1, 1 + W8 - W), (0, 0)))
    xs = jnp.stack([xp[:, i * th:i * th + th + 2] for i in range(nh)], axis=1)
    xs = xs.reshape(N * nh, th + 2, Wp, C)
    bias2 = bias.reshape(1, cout).astype(jnp.float32)

    out = pl.pallas_call(
        _conv3x3_kernel,
        out_shape=jax.ShapeDtypeStruct((N * nh, th, W, cout), jnp.bfloat16),
        grid_spec=pltpu.PrefetchScalarGridSpec(
            num_scalar_prefetch=0,
            grid=(N * nh,),
            in_specs=[
                pl.BlockSpec((1, th + 2, Wp, C), lambda b: (b, 0, 0, 0)),
                pl.BlockSpec((3, 3, C, cout), lambda b: (0, 0, 0, 0)),
                pl.BlockSpec((1, cout), lambda b: (0, 0)),
            ],
            out_specs=pl.BlockSpec((1, th, W, cout), lambda b: (b, 0, 0, 0)),
            scratch_shapes=[pltpu.VMEM((th * W8, cout), jnp.float32)],
        ),
        compiler_params=pltpu.CompilerParams(
            dimension_semantics=("parallel",),
            vmem_limit_bytes=vmem_limit),
    )(xs, w4d, bias2)

    out = out.reshape(N, Hpad, W, cout)
    return out[:, :H] if Hpad != H else out


# ---------------------------------------------------------------------------
# Parameters (BN folded into conv weights at build time)
# ---------------------------------------------------------------------------
def _fold_bn(w, cout, gamma=None, beta=None, mean=None, var=None, eps=_BN_EPS):
    """Fold eval-mode BN: y = gamma*(conv(x)-mean)/sqrt(var+eps) + beta.
    Defaults are the module's init values (gamma=1, beta=0, mean=0, var=1)."""
    gamma = jnp.ones((cout,), jnp.float32) if gamma is None else gamma
    beta = jnp.zeros((cout,), jnp.float32) if beta is None else beta
    mean = jnp.zeros((cout,), jnp.float32) if mean is None else mean
    var = jnp.ones((cout,), jnp.float32) if var is None else var
    scale = gamma * jax.lax.rsqrt(var + eps)
    w_f = (w * scale).astype(jnp.bfloat16)          # scale broadcasts over trailing cout
    b_f = (beta - mean * scale).astype(jnp.float32)
    return w_f, b_f


def make_conv1x1(key, cin, cout):
    std = math.sqrt(2.0 / (1 * 1 * cout))            # PyTorch init: normal(0, sqrt(2/n))
    w = std * jax.random.normal(key, (cout, cin), jnp.float32)
    w2d, b = _fold_bn(jnp.transpose(w), cout)        # (cin, cout)
    return {"w": w2d, "b": b}


def make_conv3x3(key, cin, cout):
    std = math.sqrt(2.0 / (3 * 3 * cout))
    w = std * jax.random.normal(key, (cout, cin, 3, 3), jnp.float32)
    w4d, b = _fold_bn(jnp.transpose(w, (2, 3, 1, 0)), cout)   # (kh, kw, cin, cout)
    return {"w": w4d, "b": b}


def init_fpn_params(key):
    keys = jax.random.split(key, 7)
    return {
        "toplayer": make_conv1x1(keys[0], 2048, 256),
        "smooth1": make_conv3x3(keys[1], 256, 256),
        "smooth2": make_conv3x3(keys[2], 256, 256),
        "smooth3": make_conv3x3(keys[3], 256, 256),
        "latlayer1": make_conv1x1(keys[4], 1024, 256),
        "latlayer2": make_conv1x1(keys[5], 512, 256),
        "latlayer3": make_conv1x1(keys[6], 256, 256),
        # CSF1/CSF2/CSF3 parameters exist in the PyTorch module but their
        # outputs are immediately overwritten in forward(); not materialized.
    }


def upsample_to(x_nhwc, h, w):
    # TODO(synk): legacy F.upsample(mode='bilinear') matched to half-pixel
    # (align_corners=False); very old PyTorch pinned align_corners=True.
    n, _, _, c = x_nhwc.shape
    return jax.image.resize(x_nhwc, (n, h, w, c), method="bilinear")


# ---------------------------------------------------------------------------
# FPN forward
# ---------------------------------------------------------------------------
def fpn_forward(params, f2, f3, f4, f5):
    """NCHW in / NCHW out (float32); internal compute NHWC bf16 with f32 accum."""
    vmem_limit, budget = _vmem_budget()
    f2, f3, f4, f5 = (jnp.transpose(x, (0, 2, 3, 1)) for x in (f2, f3, f4, f5))

    # TODO(synk): self.ASPP is called in the reference forward() but never
    # defined in __init__ (AttributeError there); treated as identity.
    p5 = conv1x1_bn_relu(f5, params["toplayer"], None, vmem_limit, budget)

    # CSF1/2/3 outputs are discarded in the reference forward(); skipped.
    up5 = upsample_to(p5, f4.shape[1], f4.shape[2])
    p4 = conv1x1_bn_relu(f4, params["latlayer1"], up5, vmem_limit, budget)  # fused +up
    p4 = conv3x3_bn_relu(p4, params["smooth1"], vmem_limit, budget)

    up4 = upsample_to(p4, f3.shape[1], f3.shape[2])
    p3 = conv1x1_bn_relu(f3, params["latlayer2"], up4, vmem_limit, budget)
    p3 = conv3x3_bn_relu(p3, params["smooth2"], vmem_limit, budget)

    up3 = upsample_to(p3, f2.shape[1], f2.shape[2])
    p2 = conv1x1_bn_relu(f2, params["latlayer3"], up3, vmem_limit, budget)
    p2 = conv3x3_bn_relu(p2, params["smooth3"], vmem_limit, budget)

    h, w = p2.shape[1], p2.shape[2]
    p3 = upsample_to(p3, h, w)
    p4 = upsample_to(p4, h, w)
    p5 = upsample_to(p5, h, w)

    return tuple(jnp.transpose(p, (0, 3, 1, 2)).astype(jnp.float32)
                 for p in (p2, p3, p4, p5))


if __name__ == "__main__":
    key = jax.random.PRNGKey(0)
    pkey, k2, k3, k4, k5 = jax.random.split(key, 5)
    params = init_fpn_params(pkey)

    # Small pyramid consistent with the module's fixed channel counts.
    f2 = jax.random.normal(k2, (2, 256, 16, 16), jnp.float32)
    f3 = jax.random.normal(k3, (2, 512, 8, 8), jnp.float32)
    f4 = jax.random.normal(k4, (2, 1024, 4, 4), jnp.float32)
    f5 = jax.random.normal(k5, (2, 2048, 2, 2), jnp.float32)

    outs = jax.jit(fpn_forward)(params, f2, f3, f4, f5)
    jax.block_until_ready(outs)
    p2, p3, p4, p5 = outs

    assert p2.shape == (2, 256, 16, 16)
    assert p3.shape == (2, 256, 16, 16)
    assert p4.shape == (2, 256, 16, 16)
    assert p5.shape == (2, 256, 16, 16)
    assert all(bool(jnp.all(jnp.isfinite(p))) for p in outs)
    print("KERNEL_OK")
</pallas_src>

<mosaic_0001>
module attributes {stable_mosaic.version = 11 : i64} {
  func.func @_mm_kernel(%arg0: i32, %arg1: memref<8x2048xbf16, #tpu.memory_space<vmem>>, %arg2: memref<2048x256xbf16, #tpu.memory_space<vmem>>, %arg3: memref<1x256xf32, #tpu.memory_space<vmem>>, %arg4: memref<8x256xbf16, #tpu.memory_space<vmem>>) attributes {dimension_semantics = [#tpu.dimension_semantics<parallel>], iteration_bounds = array<i64: 1>, scalar_prefetch = 0 : i64, scratch_operands = 0 : i64, tpu.core_type = #tpu.core_type<tc>, window_params = [{transform_indices = @transform_0, window_bounds = array<i64: 8, 2048>}, {pipeline_mode = #tpu.pipeline_mode<synchronous>, transform_indices = @transform_1, window_bounds = array<i64: 2048, 256>}, {pipeline_mode = #tpu.pipeline_mode<synchronous>, transform_indices = @transform_2, window_bounds = array<i64: 1, 256>}, {transform_indices = @transform_3, window_bounds = array<i64: 8, 256>}]} {
    %c0 = arith.constant 0 : index
    %c0_0 = arith.constant 0 : index
    %0 = vector.load %arg1[%c0, %c0_0] : memref<8x2048xbf16, #tpu.memory_space<vmem>>, vector<8x2048xbf16>
    %c0_1 = arith.constant 0 : index
    %c0_2 = arith.constant 0 : index
    %1 = vector.load %arg2[%c0_1, %c0_2] : memref<2048x256xbf16, #tpu.memory_space<vmem>>, vector<2048x256xbf16>
    %cst = arith.constant dense<0.000000e+00> : vector<8x256xf32>
    %2 = tpu.matmul %0, %1, %cst {dimension_numbers = #tpu.dot_dimension_numbers<[1], [0], [0], [1], [0, 0, 1, 1], [], []>} : vector<8x2048xbf16>, vector<2048x256xbf16>, vector<8x256xf32> -> vector<8x256xf32>
    %c0_3 = arith.constant 0 : index
    %c0_4 = arith.constant 0 : index
    %3 = vector.load %arg3[%c0_3, %c0_4] : memref<1x256xf32, #tpu.memory_space<vmem>>, vector<1x256xf32>
    %4 = vector.broadcast %3 : vector<1x256xf32> to vector<8x256xf32>
    %5 = arith.addf %2, %4 : vector<8x256xf32>
    %cst_5 = arith.constant 0.000000e+00 : f32
    %6 = vector.broadcast %cst_5 : f32 to vector<8x256xf32>
    %7 = arith.maximumf %5, %6 : vector<8x256xf32>
    %8 = arith.truncf %7 : vector<8x256xf32> to vector<8x256xbf16>
    %c0_6 = arith.constant 0 : index
    %c0_7 = arith.constant 0 : index
    %9 = vector.load %arg4[%c0_6, %c0_7] : memref<8x256xbf16, #tpu.memory_space<vmem>>, vector<8x256xbf16>
    tpu.vector_store %arg4[%c0_6, %c0_7], %8 {strides = array<i32>} : memref<8x256xbf16, #tpu.memory_space<vmem>>, vector<8x256xbf16>,
    return
  }
  func.func @transform_0(%arg0: i32) -> (i32, i32) {
    %c0_i32 = arith.constant 0 : i32
    %c0_i32_0 = arith.constant 0 : i32
    return %arg0, %c0_i32 : i32, i32
  }
  func.func @transform_1(%arg0: i32) -> (i32, i32) {
    %c0_i32 = arith.constant 0 : i32
    %c0_i32_0 = arith.constant 0 : i32
    %c0_i32_1 = arith.constant 0 : i32
    return %c0_i32, %c0_i32_0 : i32, i32
  }
  func.func @transform_2(%arg0: i32) -> (i32, i32) {
    %c0_i32 = arith.constant 0 : i32
    %c0_i32_0 = arith.constant 0 : i32
    %c0_i32_1 = arith.constant 0 : i32
    return %c0_i32, %c0_i32_0 : i32, i32
  }
  func.func @transform_3(%arg0: i32) -> (i32, i32) {
    %c0_i32 = arith.constant 0 : i32
    %c0_i32_0 = arith.constant 0 : i32
    return %arg0, %c0_i32 : i32, i32
  }
}

module attributes {stable_mosaic.version = 11 : i64} {
  func.func @_mm_add_kernel(%arg0: i32, %arg1: memref<16x1024xbf16, #tpu.memory_space<vmem>>, %arg2: memref<1024x256xbf16, #tpu.memory_space<vmem>>, %arg3: memref<1x256xf32, #tpu.memory_space<vmem>>, %arg4: memref<16x256xbf16, #tpu.memory_space<vmem>>, %arg5: memref<16x256xbf16, #tpu.memory_space<vmem>>) attributes {dimension_semantics = [#tpu.dimension_semantics<parallel>], iteration_bounds = array<i64: 2>, scalar_prefetch = 0 : i64, scratch_operands = 0 : i64, tpu.core_type = #tpu.core_type<tc>, window_params = [{transform_indices = @transform_0, window_bounds = array<i64: 16, 1024>}, {pipeline_mode = #tpu.pipeline_mode<synchronous>, transform_indices = @transform_1, window_bounds = array<i64: 1024, 256>}, {pipeline_mode = #tpu.pipeline_mode<synchronous>, transform_indices = @transform_2, window_bounds = array<i64: 1, 256>}, {transform_indices = @transform_3, window_bounds = array<i64: 16, 256>}, {transform_indices = @transform_4, window_bounds = array<i64: 16, 256>}]} {
    %c0 = arith.constant 0 : index
    %c0_0 = arith.constant 0 : index
    %0 = vector.load %arg1[%c0, %c0_0] : memref<16x1024xbf16, #tpu.memory_space<vmem>>, vector<16x1024xbf16>
    %c0_1 = arith.constant 0 : index
    %c0_2 = arith.constant 0 : index
    %1 = vector.load %arg2[%c0_1, %c0_2] : memref<1024x256xbf16, #tpu.memory_space<vmem>>, vector<1024x256xbf16>
    %cst = arith.constant dense<0.000000e+00> : vector<16x256xf32>
    %2 = tpu.matmul %0, %1, %cst {dimension_numbers = #tpu.dot_dimension_numbers<[1], [0], [0], [1], [0, 0, 1, 1], [], []>} : vector<16x1024xbf16>, vector<1024x256xbf16>, vector<16x256xf32> -> vector<16x256xf32>
    %c0_3 = arith.constant 0 : index
    %c0_4 = arith.constant 0 : index
    %3 = vector.load %arg3[%c0_3, %c0_4] : memref<1x256xf32, #tpu.memory_space<vmem>>, vector<1x256xf32>
    %4 = vector.broadcast %3 : vector<1x256xf32> to vector<16x256xf32>
    %5 = arith.addf %2, %4 : vector<16x256xf32>
    %cst_5 = arith.constant 0.000000e+00 : f32
    %6 = vector.broadcast %cst_5 : f32 to vector<16x256xf32>
    %7 = arith.maximumf %5, %6 : vector<16x256xf32>
    %c0_6 = arith.constant 0 : index
    %c0_7 = arith.constant 0 : index
    %8 = vector.load %arg4[%c0_6, %c0_7] : memref<16x256xbf16, #tpu.memory_space<vmem>>, vector<16x256xbf16>
    %9 = arith.extf %8 : vector<16x256xbf16> to vector<16x256xf32>
    %10 = arith.addf %7, %9 : vector<16x256xf32>
    %11 = arith.truncf %10 : vector<16x256xf32> to vector<16x256xbf16>
    %c0_8 = arith.constant 0 : index
    %c0_9 = arith.constant 0 : index
    %12 = vector.load %arg5[%c0_8, %c0_9] : memref<16x256xbf16, #tpu.memory_space<vmem>>, vector<16x256xbf16>
    tpu.vector_store %arg5[%c0_8, %c0_9], %11 {strides = array<i32>} : memref<16x256xbf16, #tpu.memory_space<vmem>>, vector<16x256xbf16>,
    return
  }
  func.func @transform_0(%arg0: i32) -> (i32, i32) {
    %c0_i32 = arith.constant 0 : i32
    %c0_i32_0 = arith.constant 0 : i32
    return %arg0, %c0_i32 : i32, i32
  }
  func.func @transform_1(%arg0: i32) -> (i32, i32) {
    %c0_i32 = arith.constant 0 : i32
    %c0_i32_0 = arith.constant 0 : i32
    %c0_i32_1 = arith.constant 0 : i32
    return %c0_i32, %c0_i32_0 : i32, i32
  }
  func.func @transform_2(%arg0: i32) -> (i32, i32) {
    %c0_i32 = arith.constant 0 : i32
    %c0_i32_0 = arith.constant 0 : i32
    %c0_i32_1 = arith.constant 0 : i32
    return %c0_i32, %c0_i32_0 : i32, i32
  }
  func.func @transform_3(%arg0: i32) -> (i32, i32) {
    %c0_i32 = arith.constant 0 : i32
    %c0_i32_0 = arith.constant 0 : i32
    return %arg0, %c0_i32 : i32, i32
  }
  func.func @transform_4(%arg0: i32) -> (i32, i32) {
    %c0_i32 = arith.constant 0 : i32
    %c0_i32_0 = arith.constant 0 : i32
    return %arg0, %c0_i32 : i32, i32
  }
}

module attributes {stable_mosaic.version = 11 : i64} {
  func.func @_conv3x3_kernel(%arg0: i32, %arg1: memref<1x10x10x256xbf16, #tpu.memory_space<vmem>>, %arg2: memref<3x3x256x256xbf16, #tpu.memory_space<vmem>>, %arg3: memref<1x256xf32, #tpu.memory_space<vmem>>, %arg4: memref<1x8x4x256xbf16, #tpu.memory_space<vmem>>, %arg5: memref<64x256xf32, #tpu.memory_space<vmem>>) attributes {dimension_semantics = [#tpu.dimension_semantics<parallel>], iteration_bounds = array<i64: 2>, scalar_prefetch = 0 : i64, scratch_operands = 1 : i64, tpu.core_type = #tpu.core_type<tc>, window_params = [{transform_indices = @transform_0, window_bounds = array<i64: 1, 10, 10, 256>}, {pipeline_mode = #tpu.pipeline_mode<synchronous>, transform_indices = @transform_1, window_bounds = array<i64: 3, 3, 256, 256>}, {pipeline_mode = #tpu.pipeline_mode<synchronous>, transform_indices = @transform_2, window_bounds = array<i64: 1, 256>}, {transform_indices = @transform_3, window_bounds = array<i64: 1, 8, 4, 256>}]} {
    %c0 = arith.constant 0 : index
    %c0_0 = arith.constant 0 : index
    %c0_1 = arith.constant 0 : index
    %c0_2 = arith.constant 0 : index
    %0 = vector.load %arg1[%c0, %c0_0, %c0_1, %c0_2] : memref<1x10x10x256xbf16, #tpu.memory_space<vmem>>, vector<1x10x8x256xbf16>
    %1 = vector.shape_cast %0 : vector<1x10x8x256xbf16> to vector<10x8x256xbf16>
    %2 = vector.extract_strided_slice %1 {offsets = [0, 0, 0], sizes = [8, 8, 256], strides = [1, 1, 1]} : vector<10x8x256xbf16> to vector<8x8x256xbf16>
    %3 = vector.shape_cast %2 : vector<8x8x256xbf16> to vector<64x256xbf16>
    %c0_3 = arith.constant 0 : index
    %c0_4 = arith.constant 0 : index
    %c0_5 = arith.constant 0 : index
    %c0_6 = arith.constant 0 : index
    %4 = vector.load %arg2[%c0_3, %c0_4, %c0_5, %c0_6] : memref<3x3x256x256xbf16, #tpu.memory_space<vmem>>, vector<1x1x256x256xbf16>
    %5 = vector.shape_cast %4 : vector<1x1x256x256xbf16> to vector<256x256xbf16>
    %cst = arith.constant dense<0.000000e+00> : vector<64x256xf32>
    %6 = tpu.matmul %3, %5, %cst {dimension_numbers = #tpu.dot_dimension_numbers<[1], [0], [0], [1], [0, 0, 1, 1], [], []>} : vector<64x256xbf16>, vector<256x256xbf16>, vector<64x256xf32> -> vector<64x256xf32>
    %c0_7 = arith.constant 0 : index
    %c0_8 = arith.constant 0 : index
    %7 = vector.load %arg5[%c0_7, %c0_8] : memref<64x256xf32, #tpu.memory_space<vmem>>, vector<64x256xf32>
    tpu.vector_store %arg5[%c0_7, %c0_8], %6 {strides = array<i32>} : memref<64x256xf32, #tpu.memory_space<vmem>>, vector<64x256xf32>,
    %8 = vector.extract_strided_slice %1 {offsets = [1, 0, 0], sizes = [8, 8, 256], strides = [1, 1, 1]} : vector<10x8x256xbf16> to vector<8x8x256xbf16>
    %9 = vector.shape_cast %8 : vector<8x8x256xbf16> to vector<64x256xbf16>
    %c1 = arith.constant 1 : index
    %c0_9 = arith.constant 0 : index
    %c0_10 = arith.constant 0 : index
    %c0_11 = arith.constant 0 : index
    %10 = vector.load %arg2[%c1, %c0_9, %c0_10, %c0_11] : memref<3x3x256x256xbf16, #tpu.memory_space<vmem>>, vector<1x1x256x256xbf16>
    %11 = vector.shape_cast %10 : vector<1x1x256x256xbf16> to vector<256x256xbf16>
    %cst_12 = arith.constant dense<0.000000e+00> : vector<64x256xf32>
    %12 = tpu.matmul %9, %11, %cst_12 {dimension_numbers = #tpu.dot_dimension_numbers<[1], [0], [0], [1], [0, 0, 1, 1], [], []>} : vector<64x256xbf16>, vector<256x256xbf16>, vector<64x256xf32> -> vector<64x256xf32>
    %c0_13 = arith.constant 0 : index
    %c0_14 = arith.constant 0 : index
    %13 = vector.load %arg5[%c0_13, %c0_14] : memref<64x256xf32, #tpu.memory_space<vmem>>, vector<64x256xf32>
    %14 = arith.addf %13, %12 : vector<64x256xf32>
    %c0_15 = arith.constant 0 : index
    %c0_16 = arith.constant 0 : index
    %15 = vector.load %arg5[%c0_15, %c0_16] : memref<64x256xf32, #tpu.memory_space<vmem>>, vector<64x256xf32>
    tpu.vector_store %arg5[%c0_15, %c0_16], %14 {strides = array<i32>} : memref<64x256xf32, #tpu.memory_space<vmem>>, vector<64x256xf32>,
    %16 = vector.extract_strided_slice %1 {offsets = [2, 0, 0], sizes = [8, 8, 256], strides = [1, 1, 1]} : vector<10x8x256xbf16> to vector<8x8x256xbf16>
    %17 = vector.shape_cast %16 : vector<8x8x256xbf16> to vector<64x256xbf16>
    %c2 = arith.constant 2 : index
    %c0_17 = arith.constant 0 : index
    %c0_18 = arith.constant 0 : index
    %c0_19 = arith.constant 0 : index
    %18 = vector.load %arg2[%c2, %c0_17, %c0_18, %c0_19] : memref<3x3x256x256xbf16, #tpu.memory_space<vmem>>, vector<1x1x256x256xbf16>
    %19 = vector.shape_cast %18 : vector<1x1x256x256xbf16> to vector<256x256xbf16>
    %cst_20 = arith.constant dense<0.000000e+00> : vector<64x256xf32>
    %20 = tpu.matmul %17, %19, %cst_20 {dimension_numbers = #tpu.dot_dimension_numbers<[1], [0], [0], [1], [0, 0, 1, 1], [], []>} : vector<64x256xbf16>, vector<256x256xbf16>, vector<64x256xf32> -> vector<64x256xf32>
    %c0_21 = arith.constant 0 : index
    %c0_22 = arith.constant 0 : index
    %21 = vector.load %arg5[%c0_21, %c0_22] : memref<64x256xf32, #tpu.memory_space<vmem>>, vector<64x256xf32>
    %22 = arith.addf %21, %20 : vector<64x256xf32>
    %c0_23 = arith.constant 0 : index
    %c0_24 = arith.constant 0 : index
    %23 = vector.load %arg5[%c0_23, %c0_24] : memref<64x256xf32, #tpu.memory_space<vmem>>, vector<64x256xf32>
    tpu.vector_store %arg5[%c0_23, %c0_24], %22 {strides = array<i32>} : memref<64x256xf32, #tpu.memory_space<vmem>>, vector<64x256xf32>,
    %c0_25 = arith.constant 0 : index
    %c0_26 = arith.constant 0 : index
    %c1_27 = arith.constant 1 : index
    %c0_28 = arith.constant 0 : index
    %24 = vector.load %arg1[%c0_25, %c0_26, %c1_27, %c0_28] : memref<1x10x10x256xbf16, #tpu.memory_space<vmem>>, vector<1x10x8x256xbf16>
    %25 = vector.shape_cast %24 : vector<1x10x8x256xbf16> to vector<10x8x256xbf16>
    %26 = vector.extract_strided_slice %25 {offsets = [0, 0, 0], sizes = [8, 8, 256], strides = [1, 1, 1]} : vector<10x8x256xbf16> to vector<8x8x256xbf16>
    %27 = vector.shape_cast %26 : vector<8x8x256xbf16> to vector<64x256xbf16>
    %c0_29 = arith.constant 0 : index
    %c1_30 = arith.constant 1 : index
    %c0_31 = arith.constant 0 : index
    %c0_32 = arith.constant 0 : index
    %28 = vector.load %arg2[%c0_29, %c1_30, %c0_31, %c0_32] : memref<3x3x256x256xbf16, #tpu.memory_space<vmem>>, vector<1x1x256x256xbf16>
    %29 = vector.shape_cast %28 : vector<1x1x256x256xbf16> to vector<256x256xbf16>
    %cst_33 = arith.constant dense<0.000000e+00> : vector<64x256xf32>
    %30 = tpu.matmul %27, %29, %cst_33 {dimension_numbers = #tpu.dot_dimension_numbers<[1], [0], [0], [1], [0, 0, 1, 1], [], []>} : vector<64x256xbf16>, vector<256x256xbf16>, vector<64x256xf32> -> vector<64x256xf32>
    %c0_34 = arith.constant 0 : index
    %c0_35 = arith.constant 0 : index
    %31 = vector.load %arg5[%c0_34, %c0_35] : memref<64x256xf32, #tpu.memory_space<vmem>>, vector<64x256xf32>
    %32 = arith.addf %31, %30 : vector<64x256xf32>
    %c0_36 = arith.constant 0 : index
    %c0_37 = arith.constant 0 : index
    %33 = vector.load %arg5[%c0_36, %c0_37] : memref<64x256xf32, #tpu.memory_space<vmem>>, vector<64x256xf32>
    tpu.vector_store %arg5[%c0_36, %c0_37], %32 {strides = array<i32>} : memref<64x256xf32, #tpu.memory_space<vmem>>, vector<64x256xf32>,
    %34 = vector.extract_strided_slice %25 {offsets = [1, 0, 0], sizes = [8, 8, 256], strides = [1, 1, 1]} : vector<10x8x256xbf16> to vector<8x8x256xbf16>
    %35 = vector.shape_cast %34 : vector<8x8x256xbf16> to vector<64x256xbf16>
    %c1_38 = arith.constant 1 : index
    %c1_39 = arith.constant 1 : index
    %c0_40 = arith.constant 0 : index
    %c0_41 = arith.constant 0 : index
    %36 = vector.load %arg2[%c1_38, %c1_39, %c0_40, %c0_41] : memref<3x3x256x256xbf16, #tpu.memory_space<vmem>>, vector<1x1x256x256xbf16>
    %37 = vector.shape_cast %36 : vector<1x1x256x256xbf16> to vector<256x256xbf16>
    %cst_42 = arith.constant dense<0.000000e+00> : vector<64x256xf32>
    %38 = tpu.matmul %35, %37, %cst_42 {dimension_numbers = #tpu.dot_dimension_numbers<[1], [0], [0], [1], [0, 0, 1, 1], [], []>} : vector<64x256xbf16>, vector<256x256xbf16>, vector<64x256xf32> -> vector<64x256xf32>
    %c0_43 = arith.constant 0 : index
    %c0_44 = arith.constant 0 : index
    %39 = vector.load %arg5[%c0_43, %c0_44] : memref<64x256xf32, #tpu.memory_space<vmem>>, vector<64x256xf32>
    %40 = arith.addf %39, %38 : vector<64x256xf32>
    %c0_45 = arith.constant 0 : index
    %c0_46 = arith.constant 0 : index
    %41 = vector.load %arg5[%c0_45, %c0_46] : memref<64x256xf32, #tpu.memory_space<vmem>>, vector<64x256xf32>
    tpu.vector_store %arg5[%c0_45, %c0_46], %40 {strides = array<i32>} : memref<64x256xf32, #tpu.memory_space<vmem>>, vector<64x256xf32>,
    %42 = vector.extract_strided_slice %25 {offsets = [2, 0, 0], sizes = [8, 8, 256], strides = [1, 1, 1]} : vector<10x8x256xbf16> to vector<8x8x256xbf16>
    %43 = vector.shape_cast %42 : vector<8x8x256xbf16> to vector<64x256xbf16>
    %c2_47 = arith.constant 2 : index
    %c1_48 = arith.constant 1 : index
    %c0_49 = arith.constant 0 : index
    %c0_50 = arith.constant 0 : index
    %44 = vector.load %arg2[%c2_47, %c1_48, %c0_49, %c0_50] : memref<3x3x256x256xbf16, #tpu.memory_space<vmem>>, vector<1x1x256x256xbf16>
    %45 = vector.shape_cast %44 : vector<1x1x256x256xbf16> to vector<256x256xbf16>
    %cst_51 = arith.constant dense<0.000000e+00> : vector<64x256xf32>
    %46 = tpu.matmul %43, %45, %cst_51 {dimension_numbers = #tpu.dot_dimension_numbers<[1], [0], [0], [1], [0, 0, 1, 1], [], []>} : vector<64x256xbf16>, vector<256x256xbf16>, vector<64x256xf32> -> vector<64x256xf32>
    %c0_52 = arith.constant 0 : index
    %c0_53 = arith.constant 0 : index
    %47 = vector.load %arg5[%c0_52, %c0_53] : memref<64x256xf32, #tpu.memory_space<vmem>>, vector<64x256xf32>
    %48 = arith.addf %47, %46 : vector<64x256xf32>
    %c0_54 = arith.constant 0 : index
    %c0_55 = arith.constant 0 : index
    %49 = vector.load %arg5[%c0_54, %c0_55] : memref<64x256xf32, #tpu.memory_space<vmem>>, vector<64x256xf32>
    tpu.vector_store %arg5[%c0_54, %c0_55], %48 {strides = array<i32>} : memref<64x256xf32, #tpu.memory_space<vmem>>, vector<64x256xf32>,
    %c0_56 = arith.constant 0 : index
    %c0_57 = arith.constant 0 : index
    %c2_58 = arith.constant 2 : index
    %c0_59 = arith.constant 0 : index
    %50 = vector.load %arg1[%c0_56, %c0_57, %c2_58, %c0_59] : memref<1x10x10x256xbf16, #tpu.memory_space<vmem>>, vector<1x10x8x256xbf16>
    %51 = vector.shape_cast %50 : vector<1x10x8x256xbf16> to vector<10x8x256xbf16>
    %52 = vector.extract_strided_slice %51 {offsets = [0, 0, 0], sizes = [8, 8, 256], strides = [1, 1, 1]} : vector<10x8x256xbf16> to vector<8x8x256xbf16>
    %53 = vector.shape_cast %52 : vector<8x8x256xbf16> to vector<64x256xbf16>
    %c0_60 = arith.constant 0 : index
    %c2_61 = arith.constant 2 : index
    %c0_62 = arith.constant 0 : index
    %c0_63 = arith.constant 0 : index
    %54 = vector.load %arg2[%c0_60, %c2_61, %c0_62, %c0_63] : memref<3x3x256x256xbf16, #tpu.memory_space<vmem>>, vector<1x1x256x256xbf16>
    %55 = vector.shape_cast %54 : vector<1x1x256x256xbf16> to vector<256x256xbf16>
    %cst_64 = arith.constant dense<0.000000e+00> : vector<64x256xf32>
    %56 = tpu.matmul %53, %55, %cst_64 {dimension_numbers = #tpu.dot_dimension_numbers<[1], [0], [0], [1], [0, 0, 1, 1], [], []>} : vector<64x256xbf16>, vector<256x256xbf16>, vector<64x256xf32> -> vector<64x256xf32>
    %c0_65 = arith.constant 0 : index
    %c0_66 = arith.constant 0 : index
    %57 = vector.load %arg5[%c0_65, %c0_66] : memref<64x256xf32, #tpu.memory_space<vmem>>, vector<64x256xf32>
    %58 = arith.addf %57, %56 : vector<64x256xf32>
    %c0_67 = arith.constant 0 : index
    %c0_68 = arith.constant 0 : index
    %59 = vector.load %arg5[%c0_67, %c0_68] : memref<64x256xf32, #tpu.memory_space<vmem>>, vector<64x256xf32>
    tpu.vector_store %arg5[%c0_67, %c0_68], %58 {strides = array<i32>} : memref<64x256xf32, #tpu.memory_space<vmem>>, vector<64x256xf32>,
    %60 = vector.extract_strided_slice %51 {offsets = [1, 0, 0], sizes = [8, 8, 256], strides = [1, 1, 1]} : vector<10x8x256xbf16> to vector<8x8x256xbf16>
    %61 = vector.shape_cast %60 : vector<8x8x256xbf16> to vector<64x256xbf16>
    %c1_69 = arith.constant 1 : index
    %c2_70 = arith.constant 2 : index
    %c0_71 = arith.constant 0 : index
    %c0_72 = arith.constant 0 : index
    %62 = vector.load %arg2[%c1_69, %c2_70, %c0_71, %c0_72] : memref<3x3x256x256xbf16, #tpu.memory_space<vmem>>, vector<1x1x256x256xbf16>
    %63 = vector.shape_cast %62 : vector<1x1x256x256xbf16> to vector<256x256xbf16>
    %cst_73 = arith.constant dense<0.000000e+00> : vector<64x256xf32>
    %64 = tpu.matmul %61, %63, %cst_73 {dimension_numbers = #tpu.dot_dimension_numbers<[1], [0], [0], [1], [0, 0, 1, 1], [], []>} : vector<64x256xbf16>, vector<256x256xbf16>, vector<64x256xf32> -> vector<64x256xf32>
    %c0_74 = arith.constant 0 : index
    %c0_75 = arith.constant 0 : index
    %65 = vector.load %arg5[%c0_74, %c0_75] : memref<64x256xf32, #tpu.memory_space<vmem>>, vector<64x256xf32>
    %66 = arith.addf %65, %64 : vector<64x256xf32>
    %c0_76 = arith.constant 0 : index
    %c0_77 = arith.constant 0 : index
    %67 = vector.load %arg5[%c0_76, %c0_77] : memref<64x256xf32, #tpu.memory_space<vmem>>, vector<64x256xf32>
    tpu.vector_store %arg5[%c0_76, %c0_77], %66 {strides = array<i32>} : memref<64x256xf32, #tpu.memory_space<vmem>>, vector<64x256xf32>,
    %68 = vector.extract_strided_slice %51 {offsets = [2, 0, 0], sizes = [8, 8, 256], strides = [1, 1, 1]} : vector<10x8x256xbf16> to vector<8x8x256xbf16>
    %69 = vector.shape_cast %68 : vector<8x8x256xbf16> to vector<64x256xbf16>
    %c2_78 = arith.constant 2 : index
    %c2_79 = arith.constant 2 : index
    %c0_80 = arith.constant 0 : index
    %c0_81 = arith.constant 0 : index
    %70 = vector.load %arg2[%c2_78, %c2_79, %c0_80, %c0_81] : memref<3x3x256x256xbf16, #tpu.memory_space<vmem>>, vector<1x1x256x256xbf16>
    %71 = vector.shape_cast %70 : vector<1x1x256x256xbf16> to vector<256x256xbf16>
    %cst_82 = arith.constant dense<0.000000e+00> : vector<64x256xf32>
    %72 = tpu.matmul %69, %71, %cst_82 {dimension_numbers = #tpu.dot_dimension_numbers<[1], [0], [0], [1], [0, 0, 1, 1], [], []>} : vector<64x256xbf16>, vector<256x256xbf16>, vector<64x256xf32> -> vector<64x256xf32>
    %c0_83 = arith.constant 0 : index
    %c0_84 = arith.constant 0 : index
    %73 = vector.load %arg5[%c0_83, %c0_84] : memref<64x256xf32, #tpu.memory_space<vmem>>, vector<64x256xf32>
    %74 = arith.addf %73, %72 : vector<64x256xf32>
    %c0_85 = arith.constant 0 : index
    %c0_86 = arith.constant 0 : index
    %75 = vector.load %arg5[%c0_85, %c0_86] : memref<64x256xf32, #tpu.memory_space<vmem>>, vector<64x256xf32>
    tpu.vector_store %arg5[%c0_85, %c0_86], %74 {strides = array<i32>} : memref<64x256xf32, #tpu.memory_space<vmem>>, vector<64x256xf32>,
    %c0_87 = arith.constant 0 : index
    %c0_88 = arith.constant 0 : index
    %76 = vector.load %arg5[%c0_87, %c0_88] : memref<64x256xf32, #tpu.memory_space<vmem>>, vector<64x256xf32>
    %c0_89 = arith.constant 0 : index
    %c0_90 = arith.constant 0 : index
    %77 = vector.load %arg3[%c0_89, %c0_90] : memref<1x256xf32, #tpu.memory_space<vmem>>, vector<1x256xf32>
    %78 = vector.broadcast %77 : vector<1x256xf32> to vector<64x256xf32>
    %79 = arith.addf %76, %78 : vector<64x256xf32>
    %cst_91 = arith.constant 0.000000e+00 : f32
    %80 = vector.broadcast %cst_91 : f32 to vector<64x256xf32>
    %81 = arith.maximumf %79, %80 : vector<64x256xf32>
    %82 = vector.shape_cast %81 : vector<64x256xf32> to vector<8x8x256xf32>
    %83 = vector.extract_strided_slice %82 {offsets = [0, 0, 0], sizes = [8, 4, 256], strides = [1, 1, 1]} : vector<8x8x256xf32> to vector<8x4x256xf32>
    %84 = vector.shape_cast %83 : vector<8x4x256xf32> to vector<1x8x4x256xf32>
    %85 = arith.truncf %84 : vector<1x8x4x256xf32> to vector<1x8x4x256xbf16>
    %c0_92 = arith.constant 0 : index
    %c0_93 = arith.constant 0 : index
    %c0_94 = arith.constant 0 : index
    %c0_95 = arith.constant 0 : index
    %86 = vector.load %arg4[%c0_92, %c0_93, %c0_94, %c0_95] : memref<1x8x4x256xbf16, #tpu.memory_space<vmem>>, vector<1x8x4x256xbf16>
    tpu.vector_store %arg4[%c0_92, %c0_93, %c0_94, %c0_95], %85 {strides = array<i32>} : memref<1x8x4x256xbf16, #tpu.memory_space<vmem>>, vector<1x8x4x256xbf16>,
    return
  }
  func.func @transform_0(%arg0: i32) -> (i32, i32, i32, i32) {
    %c0_i32 = arith.constant 0 : i32
    %c0_i32_0 = arith.constant 0 : i32
    %c0_i32_1 = arith.constant 0 : i32
    %c0_i32_2 = arith.constant 0 : i32
    return %arg0, %c0_i32, %c0_i32_0, %c0_i32_1 : i32, i32, i32, i32
  }
  func.func @transform_1(%arg0: i32) -> (i32, i32, i32, i32) {
    %c0_i32 = arith.constant 0 : i32
    %c0_i32_0 = arith.constant 0 : i32
    %c0_i32_1 = arith.constant 0 : i32
    %c0_i32_2 = arith.constant 0 : i32
    %c0_i32_3 = arith.constant 0 : i32
    return %c0_i32, %c0_i32_0, %c0_i32_1, %c0_i32_2 : i32, i32, i32, i32
  }
  func.func @transform_2(%arg0: i32) -> (i32, i32) {
    %c0_i32 = arith.constant 0 : i32
    %c0_i32_0 = arith.constant 0 : i32
    %c0_i32_1 = arith.constant 0 : i32
    return %c0_i32, %c0_i32_0 : i32, i32
  }
  func.func @transform_3(%arg0: i32) -> (i32, i32, i32, i32) {
    %c0_i32 = arith.constant 0 : i32
    %c0_i32_0 = arith.constant 0 : i32
    %c0_i32_1 = arith.constant 0 : i32
    %c0_i32_2 = arith.constant 0 : i32
    return %arg0, %c0_i32, %c0_i32_0, %c0_i32_1 : i32, i32, i32, i32
  }
}

module attributes {stable_mosaic.version = 11 : i64} {
  func.func @_mm_add_kernel(%arg0: i32, %arg1: memref<64x512xbf16, #tpu.memory_space<vmem>>, %arg2: memref<512x256xbf16, #tpu.memory_space<vmem>>, %arg3: memref<1x256xf32, #tpu.memory_space<vmem>>, %arg4: memref<64x256xbf16, #tpu.memory_space<vmem>>, %arg5: memref<64x256xbf16, #tpu.memory_space<vmem>>) attributes {dimension_semantics = [#tpu.dimension_semantics<parallel>], iteration_bounds = array<i64: 2>, scalar_prefetch = 0 : i64, scratch_operands = 0 : i64, tpu.core_type = #tpu.core_type<tc>, window_params = [{transform_indices = @transform_0, window_bounds = array<i64: 64, 512>}, {pipeline_mode = #tpu.pipeline_mode<synchronous>, transform_indices = @transform_1, window_bounds = array<i64: 512, 256>}, {pipeline_mode = #tpu.pipeline_mode<synchronous>, transform_indices = @transform_2, window_bounds = array<i64: 1, 256>}, {transform_indices = @transform_3, window_bounds = array<i64: 64, 256>}, {transform_indices = @transform_4, window_bounds = array<i64: 64, 256>}]} {
    %c0 = arith.constant 0 : index
    %c0_0 = arith.constant 0 : index
    %0 = vector.load %arg1[%c0, %c0_0] : memref<64x512xbf16, #tpu.memory_space<vmem>>, vector<64x512xbf16>
    %c0_1 = arith.constant 0 : index
    %c0_2 = arith.constant 0 : index
    %1 = vector.load %arg2[%c0_1, %c0_2] : memref<512x256xbf16, #tpu.memory_space<vmem>>, vector<512x256xbf16>
    %cst = arith.constant dense<0.000000e+00> : vector<64x256xf32>
    %2 = tpu.matmul %0, %1, %cst {dimension_numbers = #tpu.dot_dimension_numbers<[1], [0], [0], [1], [0, 0, 1, 1], [], []>} : vector<64x512xbf16>, vector<512x256xbf16>, vector<64x256xf32> -> vector<64x256xf32>
    %c0_3 = arith.constant 0 : index
    %c0_4 = arith.constant 0 : index
    %3 = vector.load %arg3[%c0_3, %c0_4] : memref<1x256xf32, #tpu.memory_space<vmem>>, vector<1x256xf32>
    %4 = vector.broadcast %3 : vector<1x256xf32> to vector<64x256xf32>
    %5 = arith.addf %2, %4 : vector<64x256xf32>
    %cst_5 = arith.constant 0.000000e+00 : f32
    %6 = vector.broadcast %cst_5 : f32 to vector<64x256xf32>
    %7 = arith.maximumf %5, %6 : vector<64x256xf32>
    %c0_6 = arith.constant 0 : index
    %c0_7 = arith.constant 0 : index
    %8 = vector.load %arg4[%c0_6, %c0_7] : memref<64x256xbf16, #tpu.memory_space<vmem>>, vector<64x256xbf16>
    %9 = arith.extf %8 : vector<64x256xbf16> to vector<64x256xf32>
    %10 = arith.addf %7, %9 : vector<64x256xf32>
    %11 = arith.truncf %10 : vector<64x256xf32> to vector<64x256xbf16>
    %c0_8 = arith.constant 0 : index
    %c0_9 = arith.constant 0 : index
    %12 = vector.load %arg5[%c0_8, %c0_9] : memref<64x256xbf16, #tpu.memory_space<vmem>>, vector<64x256xbf16>
    tpu.vector_store %arg5[%c0_8, %c0_9], %11 {strides = array<i32>} : memref<64x256xbf16, #tpu.memory_space<vmem>>, vector<64x256xbf16>,
    return
  }
  func.func @transform_0(%arg0: i32) -> (i32, i32) {
    %c0_i32 = arith.constant 0 : i32
    %c0_i32_0 = arith.constant 0 : i32
    return %arg0, %c0_i32 : i32, i32
  }
  func.func @transform_1(%arg0: i32) -> (i32, i32) {
    %c0_i32 = arith.constant 0 : i32
    %c0_i32_0 = arith.constant 0 : i32
    %c0_i32_1 = arith.constant 0 : i32
    return %c0_i32, %c0_i32_0 : i32, i32
  }
  func.func @transform_2(%arg0: i32) -> (i32, i32) {
    %c0_i32 = arith.constant 0 : i32
    %c0_i32_0 = arith.constant 0 : i32
    %c0_i32_1 = arith.constant 0 : i32
    return %c0_i32, %c0_i32_0 : i32, i32
  }
  func.func @transform_3(%arg0: i32) -> (i32, i32) {
    %c0_i32 = arith.constant 0 : i32
    %c0_i32_0 = arith.constant 0 : i32
    return %arg0, %c0_i32 : i32, i32
  }
  func.func @transform_4(%arg0: i32) -> (i32, i32) {
    %c0_i32 = arith.constant 0 : i32
    %c0_i32_0 = arith.constant 0 : i32
    return %arg0, %c0_i32 : i32, i32
  }
}

module attributes {stable_mosaic.version = 11 : i64} {
  func.func @_conv3x3_kernel(%arg0: i32, %arg1: memref<1x10x10x256xbf16, #tpu.memory_space<vmem>>, %arg2: memref<3x3x256x256xbf16, #tpu.memory_space<vmem>>, %arg3: memref<1x256xf32, #tpu.memory_space<vmem>>, %arg4: memref<1x8x8x256xbf16, #tpu.memory_space<vmem>>, %arg5: memref<64x256xf32, #tpu.memory_space<vmem>>) attributes {dimension_semantics = [#tpu.dimension_semantics<parallel>], iteration_bounds = array<i64: 2>, scalar_prefetch = 0 : i64, scratch_operands = 1 : i64, tpu.core_type = #tpu.core_type<tc>, window_params = [{transform_indices = @transform_0, window_bounds = array<i64: 1, 10, 10, 256>}, {pipeline_mode = #tpu.pipeline_mode<synchronous>, transform_indices = @transform_1, window_bounds = array<i64: 3, 3, 256, 256>}, {pipeline_mode = #tpu.pipeline_mode<synchronous>, transform_indices = @transform_2, window_bounds = array<i64: 1, 256>}, {transform_indices = @transform_3, window_bounds = array<i64: 1, 8, 8, 256>}]} {
    %c0 = arith.constant 0 : index
    %c0_0 = arith.constant 0 : index
    %c0_1 = arith.constant 0 : index
    %c0_2 = arith.constant 0 : index
    %0 = vector.load %arg1[%c0, %c0_0, %c0_1, %c0_2] : memref<1x10x10x256xbf16, #tpu.memory_space<vmem>>, vector<1x10x8x256xbf16>
    %1 = vector.shape_cast %0 : vector<1x10x8x256xbf16> to vector<10x8x256xbf16>
    %2 = vector.extract_strided_slice %1 {offsets = [0, 0, 0], sizes = [8, 8, 256], strides = [1, 1, 1]} : vector<10x8x256xbf16> to vector<8x8x256xbf16>
    %3 = vector.shape_cast %2 : vector<8x8x256xbf16> to vector<64x256xbf16>
    %c0_3 = arith.constant 0 : index
    %c0_4 = arith.constant 0 : index
    %c0_5 = arith.constant 0 : index
    %c0_6 = arith.constant 0 : index
    %4 = vector.load %arg2[%c0_3, %c0_4, %c0_5, %c0_6] : memref<3x3x256x256xbf16, #tpu.memory_space<vmem>>, vector<1x1x256x256xbf16>
    %5 = vector.shape_cast %4 : vector<1x1x256x256xbf16> to vector<256x256xbf16>
    %cst = arith.constant dense<0.000000e+00> : vector<64x256xf32>
    %6 = tpu.matmul %3, %5, %cst {dimension_numbers = #tpu.dot_dimension_numbers<[1], [0], [0], [1], [0, 0, 1, 1], [], []>} : vector<64x256xbf16>, vector<256x256xbf16>, vector<64x256xf32> -> vector<64x256xf32>
    %c0_7 = arith.constant 0 : index
    %c0_8 = arith.constant 0 : index
    %7 = vector.load %arg5[%c0_7, %c0_8] : memref<64x256xf32, #tpu.memory_space<vmem>>, vector<64x256xf32>
    tpu.vector_store %arg5[%c0_7, %c0_8], %6 {strides = array<i32>} : memref<64x256xf32, #tpu.memory_space<vmem>>, vector<64x256xf32>,
    %8 = vector.extract_strided_slice %1 {offsets = [1, 0, 0], sizes = [8, 8, 256], strides = [1, 1, 1]} : vector<10x8x256xbf16> to vector<8x8x256xbf16>
    %9 = vector.shape_cast %8 : vector<8x8x256xbf16> to vector<64x256xbf16>
    %c1 = arith.constant 1 : index
    %c0_9 = arith.constant 0 : index
    %c0_10 = arith.constant 0 : index
    %c0_11 = arith.constant 0 : index
    %10 = vector.load %arg2[%c1, %c0_9, %c0_10, %c0_11] : memref<3x3x256x256xbf16, #tpu.memory_space<vmem>>, vector<1x1x256x256xbf16>
    %11 = vector.shape_cast %10 : vector<1x1x256x256xbf16> to vector<256x256xbf16>
    %cst_12 = arith.constant dense<0.000000e+00> : vector<64x256xf32>
    %12 = tpu.matmul %9, %11, %cst_12 {dimension_numbers = #tpu.dot_dimension_numbers<[1], [0], [0], [1], [0, 0, 1, 1], [], []>} : vector<64x256xbf16>, vector<256x256xbf16>, vector<64x256xf32> -> vector<64x256xf32>
    %c0_13 = arith.constant 0 : index
    %c0_14 = arith.constant 0 : index
    %13 = vector.load %arg5[%c0_13, %c0_14] : memref<64x256xf32, #tpu.memory_space<vmem>>, vector<64x256xf32>
    %14 = arith.addf %13, %12 : vector<64x256xf32>
    %c0_15 = arith.constant 0 : index
    %c0_16 = arith.constant 0 : index
    %15 = vector.load %arg5[%c0_15, %c0_16] : memref<64x256xf32, #tpu.memory_space<vmem>>, vector<64x256xf32>
    tpu.vector_store %arg5[%c0_15, %c0_16], %14 {strides = array<i32>} : memref<64x256xf32, #tpu.memory_space<vmem>>, vector<64x256xf32>,
    %16 = vector.extract_strided_slice %1 {offsets = [2, 0, 0], sizes = [8, 8, 256], strides = [1, 1, 1]} : vector<10x8x256xbf16> to vector<8x8x256xbf16>
    %17 = vector.shape_cast %16 : vector<8x8x256xbf16> to vector<64x256xbf16>
    %c2 = arith.constant 2 : index
    %c0_17 = arith.constant 0 : index
    %c0_18 = arith.constant 0 : index
    %c0_19 = arith.constant 0 : index
    %18 = vector.load %arg2[%c2, %c0_17, %c0_18, %c0_19] : memref<3x3x256x256xbf16, #tpu.memory_space<vmem>>, vector<1x1x256x256xbf16>
    %19 = vector.shape_cast %18 : vector<1x1x256x256xbf16> to vector<256x256xbf16>
    %cst_20 = arith.constant dense<0.000000e+00> : vector<64x256xf32>
    %20 = tpu.matmul %17, %19, %cst_20 {dimension_numbers = #tpu.dot_dimension_numbers<[1], [0], [0], [1], [0, 0, 1, 1], [], []>} : vector<64x256xbf16>, vector<256x256xbf16>, vector<64x256xf32> -> vector<64x256xf32>
    %c0_21 = arith.constant 0 : index
    %c0_22 = arith.constant 0 : index
    %21 = vector.load %arg5[%c0_21, %c0_22] : memref<64x256xf32, #tpu.memory_space<vmem>>, vector<64x256xf32>
    %22 = arith.addf %21, %20 : vector<64x256xf32>
    %c0_23 = arith.constant 0 : index
    %c0_24 = arith.constant 0 : index
    %23 = vector.load %arg5[%c0_23, %c0_24] : memref<64x256xf32, #tpu.memory_space<vmem>>, vector<64x256xf32>
    tpu.vector_store %arg5[%c0_23, %c0_24], %22 {strides = array<i32>} : memref<64x256xf32, #tpu.memory_space<vmem>>, vector<64x256xf32>,
    %c0_25 = arith.constant 0 : index
    %c0_26 = arith.constant 0 : index
    %c1_27 = arith.constant 1 : index
    %c0_28 = arith.constant 0 : index
    %24 = vector.load %arg1[%c0_25, %c0_26, %c1_27, %c0_28] : memref<1x10x10x256xbf16, #tpu.memory_space<vmem>>, vector<1x10x8x256xbf16>
    %25 = vector.shape_cast %24 : vector<1x10x8x256xbf16> to vector<10x8x256xbf16>
    %26 = vector.extract_strided_slice %25 {offsets = [0, 0, 0], sizes = [8, 8, 256], strides = [1, 1, 1]} : vector<10x8x256xbf16> to vector<8x8x256xbf16>
    %27 = vector.shape_cast %26 : vector<8x8x256xbf16> to vector<64x256xbf16>
    %c0_29 = arith.constant 0 : index
    %c1_30 = arith.constant 1 : index
    %c0_31 = arith.constant 0 : index
    %c0_32 = arith.constant 0 : index
    %28 = vector.load %arg2[%c0_29, %c1_30, %c0_31, %c0_32] : memref<3x3x256x256xbf16, #tpu.memory_space<vmem>>, vector<1x1x256x256xbf16>
    %29 = vector.shape_cast %28 : vector<1x1x256x256xbf16> to vector<256x256xbf16>
    %cst_33 = arith.constant dense<0.000000e+00> : vector<64x256xf32>
    %30 = tpu.matmul %27, %29, %cst_33 {dimension_numbers = #tpu.dot_dimension_numbers<[1], [0], [0], [1], [0, 0, 1, 1], [], []>} : vector<64x256xbf16>, vector<256x256xbf16>, vector<64x256xf32> -> vector<64x256xf32>
    %c0_34 = arith.constant 0 : index
    %c0_35 = arith.constant 0 : index
    %31 = vector.load %arg5[%c0_34, %c0_35] : memref<64x256xf32, #tpu.memory_space<vmem>>, vector<64x256xf32>
    %32 = arith.addf %31, %30 : vector<64x256xf32>
    %c0_36 = arith.constant 0 : index
    %c0_37 = arith.constant 0 : index
    %33 = vector.load %arg5[%c0_36, %c0_37] : memref<64x256xf32, #tpu.memory_space<vmem>>, vector<64x256xf32>
    tpu.vector_store %arg5[%c0_36, %c0_37], %32 {strides = array<i32>} : memref<64x256xf32, #tpu.memory_space<vmem>>, vector<64x256xf32>,
    %34 = vector.extract_strided_slice %25 {offsets = [1, 0, 0], sizes = [8, 8, 256], strides = [1, 1, 1]} : vector<10x8x256xbf16> to vector<8x8x256xbf16>
    %35 = vector.shape_cast %34 : vector<8x8x256xbf16> to vector<64x256xbf16>
    %c1_38 = arith.constant 1 : index
    %c1_39 = arith.constant 1 : index
    %c0_40 = arith.constant 0 : index
    %c0_41 = arith.constant 0 : index
    %36 = vector.load %arg2[%c1_38, %c1_39, %c0_40, %c0_41] : memref<3x3x256x256xbf16, #tpu.memory_space<vmem>>, vector<1x1x256x256xbf16>
    %37 = vector.shape_cast %36 : vector<1x1x256x256xbf16> to vector<256x256xbf16>
    %cst_42 = arith.constant dense<0.000000e+00> : vector<64x256xf32>
    %38 = tpu.matmul %35, %37, %cst_42 {dimension_numbers = #tpu.dot_dimension_numbers<[1], [0], [0], [1], [0, 0, 1, 1], [], []>} : vector<64x256xbf16>, vector<256x256xbf16>, vector<64x256xf32> -> vector<64x256xf32>
    %c0_43 = arith.constant 0 : index
    %c0_44 = arith.constant 0 : index
    %39 = vector.load %arg5[%c0_43, %c0_44] : memref<64x256xf32, #tpu.memory_space<vmem>>, vector<64x256xf32>
    %40 = arith.addf %39, %38 : vector<64x256xf32>
    %c0_45 = arith.constant 0 : index
    %c0_46 = arith.constant 0 : index
    %41 = vector.load %arg5[%c0_45, %c0_46] : memref<64x256xf32, #tpu.memory_space<vmem>>, vector<64x256xf32>
    tpu.vector_store %arg5[%c0_45, %c0_46], %40 {strides = array<i32>} : memref<64x256xf32, #tpu.memory_space<vmem>>, vector<64x256xf32>,
    %42 = vector.extract_strided_slice %25 {offsets = [2, 0, 0], sizes = [8, 8, 256], strides = [1, 1, 1]} : vector<10x8x256xbf16> to vector<8x8x256xbf16>
    %43 = vector.shape_cast %42 : vector<8x8x256xbf16> to vector<64x256xbf16>
    %c2_47 = arith.constant 2 : index
    %c1_48 = arith.constant 1 : index
    %c0_49 = arith.constant 0 : index
    %c0_50 = arith.constant 0 : index
    %44 = vector.load %arg2[%c2_47, %c1_48, %c0_49, %c0_50] : memref<3x3x256x256xbf16, #tpu.memory_space<vmem>>, vector<1x1x256x256xbf16>
    %45 = vector.shape_cast %44 : vector<1x1x256x256xbf16> to vector<256x256xbf16>
    %cst_51 = arith.constant dense<0.000000e+00> : vector<64x256xf32>
    %46 = tpu.matmul %43, %45, %cst_51 {dimension_numbers = #tpu.dot_dimension_numbers<[1], [0], [0], [1], [0, 0, 1, 1], [], []>} : vector<64x256xbf16>, vector<256x256xbf16>, vector<64x256xf32> -> vector<64x256xf32>
    %c0_52 = arith.constant 0 : index
    %c0_53 = arith.constant 0 : index
    %47 = vector.load %arg5[%c0_52, %c0_53] : memref<64x256xf32, #tpu.memory_space<vmem>>, vector<64x256xf32>
    %48 = arith.addf %47, %46 : vector<64x256xf32>
    %c0_54 = arith.constant 0 : index
    %c0_55 = arith.constant 0 : index
    %49 = vector.load %arg5[%c0_54, %c0_55] : memref<64x256xf32, #tpu.memory_space<vmem>>, vector<64x256xf32>
    tpu.vector_store %arg5[%c0_54, %c0_55], %48 {strides = array<i32>} : memref<64x256xf32, #tpu.memory_space<vmem>>, vector<64x256xf32>,
    %c0_56 = arith.constant 0 : index
    %c0_57 = arith.constant 0 : index
    %c2_58 = arith.constant 2 : index
    %c0_59 = arith.constant 0 : index
    %50 = vector.load %arg1[%c0_56, %c0_57, %c2_58, %c0_59] : memref<1x10x10x256xbf16, #tpu.memory_space<vmem>>, vector<1x10x8x256xbf16>
    %51 = vector.shape_cast %50 : vector<1x10x8x256xbf16> to vector<10x8x256xbf16>
    %52 = vector.extract_strided_slice %51 {offsets = [0, 0, 0], sizes = [8, 8, 256], strides = [1, 1, 1]} : vector<10x8x256xbf16> to vector<8x8x256xbf16>
    %53 = vector.shape_cast %52 : vector<8x8x256xbf16> to vector<64x256xbf16>
    %c0_60 = arith.constant 0 : index
    %c2_61 = arith.constant 2 : index
    %c0_62 = arith.constant 0 : index
    %c0_63 = arith.constant 0 : index
    %54 = vector.load %arg2[%c0_60, %c2_61, %c0_62, %c0_63] : memref<3x3x256x256xbf16, #tpu.memory_space<vmem>>, vector<1x1x256x256xbf16>
    %55 = vector.shape_cast %54 : vector<1x1x256x256xbf16> to vector<256x256xbf16>
    %cst_64 = arith.constant dense<0.000000e+00> : vector<64x256xf32>
    %56 = tpu.matmul %53, %55, %cst_64 {dimension_numbers = #tpu.dot_dimension_numbers<[1], [0], [0], [1], [0, 0, 1, 1], [], []>} : vector<64x256xbf16>, vector<256x256xbf16>, vector<64x256xf32> -> vector<64x256xf32>
    %c0_65 = arith.constant 0 : index
    %c0_66 = arith.constant 0 : index
    %57 = vector.load %arg5[%c0_65, %c0_66] : memref<64x256xf32, #tpu.memory_space<vmem>>, vector<64x256xf32>
    %58 = arith.addf %57, %56 : vector<64x256xf32>
    %c0_67 = arith.constant 0 : index
    %c0_68 = arith.constant 0 : index
    %59 = vector.load %arg5[%c0_67, %c0_68] : memref<64x256xf32, #tpu.memory_space<vmem>>, vector<64x256xf32>
    tpu.vector_store %arg5[%c0_67, %c0_68], %58 {strides = array<i32>} : memref<64x256xf32, #tpu.memory_space<vmem>>, vector<64x256xf32>,
    %60 = vector.extract_strided_slice %51 {offsets = [1, 0, 0], sizes = [8, 8, 256], strides = [1, 1, 1]} : vector<10x8x256xbf16> to vector<8x8x256xbf16>
    %61 = vector.shape_cast %60 : vector<8x8x256xbf16> to vector<64x256xbf16>
    %c1_69 = arith.constant 1 : index
    %c2_70 = arith.constant 2 : index
    %c0_71 = arith.constant 0 : index
    %c0_72 = arith.constant 0 : index
    %62 = vector.load %arg2[%c1_69, %c2_70, %c0_71, %c0_72] : memref<3x3x256x256xbf16, #tpu.memory_space<vmem>>, vector<1x1x256x256xbf16>
    %63 = vector.shape_cast %62 : vector<1x1x256x256xbf16> to vector<256x256xbf16>
    %cst_73 = arith.constant dense<0.000000e+00> : vector<64x256xf32>
    %64 = tpu.matmul %61, %63, %cst_73 {dimension_numbers = #tpu.dot_dimension_numbers<[1], [0], [0], [1], [0, 0, 1, 1], [], []>} : vector<64x256xbf16>, vector<256x256xbf16>, vector<64x256xf32> -> vector<64x256xf32>
    %c0_74 = arith.constant 0 : index
    %c0_75 = arith.constant 0 : index
    %65 = vector.load %arg5[%c0_74, %c0_75] : memref<64x256xf32, #tpu.memory_space<vmem>>, vector<64x256xf32>
    %66 = arith.addf %65, %64 : vector<64x256xf32>
    %c0_76 = arith.constant 0 : index
    %c0_77 = arith.constant 0 : index
    %67 = vector.load %arg5[%c0_76, %c0_77] : memref<64x256xf32, #tpu.memory_space<vmem>>, vector<64x256xf32>
    tpu.vector_store %arg5[%c0_76, %c0_77], %66 {strides = array<i32>} : memref<64x256xf32, #tpu.memory_space<vmem>>, vector<64x256xf32>,
    %68 = vector.extract_strided_slice %51 {offsets = [2, 0, 0], sizes = [8, 8, 256], strides = [1, 1, 1]} : vector<10x8x256xbf16> to vector<8x8x256xbf16>
    %69 = vector.shape_cast %68 : vector<8x8x256xbf16> to vector<64x256xbf16>
    %c2_78 = arith.constant 2 : index
    %c2_79 = arith.constant 2 : index
    %c0_80 = arith.constant 0 : index
    %c0_81 = arith.constant 0 : index
    %70 = vector.load %arg2[%c2_78, %c2_79, %c0_80, %c0_81] : memref<3x3x256x256xbf16, #tpu.memory_space<vmem>>, vector<1x1x256x256xbf16>
    %71 = vector.shape_cast %70 : vector<1x1x256x256xbf16> to vector<256x256xbf16>
    %cst_82 = arith.constant dense<0.000000e+00> : vector<64x256xf32>
    %72 = tpu.matmul %69, %71, %cst_82 {dimension_numbers = #tpu.dot_dimension_numbers<[1], [0], [0], [1], [0, 0, 1, 1], [], []>} : vector<64x256xbf16>, vector<256x256xbf16>, vector<64x256xf32> -> vector<64x256xf32>
    %c0_83 = arith.constant 0 : index
    %c0_84 = arith.constant 0 : index
    %73 = vector.load %arg5[%c0_83, %c0_84] : memref<64x256xf32, #tpu.memory_space<vmem>>, vector<64x256xf32>
    %74 = arith.addf %73, %72 : vector<64x256xf32>
    %c0_85 = arith.constant 0 : index
    %c0_86 = arith.constant 0 : index
    %75 = vector.load %arg5[%c0_85, %c0_86] : memref<64x256xf32, #tpu.memory_space<vmem>>, vector<64x256xf32>
    tpu.vector_store %arg5[%c0_85, %c0_86], %74 {strides = array<i32>} : memref<64x256xf32, #tpu.memory_space<vmem>>, vector<64x256xf32>,
    %c0_87 = arith.constant 0 : index
    %c0_88 = arith.constant 0 : index
    %76 = vector.load %arg5[%c0_87, %c0_88] : memref<64x256xf32, #tpu.memory_space<vmem>>, vector<64x256xf32>
    %c0_89 = arith.constant 0 : index
    %c0_90 = arith.constant 0 : index
    %77 = vector.load %arg3[%c0_89, %c0_90] : memref<1x256xf32, #tpu.memory_space<vmem>>, vector<1x256xf32>
    %78 = vector.broadcast %77 : vector<1x256xf32> to vector<64x256xf32>
    %79 = arith.addf %76, %78 : vector<64x256xf32>
    %cst_91 = arith.constant 0.000000e+00 : f32
    %80 = vector.broadcast %cst_91 : f32 to vector<64x256xf32>
    %81 = arith.maximumf %79, %80 : vector<64x256xf32>
    %82 = vector.shape_cast %81 : vector<64x256xf32> to vector<8x8x256xf32>
    %83 = vector.shape_cast %82 : vector<8x8x256xf32> to vector<1x8x8x256xf32>
    %84 = arith.truncf %83 : vector<1x8x8x256xf32> to vector<1x8x8x256xbf16>
    %c0_92 = arith.constant 0 : index
    %c0_93 = arith.constant 0 : index
    %c0_94 = arith.constant 0 : index
    %c0_95 = arith.constant 0 : index
    %85 = vector.load %arg4[%c0_92, %c0_93, %c0_94, %c0_95] : memref<1x8x8x256xbf16, #tpu.memory_space<vmem>>, vector<1x8x8x256xbf16>
    tpu.vector_store %arg4[%c0_92, %c0_93, %c0_94, %c0_95], %84 {strides = array<i32>} : memref<1x8x8x256xbf16, #tpu.memory_space<vmem>>, vector<1x8x8x256xbf16>,
    return
  }
  func.func @transform_0(%arg0: i32) -> (i32, i32, i32, i32) {
    %c0_i32 = arith.constant 0 : i32
    %c0_i32_0 = arith.constant 0 : i32
    %c0_i32_1 = arith.constant 0 : i32
    %c0_i32_2 = arith.constant 0 : i32
    return %arg0, %c0_i32, %c0_i32_0, %c0_i32_1 : i32, i32, i32, i32
  }
  func.func @transform_1(%arg0: i32) -> (i32, i32, i32, i32) {
    %c0_i32 = arith.constant 0 : i32
    %c0_i32_0 = arith.constant 0 : i32
    %c0_i32_1 = arith.constant 0 : i32
    %c0_i32_2 = arith.constant 0 : i32
    %c0_i32_3 = arith.constant 0 : i32
    return %c0_i32, %c0_i32_0, %c0_i32_1, %c0_i32_2 : i32, i32, i32, i32
  }
  func.func @transform_2(%arg0: i32) -> (i32, i32) {
    %c0_i32 = arith.constant 0 : i32
    %c0_i32_0 = arith.constant 0 : i32
    %c0_i32_1 = arith.constant 0 : i32
    return %c0_i32, %c0_i32_0 : i32, i32
  }
  func.func @transform_3(%arg0: i32) -> (i32, i32, i32, i32) {
    %c0_i32 = arith.constant 0 : i32
    %c0_i32_0 = arith.constant 0 : i32
    %c0_i32_1 = arith.constant 0 : i32
    %c0_i32_2 = arith.constant 0 : i32
    return %arg0, %c0_i32, %c0_i32_0, %c0_i32_1 : i32, i32, i32, i32
  }
}

module attributes {stable_mosaic.version = 11 : i64} {
  func.func @_mm_add_kernel(%arg0: i32, %arg1: memref<256x256xbf16, #tpu.memory_space<vmem>>, %arg2: memref<256x256xbf16, #tpu.memory_space<vmem>>, %arg3: memref<1x256xf32, #tpu.memory_space<vmem>>, %arg4: memref<256x256xbf16, #tpu.memory_space<vmem>>, %arg5: memref<256x256xbf16, #tpu.memory_space<vmem>>) attributes {dimension_semantics = [#tpu.dimension_semantics<parallel>], iteration_bounds = array<i64: 2>, scalar_prefetch = 0 : i64, scratch_operands = 0 : i64, tpu.core_type = #tpu.core_type<tc>, window_params = [{transform_indices = @transform_0, window_bounds = array<i64: 256, 256>}, {pipeline_mode = #tpu.pipeline_mode<synchronous>, transform_indices = @transform_1, window_bounds = array<i64: 256, 256>}, {pipeline_mode = #tpu.pipeline_mode<synchronous>, transform_indices = @transform_2, window_bounds = array<i64: 1, 256>}, {transform_indices = @transform_3, window_bounds = array<i64: 256, 256>}, {transform_indices = @transform_4, window_bounds = array<i64: 256, 256>}]} {
    %c0 = arith.constant 0 : index
    %c0_0 = arith.constant 0 : index
    %0 = vector.load %arg1[%c0, %c0_0] : memref<256x256xbf16, #tpu.memory_space<vmem>>, vector<256x256xbf16>
    %c0_1 = arith.constant 0 : index
    %c0_2 = arith.constant 0 : index
    %1 = vector.load %arg2[%c0_1, %c0_2] : memref<256x256xbf16, #tpu.memory_space<vmem>>, vector<256x256xbf16>
    %cst = arith.constant dense<0.000000e+00> : vector<256x256xf32>
    %2 = tpu.matmul %0, %1, %cst {dimension_numbers = #tpu.dot_dimension_numbers<[1], [0], [0], [1], [0, 0, 1, 1], [], []>} : vector<256x256xbf16>, vector<256x256xbf16>, vector<256x256xf32> -> vector<256x256xf32>
    %c0_3 = arith.constant 0 : index
    %c0_4 = arith.constant 0 : index
    %3 = vector.load %arg3[%c0_3, %c0_4] : memref<1x256xf32, #tpu.memory_space<vmem>>, vector<1x256xf32>
    %4 = vector.broadcast %3 : vector<1x256xf32> to vector<256x256xf32>
    %5 = arith.addf %2, %4 : vector<256x256xf32>
    %cst_5 = arith.constant 0.000000e+00 : f32
    %6 = vector.broadcast %cst_5 : f32 to vector<256x256xf32>
    %7 = arith.maximumf %5, %6 : vector<256x256xf32>
    %c0_6 = arith.constant 0 : index
    %c0_7 = arith.constant 0 : index
    %8 = vector.load %arg4[%c0_6, %c0_7] : memref<256x256xbf16, #tpu.memory_space<vmem>>, vector<256x256xbf16>
    %9 = arith.extf %8 : vector<256x256xbf16> to vector<256x256xf32>
    %10 = arith.addf %7, %9 : vector<256x256xf32>
    %11 = arith.truncf %10 : vector<256x256xf32> to vector<256x256xbf16>
    %c0_8 = arith.constant 0 : index
    %c0_9 = arith.constant 0 : index
    %12 = vector.load %arg5[%c0_8, %c0_9] : memref<256x256xbf16, #tpu.memory_space<vmem>>, vector<256x256xbf16>
    tpu.vector_store %arg5[%c0_8, %c0_9], %11 {strides = array<i32>} : memref<256x256xbf16, #tpu.memory_space<vmem>>, vector<256x256xbf16>,
    return
  }
  func.func @transform_0(%arg0: i32) -> (i32, i32) {
    %c0_i32 = arith.constant 0 : i32
    %c0_i32_0 = arith.constant 0 : i32
    return %arg0, %c0_i32 : i32, i32
  }
  func.func @transform_1(%arg0: i32) -> (i32, i32) {
    %c0_i32 = arith.constant 0 : i32
    %c0_i32_0 = arith.constant 0 : i32
    %c0_i32_1 = arith.constant 0 : i32
    return %c0_i32, %c0_i32_0 : i32, i32
  }
  func.func @transform_2(%arg0: i32) -> (i32, i32) {
    %c0_i32 = arith.constant 0 : i32
    %c0_i32_0 = arith.constant 0 : i32
    %c0_i32_1 = arith.constant 0 : i32
    return %c0_i32, %c0_i32_0 : i32, i32
  }
  func.func @transform_3(%arg0: i32) -> (i32, i32) {
    %c0_i32 = arith.constant 0 : i32
    %c0_i32_0 = arith.constant 0 : i32
    return %arg0, %c0_i32 : i32, i32
  }
  func.func @transform_4(%arg0: i32) -> (i32, i32) {
    %c0_i32 = arith.constant 0 : i32
    %c0_i32_0 = arith.constant 0 : i32
    return %arg0, %c0_i32 : i32, i32
  }
}

module attributes {stable_mosaic.version = 11 : i64} {
  func.func @_conv3x3_kernel(%arg0: i32, %arg1: memref<1x10x18x256xbf16, #tpu.memory_space<vmem>>, %arg2: memref<3x3x256x256xbf16, #tpu.memory_space<vmem>>, %arg3: memref<1x256xf32, #tpu.memory_space<vmem>>, %arg4: memref<1x8x16x256xbf16, #tpu.memory_space<vmem>>, %arg5: memref<128x256xf32, #tpu.memory_space<vmem>>) attributes {dimension_semantics = [#tpu.dimension_semantics<parallel>], iteration_bounds = array<i64: 4>, scalar_prefetch = 0 : i64, scratch_operands = 1 : i64, tpu.core_type = #tpu.core_type<tc>, window_params = [{transform_indices = @transform_0, window_bounds = array<i64: 1, 10, 18, 256>}, {pipeline_mode = #tpu.pipeline_mode<synchronous>, transform_indices = @transform_1, window_bounds = array<i64: 3, 3, 256, 256>}, {pipeline_mode = #tpu.pipeline_mode<synchronous>, transform_indices = @transform_2, window_bounds = array<i64: 1, 256>}, {transform_indices = @transform_3, window_bounds = array<i64: 1, 8, 16, 256>}]} {
    %c0 = arith.constant 0 : index
    %c0_0 = arith.constant 0 : index
    %c0_1 = arith.constant 0 : index
    %c0_2 = arith.constant 0 : index
    %0 = vector.load %arg1[%c0, %c0_0, %c0_1, %c0_2] : memref<1x10x18x256xbf16, #tpu.memory_space<vmem>>, vector<1x10x16x256xbf16>
    %1 = vector.shape_cast %0 : vector<1x10x16x256xbf16> to vector<10x16x256xbf16>
    %2 = vector.extract_strided_slice %1 {offsets = [0, 0, 0], sizes = [8, 16, 256], strides = [1, 1, 1]} : vector<10x16x256xbf16> to vector<8x16x256xbf16>
    %3 = vector.shape_cast %2 : vector<8x16x256xbf16> to vector<128x256xbf16>
    %c0_3 = arith.constant 0 : index
    %c0_4 = arith.constant 0 : index
    %c0_5 = arith.constant 0 : index
    %c0_6 = arith.constant 0 : index
    %4 = vector.load %arg2[%c0_3, %c0_4, %c0_5, %c0_6] : memref<3x3x256x256xbf16, #tpu.memory_space<vmem>>, vector<1x1x256x256xbf16>
    %5 = vector.shape_cast %4 : vector<1x1x256x256xbf16> to vector<256x256xbf16>
    %cst = arith.constant dense<0.000000e+00> : vector<128x256xf32>
    %6 = tpu.matmul %3, %5, %cst {dimension_numbers = #tpu.dot_dimension_numbers<[1], [0], [0], [1], [0, 0, 1, 1], [], []>} : vector<128x256xbf16>, vector<256x256xbf16>, vector<128x256xf32> -> vector<128x256xf32>
    %c0_7 = arith.constant 0 : index
    %c0_8 = arith.constant 0 : index
    %7 = vector.load %arg5[%c0_7, %c0_8] : memref<128x256xf32, #tpu.memory_space<vmem>>, vector<128x256xf32>
    tpu.vector_store %arg5[%c0_7, %c0_8], %6 {strides = array<i32>} : memref<128x256xf32, #tpu.memory_space<vmem>>, vector<128x256xf32>,
    %8 = vector.extract_strided_slice %1 {offsets = [1, 0, 0], sizes = [8, 16, 256], strides = [1, 1, 1]} : vector<10x16x256xbf16> to vector<8x16x256xbf16>
    %9 = vector.shape_cast %8 : vector<8x16x256xbf16> to vector<128x256xbf16>
    %c1 = arith.constant 1 : index
    %c0_9 = arith.constant 0 : index
    %c0_10 = arith.constant 0 : index
    %c0_11 = arith.constant 0 : index
    %10 = vector.load %arg2[%c1, %c0_9, %c0_10, %c0_11] : memref<3x3x256x256xbf16, #tpu.memory_space<vmem>>, vector<1x1x256x256xbf16>
    %11 = vector.shape_cast %10 : vector<1x1x256x256xbf16> to vector<256x256xbf16>
    %cst_12 = arith.constant dense<0.000000e+00> : vector<128x256xf32>
    %12 = tpu.matmul %9, %11, %cst_12 {dimension_numbers = #tpu.dot_dimension_numbers<[1], [0], [0], [1], [0, 0, 1, 1], [], []>} : vector<128x256xbf16>, vector<256x256xbf16>, vector<128x256xf32> -> vector<128x256xf32>
    %c0_13 = arith.constant 0 : index
    %c0_14 = arith.constant 0 : index
    %13 = vector.load %arg5[%c0_13, %c0_14] : memref<128x256xf32, #tpu.memory_space<vmem>>, vector<128x256xf32>
    %14 = arith.addf %13, %12 : vector<128x256xf32>
    %c0_15 = arith.constant 0 : index
    %c0_16 = arith.constant 0 : index
    %15 = vector.load %arg5[%c0_15, %c0_16] : memref<128x256xf32, #tpu.memory_space<vmem>>, vector<128x256xf32>
    tpu.vector_store %arg5[%c0_15, %c0_16], %14 {strides = array<i32>} : memref<128x256xf32, #tpu.memory_space<vmem>>, vector<128x256xf32>,
    %16 = vector.extract_strided_slice %1 {offsets = [2, 0, 0], sizes = [8, 16, 256], strides = [1, 1, 1]} : vector<10x16x256xbf16> to vector<8x16x256xbf16>
    %17 = vector.shape_cast %16 : vector<8x16x256xbf16> to vector<128x256xbf16>
    %c2 = arith.constant 2 : index
    %c0_17 = arith.constant 0 : index
    %c0_18 = arith.constant 0 : index
    %c0_19 = arith.constant 0 : index
    %18 = vector.load %arg2[%c2, %c0_17, %c0_18, %c0_19] : memref<3x3x256x256xbf16, #tpu.memory_space<vmem>>, vector<1x1x256x256xbf16>
    %19 = vector.shape_cast %18 : vector<1x1x256x256xbf16> to vector<256x256xbf16>
    %cst_20 = arith.constant dense<0.000000e+00> : vector<128x256xf32>
    %20 = tpu.matmul %17, %19, %cst_20 {dimension_numbers = #tpu.dot_dimension_numbers<[1], [0], [0], [1], [0, 0, 1, 1], [], []>} : vector<128x256xbf16>, vector<256x256xbf16>, vector<128x256xf32> -> vector<128x256xf32>
    %c0_21 = arith.constant 0 : index
    %c0_22 = arith.constant 0 : index
    %21 = vector.load %arg5[%c0_21, %c0_22] : memref<128x256xf32, #tpu.memory_space<vmem>>, vector<128x256xf32>
    %22 = arith.addf %21, %20 : vector<128x256xf32>
    %c0_23 = arith.constant 0 : index
    %c0_24 = arith.constant 0 : index
    %23 = vector.load %arg5[%c0_23, %c0_24] : memref<128x256xf32, #tpu.memory_space<vmem>>, vector<128x256xf32>
    tpu.vector_store %arg5[%c0_23, %c0_24], %22 {strides = array<i32>} : memref<128x256xf32, #tpu.memory_space<vmem>>, vector<128x256xf32>,
    %c0_25 = arith.constant 0 : index
    %c0_26 = arith.constant 0 : index
    %c1_27 = arith.constant 1 : index
    %c0_28 = arith.constant 0 : index
    %24 = vector.load %arg1[%c0_25, %c0_26, %c1_27, %c0_28] : memref<1x10x18x256xbf16, #tpu.memory_space<vmem>>, vector<1x10x16x256xbf16>
    %25 = vector.shape_cast %24 : vector<1x10x16x256xbf16> to vector<10x16x256xbf16>
    %26 = vector.extract_strided_slice %25 {offsets = [0, 0, 0], sizes = [8, 16, 256], strides = [1, 1, 1]} : vector<10x16x256xbf16> to vector<8x16x256xbf16>
    %27 = vector.shape_cast %26 : vector<8x16x256xbf16> to vector<128x256xbf16>
    %c0_29 = arith.constant 0 : index
    %c1_30 = arith.constant 1 : index
    %c0_31 = arith.constant 0 : index
    %c0_32 = arith.constant 0 : index
    %28 = vector.load %arg2[%c0_29, %c1_30, %c0_31, %c0_32] : memref<3x3x256x256xbf16, #tpu.memory_space<vmem>>, vector<1x1x256x256xbf16>
    %29 = vector.shape_cast %28 : vector<1x1x256x256xbf16> to vector<256x256xbf16>
    %cst_33 = arith.constant dense<0.000000e+00> : vector<128x256xf32>
    %30 = tpu.matmul %27, %29, %cst_33 {dimension_numbers = #tpu.dot_dimension_numbers<[1], [0], [0], [1], [0, 0, 1, 1], [], []>} : vector<128x256xbf16>, vector<256x256xbf16>, vector<128x256xf32> -> vector<128x256xf32>
    %c0_34 = arith.constant 0 : index
    %c0_35 = arith.constant 0 : index
    %31 = vector.load %arg5[%c0_34, %c0_35] : memref<128x256xf32, #tpu.memory_space<vmem>>, vector<128x256xf32>
    %32 = arith.addf %31, %30 : vector<128x256xf32>
    %c0_36 = arith.constant 0 : index
    %c0_37 = arith.constant 0 : index
    %33 = vector.load %arg5[%c0_36, %c0_37] : memref<128x256xf32, #tpu.memory_space<vmem>>, vector<128x256xf32>
    tpu.vector_store %arg5[%c0_36, %c0_37], %32 {strides = array<i32>} : memref<128x256xf32, #tpu.memory_space<vmem>>, vector<128x256xf32>,
    %34 = vector.extract_strided_slice %25 {offsets = [1, 0, 0], sizes = [8, 16, 256], strides = [1, 1, 1]} : vector<10x16x256xbf16> to vector<8x16x256xbf16>
    %35 = vector.shape_cast %34 : vector<8x16x256xbf16> to vector<128x256xbf16>
    %c1_38 = arith.constant 1 : index
    %c1_39 = arith.constant 1 : index
    %c0_40 = arith.constant 0 : index
    %c0_41 = arith.constant 0 : index
    %36 = vector.load %arg2[%c1_38, %c1_39, %c0_40, %c0_41] : memref<3x3x256x256xbf16, #tpu.memory_space<vmem>>, vector<1x1x256x256xbf16>
    %37 = vector.shape_cast %36 : vector<1x1x256x256xbf16> to vector<256x256xbf16>
    %cst_42 = arith.constant dense<0.000000e+00> : vector<128x256xf32>
    %38 = tpu.matmul %35, %37, %cst_42 {dimension_numbers = #tpu.dot_dimension_numbers<[1], [0], [0], [1], [0, 0, 1, 1], [], []>} : vector<128x256xbf16>, vector<256x256xbf16>, vector<128x256xf32> -> vector<128x256xf32>
    %c0_43 = arith.constant 0 : index
    %c0_44 = arith.constant 0 : index
    %39 = vector.load %arg5[%c0_43, %c0_44] : memref<128x256xf32, #tpu.memory_space<vmem>>, vector<128x256xf32>
    %40 = arith.addf %39, %38 : vector<128x256xf32>
    %c0_45 = arith.constant 0 : index
    %c0_46 = arith.constant 0 : index
    %41 = vector.load %arg5[%c0_45, %c0_46] : memref<128x256xf32, #tpu.memory_space<vmem>>, vector<128x256xf32>
    tpu.vector_store %arg5[%c0_45, %c0_46], %40 {strides = array<i32>} : memref<128x256xf32, #tpu.memory_space<vmem>>, vector<128x256xf32>,
    %42 = vector.extract_strided_slice %25 {offsets = [2, 0, 0], sizes = [8, 16, 256], strides = [1, 1, 1]} : vector<10x16x256xbf16> to vector<8x16x256xbf16>
    %43 = vector.shape_cast %42 : vector<8x16x256xbf16> to vector<128x256xbf16>
    %c2_47 = arith.constant 2 : index
    %c1_48 = arith.constant 1 : index
    %c0_49 = arith.constant 0 : index
    %c0_50 = arith.constant 0 : index
    %44 = vector.load %arg2[%c2_47, %c1_48, %c0_49, %c0_50] : memref<3x3x256x256xbf16, #tpu.memory_space<vmem>>, vector<1x1x256x256xbf16>
    %45 = vector.shape_cast %44 : vector<1x1x256x256xbf16> to vector<256x256xbf16>
    %cst_51 = arith.constant dense<0.000000e+00> : vector<128x256xf32>
    %46 = tpu.matmul %43, %45, %cst_51 {dimension_numbers = #tpu.dot_dimension_numbers<[1], [0], [0], [1], [0, 0, 1, 1], [], []>} : vector<128x256xbf16>, vector<256x256xbf16>, vector<128x256xf32> -> vector<128x256xf32>
    %c0_52 = arith.constant 0 : index
    %c0_53 = arith.constant 0 : index
    %47 = vector.load %arg5[%c0_52, %c0_53] : memref<128x256xf32, #tpu.memory_space<vmem>>, vector<128x256xf32>
    %48 = arith.addf %47, %46 : vector<128x256xf32>
    %c0_54 = arith.constant 0 : index
    %c0_55 = arith.constant 0 : index
    %49 = vector.load %arg5[%c0_54, %c0_55] : memref<128x256xf32, #tpu.memory_space<vmem>>, vector<128x256xf32>
    tpu.vector_store %arg5[%c0_54, %c0_55], %48 {strides = array<i32>} : memref<128x256xf32, #tpu.memory_space<vmem>>, vector<128x256xf32>,
    %c0_56 = arith.constant 0 : index
    %c0_57 = arith.constant 0 : index
    %c2_58 = arith.constant 2 : index
    %c0_59 = arith.constant 0 : index
    %50 = vector.load %arg1[%c0_56, %c0_57, %c2_58, %c0_59] : memref<1x10x18x256xbf16, #tpu.memory_space<vmem>>, vector<1x10x16x256xbf16>
    %51 = vector.shape_cast %50 : vector<1x10x16x256xbf16> to vector<10x16x256xbf16>
    %52 = vector.extract_strided_slice %51 {offsets = [0, 0, 0], sizes = [8, 16, 256], strides = [1, 1, 1]} : vector<10x16x256xbf16> to vector<8x16x256xbf16>
    %53 = vector.shape_cast %52 : vector<8x16x256xbf16> to vector<128x256xbf16>
    %c0_60 = arith.constant 0 : index
    %c2_61 = arith.constant 2 : index
    %c0_62 = arith.constant 0 : index
    %c0_63 = arith.constant 0 : index
    %54 = vector.load %arg2[%c0_60, %c2_61, %c0_62, %c0_63] : memref<3x3x256x256xbf16, #tpu.memory_space<vmem>>, vector<1x1x256x256xbf16>
    %55 = vector.shape_cast %54 : vector<1x1x256x256xbf16> to vector<256x256xbf16>
    %cst_64 = arith.constant dense<0.000000e+00> : vector<128x256xf32>
    %56 = tpu.matmul %53, %55, %cst_64 {dimension_numbers = #tpu.dot_dimension_numbers<[1], [0], [0], [1], [0, 0, 1, 1], [], []>} : vector<128x256xbf16>, vector<256x256xbf16>, vector<128x256xf32> -> vector<128x256xf32>
    %c0_65 = arith.constant 0 : index
    %c0_66 = arith.constant 0 : index
    %57 = vector.load %arg5[%c0_65, %c0_66] : memref<128x256xf32, #tpu.memory_space<vmem>>, vector<128x256xf32>
    %58 = arith.addf %57, %56 : vector<128x256xf32>
    %c0_67 = arith.constant 0 : index
    %c0_68 = arith.constant 0 : index
    %59 = vector.load %arg5[%c0_67, %c0_68] : memref<128x256xf32, #tpu.memory_space<vmem>>, vector<128x256xf32>
    tpu.vector_store %arg5[%c0_67, %c0_68], %58 {strides = array<i32>} : memref<128x256xf32, #tpu.memory_space<vmem>>, vector<128x256xf32>,
    %60 = vector.extract_strided_slice %51 {offsets = [1, 0, 0], sizes = [8, 16, 256], strides = [1, 1, 1]} : vector<10x16x256xbf16> to vector<8x16x256xbf16>
    %61 = vector.shape_cast %60 : vector<8x16x256xbf16> to vector<128x256xbf16>
    %c1_69 = arith.constant 1 : index
    %c2_70 = arith.constant 2 : index
    %c0_71 = arith.constant 0 : index
    %c0_72 = arith.constant 0 : index
    %62 = vector.load %arg2[%c1_69, %c2_70, %c0_71, %c0_72] : memref<3x3x256x256xbf16, #tpu.memory_space<vmem>>, vector<1x1x256x256xbf16>
    %63 = vector.shape_cast %62 : vector<1x1x256x256xbf16> to vector<256x256xbf16>
    %cst_73 = arith.constant dense<0.000000e+00> : vector<128x256xf32>
    %64 = tpu.matmul %61, %63, %cst_73 {dimension_numbers = #tpu.dot_dimension_numbers<[1], [0], [0], [1], [0, 0, 1, 1], [], []>} : vector<128x256xbf16>, vector<256x256xbf16>, vector<128x256xf32> -> vector<128x256xf32>
    %c0_74 = arith.constant 0 : index
    %c0_75 = arith.constant 0 : index
    %65 = vector.load %arg5[%c0_74, %c0_75] : memref<128x256xf32, #tpu.memory_space<vmem>>, vector<128x256xf32>
    %66 = arith.addf %65, %64 : vector<128x256xf32>
    %c0_76 = arith.constant 0 : index
    %c0_77 = arith.constant 0 : index
    %67 = vector.load %arg5[%c0_76, %c0_77] : memref<128x256xf32, #tpu.memory_space<vmem>>, vector<128x256xf32>
    tpu.vector_store %arg5[%c0_76, %c0_77], %66 {strides = array<i32>} : memref<128x256xf32, #tpu.memory_space<vmem>>, vector<128x256xf32>,
    %68 = vector.extract_strided_slice %51 {offsets = [2, 0, 0], sizes = [8, 16, 256], strides = [1, 1, 1]} : vector<10x16x256xbf16> to vector<8x16x256xbf16>
    %69 = vector.shape_cast %68 : vector<8x16x256xbf16> to vector<128x256xbf16>
    %c2_78 = arith.constant 2 : index
    %c2_79 = arith.constant 2 : index
    %c0_80 = arith.constant 0 : index
    %c0_81 = arith.constant 0 : index
    %70 = vector.load %arg2[%c2_78, %c2_79, %c0_80, %c0_81] : memref<3x3x256x256xbf16, #tpu.memory_space<vmem>>, vector<1x1x256x256xbf16>
    %71 = vector.shape_cast %70 : vector<1x1x256x256xbf16> to vector<256x256xbf16>
    %cst_82 = arith.constant dense<0.000000e+00> : vector<128x256xf32>
    %72 = tpu.matmul %69, %71, %cst_82 {dimension_numbers = #tpu.dot_dimension_numbers<[1], [0], [0], [1], [0, 0, 1, 1], [], []>} : vector<128x256xbf16>, vector<256x256xbf16>, vector<128x256xf32> -> vector<128x256xf32>
    %c0_83 = arith.constant 0 : index
    %c0_84 = arith.constant 0 : index
    %73 = vector.load %arg5[%c0_83, %c0_84] : memref<128x256xf32, #tpu.memory_space<vmem>>, vector<128x256xf32>
    %74 = arith.addf %73, %72 : vector<128x256xf32>
    %c0_85 = arith.constant 0 : index
    %c0_86 = arith.constant 0 : index
    %75 = vector.load %arg5[%c0_85, %c0_86] : memref<128x256xf32, #tpu.memory_space<vmem>>, vector<128x256xf32>
    tpu.vector_store %arg5[%c0_85, %c0_86], %74 {strides = array<i32>} : memref<128x256xf32, #tpu.memory_space<vmem>>, vector<128x256xf32>,
    %c0_87 = arith.constant 0 : index
    %c0_88 = arith.constant 0 : index
    %76 = vector.load %arg5[%c0_87, %c0_88] : memref<128x256xf32, #tpu.memory_space<vmem>>, vector<128x256xf32>
    %c0_89 = arith.constant 0 : index
    %c0_90 = arith.constant 0 : index
    %77 = vector.load %arg3[%c0_89, %c0_90] : memref<1x256xf32, #tpu.memory_space<vmem>>, vector<1x256xf32>
    %78 = vector.broadcast %77 : vector<1x256xf32> to vector<128x256xf32>
    %79 = arith.addf %76, %78 : vector<128x256xf32>
    %cst_91 = arith.constant 0.000000e+00 : f32
    %80 = vector.broadcast %cst_91 : f32 to vector<128x256xf32>
    %81 = arith.maximumf %79, %80 : vector<128x256xf32>
    %82 = vector.shape_cast %81 : vector<128x256xf32> to vector<8x16x256xf32>
    %83 = vector.shape_cast %82 : vector<8x16x256xf32> to vector<1x8x16x256xf32>
    %84 = arith.truncf %83 : vector<1x8x16x256xf32> to vector<1x8x16x256xbf16>
    %c0_92 = arith.constant 0 : index
    %c0_93 = arith.constant 0 : index
    %c0_94 = arith.constant 0 : index
    %c0_95 = arith.constant 0 : index
    %85 = vector.load %arg4[%c0_92, %c0_93, %c0_94, %c0_95] : memref<1x8x16x256xbf16, #tpu.memory_space<vmem>>, vector<1x8x16x256xbf16>
    tpu.vector_store %arg4[%c0_92, %c0_93, %c0_94, %c0_95], %84 {strides = array<i32>} : memref<1x8x16x256xbf16, #tpu.memory_space<vmem>>, vector<1x8x16x256xbf16>,
    return
  }
  func.func @transform_0(%arg0: i32) -> (i32, i32, i32, i32) {
    %c0_i32 = arith.constant 0 : i32
    %c0_i32_0 = arith.constant 0 : i32
    %c0_i32_1 = arith.constant 0 : i32
    %c0_i32_2 = arith.constant 0 : i32
    return %arg0, %c0_i32, %c0_i32_0, %c0_i32_1 : i32, i32, i32, i32
  }
  func.func @transform_1(%arg0: i32) -> (i32, i32, i32, i32) {
    %c0_i32 = arith.constant 0 : i32
    %c0_i32_0 = arith.constant 0 : i32
    %c0_i32_1 = arith.constant 0 : i32
    %c0_i32_2 = arith.constant 0 : i32
    %c0_i32_3 = arith.constant 0 : i32
    return %c0_i32, %c0_i32_0, %c0_i32_1, %c0_i32_2 : i32, i32, i32, i32
  }
  func.func @transform_2(%arg0: i32) -> (i32, i32) {
    %c0_i32 = arith.constant 0 : i32
    %c0_i32_0 = arith.constant 0 : i32
    %c0_i32_1 = arith.constant 0 : i32
    return %c0_i32, %c0_i32_0 : i32, i32
  }
  func.func @transform_3(%arg0: i32) -> (i32, i32, i32, i32) {
    %c0_i32 = arith.constant 0 : i32
    %c0_i32_0 = arith.constant 0 : i32
    %c0_i32_1 = arith.constant 0 : i32
    %c0_i32_2 = arith.constant 0 : i32
    return %arg0, %c0_i32, %c0_i32_0, %c0_i32_1 : i32, i32, i32, i32
  }
}

</mosaic_0001>

<bundles_post_ra>
// kernel: fpn_forward.8
= control target key start
LH: loop header
LB: loop body
LE: loop exit
PB: predicated region body
PF: predicated region fallthrough
CT: control target
= control target key end

     0   :  { %s1737_s15 = smov 0   ;;  %s2180_s0 = inlined_call_operand.vmem [shape: bf16[32,1024], index: 0, kind: input, shape index: {}]   ;;  %s2181_s1 = inlined_call_operand.vmem [shape: bf16[1024,256], index: 1, kind: input, shape index: {}]   ;;  %s2182_s2 = inlined_call_operand.vmem [shape: f32[1,256], index: 2, kind: input, shape index: {}]   ;;  %s2183_s3 = inlined_call_operand.vmem [shape: bf16[32,256], index: 3, kind: input, shape index: {}]   ;;  %s2184_s4 = inlined_call_operand.vmem [shape: bf16[32,256], index: 4, kind: output, shape index: {}]  }
   0x1 LB: > { %s1329_s16 = sadd.s32 4294967295, %s1710_s15   ;;  %p1333_p0 = scmp.ge.s32.totalorder %s1710_s15, 1  ;;  %s1710_s15 = sphi %s1737_s15, %s14_s15  }
   0x2   : > { %p176_p1 = scmp.lt.s32.totalorder %s1710_s15, 3 }
   0x4   : > { %p177_p2 = pnand %p1333_p0, %p176_p1 }
   0x5   : > { %v1512_v0 = vld [vmem:[%s2181_s1 + $0x4] ss:$8 sps:$4 sm:$0xff] (!%p177_p2)   ;;  %v1516_v2 = vld [vmem:[%s2181_s1] ss:$8 sps:$4 sm:$0xff] (!%p177_p2)   ;;  %v1518_v4 = vld [vmem:[%s2181_s1 + $0x14] ss:$8 sps:$4 sm:$0xff] (!%p177_p2)  }
   0x6   : > { %180 = sbr.rel (%p177_p2) target bundleno = 360 (0x168), region = 36  ;;  %v1514_v1 = vld [vmem:[%s2181_s1 + $0x204] ss:$8 sps:$4 sm:$0xff] (!%p177_p2)   ;;  %1059 = vmatprep.subr.bf16.mxu1 (!%p177_p2), %v1512_v0  ;;  %v1517_v3 = vld [vmem:[%s2181_s1 + $0x200] ss:$8 sps:$4 sm:$0xff] (!%p177_p2)   ;;  %s1334_s29 = sshll.u32 (!%p177_p2), %s1329_s16, 1 }
   0x7   : > { %1145 = vmatprep.subr.bf16.mxu0 (!%p177_p2), %v1514_v1  ;;  %1060 = vmatpush1.bf16.msra.mxu1 (!%p177_p2), %v1516_v2  ;;  %v1520_v5 = vld [vmem:[%s2181_s1 + $0x214] ss:$8 sps:$4 sm:$0xff] (!%p177_p2)   ;;  %v1522_v6 = vld [vmem:[%s2181_s1 + $0x10] ss:$8 sps:$4 sm:$0xff] (!%p177_p2)   ;;  %v1524_v8 = vld [vmem:[%s2181_s1 + $0x24] ss:$8 sps:$4 sm:$0xff] (!%p177_p2)  }
   0x8   : > { %1146 = vmatpush1.bf16.msra.mxu0 (!%p177_p2), %v1517_v3  ;;  %1061 = vmatprep.subr.bf16.mxu1 (!%p177_p2), %v1518_v4  ;;  %v1523_v7 = vld [vmem:[%s2181_s1 + $0x210] ss:$8 sps:$4 sm:$0xff] (!%p177_p2)   ;;  %v1526_v9 = vld [vmem:[%s2181_s1 + $0x224] ss:$8 sps:$4 sm:$0xff] (!%p177_p2)   ;;  %v1528_v10 = vld [vmem:[%s2181_s1 + $0x20] ss:$8 sps:$4 sm:$0xff] (!%p177_p2)  }
   0x9   : > { %1147 = vmatprep.subr.bf16.mxu0 (!%p177_p2), %v1520_v5  ;;  %v1529_v11 = vld [vmem:[%s2181_s1 + $0x220] ss:$8 sps:$4 sm:$0xff] (!%p177_p2)   ;;  %v1530_v12 = vld [vmem:[%s2181_s1 + $0x34] ss:$8 sps:$4 sm:$0xff] (!%p177_p2)   ;;  %v1534_v14 = vld [vmem:[%s2181_s1 + $0x30] ss:$8 sps:$4 sm:$0xff] (!%p177_p2)  }
   0xa   : > { %v1532_v13 = vld [vmem:[%s2181_s1 + $0x234] ss:$8 sps:$4 sm:$0xff] (!%p177_p2)   ;;  %v1535_v15 = vld [vmem:[%s2181_s1 + $0x230] ss:$8 sps:$4 sm:$0xff] (!%p177_p2)   ;;  %v1536_v16 = vld [vmem:[%s2181_s1 + $0x44] ss:$8 sps:$4 sm:$0xff] (!%p177_p2)  }
   0xb   : > { %1062 = vmatpush1.bf16.msra.mxu1 (!%p177_p2), %v1522_v6  ;;  %v1538_v17 = vld [vmem:[%s2181_s1 + $0x244] ss:$8 sps:$4 sm:$0xff] (!%p177_p2)   ;;  %v1540_v18 = vld [vmem:[%s2181_s1 + $0x40] ss:$8 sps:$4 sm:$0xff] (!%p177_p2)   ;;  %v1542_v20 = vld [vmem:[%s2181_s1 + $0x54] ss:$8 sps:$4 sm:$0xff] (!%p177_p2)  }
   0xc   : > { %1148 = vmatpush1.bf16.msra.mxu0 (!%p177_p2), %v1523_v7  ;;  %1063 = vmatprep.subr.bf16.mxu1 (!%p177_p2), %v1524_v8  ;;  %v1541_v19 = vld [vmem:[%s2181_s1 + $0x240] ss:$8 sps:$4 sm:$0xff] (!%p177_p2)   ;;  %v1544_v21 = vld [vmem:[%s2181_s1 + $0x254] ss:$8 sps:$4 sm:$0xff] (!%p177_p2)   ;;  %v1546_v22 = vld [vmem:[%s2181_s1 + $0x50] ss:$8 sps:$4 sm:$0xff] (!%p177_p2)  }
   0xd   : > { %1149 = vmatprep.subr.bf16.mxu0 %v1526_v9  ;;  %v1547_v23 = vld [vmem:[%s2181_s1 + $0x250] ss:$8 sps:$4 sm:$0xff]   ;;  %v1548_v24 = vld [vmem:[%s2181_s1 + $0x64] ss:$8 sps:$4 sm:$0xff]   ;;  %v1552_v26 = vld [vmem:[%s2181_s1 + $0x60] ss:$8 sps:$4 sm:$0xff]  }
   0xe   : > { %v1550_v25 = vld [vmem:[%s2181_s1 + $0x264] ss:$8 sps:$4 sm:$0xff]   ;;  %v1553_v27 = vld [vmem:[%s2181_s1 + $0x260] ss:$8 sps:$4 sm:$0xff]   ;;  %v1554_v28 = vld [vmem:[%s2181_s1 + $0x74] ss:$8 sps:$4 sm:$0xff]  }
   0xf   : > { %1064 = vmatpush1.bf16.msra.mxu1 %v1528_v10  ;;  %v1556_v29 = vld [vmem:[%s2181_s1 + $0x274] ss:$8 sps:$4 sm:$0xff]   ;;  %v1558_v30 = vld [vmem:[%s2181_s1 + $0x70] ss:$8 sps:$4 sm:$0xff]   ;;  %v1560_v32 = vld [vmem:[%s2181_s1 + $0x84] ss:$8 sps:$4 sm:$0xff]  }
  0x10   : > { %1150 = vmatpush1.bf16.msra.mxu0 %v1529_v11  ;;  %1065 = vmatprep.subr.bf16.mxu1 %v1530_v12  ;;  %v1559_v31 = vld [vmem:[%s2181_s1 + $0x270] ss:$8 sps:$4 sm:$0xff]   ;;  %p211_p3 = scmp.lt.s32.totalorder %s1334_s29, 3  ;;  %v1562_v33 = vld [vmem:[%s2181_s1 + $0x284] ss:$8 sps:$4 sm:$0xff]  }
  0x11   : > { %1151 = vmatprep.subr.bf16.mxu0 %v1532_v13  ;;  %v1564_v34 = vld [vmem:[%s2181_s1 + $0x80] ss:$8 sps:$4 sm:$0xff]   ;;  %v1566_v36 = vld [vmem:[%s2181_s1 + $0x94] ss:$8 sps:$4 sm:$0xff]   ;;  %v1570_v38 = vld [vmem:[%s2181_s1 + $0x90] ss:$8 sps:$4 sm:$0xff]  }
  0x12   : > { %v1565_v35 = vld [vmem:[%s2181_s1 + $0x280] ss:$8 sps:$4 sm:$0xff]   ;;  %s2186_s29 = smov (!%p211_p3, %s1334_s29), 3  ;;  %v1568_v37 = vld [vmem:[%s2181_s1 + $0x294] ss:$8 sps:$4 sm:$0xff]  }
  0x13   : > { %1066 = vmatpush1.bf16.msra.mxu1 %v1534_v14  ;;  %v1571_v39 = vld [vmem:[%s2181_s1 + $0x290] ss:$8 sps:$4 sm:$0xff]   ;;  %v1572_v40 = vld [vmem:[%s2181_s1 + $0xa4] ss:$8 sps:$4 sm:$0xff]   ;;  %s1483_s27 = sshll.u32 %s2186_s29, 5 }
  0x14   : > { %1152 = vmatpush1.bf16.msra.mxu0 %v1535_v15  ;;  %1067 = vmatprep.subr.bf16.mxu1 %v1536_v16  ;;  %v1574_v41 = vld [vmem:[%s2181_s1 + $0x2a4] ss:$8 sps:$4 sm:$0xff]   ;;  %v1576_v42 = vld [vmem:[%s2181_s1 + $0xa0] ss:$8 sps:$4 sm:$0xff]   ;;  %s1885_s11 = scalar_lea.vmem %s2180_s0, %s1483_s27  ;;  %v1578_v44 = vld [vmem:[%s2181_s1 + $0xb4] ss:$8 sps:$4 sm:$0xff]  }
  0x15   : > { %1153 = vmatprep.subr.bf16.mxu0 %v1538_v17  ;;  %v1577_v43 = vld [vmem:[%s2181_s1 + $0x2a0] ss:$8 sps:$4 sm:$0xff]   ;;  %v1580_v45 = vld [vmem:[%s2181_s1 + $0x2b4] ss:$8 sps:$4 sm:$0xff]   ;;  %v1582_v46 = vld [vmem:[%s2181_s1 + $0xb0] ss:$8 sps:$4 sm:$0xff]  }
  0x16   : > { %v1583_v47 = vld [vmem:[%s2181_s1 + $0x2b0] ss:$8 sps:$4 sm:$0xff]   ;;  %v231_v48 = vld [vmem:[%s1885_s11] sm:$0xff]  ;;  %v1590_v58 = vld [vmem:[%s2181_s1 + $0xd4] ss:$8 sps:$4 sm:$0xff]  }
  0x17   : > { %1068 = vmatpush1.bf16.msra.mxu1 %v1540_v18  ;;  %v235_v49 = vld [vmem:[%s1885_s11 + $0x20] sm:$0xff]  ;;  %v233_v53 = vld [vmem:[%s1885_s11 + $0x10] sm:$0xff] }
  0x18   : > { %1154 = vmatpush1.bf16.msra.mxu0 %v1541_v19  ;;  %1069 = vmatprep.subr.bf16.mxu1 %v1542_v20  ;;  %v1584_v50 = vld [vmem:[%s2181_s1 + $0xc4] ss:$8 sps:$4 sm:$0xff]   ;;  %v1344_v52 = vcombine.high %v231_v48, %v235_v49  ;;  %v237_v54 = vld [vmem:[%s1885_s11 + $0x30] sm:$0xff]  ;;  %v1588_v56 = vld [vmem:[%s2181_s1 + $0xc0] ss:$8 sps:$4 sm:$0xff]   ;;  %v1343_v8 = vcombine.low %v231_v48, %v235_v49 }
  0x19   : > { %1155 = vmatprep.subr.bf16.mxu0 %v1544_v21  ;;  %v1586_v51 = vld [vmem:[%s2181_s1 + $0x2c4] ss:$8 sps:$4 sm:$0xff]   ;;  %v1348_v55 = vcombine.high %v233_v53, %v237_v54  ;;  %v1589_v57 = vld [vmem:[%s2181_s1 + $0x2c0] ss:$8 sps:$4 sm:$0xff]   ;;  %v1592_v59 = vld [vmem:[%s2181_s1 + $0x2d4] ss:$8 sps:$4 sm:$0xff]   ;;  %v1347_v10 = vcombine.low %v233_v53, %v237_v54 }
  0x1a   : > { %1091 = vmatprep.mubr.bf16.mxu1 %v1344_v52  ;;  %v1594_v60 = vld [vmem:[%s2181_s1 + $0xd0] ss:$8 sps:$4 sm:$0xff]   ;;  %v1596_v62 = vld [vmem:[%s2181_s1 + $0xe4] ss:$8 sps:$4 sm:$0xff]   ;;  %v1600_v0 = vld [vmem:[%s2181_s1 + $0xe0] ss:$8 sps:$4 sm:$0xff]  }
  0x1b   : > { %1070 = vmatpush1.bf16.msra.mxu1 %v1546_v22  ;;  %1177 = vmatprep.mubr.bf16.mxu0 %v1348_v55  ;;  %v1595_v61 = vld [vmem:[%s2181_s1 + $0x2d0] ss:$8 sps:$4 sm:$0xff]   ;;  %v1598_v63 = vld [vmem:[%s2181_s1 + $0x2e4] ss:$8 sps:$4 sm:$0xff]   ;;  %v1601_v1 = vld [vmem:[%s2181_s1 + $0x2e0] ss:$8 sps:$4 sm:$0xff]  }
  0x1c   : > { %1156 = vmatpush1.bf16.msra.mxu0 %v1547_v23  ;;  %1071 = vmatprep.subr.bf16.mxu1 %v1548_v24  ;;  %v1602_v2 = vld [vmem:[%s2181_s1 + $0xf4] ss:$8 sps:$4 sm:$0xff]   ;;  %v1606_v4 = vld [vmem:[%s2181_s1 + $0xf0] ss:$8 sps:$4 sm:$0xff]   ;;  %v1610_v6 = vld [vmem:[%s2181_s1 + $0x104] ss:$8 sps:$4 sm:$0xff]  }
  0x1d   : > { %1157 = vmatprep.subr.bf16.mxu0 %v1550_v25  ;;  %v1604_v3 = vld [vmem:[%s2181_s1 + $0x2f4] ss:$8 sps:$4 sm:$0xff]   ;;  %v1607_v5 = vld [vmem:[%s2181_s1 + $0x2f0] ss:$8 sps:$4 sm:$0xff]   ;;  %v1613_v7 = vld [vmem:[%s2181_s1 + $0x304] ss:$8 sps:$4 sm:$0xff]  }
  0x1e   : > { %v1608_v9 = vld [vmem:[%s2181_s1 + $0x100] ss:$8 sps:$4 sm:$0xff]   ;;  %v1616_v12 = vld [vmem:[%s2181_s1 + $0x114] ss:$8 sps:$4 sm:$0xff]   ;;  %v1614_v14 = vld [vmem:[%s2181_s1 + $0x110] ss:$8 sps:$4 sm:$0xff]  }
  0x1f   : > { %1072 = vmatpush1.bf16.msra.mxu1 %v1552_v26  ;;  %v1611_v11 = vld [vmem:[%s2181_s1 + $0x300] ss:$8 sps:$4 sm:$0xff]   ;;  %v1619_v13 = vld [vmem:[%s2181_s1 + $0x314] ss:$8 sps:$4 sm:$0xff]   ;;  %v1617_v15 = vld [vmem:[%s2181_s1 + $0x310] ss:$8 sps:$4 sm:$0xff]  }
  0x20   : > { %1158 = vmatpush1.bf16.msra.mxu0 %v1553_v27  ;;  %1073 = vmatprep.subr.bf16.mxu1 %v1554_v28  ;;  %v1622_v16 = vld [vmem:[%s2181_s1 + $0x124] ss:$8 sps:$4 sm:$0xff]   ;;  %v1620_v18 = vld [vmem:[%s2181_s1 + $0x120] ss:$8 sps:$4 sm:$0xff]   ;;  %v1628_v20 = vld [vmem:[%s2181_s1 + $0x134] ss:$8 sps:$4 sm:$0xff]  }
  0x21   : > { %1159 = vmatprep.subr.bf16.mxu0 %v1556_v29  ;;  %v1625_v17 = vld [vmem:[%s2181_s1 + $0x324] ss:$8 sps:$4 sm:$0xff]   ;;  %v1623_v19 = vld [vmem:[%s2181_s1 + $0x320] ss:$8 sps:$4 sm:$0xff]   ;;  %v1631_v21 = vld [vmem:[%s2181_s1 + $0x334] ss:$8 sps:$4 sm:$0xff]  }
  0x22   : > { %v1626_v22 = vld [vmem:[%s2181_s1 + $0x130] ss:$8 sps:$4 sm:$0xff]   ;;  %v1634_v24 = vld [vmem:[%s2181_s1 + $0x144] ss:$8 sps:$4 sm:$0xff]   ;;  %v1632_v26 = vld [vmem:[%s2181_s1 + $0x140] ss:$8 sps:$4 sm:$0xff]  }
  0x23   : > { %1074 = vmatpush1.bf16.msra.mxu1 %v1558_v30  ;;  %v1629_v23 = vld [vmem:[%s2181_s1 + $0x330] ss:$8 sps:$4 sm:$0xff]   ;;  %v1637_v25 = vld [vmem:[%s2181_s1 + $0x344] ss:$8 sps:$4 sm:$0xff]   ;;  %v1635_v27 = vld [vmem:[%s2181_s1 + $0x340] ss:$8 sps:$4 sm:$0xff]  }
  0x24   : > { %1160 = vmatpush1.bf16.msra.mxu0 %v1559_v31  ;;  %1075 = vmatprep.subr.bf16.mxu1 %v1560_v32  ;;  %v1640_v28 = vld [vmem:[%s2181_s1 + $0x154] ss:$8 sps:$4 sm:$0xff]   ;;  %v1638_v30 = vld [vmem:[%s2181_s1 + $0x150] ss:$8 sps:$4 sm:$0xff]   ;;  %v1646_v32 = vld [vmem:[%s2181_s1 + $0x164] ss:$8 sps:$4 sm:$0xff]  }
  0x25   : > { %1161 = vmatprep.subr.bf16.mxu0 %v1562_v33  ;;  %v1643_v29 = vld [vmem:[%s2181_s1 + $0x354] ss:$8 sps:$4 sm:$0xff]   ;;  %v1641_v31 = vld [vmem:[%s2181_s1 + $0x350] ss:$8 sps:$4 sm:$0xff]   ;;  %v1649_v33 = vld [vmem:[%s2181_s1 + $0x364] ss:$8 sps:$4 sm:$0xff]  }
  0x26   : > { %v1656_v48 = vld [vmem:[%s2181_s1 + $0x180] ss:$8 sps:$4 sm:$0xff]   ;;  %v1662_v52 = vld [vmem:[%s2181_s1 + $0x190] ss:$8 sps:$4 sm:$0xff]   ;;  %v1670_v54 = vld [vmem:[%s2181_s1 + $0x1a4] ss:$8 sps:$4 sm:$0xff]  }
  0x27   : > { %1076 = vmatpush1.bf16.msra.mxu1 %v1564_v34  ;;  %v2030_v34 = vld [vmem:[%s1885_s11 + $0x8] sm:$0xff]  ;;  %v1665_v53 = vld [vmem:[%s2181_s1 + $0x390] ss:$8 sps:$4 sm:$0xff]  }
  0x28   : > { %1162 = vmatpush1.bf16.msra.mxu0 %v1565_v35  ;;  %1077 = vmatprep.subr.bf16.mxu1 %v1566_v36  ;;  %v2033_v35 = vld [vmem:[%s1885_s11 + $0x28] sm:$0xff]  ;;  %v2036_v36 = vld [vmem:[%s1885_s11 + $0x18] sm:$0xff] }
  0x29   : > { %1163 = vmatprep.subr.bf16.mxu0 %v1568_v37  ;;  %v2039_v37 = vld [vmem:[%s1885_s11 + $0x38] sm:$0xff]  ;;  %v1659_v49 = vld [vmem:[%s2181_s1 + $0x380] ss:$8 sps:$4 sm:$0xff]   ;;  %v1673_v55 = vld [vmem:[%s2181_s1 + $0x3a4] ss:$8 sps:$4 sm:$0xff]   ;;  %s1484_s11 = sshll.u32 %s2186_s29, 3 }
  0x2a   : > { %s222_s21 = scalar_lea.vmem %s2183_s3, %s1484_s11  ;;  %s229_s24 = scalar_lea.vmem %s2184_s4, %s1484_s11 }
  0x2b   : > { %1078 = vmatpush1.bf16.msra.mxu1 %v1570_v38  ;;  %v1644_v38 = vld [vmem:[%s2181_s1 + $0x160] ss:$8 sps:$4 sm:$0xff]  }
  0x2c   : > { %1164 = vmatpush1.bf16.msra.mxu0 %v1571_v39  ;;  %1079 = vmatprep.subr.bf16.mxu1 %v1572_v40  ;;  %v1647_v39 = vld [vmem:[%s2181_s1 + $0x360] ss:$8 sps:$4 sm:$0xff]   ;;  %v1346_v40 = vcombine.high %v2030_v34, %v2033_v35 }
  0x2d   : > { %1165 = vmatprep.subr.bf16.mxu0 %v1574_v41  ;;  %v1652_v41 = vld [vmem:[%s2181_s1 + $0x174] ss:$8 sps:$4 sm:$0xff]  }
  0x2f   : > { %1080 = vmatpush1.bf16.msra.mxu1 %v1576_v42  ;;  %v1655_v42 = vld [vmem:[%s2181_s1 + $0x374] ss:$8 sps:$4 sm:$0xff]  }
  0x30   : > { %1166 = vmatpush1.bf16.msra.mxu0 %v1577_v43  ;;  %1081 = vmatprep.subr.bf16.mxu1 %v1578_v44  ;;  %v1350_v43 = vcombine.high %v2036_v36, %v2039_v37  ;;  %v1650_v44 = vld [vmem:[%s2181_s1 + $0x170] ss:$8 sps:$4 sm:$0xff]  }
  0x31   : > { %1167 = vmatprep.subr.bf16.mxu0 %v1580_v45  ;;  %v1653_v45 = vld [vmem:[%s2181_s1 + $0x370] ss:$8 sps:$4 sm:$0xff]  }
  0x33   : > { %1082 = vmatpush1.bf16.msra.mxu1 %v1582_v46  ;;  %v1658_v46 = vld [vmem:[%s2181_s1 + $0x184] ss:$8 sps:$4 sm:$0xff]  }
  0x34   : > { %1168 = vmatpush1.bf16.msra.mxu0 %v1583_v47  ;;  %1083 = vmatprep.subr.bf16.mxu1 %v1584_v50  ;;  %v1661_v47 = vld [vmem:[%s2181_s1 + $0x384] ss:$8 sps:$4 sm:$0xff]   ;;  %v1664_v50 = vld [vmem:[%s2181_s1 + $0x194] ss:$8 sps:$4 sm:$0xff]  }
  0x35   : > { %1169 = vmatprep.subr.bf16.mxu0 %v1586_v51  ;;  %v1667_v51 = vld [vmem:[%s2181_s1 + $0x394] ss:$8 sps:$4 sm:$0xff]  }
  0x37   : > { %1084 = vmatpush1.bf16.msra.mxu1 %v1588_v56  ;;  %v1668_v56 = vld [vmem:[%s2181_s1 + $0x1a0] ss:$8 sps:$4 sm:$0xff]  }
  0x38   : > { %1170 = vmatpush1.bf16.msra.mxu0 %v1589_v57  ;;  %1085 = vmatprep.subr.bf16.mxu1 %v1590_v58  ;;  %v1671_v57 = vld [vmem:[%s2181_s1 + $0x3a0] ss:$8 sps:$4 sm:$0xff]   ;;  %v1676_v58 = vld [vmem:[%s2181_s1 + $0x1b4] ss:$8 sps:$4 sm:$0xff]  }
  0x39   : > { %1171 = vmatprep.subr.bf16.mxu0 %v1592_v59  ;;  %v1679_v59 = vld [vmem:[%s2181_s1 + $0x3b4] ss:$8 sps:$4 sm:$0xff]  }
  0x3b   : > { %1086 = vmatpush1.bf16.msra.mxu1 %v1594_v60  ;;  %v1674_v60 = vld [vmem:[%s2181_s1 + $0x1b0] ss:$8 sps:$4 sm:$0xff]  }
  0x3c   : > { %1172 = vmatpush1.bf16.msra.mxu0 %v1595_v61  ;;  %1087 = vmatprep.subr.bf16.mxu1 %v1596_v62  ;;  %v1677_v61 = vld [vmem:[%s2181_s1 + $0x3b0] ss:$8 sps:$4 sm:$0xff]   ;;  %v1682_v62 = vld [vmem:[%s2181_s1 + $0x1c4] ss:$8 sps:$4 sm:$0xff]  }
  0x3d   : > { %1173 = vmatprep.subr.bf16.mxu0 %v1598_v63  ;;  %v1685_v63 = vld [vmem:[%s2181_s1 + $0x3c4] ss:$8 sps:$4 sm:$0xff]  }
  0x3f   : > { %1088 = vmatpush1.bf16.msra.mxu1 %v1600_v0  ;;  %v1680_v0 = vld [vmem:[%s2181_s1 + $0x1c0] ss:$8 sps:$4 sm:$0xff]  }
  0x40   : > { %1174 = vmatpush1.bf16.msra.mxu0 %v1601_v1  ;;  %1089 = vmatprep.subr.bf16.mxu1 %v1602_v2  ;;  %v1683_v1 = vld [vmem:[%s2181_s1 + $0x3c0] ss:$8 sps:$4 sm:$0xff]   ;;  %v1688_v2 = vld [vmem:[%s2181_s1 + $0x1d4] ss:$8 sps:$4 sm:$0xff]  }
  0x41   : > { %1175 = vmatprep.subr.bf16.mxu0 %v1604_v3  ;;  %v1691_v3 = vld [vmem:[%s2181_s1 + $0x3d4] ss:$8 sps:$4 sm:$0xff]  }
  0x43   : > { %1090 = vmatpush1.bf16.msra.mxu1 %v1606_v4  ;;  %v1686_v4 = vld [vmem:[%s2181_s1 + $0x1d0] ss:$8 sps:$4 sm:$0xff]  }
  0x44   : > { %1176 = vmatpush1.bf16.msra.mxu0 %v1607_v5  ;;  %1102 = vmatprep.subr.bf16.mxu1 %v1610_v6  ;;  %v1689_v5 = vld [vmem:[%s2181_s1 + $0x3d0] ss:$8 sps:$4 sm:$0xff]   ;;  %v1694_v6 = vld [vmem:[%s2181_s1 + $0x1e4] ss:$8 sps:$4 sm:$0xff]  }
  0x45   : > { %1188 = vmatprep.subr.bf16.mxu0 %v1613_v7  ;;  %v1697_v7 = vld [vmem:[%s2181_s1 + $0x3e4] ss:$8 sps:$4 sm:$0xff]  }
  0x46   : > { %1092 = vmatmul.mubr.bf16.vlgmr.msra.gmra.mrb[0].mxu1 %v1343_v8  ;;  %v1692_v8 = vld [vmem:[%s2181_s1 + $0x1e0] ss:$8 sps:$4 sm:$0xff]  }
  0x47   : > { %1178 = vmatmul.mubr.bf16.vlgmr.msra.gmra.mrb[0].mxu0 %v1347_v10  ;;  %1103 = vmatpush1.bf16.msra.mxu1 %v1608_v9  ;;  %v1695_v9 = vld [vmem:[%s2181_s1 + $0x3e0] ss:$8 sps:$4 sm:$0xff]   ;;  %v1700_v10 = vld [vmem:[%s2181_s1 + $0x1f4] ss:$8 sps:$4 sm:$0xff]  }
  0x48   : > { %1189 = vmatpush1.bf16.msra.mxu0 %v1611_v11  ;;  %1104 = vmatprep.subr.bf16.mxu1 %v1616_v12  ;;  %v1703_v11 = vld [vmem:[%s2181_s1 + $0x3f4] ss:$8 sps:$4 sm:$0xff]   ;;  %v1698_v12 = vld [vmem:[%s2181_s1 + $0x1f0] ss:$8 sps:$4 sm:$0xff]  }
  0x49   : > { %1190 = vmatprep.subr.bf16.mxu0 %v1619_v13  ;;  %1134 = vmatprep.mubr.bf16.mxu1 %v1346_v40  ;;  %v1701_v13 = vld [vmem:[%s2181_s1 + $0x3f0] ss:$8 sps:$4 sm:$0xff]  }
  0x4a   : > { %1220 = vmatprep.mubr.bf16.mxu0 %v1350_v43 }
  0x4b   : > { %1105 = vmatpush1.bf16.msra.mxu1 %v1614_v14  ;;  %v1345_v14 = vcombine.low %v2030_v34, %v2033_v35 }
  0x4c   : > { %1191 = vmatpush1.bf16.msra.mxu0 %v1617_v15  ;;  %1106 = vmatprep.subr.bf16.mxu1 %v1622_v16  ;;  %v1349_v15 = vcombine.low %v2036_v36, %v2039_v37  ;;  %v369_v16 = vlaneseq }
  0x4d   : > { %1192 = vmatprep.subr.bf16.mxu0 %v1625_v17 }
  0x4e   : > { %v370_v17 = vshrl.u32 %v369_v16, 7 }
  0x4f   : > { %1107 = vmatpush1.bf16.msra.mxu1 %v1620_v18 }
  0x50   : > { %1193 = vmatpush1.bf16.msra.mxu0 %v1623_v19  ;;  %1108 = vmatprep.subr.bf16.mxu1 %v1628_v20  ;;  %v371_v18 = vsub.s32 0, %v370_v17  ;;  %v367_v19 = vld [vmem:[%s2182_s2] sm:$0x3]  ;;  %v375_v20 = vsub.s32 1, %v370_v17 }
  0x51   : > { %1194 = vmatprep.subr.bf16.mxu0 %v1631_v21 }
  0x52   : > { %v372_v21 = vrot.slane %v367_v19, %v371_v18 }
  0x53   : > { %1109 = vmatpush1.bf16.msra.mxu1 %v1626_v22  ;;  %v376_v22 = vrot.slane %v367_v19, %v375_v20 }
  0x54   : > { %1195 = vmatpush1.bf16.msra.mxu0 %v1629_v23  ;;  %1110 = vmatprep.subr.bf16.mxu1 %v1634_v24 }
  0x55   : > { %1196 = vmatprep.subr.bf16.mxu0 %v1637_v25  ;;  %v1235_v25 = vld [vmem:[%s222_s21] sm:$0xff] }
  0x56   : > { %v1237_v34 = vunpack.c.l.bf16 %v1235_v25 }
  0x57   : > { %1111 = vmatpush1.bf16.msra.mxu1 %v1632_v26 }
  0x58   : > { %1197 = vmatpush1.bf16.msra.mxu0 %v1635_v27  ;;  %1112 = vmatprep.subr.bf16.mxu1 %v1640_v28 }
  0x59   : > { %1198 = vmatprep.subr.bf16.mxu0 %v1643_v29 }
  0x5b   : > { %1113 = vmatpush1.bf16.msra.mxu1 %v1638_v30 }
  0x5c   : > { %1199 = vmatpush1.bf16.msra.mxu0 %v1641_v31  ;;  %1114 = vmatprep.subr.bf16.mxu1 %v1646_v32  ;;  %v1236_v32 = vld [vmem:[%s222_s21 + $0x8] sm:$0xff] }
  0x5d   : > { %1200 = vmatprep.subr.bf16.mxu0 %v1649_v33  ;;  %v1239_v43 = vunpack.c.l.bf16 %v1236_v32 }
  0x5f   : > { %1115 = vmatpush1.bf16.msra.mxu1 %v1644_v38 }
  0x60   : > { %1201 = vmatpush1.bf16.msra.mxu0 %v1647_v39  ;;  %1116 = vmatprep.subr.bf16.mxu1 %v1652_v41  ;;  %v1238_v39 = vunpack.c.h.bf16 %v1235_v25 }
  0x61   : > { %1202 = vmatprep.subr.bf16.mxu0 %v1655_v42 }
  0x63   : > { %1117 = vmatpush1.bf16.msra.mxu1 %v1650_v44 }
  0x64   : > { %1203 = vmatpush1.bf16.msra.mxu0 %v1653_v45  ;;  %1118 = vmatprep.subr.bf16.mxu1 %v1658_v46  ;;  %v1240_v46 = vunpack.c.h.bf16 %v1236_v32 }
  0x65   : > { %1204 = vmatprep.subr.bf16.mxu0 %v1661_v47 }
  0x67   : > { %1119 = vmatpush1.bf16.msra.mxu1 %v1656_v48 }
  0x68   : > { %1205 = vmatpush1.bf16.msra.mxu0 %v1659_v49  ;;  %1120 = vmatprep.subr.bf16.mxu1 %v1664_v50 }
  0x69   : > { %1206 = vmatprep.subr.bf16.mxu0 %v1667_v51 }
  0x6b   : > { %1121 = vmatpush1.bf16.msra.mxu1 %v1662_v52 }
  0x6c   : > { %1207 = vmatpush1.bf16.msra.mxu0 %v1665_v53  ;;  %1122 = vmatprep.subr.bf16.mxu1 %v1670_v54 }
  0x6d   : > { %1208 = vmatprep.subr.bf16.mxu0 %v1673_v55 }
  0x6f   : > { %1123 = vmatpush1.bf16.msra.mxu1 %v1668_v56 }
  0x70   : > { %1209 = vmatpush1.bf16.msra.mxu0 %v1671_v57  ;;  %1124 = vmatprep.subr.bf16.mxu1 %v1676_v58 }
  0x71   : > { %1210 = vmatprep.subr.bf16.mxu0 %v1679_v59 }
  0x73   : > { %1125 = vmatpush1.bf16.msra.mxu1 %v1674_v60 }
  0x74   : > { %1211 = vmatpush1.bf16.msra.mxu0 %v1677_v61  ;;  %1126 = vmatprep.subr.bf16.mxu1 %v1682_v62 }
  0x75   : > { %1212 = vmatprep.subr.bf16.mxu0 %v1685_v63 }
  0x77   : > { %1127 = vmatpush1.bf16.msra.mxu1 %v1680_v0 }
  0x78   : > { %1213 = vmatpush1.bf16.msra.mxu0 %v1683_v1  ;;  %1128 = vmatprep.subr.bf16.mxu1 %v1688_v2 }
  0x79   : > { %1214 = vmatprep.subr.bf16.mxu0 %v1691_v3 }
  0x7b   : > { %1129 = vmatpush1.bf16.msra.mxu1 %v1686_v4 }
  0x7c   : > { %1215 = vmatpush1.bf16.msra.mxu0 %v1689_v5  ;;  %1130 = vmatprep.subr.bf16.mxu1 %v1694_v6 }
  0x7d   : > { %1216 = vmatprep.subr.bf16.mxu0 %v1697_v7 }
  0x7f   : > { %1131 = vmatpush1.bf16.msra.mxu1 %v1692_v8 }
  0x80   : > { %1217 = vmatpush1.bf16.msra.mxu0 %v1695_v9  ;;  %1132 = vmatprep.subr.bf16.mxu1 %v1700_v10 }
  0x81   : > { %1218 = vmatprep.subr.bf16.mxu0 %v1703_v11 }
  0x83   : > { %1133 = vmatpush1.bf16.msra.mxu1 %v1698_v12 }
  0x84   : > { %1219 = vmatpush1.bf16.msra.mxu0 %v1701_v13 }
  0x86   : > { %1135 = vmatmul.mubr.bf16.vlgmr.msra.gmra.mrb[0].mxu1 %v1345_v14 }
  0x87   : > { %1221 = vmatmul.mubr.bf16.vlgmr.msra.gmra.mrb[0].mxu0 %v1349_v15 }
 0x159   : > { %v1136_v23 = vpop.f32.mrb[0].mxu1 }
 0x15a   : > { %v1222_v24 = vpop.f32.mrb[0].mxu0  ;;  %v1488_v26 = vadd.f32 %v1136_v23, %v372_v21  ;;  %v1138_v27 = vpop.f32.mrb[1].mxu1 }
 0x15b   : > { %v1224_v28 = vpop.f32.mrb[1].mxu0  ;;  %v1490_v29 = vadd.f32 %v1138_v27, %v376_v22  ;;  %v1140_v30 = vpop.f32.mrb[2].mxu1 }
 0x15c   : > { %v1226_v31 = vpop.f32.mrb[2].mxu0  ;;  %v1489_v33 = vadd.f32 %v1488_v26, %v1222_v24  ;;  %v1492_v35 = vadd.f32 %v1140_v30, %v372_v21  ;;  %v1142_v36 = vpop.f32.mrb[3].mxu1 }
 0x15d   : > { %v1228_v37 = vpop.f32.mrb[3].mxu0  ;;  %v1491_v38 = vadd.f32 %v1490_v29, %v1224_v28  ;;  %v1494_v40 = vadd.f32 %v1142_v36, %v376_v22 }
 0x15e   : > { %v1231_v41 = vmax.f32 %v1489_v33, 0.0  ;;  %v1493_v42 = vadd.f32 %v1492_v35, %v1226_v31 }
 0x15f   : > { %v1232_v44 = vmax.f32 %v1491_v38, 0.0  ;;  %v1495_v45 = vadd.f32 %v1494_v40, %v1228_v37 }
 0x160   : > { %v1241_v47 = vadd.f32 %v1237_v34, %v1231_v41  ;;  %v1233_v48 = vmax.f32 %v1493_v42, 0.0 }
 0x161   : > { %v1242_v49 = vadd.f32 %v1238_v39, %v1232_v44  ;;  %v1234_v50 = vmax.f32 %v1495_v45, 0.0 }
 0x162   : > { %v1243_v51 = vadd.f32 %v1239_v43, %v1233_v48 }
 0x163   : > { %v1486_v52 = vpack.c.bf16 %v1242_v49, %v1241_v47  ;;  %v1244_v53 = vadd.f32 %v1240_v46, %v1234_v50 }
 0x165   : > { %1257 = vst [vmem:[%s229_s24] sm:$0xff] %v1486_v52  ;;  %v1487_v54 = vpack.c.bf16 %v1244_v53, %v1243_v51 }
 0x167   : > { %1258 = vst [vmem:[%s229_s24 + $0x8] sm:$0xff] %v1487_v54 }
 0x168 PF: > { %s14_s15 = sadd.s32 1, %s1710_s15  }
 0x169   : > { %p11_p4 = scmp.ge.s32.totalorder %s14_s15, 4  }
 0x16b   :  { %13 = sbr.rel (!%p11_p4) target bundleno = 1 (0x1), region = 69 }

// kernel: fpn_forward.7
= control target key start
LH: loop header
LB: loop body
LE: loop exit
PB: predicated region body
PF: predicated region fallthrough
CT: control target
= control target key end

     0   :  { %8 = vsyncpa [#allocation3], 0  ;;  %s2862_s0 = inlined_call_operand.vmem [shape: bf16[8,2048], index: 0, kind: input, shape index: {}]   ;;  %s2863_s1 = inlined_call_operand.hbm [shape: bf16[2048,256], index: 1, kind: input, shape index: {}]   ;;  %s2864_s2 = inlined_call_operand.hbm [shape: f32[1,256], index: 2, kind: input, shape index: {}]   ;;  %s2865_s3 = inlined_call_operand.vmem [shape: bf16[8,256], index: 3, kind: output, shape index: {}]  }
   0x1   :  { %9 = vsyncpa [#allocation5], 0  ;;  %s2751_s12 = smov [#allocation2]   ;;  %s2703_s16 = scalar_lea.hbm %s2863_s1, 32768 }
   0x2   :  { %s17_s13 = sshll.u32 %s2751_s12, 4  ;;  %p2704_p0 = scmp.ne.s32.totalorder %s2863_s1, %s2703_s16  ;;  %s18_s13 = int_to_ptr.vmem [resolvable:$true] %s17_s13 }
   0x3   :  { %p2707_p1 = scmp.lt.u32.totalorder %s2703_s16, %s2863_s1 }
   0x5   :  { %p2709_p2 = pnand %p2707_p1, %p2704_p0 }
   0x7   :  { %2712 = shalt.err (!%p2709_p2)
}
   0x8   :  { %s2713_s21 = scalar_lea.vmem %s18_s13, 32768  ;;  %p2718_p4 = scmp.lt.s32.totalorder %s18_s13, %s18_s13 }
   0x9   :  { %p2714_p3 = scmp.ne.s32.totalorder %s18_s13, %s2713_s21  ;;  %p2719_p5 = scmp.lt.s32.totalorder %s2713_s21, %s2713_s21 }
   0xb   :  { %p2720_p6 = por %p2719_p5, %p2718_p4 }
   0xd   :  { %p2721_p7 = pnand %p2720_p6, %p2714_p3 }
   0xf   :  { %2724 = shalt.err (!%p2721_p7)
}
  0x10   :  { %s2752_s22 = smov 128   ;;  %s2753_s23 = smov 8  }
  0x11   :  { %23 = dma.hbm_to_vmem [thread:$0]  %s2863_s1, 32768, %s18_s13, [#allocation3], %s2752_s22, %s2752_s22, %s2753_s23  }
  0x12   :  { %s2754_s26 = smov [#allocation4]   ;;  %s2725_s30 = scalar_lea.hbm %s2864_s2, 32 }
  0x13   :  { %s30_s27 = sshll.u32 %s2754_s26, 4  ;;  %p2726_p8 = scmp.ne.s32.totalorder %s2864_s2, %s2725_s30  ;;  %s31_s27 = int_to_ptr.vmem [resolvable:$true] %s30_s27 }
  0x14   :  { %p2729_p9 = scmp.lt.u32.totalorder %s2725_s30, %s2864_s2 }
  0x16   :  { %p2731_p10 = pnand %p2729_p9, %p2726_p8 }
  0x18   :  { %2734 = shalt.err (!%p2731_p10)
}
  0x19   :  { %s2735_s8 = scalar_lea.vmem %s31_s27, 32  ;;  %p2740_p12 = scmp.lt.s32.totalorder %s31_s27, %s31_s27 }
  0x1a   :  { %p2736_p11 = scmp.ne.s32.totalorder %s31_s27, %s2735_s8  ;;  %p2741_p13 = scmp.lt.s32.totalorder %s2735_s8, %s2735_s8 }
  0x1c   :  { %p2742_p0 = por %p2741_p13, %p2740_p12 }
  0x1e   :  { %p2743_p1 = pnand %p2742_p0, %p2736_p11 }
  0x20   :  { %2746 = shalt.err (!%p2743_p1)
}
  0x21   :  { %33 = dma.hbm_to_vmem [thread:$0]  %s2864_s2, 32, %s31_s27, [#allocation5]  }
  0x22   :  { %2747 = dma.done.wait [#allocation3], 32768  }
  0x23   :  { %2748 = vsyncadd [#allocation3], 4294934528 }
  0x24   :  { %2749 = dma.done.wait [#allocation5], 32  }
  0x25   :  { %2750 = vsyncadd [#allocation5], 4294967264  ;;  %v2303_v0 = vld [vmem:[#allocation2 + $0x4] ss:$8 sps:$4 sm:$0xff]   ;;  %v2307_v2 = vld [vmem:[#allocation2] ss:$8 sps:$4 sm:$0xff]  }
  0x26   :  { %v2305_v1 = vld [vmem:[#allocation2 + $0x404] ss:$8 sps:$4 sm:$0xff]   ;;  %1652 = vmatprep.subr.bf16.mxu1 %v2303_v0  ;;  %v2308_v3 = vld [vmem:[#allocation2 + $0x400] ss:$8 sps:$4 sm:$0xff]   ;;  %v2309_v4 = vld [vmem:[#allocation2 + $0x14] ss:$8 sps:$4 sm:$0xff]  }
  0x27   :  { %1816 = vmatprep.subr.bf16.mxu0 %v2305_v1  ;;  %1653 = vmatpush1.bf16.msra.mxu1 %v2307_v2  ;;  %v2311_v5 = vld [vmem:[#allocation2 + $0x414] ss:$8 sps:$4 sm:$0xff]   ;;  %v2313_v6 = vld [vmem:[#allocation2 + $0x10] ss:$8 sps:$4 sm:$0xff]   ;;  %v2315_v8 = vld [vmem:[#allocation2 + $0x24] ss:$8 sps:$4 sm:$0xff]  }
  0x28   :  { %1817 = vmatpush1.bf16.msra.mxu0 %v2308_v3  ;;  %1654 = vmatprep.subr.bf16.mxu1 %v2309_v4  ;;  %v2314_v7 = vld [vmem:[#allocation2 + $0x410] ss:$8 sps:$4 sm:$0xff]   ;;  %v2317_v9 = vld [vmem:[#allocation2 + $0x424] ss:$8 sps:$4 sm:$0xff]   ;;  %v2319_v10 = vld [vmem:[#allocation2 + $0x20] ss:$8 sps:$4 sm:$0xff]  }
  0x29   :  { %1818 = vmatprep.subr.bf16.mxu0 %v2311_v5  ;;  %v2320_v11 = vld [vmem:[#allocation2 + $0x420] ss:$8 sps:$4 sm:$0xff]   ;;  %v2321_v12 = vld [vmem:[#allocation2 + $0x34] ss:$8 sps:$4 sm:$0xff]   ;;  %v2325_v14 = vld [vmem:[#allocation2 + $0x30] ss:$8 sps:$4 sm:$0xff]  }
  0x2a   :  { %v2323_v13 = vld [vmem:[#allocation2 + $0x434] ss:$8 sps:$4 sm:$0xff]   ;;  %v2326_v15 = vld [vmem:[#allocation2 + $0x430] ss:$8 sps:$4 sm:$0xff]   ;;  %v2327_v16 = vld [vmem:[#allocation2 + $0x44] ss:$8 sps:$4 sm:$0xff]  }
  0x2b   :  { %1655 = vmatpush1.bf16.msra.mxu1 %v2313_v6  ;;  %v2329_v17 = vld [vmem:[#allocation2 + $0x444] ss:$8 sps:$4 sm:$0xff]   ;;  %v2331_v18 = vld [vmem:[#allocation2 + $0x40] ss:$8 sps:$4 sm:$0xff]   ;;  %v2333_v20 = vld [vmem:[#allocation2 + $0x54] ss:$8 sps:$4 sm:$0xff]  }
  0x2c   :  { %1819 = vmatpush1.bf16.msra.mxu0 %v2314_v7  ;;  %1656 = vmatprep.subr.bf16.mxu1 %v2315_v8  ;;  %v2332_v19 = vld [vmem:[#allocation2 + $0x440] ss:$8 sps:$4 sm:$0xff]   ;;  %v2335_v21 = vld [vmem:[#allocation2 + $0x454] ss:$8 sps:$4 sm:$0xff]   ;;  %v2337_v22 = vld [vmem:[#allocation2 + $0x50] ss:$8 sps:$4 sm:$0xff]  }
  0x2d   :  { %1820 = vmatprep.subr.bf16.mxu0 %v2317_v9  ;;  %v2338_v23 = vld [vmem:[#allocation2 + $0x450] ss:$8 sps:$4 sm:$0xff]   ;;  %v2339_v24 = vld [vmem:[#allocation2 + $0x64] ss:$8 sps:$4 sm:$0xff]   ;;  %v2343_v26 = vld [vmem:[#allocation2 + $0x60] ss:$8 sps:$4 sm:$0xff]  }
  0x2e   :  { %v2341_v25 = vld [vmem:[#allocation2 + $0x464] ss:$8 sps:$4 sm:$0xff]   ;;  %v2344_v27 = vld [vmem:[#allocation2 + $0x460] ss:$8 sps:$4 sm:$0xff]   ;;  %v2345_v28 = vld [vmem:[#allocation2 + $0x74] ss:$8 sps:$4 sm:$0xff]  }
  0x2f   :  { %1657 = vmatpush1.bf16.msra.mxu1 %v2319_v10  ;;  %v2347_v29 = vld [vmem:[#allocation2 + $0x474] ss:$8 sps:$4 sm:$0xff]   ;;  %v2349_v30 = vld [vmem:[#allocation2 + $0x70] ss:$8 sps:$4 sm:$0xff]   ;;  %v2351_v32 = vld [vmem:[#allocation2 + $0x84] ss:$8 sps:$4 sm:$0xff]  }
  0x30   :  { %1821 = vmatpush1.bf16.msra.mxu0 %v2320_v11  ;;  %1658 = vmatprep.subr.bf16.mxu1 %v2321_v12  ;;  %v2350_v31 = vld [vmem:[#allocation2 + $0x470] ss:$8 sps:$4 sm:$0xff]   ;;  %v2353_v33 = vld [vmem:[#allocation2 + $0x484] ss:$8 sps:$4 sm:$0xff]   ;;  %v2355_v34 = vld [vmem:[#allocation2 + $0x80] ss:$8 sps:$4 sm:$0xff]  }
  0x31   :  { %1822 = vmatprep.subr.bf16.mxu0 %v2323_v13  ;;  %v2356_v35 = vld [vmem:[#allocation2 + $0x480] ss:$8 sps:$4 sm:$0xff]   ;;  %v2357_v36 = vld [vmem:[#allocation2 + $0x94] ss:$8 sps:$4 sm:$0xff]   ;;  %v2361_v38 = vld [vmem:[#allocation2 + $0x90] ss:$8 sps:$4 sm:$0xff]  }
  0x32   :  { %v2359_v37 = vld [vmem:[#allocation2 + $0x494] ss:$8 sps:$4 sm:$0xff]   ;;  %v2362_v39 = vld [vmem:[#allocation2 + $0x490] ss:$8 sps:$4 sm:$0xff]   ;;  %v2363_v40 = vld [vmem:[#allocation2 + $0xa4] ss:$8 sps:$4 sm:$0xff]  }
  0x33   :  { %1659 = vmatpush1.bf16.msra.mxu1 %v2325_v14  ;;  %v2365_v41 = vld [vmem:[#allocation2 + $0x4a4] ss:$8 sps:$4 sm:$0xff]   ;;  %v2367_v42 = vld [vmem:[#allocation2 + $0xa0] ss:$8 sps:$4 sm:$0xff]   ;;  %v2369_v44 = vld [vmem:[#allocation2 + $0xb4] ss:$8 sps:$4 sm:$0xff]  }
  0x34   :  { %1823 = vmatpush1.bf16.msra.mxu0 %v2326_v15  ;;  %1660 = vmatprep.subr.bf16.mxu1 %v2327_v16  ;;  %v2368_v43 = vld [vmem:[#allocation2 + $0x4a0] ss:$8 sps:$4 sm:$0xff]   ;;  %v2371_v45 = vld [vmem:[#allocation2 + $0x4b4] ss:$8 sps:$4 sm:$0xff]   ;;  %v2373_v47 = vld [vmem:[#allocation2 + $0xb0] ss:$8 sps:$4 sm:$0xff]  }
  0x35   :  { %1824 = vmatprep.subr.bf16.mxu0 %v2329_v17  ;;  %v40_v46 = vld [vmem:[%s2862_s0] sm:$0xff]  ;;  %v2374_v49 = vld [vmem:[#allocation2 + $0x4b0] ss:$8 sps:$4 sm:$0xff]   ;;  %v2381_v56 = vld [vmem:[#allocation2 + $0xd4] ss:$8 sps:$4 sm:$0xff]  }
  0x36   :  { %v1998_v48 = vcombine.high %v40_v46, %v40_v46  ;;  %v44_v50 = vld [vmem:[%s2862_s0 + $0x20] sm:$0xff]  ;;  %v2383_v57 = vld [vmem:[#allocation2 + $0x4d4] ss:$8 sps:$4 sm:$0xff]   ;;  %v2385_v58 = vld [vmem:[#allocation2 + $0xd0] ss:$8 sps:$4 sm:$0xff]   ;;  %v1997_v6 = vcombine.low %v40_v46, %v40_v46 }
  0x37   :  { %1661 = vmatpush1.bf16.msra.mxu1 %v2331_v18  ;;  %v2375_v51 = vld [vmem:[#allocation2 + $0xc4] ss:$8 sps:$4 sm:$0xff]   ;;  %v2006_v53 = vcombine.high %v44_v50, %v44_v50  ;;  %v2379_v54 = vld [vmem:[#allocation2 + $0xc0] ss:$8 sps:$4 sm:$0xff]   ;;  %v2386_v59 = vld [vmem:[#allocation2 + $0x4d0] ss:$8 sps:$4 sm:$0xff]   ;;  %v2005_v7 = vcombine.low %v44_v50, %v44_v50 }
  0x38   :  { %1825 = vmatpush1.bf16.msra.mxu0 %v2332_v19  ;;  %1662 = vmatprep.subr.bf16.mxu1 %v2333_v20  ;;  %v2377_v52 = vld [vmem:[#allocation2 + $0x4c4] ss:$8 sps:$4 sm:$0xff]   ;;  %v2380_v55 = vld [vmem:[#allocation2 + $0x4c0] ss:$8 sps:$4 sm:$0xff]   ;;  %v2393_v0 = vld [vmem:[#allocation2 + $0xf4] ss:$8 sps:$4 sm:$0xff]  }
  0x39   :  { %1826 = vmatprep.subr.bf16.mxu0 %v2335_v21  ;;  %1684 = vmatprep.mubr.bf16.mxu1 %v1998_v48  ;;  %v2387_v60 = vld [vmem:[#allocation2 + $0xe4] ss:$8 sps:$4 sm:$0xff]   ;;  %v2391_v62 = vld [vmem:[#allocation2 + $0xe0] ss:$8 sps:$4 sm:$0xff]   ;;  %v2395_v1 = vld [vmem:[#allocation2 + $0x4f4] ss:$8 sps:$4 sm:$0xff]  }
  0x3a   :  { %1848 = vmatprep.mubr.bf16.mxu0 %v2006_v53  ;;  %v2389_v61 = vld [vmem:[#allocation2 + $0x4e4] ss:$8 sps:$4 sm:$0xff]   ;;  %v2392_v63 = vld [vmem:[#allocation2 + $0x4e0] ss:$8 sps:$4 sm:$0xff]   ;;  %v2397_v2 = vld [vmem:[#allocation2 + $0xf0] ss:$8 sps:$4 sm:$0xff]  }
  0x3b   :  { %1663 = vmatpush1.bf16.msra.mxu1 %v2337_v22  ;;  %v2398_v3 = vld [vmem:[#allocation2 + $0x4f0] ss:$8 sps:$4 sm:$0xff]   ;;  %v2403_v4 = vld [vmem:[#allocation2 + $0x104] ss:$8 sps:$4 sm:$0xff]   ;;  %v2401_v8 = vld [vmem:[#allocation2 + $0x100] ss:$8 sps:$4 sm:$0xff]  }
  0x3c   :  { %1827 = vmatpush1.bf16.msra.mxu0 %v2338_v23  ;;  %1664 = vmatprep.subr.bf16.mxu1 %v2339_v24  ;;  %v2408_v5 = vld [vmem:[#allocation2 + $0x504] ss:$8 sps:$4 sm:$0xff]   ;;  %v2406_v9 = vld [vmem:[#allocation2 + $0x500] ss:$8 sps:$4 sm:$0xff]   ;;  %v2411_v10 = vld [vmem:[#allocation2 + $0x114] ss:$8 sps:$4 sm:$0xff]  }
  0x3d   :  { %1828 = vmatprep.subr.bf16.mxu0 %v2341_v25  ;;  %v2414_v11 = vld [vmem:[#allocation2 + $0x514] ss:$8 sps:$4 sm:$0xff]   ;;  %v2409_v12 = vld [vmem:[#allocation2 + $0x110] ss:$8 sps:$4 sm:$0xff]   ;;  %v2417_v14 = vld [vmem:[#allocation2 + $0x124] ss:$8 sps:$4 sm:$0xff]  }
  0x3e   :  { %v2412_v13 = vld [vmem:[#allocation2 + $0x510] ss:$8 sps:$4 sm:$0xff]   ;;  %v2420_v15 = vld [vmem:[#allocation2 + $0x524] ss:$8 sps:$4 sm:$0xff]   ;;  %v2415_v16 = vld [vmem:[#allocation2 + $0x120] ss:$8 sps:$4 sm:$0xff]  }
  0x3f   :  { %1665 = vmatpush1.bf16.msra.mxu1 %v2343_v26  ;;  %v2418_v17 = vld [vmem:[#allocation2 + $0x520] ss:$8 sps:$4 sm:$0xff]   ;;  %v2423_v18 = vld [vmem:[#allocation2 + $0x134] ss:$8 sps:$4 sm:$0xff]   ;;  %v2421_v20 = vld [vmem:[#allocation2 + $0x130] ss:$8 sps:$4 sm:$0xff]  }
  0x40   :  { %1829 = vmatpush1.bf16.msra.mxu0 %v2344_v27  ;;  %1666 = vmatprep.subr.bf16.mxu1 %v2345_v28  ;;  %v2426_v19 = vld [vmem:[#allocation2 + $0x534] ss:$8 sps:$4 sm:$0xff]   ;;  %v2424_v21 = vld [vmem:[#allocation2 + $0x530] ss:$8 sps:$4 sm:$0xff]   ;;  %v2429_v22 = vld [vmem:[#allocation2 + $0x144] ss:$8 sps:$4 sm:$0xff]  }
  0x41   :  { %1830 = vmatprep.subr.bf16.mxu0 %v2347_v29  ;;  %v2432_v23 = vld [vmem:[#allocation2 + $0x544] ss:$8 sps:$4 sm:$0xff]   ;;  %v2427_v24 = vld [vmem:[#allocation2 + $0x140] ss:$8 sps:$4 sm:$0xff]   ;;  %v2435_v26 = vld [vmem:[#allocation2 + $0x154] ss:$8 sps:$4 sm:$0xff]  }
  0x42   :  { %v2430_v25 = vld [vmem:[#allocation2 + $0x540] ss:$8 sps:$4 sm:$0xff]   ;;  %v2438_v27 = vld [vmem:[#allocation2 + $0x554] ss:$8 sps:$4 sm:$0xff]   ;;  %v2433_v28 = vld [vmem:[#allocation2 + $0x150] ss:$8 sps:$4 sm:$0xff]  }
  0x43   :  { %1667 = vmatpush1.bf16.msra.mxu1 %v2349_v30  ;;  %v2436_v29 = vld [vmem:[#allocation2 + $0x550] ss:$8 sps:$4 sm:$0xff]   ;;  %v2441_v30 = vld [vmem:[#allocation2 + $0x164] ss:$8 sps:$4 sm:$0xff]   ;;  %v2459_v46 = vld [vmem:[#allocation2 + $0x194] ss:$8 sps:$4 sm:$0xff]  }
  0x44   :  { %1831 = vmatpush1.bf16.msra.mxu0 %v2350_v31  ;;  %1668 = vmatprep.subr.bf16.mxu1 %v2351_v32  ;;  %v2444_v31 = vld [vmem:[#allocation2 + $0x564] ss:$8 sps:$4 sm:$0xff]   ;;  %v2457_v48 = vld [vmem:[#allocation2 + $0x190] ss:$8 sps:$4 sm:$0xff]   ;;  %v2466_v53 = vld [vmem:[#allocation2 + $0x5a0] ss:$8 sps:$4 sm:$0xff]  }
  0x45   :  { %1832 = vmatprep.subr.bf16.mxu0 %v2353_v33  ;;  %v2808_v32 = vld [vmem:[%s2862_s0 + $0x8] sm:$0xff] }
  0x46   :  { %v2439_v33 = vld [vmem:[#allocation2 + $0x160] ss:$8 sps:$4 sm:$0xff]   ;;  %v2465_v50 = vld [vmem:[#allocation2 + $0x1a4] ss:$8 sps:$4 sm:$0xff]  }
  0x47   :  { %1669 = vmatpush1.bf16.msra.mxu1 %v2355_v34  ;;  %v2442_v34 = vld [vmem:[#allocation2 + $0x560] ss:$8 sps:$4 sm:$0xff]  }
  0x48   :  { %1833 = vmatpush1.bf16.msra.mxu0 %v2356_v35  ;;  %1670 = vmatprep.subr.bf16.mxu1 %v2357_v36  ;;  %v2000_v35 = vcombine.high %v2808_v32, %v2808_v32  ;;  %v2815_v36 = vld [vmem:[%s2862_s0 + $0x28] sm:$0xff] }
  0x49   :  { %1834 = vmatprep.subr.bf16.mxu0 %v2359_v37  ;;  %v2447_v37 = vld [vmem:[#allocation2 + $0x174] ss:$8 sps:$4 sm:$0xff]  }
  0x4b   :  { %1671 = vmatpush1.bf16.msra.mxu1 %v2361_v38  ;;  %v2008_v38 = vcombine.high %v2815_v36, %v2815_v36 }
  0x4c   :  { %1835 = vmatpush1.bf16.msra.mxu0 %v2362_v39  ;;  %1672 = vmatprep.subr.bf16.mxu1 %v2363_v40  ;;  %v2450_v39 = vld [vmem:[#allocation2 + $0x574] ss:$8 sps:$4 sm:$0xff]   ;;  %v2445_v40 = vld [vmem:[#allocation2 + $0x170] ss:$8 sps:$4 sm:$0xff]  }
  0x4d   :  { %1836 = vmatprep.subr.bf16.mxu0 %v2365_v41  ;;  %v2448_v41 = vld [vmem:[#allocation2 + $0x570] ss:$8 sps:$4 sm:$0xff]  }
  0x4f   :  { %1673 = vmatpush1.bf16.msra.mxu1 %v2367_v42  ;;  %v2453_v42 = vld [vmem:[#allocation2 + $0x184] ss:$8 sps:$4 sm:$0xff]  }
  0x50   :  { %1837 = vmatpush1.bf16.msra.mxu0 %v2368_v43  ;;  %1674 = vmatprep.subr.bf16.mxu1 %v2369_v44  ;;  %v2456_v43 = vld [vmem:[#allocation2 + $0x584] ss:$8 sps:$4 sm:$0xff]   ;;  %v2451_v44 = vld [vmem:[#allocation2 + $0x180] ss:$8 sps:$4 sm:$0xff]  }
  0x51   :  { %1838 = vmatprep.subr.bf16.mxu0 %v2371_v45  ;;  %v2454_v45 = vld [vmem:[#allocation2 + $0x580] ss:$8 sps:$4 sm:$0xff]  }
  0x53   :  { %1675 = vmatpush1.bf16.msra.mxu1 %v2373_v47  ;;  %v2462_v47 = vld [vmem:[#allocation2 + $0x594] ss:$8 sps:$4 sm:$0xff]  }
  0x54   :  { %1839 = vmatpush1.bf16.msra.mxu0 %v2374_v49  ;;  %1676 = vmatprep.subr.bf16.mxu1 %v2375_v51  ;;  %v2460_v49 = vld [vmem:[#allocation2 + $0x590] ss:$8 sps:$4 sm:$0xff]   ;;  %v2468_v51 = vld [vmem:[#allocation2 + $0x5a4] ss:$8 sps:$4 sm:$0xff]  }
  0x55   :  { %1840 = vmatprep.subr.bf16.mxu0 %v2377_v52  ;;  %v2463_v52 = vld [vmem:[#allocation2 + $0x1a0] ss:$8 sps:$4 sm:$0xff]  }
  0x57   :  { %1677 = vmatpush1.bf16.msra.mxu1 %v2379_v54  ;;  %v2471_v54 = vld [vmem:[#allocation2 + $0x1b4] ss:$8 sps:$4 sm:$0xff]  }
  0x58   :  { %1841 = vmatpush1.bf16.msra.mxu0 %v2380_v55  ;;  %1678 = vmatprep.subr.bf16.mxu1 %v2381_v56  ;;  %v2474_v55 = vld [vmem:[#allocation2 + $0x5b4] ss:$8 sps:$4 sm:$0xff]   ;;  %v2469_v56 = vld [vmem:[#allocation2 + $0x1b0] ss:$8 sps:$4 sm:$0xff]  }
  0x59   :  { %1842 = vmatprep.subr.bf16.mxu0 %v2383_v57  ;;  %v2472_v57 = vld [vmem:[#allocation2 + $0x5b0] ss:$8 sps:$4 sm:$0xff]  }
  0x5b   :  { %1679 = vmatpush1.bf16.msra.mxu1 %v2385_v58  ;;  %v2477_v58 = vld [vmem:[#allocation2 + $0x1c4] ss:$8 sps:$4 sm:$0xff]  }
  0x5c   :  { %1843 = vmatpush1.bf16.msra.mxu0 %v2386_v59  ;;  %1680 = vmatprep.subr.bf16.mxu1 %v2387_v60  ;;  %v2480_v59 = vld [vmem:[#allocation2 + $0x5c4] ss:$8 sps:$4 sm:$0xff]   ;;  %v2475_v60 = vld [vmem:[#allocation2 + $0x1c0] ss:$8 sps:$4 sm:$0xff]  }
  0x5d   :  { %1844 = vmatprep.subr.bf16.mxu0 %v2389_v61  ;;  %v2478_v61 = vld [vmem:[#allocation2 + $0x5c0] ss:$8 sps:$4 sm:$0xff]  }
  0x5f   :  { %1681 = vmatpush1.bf16.msra.mxu1 %v2391_v62  ;;  %v2483_v62 = vld [vmem:[#allocation2 + $0x1d4] ss:$8 sps:$4 sm:$0xff]  }
  0x60   :  { %1845 = vmatpush1.bf16.msra.mxu0 %v2392_v63  ;;  %1682 = vmatprep.subr.bf16.mxu1 %v2393_v0  ;;  %v2486_v63 = vld [vmem:[#allocation2 + $0x5d4] ss:$8 sps:$4 sm:$0xff]   ;;  %v2481_v0 = vld [vmem:[#allocation2 + $0x1d0] ss:$8 sps:$4 sm:$0xff]  }
  0x61   :  { %1846 = vmatprep.subr.bf16.mxu0 %v2395_v1  ;;  %v2484_v1 = vld [vmem:[#allocation2 + $0x5d0] ss:$8 sps:$4 sm:$0xff]  }
  0x63   :  { %1683 = vmatpush1.bf16.msra.mxu1 %v2397_v2  ;;  %v2489_v2 = vld [vmem:[#allocation2 + $0x1e4] ss:$8 sps:$4 sm:$0xff]  }
  0x64   :  { %1847 = vmatpush1.bf16.msra.mxu0 %v2398_v3  ;;  %1693 = vmatprep.subr.bf16.mxu1 %v2403_v4  ;;  %v2492_v3 = vld [vmem:[#allocation2 + $0x5e4] ss:$8 sps:$4 sm:$0xff]   ;;  %v2487_v4 = vld [vmem:[#allocation2 + $0x1e0] ss:$8 sps:$4 sm:$0xff]  }
  0x65   :  { %1857 = vmatprep.subr.bf16.mxu0 %v2408_v5  ;;  %v2490_v5 = vld [vmem:[#allocation2 + $0x5e0] ss:$8 sps:$4 sm:$0xff]  }
  0x66   :  { %1685 = vmatmul.mubr.bf16.vlgmr.msra.gmra.mrb[0].mxu1 %v1997_v6  ;;  %v2495_v6 = vld [vmem:[#allocation2 + $0x1f4] ss:$8 sps:$4 sm:$0xff]  }
  0x67   :  { %1849 = vmatmul.mubr.bf16.vlgmr.msra.gmra.mrb[0].mxu0 %v2005_v7  ;;  %1694 = vmatpush1.bf16.msra.mxu1 %v2401_v8  ;;  %v2498_v7 = vld [vmem:[#allocation2 + $0x5f4] ss:$8 sps:$4 sm:$0xff]   ;;  %v2493_v8 = vld [vmem:[#allocation2 + $0x1f0] ss:$8 sps:$4 sm:$0xff]  }
  0x68   :  { %1858 = vmatpush1.bf16.msra.mxu0 %v2406_v9  ;;  %1695 = vmatprep.subr.bf16.mxu1 %v2411_v10  ;;  %v2496_v9 = vld [vmem:[#allocation2 + $0x5f0] ss:$8 sps:$4 sm:$0xff]   ;;  %v2503_v10 = vld [vmem:[#allocation2 + $0x204] ss:$8 sps:$4 sm:$0xff]  }
  0x69   :  { %1859 = vmatprep.subr.bf16.mxu0 %v2414_v11  ;;  %1725 = vmatprep.mubr.bf16.mxu1 %v2000_v35  ;;  %v2508_v11 = vld [vmem:[#allocation2 + $0x604] ss:$8 sps:$4 sm:$0xff]   ;;  %v2530_v35 = vld [vmem:[#allocation2 + $0x640] ss:$8 sps:$4 sm:$0xff]  }
  0x6a   :  { %1889 = vmatprep.mubr.bf16.mxu0 %v2008_v38  ;;  %v2533_v38 = vld [vmem:[#allocation2 + $0x250] ss:$8 sps:$4 sm:$0xff]  }
  0x6b   :  { %1696 = vmatpush1.bf16.msra.mxu1 %v2409_v12  ;;  %v1999_v12 = vcombine.low %v2808_v32, %v2808_v32  ;;  %v2529_v32 = vld [vmem:[#allocation2 + $0x244] ss:$8 sps:$4 sm:$0xff]  }
  0x6c   :  { %1860 = vmatpush1.bf16.msra.mxu0 %v2412_v13  ;;  %1697 = vmatprep.subr.bf16.mxu1 %v2417_v14  ;;  %v2501_v13 = vld [vmem:[#allocation2 + $0x200] ss:$8 sps:$4 sm:$0xff]   ;;  %v2007_v14 = vcombine.low %v2815_v36, %v2815_v36  ;;  %v2535_v36 = vld [vmem:[#allocation2 + $0x254] ss:$8 sps:$4 sm:$0xff]  }
  0x6d   :  { %1861 = vmatprep.subr.bf16.mxu0 %v2420_v15  ;;  %v2506_v15 = vld [vmem:[#allocation2 + $0x600] ss:$8 sps:$4 sm:$0xff]  }
  0x6f   :  { %1698 = vmatpush1.bf16.msra.mxu1 %v2415_v16  ;;  %v2511_v16 = vld [vmem:[#allocation2 + $0x214] ss:$8 sps:$4 sm:$0xff]  }
  0x70   :  { %1862 = vmatpush1.bf16.msra.mxu0 %v2418_v17  ;;  %1699 = vmatprep.subr.bf16.mxu1 %v2423_v18  ;;  %v2514_v17 = vld [vmem:[#allocation2 + $0x614] ss:$8 sps:$4 sm:$0xff]  }
  0x71   :  { %1863 = vmatprep.subr.bf16.mxu0 %v2426_v19  ;;  %v2826_v18 = vld [vmem:[%s2862_s0 + $0x10] sm:$0xff] }
  0x72   :  { %v2002_v19 = vcombine.high %v2826_v18, %v2826_v18 }
  0x73   :  { %1700 = vmatpush1.bf16.msra.mxu1 %v2421_v20  ;;  %v2833_v20 = vld [vmem:[%s2862_s0 + $0x30] sm:$0xff] }
  0x74   :  { %1864 = vmatpush1.bf16.msra.mxu0 %v2424_v21  ;;  %1701 = vmatprep.subr.bf16.mxu1 %v2429_v22  ;;  %v2509_v21 = vld [vmem:[#allocation2 + $0x210] ss:$8 sps:$4 sm:$0xff]  }
  0x75   :  { %1865 = vmatprep.subr.bf16.mxu0 %v2432_v23  ;;  %v2512_v22 = vld [vmem:[#allocation2 + $0x610] ss:$8 sps:$4 sm:$0xff]   ;;  %v2010_v23 = vcombine.high %v2833_v20, %v2833_v20 }
  0x77   :  { %1702 = vmatpush1.bf16.msra.mxu1 %v2427_v24  ;;  %v2517_v24 = vld [vmem:[#allocation2 + $0x224] ss:$8 sps:$4 sm:$0xff]  }
  0x78   :  { %1866 = vmatpush1.bf16.msra.mxu0 %v2430_v25  ;;  %1703 = vmatprep.subr.bf16.mxu1 %v2435_v26  ;;  %v2520_v25 = vld [vmem:[#allocation2 + $0x624] ss:$8 sps:$4 sm:$0xff]   ;;  %v2515_v26 = vld [vmem:[#allocation2 + $0x220] ss:$8 sps:$4 sm:$0xff]  }
  0x79   :  { %1867 = vmatprep.subr.bf16.mxu0 %v2438_v27  ;;  %v2518_v27 = vld [vmem:[#allocation2 + $0x620] ss:$8 sps:$4 sm:$0xff]  }
  0x7b   :  { %1704 = vmatpush1.bf16.msra.mxu1 %v2433_v28  ;;  %v2523_v28 = vld [vmem:[#allocation2 + $0x234] ss:$8 sps:$4 sm:$0xff]  }
  0x7c   :  { %1868 = vmatpush1.bf16.msra.mxu0 %v2436_v29  ;;  %1705 = vmatprep.subr.bf16.mxu1 %v2441_v30  ;;  %v2526_v29 = vld [vmem:[#allocation2 + $0x634] ss:$8 sps:$4 sm:$0xff]   ;;  %v2521_v30 = vld [vmem:[#allocation2 + $0x230] ss:$8 sps:$4 sm:$0xff]  }
  0x7d   :  { %1869 = vmatprep.subr.bf16.mxu0 %v2444_v31  ;;  %v2524_v31 = vld [vmem:[#allocation2 + $0x630] ss:$8 sps:$4 sm:$0xff]  }
  0x7f   :  { %1706 = vmatpush1.bf16.msra.mxu1 %v2439_v33  ;;  %v2532_v33 = vld [vmem:[#allocation2 + $0x644] ss:$8 sps:$4 sm:$0xff]  }
  0x80   :  { %1870 = vmatpush1.bf16.msra.mxu0 %v2442_v34  ;;  %1707 = vmatprep.subr.bf16.mxu1 %v2447_v37  ;;  %v2527_v34 = vld [vmem:[#allocation2 + $0x240] ss:$8 sps:$4 sm:$0xff]   ;;  %v2538_v37 = vld [vmem:[#allocation2 + $0x654] ss:$8 sps:$4 sm:$0xff]  }
  0x81   :  { %1871 = vmatprep.subr.bf16.mxu0 %v2450_v39  ;;  %v2536_v39 = vld [vmem:[#allocation2 + $0x650] ss:$8 sps:$4 sm:$0xff]  }
  0x83   :  { %1708 = vmatpush1.bf16.msra.mxu1 %v2445_v40  ;;  %v2541_v40 = vld [vmem:[#allocation2 + $0x264] ss:$8 sps:$4 sm:$0xff]  }
  0x84   :  { %1872 = vmatpush1.bf16.msra.mxu0 %v2448_v41  ;;  %1709 = vmatprep.subr.bf16.mxu1 %v2453_v42  ;;  %v2544_v41 = vld [vmem:[#allocation2 + $0x664] ss:$8 sps:$4 sm:$0xff]   ;;  %v2539_v42 = vld [vmem:[#allocation2 + $0x260] ss:$8 sps:$4 sm:$0xff]  }
  0x85   :  { %1873 = vmatprep.subr.bf16.mxu0 %v2456_v43  ;;  %v2542_v43 = vld [vmem:[#allocation2 + $0x660] ss:$8 sps:$4 sm:$0xff]  }
  0x87   :  { %1710 = vmatpush1.bf16.msra.mxu1 %v2451_v44  ;;  %v2547_v44 = vld [vmem:[#allocation2 + $0x274] ss:$8 sps:$4 sm:$0xff]  }
  0x88   :  { %1874 = vmatpush1.bf16.msra.mxu0 %v2454_v45  ;;  %1711 = vmatprep.subr.bf16.mxu1 %v2459_v46  ;;  %v2550_v45 = vld [vmem:[#allocation2 + $0x674] ss:$8 sps:$4 sm:$0xff]   ;;  %v2545_v46 = vld [vmem:[#allocation2 + $0x270] ss:$8 sps:$4 sm:$0xff]  }
  0x89   :  { %1875 = vmatprep.subr.bf16.mxu0 %v2462_v47  ;;  %v2548_v47 = vld [vmem:[#allocation2 + $0x670] ss:$8 sps:$4 sm:$0xff]  }
  0x8b   :  { %1712 = vmatpush1.bf16.msra.mxu1 %v2457_v48  ;;  %v2553_v48 = vld [vmem:[#allocation2 + $0x284] ss:$8 sps:$4 sm:$0xff]  }
  0x8c   :  { %1876 = vmatpush1.bf16.msra.mxu0 %v2460_v49  ;;  %1713 = vmatprep.subr.bf16.mxu1 %v2465_v50  ;;  %v2556_v49 = vld [vmem:[#allocation2 + $0x684] ss:$8 sps:$4 sm:$0xff]   ;;  %v2551_v50 = vld [vmem:[#allocation2 + $0x280] ss:$8 sps:$4 sm:$0xff]  }
  0x8d   :  { %1877 = vmatprep.subr.bf16.mxu0 %v2468_v51  ;;  %v2554_v51 = vld [vmem:[#allocation2 + $0x680] ss:$8 sps:$4 sm:$0xff]  }
  0x8f   :  { %1714 = vmatpush1.bf16.msra.mxu1 %v2463_v52  ;;  %v2559_v52 = vld [vmem:[#allocation2 + $0x294] ss:$8 sps:$4 sm:$0xff]  }
  0x90   :  { %1878 = vmatpush1.bf16.msra.mxu0 %v2466_v53  ;;  %1715 = vmatprep.subr.bf16.mxu1 %v2471_v54  ;;  %v2562_v53 = vld [vmem:[#allocation2 + $0x694] ss:$8 sps:$4 sm:$0xff]   ;;  %v2557_v54 = vld [vmem:[#allocation2 + $0x290] ss:$8 sps:$4 sm:$0xff]  }
  0x91   :  { %1879 = vmatprep.subr.bf16.mxu0 %v2474_v55  ;;  %v2560_v55 = vld [vmem:[#allocation2 + $0x690] ss:$8 sps:$4 sm:$0xff]  }
  0x93   :  { %1716 = vmatpush1.bf16.msra.mxu1 %v2469_v56  ;;  %v2565_v56 = vld [vmem:[#allocation2 + $0x2a4] ss:$8 sps:$4 sm:$0xff]  }
  0x94   :  { %1880 = vmatpush1.bf16.msra.mxu0 %v2472_v57  ;;  %1717 = vmatprep.subr.bf16.mxu1 %v2477_v58  ;;  %v2568_v57 = vld [vmem:[#allocation2 + $0x6a4] ss:$8 sps:$4 sm:$0xff]   ;;  %v2563_v58 = vld [vmem:[#allocation2 + $0x2a0] ss:$8 sps:$4 sm:$0xff]  }
  0x95   :  { %1881 = vmatprep.subr.bf16.mxu0 %v2480_v59  ;;  %v2566_v59 = vld [vmem:[#allocation2 + $0x6a0] ss:$8 sps:$4 sm:$0xff]  }
  0x97   :  { %1718 = vmatpush1.bf16.msra.mxu1 %v2475_v60  ;;  %v2571_v60 = vld [vmem:[#allocation2 + $0x2b4] ss:$8 sps:$4 sm:$0xff]  }
  0x98   :  { %1882 = vmatpush1.bf16.msra.mxu0 %v2478_v61  ;;  %1719 = vmatprep.subr.bf16.mxu1 %v2483_v62  ;;  %v2574_v61 = vld [vmem:[#allocation2 + $0x6b4] ss:$8 sps:$4 sm:$0xff]   ;;  %v2569_v62 = vld [vmem:[#allocation2 + $0x2b0] ss:$8 sps:$4 sm:$0xff]  }
  0x99   :  { %1883 = vmatprep.subr.bf16.mxu0 %v2486_v63  ;;  %v2572_v63 = vld [vmem:[#allocation2 + $0x6b0] ss:$8 sps:$4 sm:$0xff]  }
  0x9b   :  { %1720 = vmatpush1.bf16.msra.mxu1 %v2481_v0  ;;  %v2577_v0 = vld [vmem:[#allocation2 + $0x2c4] ss:$8 sps:$4 sm:$0xff]  }
  0x9c   :  { %1884 = vmatpush1.bf16.msra.mxu0 %v2484_v1  ;;  %1721 = vmatprep.subr.bf16.mxu1 %v2489_v2  ;;  %v2580_v1 = vld [vmem:[#allocation2 + $0x6c4] ss:$8 sps:$4 sm:$0xff]   ;;  %v2575_v2 = vld [vmem:[#allocation2 + $0x2c0] ss:$8 sps:$4 sm:$0xff]  }
  0x9d   :  { %1885 = vmatprep.subr.bf16.mxu0 %v2492_v3  ;;  %v2578_v3 = vld [vmem:[#allocation2 + $0x6c0] ss:$8 sps:$4 sm:$0xff]  }
  0x9f   :  { %1722 = vmatpush1.bf16.msra.mxu1 %v2487_v4  ;;  %v2583_v4 = vld [vmem:[#allocation2 + $0x2d4] ss:$8 sps:$4 sm:$0xff]  }
  0xa0   :  { %1886 = vmatpush1.bf16.msra.mxu0 %v2490_v5  ;;  %1723 = vmatprep.subr.bf16.mxu1 %v2495_v6  ;;  %v2586_v5 = vld [vmem:[#allocation2 + $0x6d4] ss:$8 sps:$4 sm:$0xff]   ;;  %v2581_v6 = vld [vmem:[#allocation2 + $0x2d0] ss:$8 sps:$4 sm:$0xff]  }
  0xa1   :  { %1887 = vmatprep.subr.bf16.mxu0 %v2498_v7  ;;  %v2584_v7 = vld [vmem:[#allocation2 + $0x6d0] ss:$8 sps:$4 sm:$0xff]  }
  0xa3   :  { %1724 = vmatpush1.bf16.msra.mxu1 %v2493_v8  ;;  %v2589_v8 = vld [vmem:[#allocation2 + $0x2e4] ss:$8 sps:$4 sm:$0xff]  }
  0xa4   :  { %1888 = vmatpush1.bf16.msra.mxu0 %v2496_v9  ;;  %1734 = vmatprep.subr.bf16.mxu1 %v2503_v10  ;;  %v2592_v9 = vld [vmem:[#allocation2 + $0x6e4] ss:$8 sps:$4 sm:$0xff]   ;;  %v2587_v10 = vld [vmem:[#allocation2 + $0x2e0] ss:$8 sps:$4 sm:$0xff]  }
  0xa5   :  { %1898 = vmatprep.subr.bf16.mxu0 %v2508_v11  ;;  %v2590_v11 = vld [vmem:[#allocation2 + $0x6e0] ss:$8 sps:$4 sm:$0xff]  }
  0xa6   :  { %1726 = vmatmul.mubr.bf16.vlgmr.msra.gmra.mrb[0].mxu1 %v1999_v12  ;;  %v2595_v12 = vld [vmem:[#allocation2 + $0x2f4] ss:$8 sps:$4 sm:$0xff]  }
  0xa7   :  { %1890 = vmatmul.mubr.bf16.vlgmr.msra.gmra.mrb[0].mxu0 %v2007_v14  ;;  %1735 = vmatpush1.bf16.msra.mxu1 %v2501_v13  ;;  %v2598_v13 = vld [vmem:[#allocation2 + $0x6f4] ss:$8 sps:$4 sm:$0xff]   ;;  %v2593_v14 = vld [vmem:[#allocation2 + $0x2f0] ss:$8 sps:$4 sm:$0xff]  }
  0xa8   :  { %1899 = vmatpush1.bf16.msra.mxu0 %v2506_v15  ;;  %1736 = vmatprep.subr.bf16.mxu1 %v2511_v16  ;;  %v2596_v15 = vld [vmem:[#allocation2 + $0x6f0] ss:$8 sps:$4 sm:$0xff]   ;;  %v2603_v16 = vld [vmem:[#allocation2 + $0x304] ss:$8 sps:$4 sm:$0xff]  }
  0xa9   :  { %1900 = vmatprep.subr.bf16.mxu0 %v2514_v17  ;;  %1766 = vmatprep.mubr.bf16.mxu1 %v2002_v19  ;;  %v2608_v17 = vld [vmem:[#allocation2 + $0x704] ss:$8 sps:$4 sm:$0xff]   ;;  %v2001_v19 = vcombine.low %v2826_v18, %v2826_v18  ;;  %v2611_v18 = vld [vmem:[#allocation2 + $0x314] ss:$8 sps:$4 sm:$0xff]  }
  0xaa   :  { %1930 = vmatprep.mubr.bf16.mxu0 %v2010_v23  ;;  %v2849_v23 = vld [vmem:[%s2862_s0 + $0x38] sm:$0xff] }
  0xab   :  { %1737 = vmatpush1.bf16.msra.mxu1 %v2509_v21  ;;  %v2009_v21 = vcombine.low %v2833_v20, %v2833_v20 }
  0xac   :  { %1901 = vmatpush1.bf16.msra.mxu0 %v2512_v22  ;;  %1738 = vmatprep.subr.bf16.mxu1 %v2517_v24  ;;  %v2844_v22 = vld [vmem:[%s2862_s0 + $0x18] sm:$0xff]  ;;  %v2601_v24 = vld [vmem:[#allocation2 + $0x300] ss:$8 sps:$4 sm:$0xff]  }
  0xad   :  { %1902 = vmatprep.subr.bf16.mxu0 %v2520_v25  ;;  %v2606_v25 = vld [vmem:[#allocation2 + $0x700] ss:$8 sps:$4 sm:$0xff]   ;;  %v2004_v20 = vcombine.high %v2844_v22, %v2844_v22 }
  0xaf   :  { %1739 = vmatpush1.bf16.msra.mxu1 %v2515_v26  ;;  %v2614_v26 = vld [vmem:[#allocation2 + $0x714] ss:$8 sps:$4 sm:$0xff]  }
  0xb0   :  { %1903 = vmatpush1.bf16.msra.mxu0 %v2518_v27  ;;  %1740 = vmatprep.subr.bf16.mxu1 %v2523_v28  ;;  %v2012_v27 = vcombine.high %v2849_v23, %v2849_v23  ;;  %v2609_v28 = vld [vmem:[#allocation2 + $0x310] ss:$8 sps:$4 sm:$0xff]  }
  0xb1   :  { %1904 = vmatprep.subr.bf16.mxu0 %v2526_v29  ;;  %v2612_v29 = vld [vmem:[#allocation2 + $0x710] ss:$8 sps:$4 sm:$0xff]  }
  0xb3   :  { %1741 = vmatpush1.bf16.msra.mxu1 %v2521_v30  ;;  %v2617_v30 = vld [vmem:[#allocation2 + $0x324] ss:$8 sps:$4 sm:$0xff]  }
  0xb4   :  { %1905 = vmatpush1.bf16.msra.mxu0 %v2524_v31  ;;  %1742 = vmatprep.subr.bf16.mxu1 %v2529_v32  ;;  %v2620_v31 = vld [vmem:[#allocation2 + $0x724] ss:$8 sps:$4 sm:$0xff]   ;;  %v2615_v32 = vld [vmem:[#allocation2 + $0x320] ss:$8 sps:$4 sm:$0xff]  }
  0xb5   :  { %1906 = vmatprep.subr.bf16.mxu0 %v2532_v33  ;;  %v2618_v33 = vld [vmem:[#allocation2 + $0x720] ss:$8 sps:$4 sm:$0xff]  }
  0xb7   :  { %1743 = vmatpush1.bf16.msra.mxu1 %v2527_v34  ;;  %v2623_v34 = vld [vmem:[#allocation2 + $0x334] ss:$8 sps:$4 sm:$0xff]  }
  0xb8   :  { %1907 = vmatpush1.bf16.msra.mxu0 %v2530_v35  ;;  %1744 = vmatprep.subr.bf16.mxu1 %v2535_v36  ;;  %v2626_v35 = vld [vmem:[#allocation2 + $0x734] ss:$8 sps:$4 sm:$0xff]   ;;  %v2621_v36 = vld [vmem:[#allocation2 + $0x330] ss:$8 sps:$4 sm:$0xff]  }
  0xb9   :  { %1908 = vmatprep.subr.bf16.mxu0 %v2538_v37  ;;  %v2624_v37 = vld [vmem:[#allocation2 + $0x730] ss:$8 sps:$4 sm:$0xff]  }
  0xbb   :  { %1745 = vmatpush1.bf16.msra.mxu1 %v2533_v38  ;;  %v2629_v38 = vld [vmem:[#allocation2 + $0x344] ss:$8 sps:$4 sm:$0xff]  }
  0xbc   :  { %1909 = vmatpush1.bf16.msra.mxu0 %v2536_v39  ;;  %1746 = vmatprep.subr.bf16.mxu1 %v2541_v40  ;;  %v2632_v39 = vld [vmem:[#allocation2 + $0x744] ss:$8 sps:$4 sm:$0xff]   ;;  %v2627_v40 = vld [vmem:[#allocation2 + $0x340] ss:$8 sps:$4 sm:$0xff]  }
  0xbd   :  { %1910 = vmatprep.subr.bf16.mxu0 %v2544_v41  ;;  %v2630_v41 = vld [vmem:[#allocation2 + $0x740] ss:$8 sps:$4 sm:$0xff]  }
  0xbf   :  { %1747 = vmatpush1.bf16.msra.mxu1 %v2539_v42  ;;  %v2635_v42 = vld [vmem:[#allocation2 + $0x354] ss:$8 sps:$4 sm:$0xff]  }
  0xc0   :  { %1911 = vmatpush1.bf16.msra.mxu0 %v2542_v43  ;;  %1748 = vmatprep.subr.bf16.mxu1 %v2547_v44  ;;  %v2638_v43 = vld [vmem:[#allocation2 + $0x754] ss:$8 sps:$4 sm:$0xff]   ;;  %v2633_v44 = vld [vmem:[#allocation2 + $0x350] ss:$8 sps:$4 sm:$0xff]  }
  0xc1   :  { %1912 = vmatprep.subr.bf16.mxu0 %v2550_v45  ;;  %v2636_v45 = vld [vmem:[#allocation2 + $0x750] ss:$8 sps:$4 sm:$0xff]  }
  0xc3   :  { %1749 = vmatpush1.bf16.msra.mxu1 %v2545_v46  ;;  %v2641_v46 = vld [vmem:[#allocation2 + $0x364] ss:$8 sps:$4 sm:$0xff]  }
  0xc4   :  { %1913 = vmatpush1.bf16.msra.mxu0 %v2548_v47  ;;  %1750 = vmatprep.subr.bf16.mxu1 %v2553_v48  ;;  %v2644_v47 = vld [vmem:[#allocation2 + $0x764] ss:$8 sps:$4 sm:$0xff]   ;;  %v2639_v48 = vld [vmem:[#allocation2 + $0x360] ss:$8 sps:$4 sm:$0xff]  }
  0xc5   :  { %1914 = vmatprep.subr.bf16.mxu0 %v2556_v49  ;;  %v2642_v49 = vld [vmem:[#allocation2 + $0x760] ss:$8 sps:$4 sm:$0xff]  }
  0xc7   :  { %1751 = vmatpush1.bf16.msra.mxu1 %v2551_v50  ;;  %v2647_v50 = vld [vmem:[#allocation2 + $0x374] ss:$8 sps:$4 sm:$0xff]  }
  0xc8   :  { %1915 = vmatpush1.bf16.msra.mxu0 %v2554_v51  ;;  %1752 = vmatprep.subr.bf16.mxu1 %v2559_v52  ;;  %v2650_v51 = vld [vmem:[#allocation2 + $0x774] ss:$8 sps:$4 sm:$0xff]   ;;  %v2645_v52 = vld [vmem:[#allocation2 + $0x370] ss:$8 sps:$4 sm:$0xff]  }
  0xc9   :  { %1916 = vmatprep.subr.bf16.mxu0 %v2562_v53  ;;  %v2648_v53 = vld [vmem:[#allocation2 + $0x770] ss:$8 sps:$4 sm:$0xff]  }
  0xcb   :  { %1753 = vmatpush1.bf16.msra.mxu1 %v2557_v54  ;;  %v2653_v54 = vld [vmem:[#allocation2 + $0x384] ss:$8 sps:$4 sm:$0xff]  }
  0xcc   :  { %1917 = vmatpush1.bf16.msra.mxu0 %v2560_v55  ;;  %1754 = vmatprep.subr.bf16.mxu1 %v2565_v56  ;;  %v2656_v55 = vld [vmem:[#allocation2 + $0x784] ss:$8 sps:$4 sm:$0xff]   ;;  %v2651_v56 = vld [vmem:[#allocation2 + $0x380] ss:$8 sps:$4 sm:$0xff]  }
  0xcd   :  { %1918 = vmatprep.subr.bf16.mxu0 %v2568_v57  ;;  %v2654_v57 = vld [vmem:[#allocation2 + $0x780] ss:$8 sps:$4 sm:$0xff]  }
  0xcf   :  { %1755 = vmatpush1.bf16.msra.mxu1 %v2563_v58  ;;  %v2659_v58 = vld [vmem:[#allocation2 + $0x394] ss:$8 sps:$4 sm:$0xff]  }
  0xd0   :  { %1919 = vmatpush1.bf16.msra.mxu0 %v2566_v59  ;;  %1756 = vmatprep.subr.bf16.mxu1 %v2571_v60  ;;  %v2662_v59 = vld [vmem:[#allocation2 + $0x794] ss:$8 sps:$4 sm:$0xff]   ;;  %v2657_v60 = vld [vmem:[#allocation2 + $0x390] ss:$8 sps:$4 sm:$0xff]  }
  0xd1   :  { %1920 = vmatprep.subr.bf16.mxu0 %v2574_v61  ;;  %v2660_v61 = vld [vmem:[#allocation2 + $0x790] ss:$8 sps:$4 sm:$0xff]  }
  0xd3   :  { %1757 = vmatpush1.bf16.msra.mxu1 %v2569_v62  ;;  %v2665_v62 = vld [vmem:[#allocation2 + $0x3a4] ss:$8 sps:$4 sm:$0xff]  }
  0xd4   :  { %1921 = vmatpush1.bf16.msra.mxu0 %v2572_v63  ;;  %1758 = vmatprep.subr.bf16.mxu1 %v2577_v0  ;;  %v2668_v63 = vld [vmem:[#allocation2 + $0x7a4] ss:$8 sps:$4 sm:$0xff]   ;;  %v2663_v0 = vld [vmem:[#allocation2 + $0x3a0] ss:$8 sps:$4 sm:$0xff]  }
  0xd5   :  { %1922 = vmatprep.subr.bf16.mxu0 %v2580_v1  ;;  %v2666_v1 = vld [vmem:[#allocation2 + $0x7a0] ss:$8 sps:$4 sm:$0xff]  }
  0xd7   :  { %1759 = vmatpush1.bf16.msra.mxu1 %v2575_v2  ;;  %v2671_v2 = vld [vmem:[#allocation2 + $0x3b4] ss:$8 sps:$4 sm:$0xff]  }
  0xd8   :  { %1923 = vmatpush1.bf16.msra.mxu0 %v2578_v3  ;;  %1760 = vmatprep.subr.bf16.mxu1 %v2583_v4  ;;  %v2674_v3 = vld [vmem:[#allocation2 + $0x7b4] ss:$8 sps:$4 sm:$0xff]   ;;  %v2669_v4 = vld [vmem:[#allocation2 + $0x3b0] ss:$8 sps:$4 sm:$0xff]  }
  0xd9   :  { %1924 = vmatprep.subr.bf16.mxu0 %v2586_v5  ;;  %v2672_v5 = vld [vmem:[#allocation2 + $0x7b0] ss:$8 sps:$4 sm:$0xff]  }
  0xdb   :  { %1761 = vmatpush1.bf16.msra.mxu1 %v2581_v6  ;;  %v2677_v6 = vld [vmem:[#allocation2 + $0x3c4] ss:$8 sps:$4 sm:$0xff]  }
  0xdc   :  { %1925 = vmatpush1.bf16.msra.mxu0 %v2584_v7  ;;  %1762 = vmatprep.subr.bf16.mxu1 %v2589_v8  ;;  %v2680_v7 = vld [vmem:[#allocation2 + $0x7c4] ss:$8 sps:$4 sm:$0xff]   ;;  %v2675_v8 = vld [vmem:[#allocation2 + $0x3c0] ss:$8 sps:$4 sm:$0xff]  }
  0xdd   :  { %1926 = vmatprep.subr.bf16.mxu0 %v2592_v9  ;;  %v2678_v9 = vld [vmem:[#allocation2 + $0x7c0] ss:$8 sps:$4 sm:$0xff]  }
  0xdf   :  { %1763 = vmatpush1.bf16.msra.mxu1 %v2587_v10  ;;  %v2683_v10 = vld [vmem:[#allocation2 + $0x3d4] ss:$8 sps:$4 sm:$0xff]  }
  0xe0   :  { %1927 = vmatpush1.bf16.msra.mxu0 %v2590_v11  ;;  %1764 = vmatprep.subr.bf16.mxu1 %v2595_v12  ;;  %v2686_v11 = vld [vmem:[#allocation2 + $0x7d4] ss:$8 sps:$4 sm:$0xff]   ;;  %v2681_v12 = vld [vmem:[#allocation2 + $0x3d0] ss:$8 sps:$4 sm:$0xff]  }
  0xe1   :  { %1928 = vmatprep.subr.bf16.mxu0 %v2598_v13  ;;  %v2684_v13 = vld [vmem:[#allocation2 + $0x7d0] ss:$8 sps:$4 sm:$0xff]  }
  0xe3   :  { %1765 = vmatpush1.bf16.msra.mxu1 %v2593_v14  ;;  %v2689_v14 = vld [vmem:[#allocation2 + $0x3e4] ss:$8 sps:$4 sm:$0xff]  }
  0xe4   :  { %1929 = vmatpush1.bf16.msra.mxu0 %v2596_v15  ;;  %1775 = vmatprep.subr.bf16.mxu1 %v2603_v16  ;;  %v2692_v15 = vld [vmem:[#allocation2 + $0x7e4] ss:$8 sps:$4 sm:$0xff]   ;;  %v2687_v16 = vld [vmem:[#allocation2 + $0x3e0] ss:$8 sps:$4 sm:$0xff]  }
  0xe5   :  { %1939 = vmatprep.subr.bf16.mxu0 %v2608_v17  ;;  %v2690_v17 = vld [vmem:[#allocation2 + $0x7e0] ss:$8 sps:$4 sm:$0xff]  }
  0xe6   :  { %1767 = vmatmul.mubr.bf16.vlgmr.msra.gmra.mrb[0].mxu1 %v2001_v19  ;;  %v2695_v19 = vld [vmem:[#allocation2 + $0x3f4] ss:$8 sps:$4 sm:$0xff]  }
  0xe7   :  { %1931 = vmatmul.mubr.bf16.vlgmr.msra.gmra.mrb[0].mxu0 %v2009_v21  ;;  %1776 = vmatpush1.bf16.msra.mxu1 %v2601_v24  ;;  %v2698_v21 = vld [vmem:[#allocation2 + $0x7f4] ss:$8 sps:$4 sm:$0xff]   ;;  %v2693_v24 = vld [vmem:[#allocation2 + $0x3f0] ss:$8 sps:$4 sm:$0xff]  }
  0xe8   :  { %1940 = vmatpush1.bf16.msra.mxu0 %v2606_v25  ;;  %1777 = vmatprep.subr.bf16.mxu1 %v2611_v18  ;;  %v2696_v25 = vld [vmem:[#allocation2 + $0x7f0] ss:$8 sps:$4 sm:$0xff]   ;;  %v2003_v18 = vcombine.low %v2844_v22, %v2844_v22 }
  0xe9   :  { %1941 = vmatprep.subr.bf16.mxu0 %v2614_v26  ;;  %1807 = vmatprep.mubr.bf16.mxu1 %v2004_v20  ;;  %v2011_v26 = vcombine.low %v2849_v23, %v2849_v23  ;;  %v306_v20 = vlaneseq }
  0xea   :  { %1971 = vmatprep.mubr.bf16.mxu0 %v2012_v27 }
  0xeb   :  { %1778 = vmatpush1.bf16.msra.mxu1 %v2609_v28  ;;  %v307_v27 = vshrl.u32 %v306_v20, 7 }
  0xec   :  { %1942 = vmatpush1.bf16.msra.mxu0 %v2612_v29  ;;  %1779 = vmatprep.subr.bf16.mxu1 %v2617_v30  ;;  %v304_v29 = vld [vmem:[#allocation4] sm:$0x3] }
  0xed   :  { %1943 = vmatprep.subr.bf16.mxu0 %v2620_v31  ;;  %v308_v28 = vsub.s32 0, %v307_v27  ;;  %v312_v30 = vsub.s32 1, %v307_v27 }
  0xef   :  { %1780 = vmatpush1.bf16.msra.mxu1 %v2615_v32  ;;  %v309_v31 = vrot.slane %v304_v29, %v308_v28  ;;  %v313_v32 = vrot.slane %v304_v29, %v312_v30 }
  0xf0   :  { %1944 = vmatpush1.bf16.msra.mxu0 %v2618_v33  ;;  %1781 = vmatprep.subr.bf16.mxu1 %v2623_v34 }
  0xf1   :  { %1945 = vmatprep.subr.bf16.mxu0 %v2626_v35 }
  0xf3   :  { %1782 = vmatpush1.bf16.msra.mxu1 %v2621_v36 }
  0xf4   :  { %1946 = vmatpush1.bf16.msra.mxu0 %v2624_v37  ;;  %1783 = vmatprep.subr.bf16.mxu1 %v2629_v38 }
  0xf5   :  { %1947 = vmatprep.subr.bf16.mxu0 %v2632_v39 }
  0xf7   :  { %1784 = vmatpush1.bf16.msra.mxu1 %v2627_v40 }
  0xf8   :  { %1948 = vmatpush1.bf16.msra.mxu0 %v2630_v41  ;;  %1785 = vmatprep.subr.bf16.mxu1 %v2635_v42 }
  0xf9   :  { %1949 = vmatprep.subr.bf16.mxu0 %v2638_v43 }
  0xfb   :  { %1786 = vmatpush1.bf16.msra.mxu1 %v2633_v44 }
  0xfc   :  { %1950 = vmatpush1.bf16.msra.mxu0 %v2636_v45  ;;  %1787 = vmatprep.subr.bf16.mxu1 %v2641_v46 }
  0xfd   :  { %1951 = vmatprep.subr.bf16.mxu0 %v2644_v47 }
  0xff   :  { %1788 = vmatpush1.bf16.msra.mxu1 %v2639_v48 }
 0x100   :  { %1952 = vmatpush1.bf16.msra.mxu0 %v2642_v49  ;;  %1789 = vmatprep.subr.bf16.mxu1 %v2647_v50 }
 0x101   :  { %1953 = vmatprep.subr.bf16.mxu0 %v2650_v51 }
 0x103   :  { %1790 = vmatpush1.bf16.msra.mxu1 %v2645_v52 }
 0x104   :  { %1954 = vmatpush1.bf16.msra.mxu0 %v2648_v53  ;;  %1791 = vmatprep.subr.bf16.mxu1 %v2653_v54 }
 0x105   :  { %1955 = vmatprep.subr.bf16.mxu0 %v2656_v55 }
 0x107   :  { %1792 = vmatpush1.bf16.msra.mxu1 %v2651_v56 }
 0x108   :  { %1956 = vmatpush1.bf16.msra.mxu0 %v2654_v57  ;;  %1793 = vmatprep.subr.bf16.mxu1 %v2659_v58 }
 0x109   :  { %1957 = vmatprep.subr.bf16.mxu0 %v2662_v59 }
 0x10b   :  { %1794 = vmatpush1.bf16.msra.mxu1 %v2657_v60 }
 0x10c   :  { %1958 = vmatpush1.bf16.msra.mxu0 %v2660_v61  ;;  %1795 = vmatprep.subr.bf16.mxu1 %v2665_v62 }
 0x10d   :  { %1959 = vmatprep.subr.bf16.mxu0 %v2668_v63 }
 0x10f   :  { %1796 = vmatpush1.bf16.msra.mxu1 %v2663_v0 }
 0x110   :  { %1960 = vmatpush1.bf16.msra.mxu0 %v2666_v1  ;;  %1797 = vmatprep.subr.bf16.mxu1 %v2671_v2 }
 0x111   :  { %1961 = vmatprep.subr.bf16.mxu0 %v2674_v3 }
 0x113   :  { %1798 = vmatpush1.bf16.msra.mxu1 %v2669_v4 }
 0x114   :  { %1962 = vmatpush1.bf16.msra.mxu0 %v2672_v5  ;;  %1799 = vmatprep.subr.bf16.mxu1 %v2677_v6 }
 0x115   :  { %1963 = vmatprep.subr.bf16.mxu0 %v2680_v7 }
 0x117   :  { %1800 = vmatpush1.bf16.msra.mxu1 %v2675_v8 }
 0x118   :  { %1964 = vmatpush1.bf16.msra.mxu0 %v2678_v9  ;;  %1801 = vmatprep.subr.bf16.mxu1 %v2683_v10 }
 0x119   :  { %1965 = vmatprep.subr.bf16.mxu0 %v2686_v11 }
 0x11b   :  { %1802 = vmatpush1.bf16.msra.mxu1 %v2681_v12 }
 0x11c   :  { %1966 = vmatpush1.bf16.msra.mxu0 %v2684_v13  ;;  %1803 = vmatprep.subr.bf16.mxu1 %v2689_v14 }
 0x11d   :  { %1967 = vmatprep.subr.bf16.mxu0 %v2692_v15 }
 0x11f   :  { %1804 = vmatpush1.bf16.msra.mxu1 %v2687_v16 }
 0x120   :  { %1968 = vmatpush1.bf16.msra.mxu0 %v2690_v17  ;;  %1805 = vmatprep.subr.bf16.mxu1 %v2695_v19 }
 0x121   :  { %1969 = vmatprep.subr.bf16.mxu0 %v2698_v21 }
 0x123   :  { %1806 = vmatpush1.bf16.msra.mxu1 %v2693_v24 }
 0x124   :  { %1970 = vmatpush1.bf16.msra.mxu0 %v2696_v25 }
 0x126   :  { %1808 = vmatmul.mubr.bf16.vlgmr.msra.gmra.mrb[0].mxu1 %v2003_v18 }
 0x127   :  { %1972 = vmatmul.mubr.bf16.vlgmr.msra.gmra.mrb[0].mxu0 %v2011_v26 }
 0x1f9   :  { %v1809_v33 = vpop.f32.mrb[0].mxu1 }
 0x1fa   :  { %v1973_v34 = vpop.f32.mrb[0].mxu0  ;;  %v2271_v35 = vadd.f32 %v1809_v33, %v309_v31  ;;  %v1811_v36 = vpop.f32.mrb[1].mxu1 }
 0x1fb   :  { %v1975_v37 = vpop.f32.mrb[1].mxu0  ;;  %v2273_v22 = vadd.f32 %v1811_v36, %v313_v32  ;;  %v1813_v38 = vpop.f32.mrb[2].mxu1 }
 0x1fc   :  { %v1977_v39 = vpop.f32.mrb[2].mxu0  ;;  %v2272_v23 = vadd.f32 %v2271_v35, %v1973_v34  ;;  %v1814_v40 = vpop.f32.mrb[3].mxu1 }
 0x1fd   :  { %v1978_v41 = vpop.f32.mrb[3].mxu0  ;;  %v2274_v42 = vadd.f32 %v2273_v22, %v1975_v37 }
 0x1fe   :  { %v1980_v43 = vmax.f32 %v2272_v23, 0.0 }
 0x1ff   :  { %v1981_v44 = vmax.f32 %v2274_v42, 0.0 }
 0x201   :  { %v2270_v45 = vpack.c.bf16 %v1981_v44, %v1980_v43 }
 0x203   :  { %1990 = vst [vmem:[%s2865_s3] sm:$0xff] %v2270_v45 }
 0x204   :  { %1995 = vsyncpa [#allocation3], 1 }
 0x205   :  { %1996 = vsyncpa [#allocation5], 1 }

// kernel: fpn_forward.10
= control target key start
LH: loop header
LB: loop body
LE: loop exit
PB: predicated region body
PF: predicated region fallthrough
CT: control target
= control target key end

     0   :  { %s1359_s15 = smov 0   ;;  %s1642_s0 = inlined_call_operand.vmem [shape: bf16[128,512], index: 0, kind: input, shape index: {}]   ;;  %s1643_s1 = inlined_call_operand.vmem [shape: bf16[512,256], index: 1, kind: input, shape index: {}]   ;;  %s1644_s2 = inlined_call_operand.vmem [shape: f32[1,256], index: 2, kind: input, shape index: {}]   ;;  %s1645_s3 = inlined_call_operand.vmem [shape: bf16[128,256], index: 3, kind: input, shape index: {}]   ;;  %s1646_s4 = inlined_call_operand.vmem [shape: bf16[128,256], index: 4, kind: output, shape index: {}]  }
   0x1 LB: > { %s1051_s16 = sadd.s32 4294967295, %s1332_s15   ;;  %p1055_p0 = scmp.ge.s32.totalorder %s1332_s15, 1  ;;  %s1332_s15 = sphi %s1359_s15, %s14_s15  }
   0x2   : > { %p176_p1 = scmp.lt.s32.totalorder %s1332_s15, 3 }
   0x4   : > { %p177_p2 = pnand %p1055_p0, %p176_p1 }
   0x5   : > { %v1206_v0 = vld [vmem:[%s1643_s1 + $0x4] ss:$8 sps:$4 sm:$0xff] (!%p177_p2)   ;;  %v1210_v2 = vld [vmem:[%s1643_s1] ss:$8 sps:$4 sm:$0xff] (!%p177_p2)   ;;  %v1212_v4 = vld [vmem:[%s1643_s1 + $0x14] ss:$8 sps:$4 sm:$0xff] (!%p177_p2)  }
   0x6   : > { %180 = sbr.rel (%p177_p2) target bundleno = 320 (0x140), region = 36  ;;  %v1208_v1 = vld [vmem:[%s1643_s1 + $0x104] ss:$8 sps:$4 sm:$0xff] (!%p177_p2)   ;;  %723 = vmatprep.subr.bf16.mxu1 (!%p177_p2), %v1206_v0  ;;  %v1211_v3 = vld [vmem:[%s1643_s1 + $0x100] ss:$8 sps:$4 sm:$0xff] (!%p177_p2)   ;;  %s1056_s29 = sshll.u32 (!%p177_p2), %s1051_s16, 3 }
   0x7   : > { %796 = vmatprep.subr.bf16.mxu0 (!%p177_p2), %v1208_v1  ;;  %724 = vmatpush1.bf16.msra.mxu1 (!%p177_p2), %v1210_v2  ;;  %v1214_v5 = vld [vmem:[%s1643_s1 + $0x114] ss:$8 sps:$4 sm:$0xff] (!%p177_p2)   ;;  %v1216_v6 = vld [vmem:[%s1643_s1 + $0x10] ss:$8 sps:$4 sm:$0xff] (!%p177_p2)   ;;  %v1218_v8 = vld [vmem:[%s1643_s1 + $0x24] ss:$8 sps:$4 sm:$0xff] (!%p177_p2)  }
   0x8   : > { %797 = vmatpush1.bf16.msra.mxu0 (!%p177_p2), %v1211_v3  ;;  %725 = vmatprep.subr.bf16.mxu1 (!%p177_p2), %v1212_v4  ;;  %v1217_v7 = vld [vmem:[%s1643_s1 + $0x110] ss:$8 sps:$4 sm:$0xff] (!%p177_p2)   ;;  %v1220_v9 = vld [vmem:[%s1643_s1 + $0x124] ss:$8 sps:$4 sm:$0xff] (!%p177_p2)   ;;  %v1222_v10 = vld [vmem:[%s1643_s1 + $0x20] ss:$8 sps:$4 sm:$0xff] (!%p177_p2)  }
   0x9   : > { %798 = vmatprep.subr.bf16.mxu0 (!%p177_p2), %v1214_v5  ;;  %v1223_v11 = vld [vmem:[%s1643_s1 + $0x120] ss:$8 sps:$4 sm:$0xff] (!%p177_p2)   ;;  %v1224_v12 = vld [vmem:[%s1643_s1 + $0x34] ss:$8 sps:$4 sm:$0xff] (!%p177_p2)   ;;  %v1228_v14 = vld [vmem:[%s1643_s1 + $0x30] ss:$8 sps:$4 sm:$0xff] (!%p177_p2)  }
   0xa   : > { %v1226_v13 = vld [vmem:[%s1643_s1 + $0x134] ss:$8 sps:$4 sm:$0xff] (!%p177_p2)   ;;  %v1229_v15 = vld [vmem:[%s1643_s1 + $0x130] ss:$8 sps:$4 sm:$0xff] (!%p177_p2)   ;;  %v1230_v16 = vld [vmem:[%s1643_s1 + $0x44] ss:$8 sps:$4 sm:$0xff] (!%p177_p2)  }
   0xb   : > { %726 = vmatpush1.bf16.msra.mxu1 (!%p177_p2), %v1216_v6  ;;  %v1232_v17 = vld [vmem:[%s1643_s1 + $0x144] ss:$8 sps:$4 sm:$0xff] (!%p177_p2)   ;;  %v1234_v18 = vld [vmem:[%s1643_s1 + $0x40] ss:$8 sps:$4 sm:$0xff] (!%p177_p2)   ;;  %v1236_v20 = vld [vmem:[%s1643_s1 + $0x54] ss:$8 sps:$4 sm:$0xff] (!%p177_p2)  }
   0xc   : > { %799 = vmatpush1.bf16.msra.mxu0 (!%p177_p2), %v1217_v7  ;;  %727 = vmatprep.subr.bf16.mxu1 (!%p177_p2), %v1218_v8  ;;  %v1235_v19 = vld [vmem:[%s1643_s1 + $0x140] ss:$8 sps:$4 sm:$0xff] (!%p177_p2)   ;;  %v1238_v21 = vld [vmem:[%s1643_s1 + $0x154] ss:$8 sps:$4 sm:$0xff] (!%p177_p2)   ;;  %v1240_v22 = vld [vmem:[%s1643_s1 + $0x50] ss:$8 sps:$4 sm:$0xff] (!%p177_p2)  }
   0xd   : > { %800 = vmatprep.subr.bf16.mxu0 %v1220_v9  ;;  %v1241_v23 = vld [vmem:[%s1643_s1 + $0x150] ss:$8 sps:$4 sm:$0xff]   ;;  %v1242_v24 = vld [vmem:[%s1643_s1 + $0x64] ss:$8 sps:$4 sm:$0xff]   ;;  %v1246_v26 = vld [vmem:[%s1643_s1 + $0x60] ss:$8 sps:$4 sm:$0xff]  }
   0xe   : > { %v1244_v25 = vld [vmem:[%s1643_s1 + $0x164] ss:$8 sps:$4 sm:$0xff]   ;;  %v1247_v27 = vld [vmem:[%s1643_s1 + $0x160] ss:$8 sps:$4 sm:$0xff]   ;;  %v1248_v28 = vld [vmem:[%s1643_s1 + $0x74] ss:$8 sps:$4 sm:$0xff]  }
   0xf   : > { %728 = vmatpush1.bf16.msra.mxu1 %v1222_v10  ;;  %v1250_v29 = vld [vmem:[%s1643_s1 + $0x174] ss:$8 sps:$4 sm:$0xff]   ;;  %v1252_v30 = vld [vmem:[%s1643_s1 + $0x70] ss:$8 sps:$4 sm:$0xff]   ;;  %v1254_v32 = vld [vmem:[%s1643_s1 + $0x84] ss:$8 sps:$4 sm:$0xff]  }
  0x10   : > { %801 = vmatpush1.bf16.msra.mxu0 %v1223_v11  ;;  %729 = vmatprep.subr.bf16.mxu1 %v1224_v12  ;;  %v1253_v31 = vld [vmem:[%s1643_s1 + $0x170] ss:$8 sps:$4 sm:$0xff]   ;;  %v1256_v33 = vld [vmem:[%s1643_s1 + $0x184] ss:$8 sps:$4 sm:$0xff]   ;;  %p211_p3 = scmp.lt.s32.totalorder %s1056_s29, 15 }
  0x11   : > { %802 = vmatprep.subr.bf16.mxu0 %v1226_v13  ;;  %v1258_v34 = vld [vmem:[%s1643_s1 + $0x80] ss:$8 sps:$4 sm:$0xff]   ;;  %v1260_v36 = vld [vmem:[%s1643_s1 + $0x94] ss:$8 sps:$4 sm:$0xff]   ;;  %v1264_v38 = vld [vmem:[%s1643_s1 + $0x90] ss:$8 sps:$4 sm:$0xff]  }
  0x12   : > { %v1259_v35 = vld [vmem:[%s1643_s1 + $0x180] ss:$8 sps:$4 sm:$0xff]   ;;  %v1262_v37 = vld [vmem:[%s1643_s1 + $0x194] ss:$8 sps:$4 sm:$0xff]   ;;  %s1648_s29 = smov (!%p211_p3, %s1056_s29), 15 }
  0x13   : > { %730 = vmatpush1.bf16.msra.mxu1 %v1228_v14  ;;  %v1265_v39 = vld [vmem:[%s1643_s1 + $0x190] ss:$8 sps:$4 sm:$0xff]   ;;  %v1266_v40 = vld [vmem:[%s1643_s1 + $0xa4] ss:$8 sps:$4 sm:$0xff]   ;;  %s1155_s30 = sshll.u32 %s1648_s29, 4  ;;  %s1156_s7 = sshll.u32 %s1648_s29, 3 }
  0x14   : > { %803 = vmatpush1.bf16.msra.mxu0 %v1229_v15  ;;  %731 = vmatprep.subr.bf16.mxu1 %v1230_v16  ;;  %v1268_v41 = vld [vmem:[%s1643_s1 + $0x1a4] ss:$8 sps:$4 sm:$0xff]   ;;  %v1270_v42 = vld [vmem:[%s1643_s1 + $0xa0] ss:$8 sps:$4 sm:$0xff]   ;;  %v1272_v44 = vld [vmem:[%s1643_s1 + $0xb4] ss:$8 sps:$4 sm:$0xff]   ;;  %s1510_s12 = scalar_lea.vmem %s1642_s0, %s1155_s30  ;;  %v313_v16 = vlaneseq  ;;  %s1596_s10 = scalar_lea.vmem %s1645_s3, %s1156_s7 }
  0x15   : > { %804 = vmatprep.subr.bf16.mxu0 %v1232_v17  ;;  %v1271_v43 = vld [vmem:[%s1643_s1 + $0x1a0] ss:$8 sps:$4 sm:$0xff]   ;;  %v1274_v45 = vld [vmem:[%s1643_s1 + $0x1b4] ss:$8 sps:$4 sm:$0xff]   ;;  %v1276_v46 = vld [vmem:[%s1643_s1 + $0xb0] ss:$8 sps:$4 sm:$0xff]   ;;  %s1612_s16 = scalar_lea.vmem %s1646_s4, %s1156_s7 }
  0x16   : > { %v1277_v47 = vld [vmem:[%s1643_s1 + $0x1b0] ss:$8 sps:$4 sm:$0xff]   ;;  %v1278_v48 = vld [vmem:[%s1643_s1 + $0xc4] ss:$8 sps:$4 sm:$0xff]   ;;  %v1282_v52 = vld [vmem:[%s1643_s1 + $0xc0] ss:$8 sps:$4 sm:$0xff]  }
  0x17   : > { %732 = vmatpush1.bf16.msra.mxu1 %v1234_v18  ;;  %v1304_v49 = vld [vmem:[%s1510_s12 + $0x4] ss:$16 sps:$4 sm:$0xff]   ;;  %v1307_v51 = vld [vmem:[%s1510_s12 + $0xc] ss:$16 sps:$4 sm:$0xff]   ;;  %v1283_v53 = vld [vmem:[%s1643_s1 + $0x1c0] ss:$8 sps:$4 sm:$0xff]  }
  0x18   : > { %805 = vmatpush1.bf16.msra.mxu0 %v1235_v19  ;;  %733 = vmatprep.subr.bf16.mxu1 %v1236_v20  ;;  %v1280_v50 = vld [vmem:[%s1643_s1 + $0x1c4] ss:$8 sps:$4 sm:$0xff]   ;;  %v1284_v54 = vld [vmem:[%s1643_s1 + $0xd4] ss:$8 sps:$4 sm:$0xff]   ;;  %v1288_v56 = vld [vmem:[%s1643_s1 + $0xd0] ss:$8 sps:$4 sm:$0xff]  }
  0x19   : > { %806 = vmatprep.subr.bf16.mxu0 %v1238_v21  ;;  %755 = vmatprep.mubr.bf16.mxu1 %v1304_v49  ;;  %v1286_v55 = vld [vmem:[%s1643_s1 + $0x1d4] ss:$8 sps:$4 sm:$0xff]   ;;  %v1289_v57 = vld [vmem:[%s1643_s1 + $0x1d0] ss:$8 sps:$4 sm:$0xff]   ;;  %v1290_v58 = vld [vmem:[%s1643_s1 + $0xe4] ss:$8 sps:$4 sm:$0xff]  }
  0x1a   : > { %828 = vmatprep.mubr.bf16.mxu0 %v1307_v51  ;;  %v1292_v59 = vld [vmem:[%s1643_s1 + $0x1e4] ss:$8 sps:$4 sm:$0xff]   ;;  %v1294_v60 = vld [vmem:[%s1643_s1 + $0xe0] ss:$8 sps:$4 sm:$0xff]   ;;  %v1296_v62 = vld [vmem:[%s1643_s1 + $0xf4] ss:$8 sps:$4 sm:$0xff]  }
  0x1b   : > { %734 = vmatpush1.bf16.msra.mxu1 %v1240_v22  ;;  %v1295_v61 = vld [vmem:[%s1643_s1 + $0x1e0] ss:$8 sps:$4 sm:$0xff]   ;;  %v1298_v63 = vld [vmem:[%s1643_s1 + $0x1f4] ss:$8 sps:$4 sm:$0xff]   ;;  %v1300_v0 = vld [vmem:[%s1643_s1 + $0xf0] ss:$8 sps:$4 sm:$0xff]  }
  0x1c   : > { %807 = vmatpush1.bf16.msra.mxu0 %v1241_v23  ;;  %735 = vmatprep.subr.bf16.mxu1 %v1242_v24  ;;  %v1301_v1 = vld [vmem:[%s1643_s1 + $0x1f0] ss:$8 sps:$4 sm:$0xff]   ;;  %v1308_v4 = vld [vmem:[%s1510_s12 + $0x24] ss:$16 sps:$4 sm:$0xff]   ;;  %v1310_v5 = vld [vmem:[%s1510_s12 + $0x2c] ss:$16 sps:$4 sm:$0xff]  }
  0x1d   : > { %808 = vmatprep.subr.bf16.mxu0 %v1244_v25  ;;  %v1302_v2 = vld [vmem:[%s1510_s12] ss:$16 sps:$4 sm:$0xff]   ;;  %v1305_v3 = vld [vmem:[%s1510_s12 + $0x8] ss:$16 sps:$4 sm:$0xff]   ;;  %v1314_v8 = vld [vmem:[%s1510_s12 + $0x44] ss:$16 sps:$4 sm:$0xff]  }
  0x1e   : > { %v1312_v6 = vld [vmem:[%s1510_s12 + $0x20] ss:$16 sps:$4 sm:$0xff]   ;;  %v1313_v7 = vld [vmem:[%s1510_s12 + $0x28] ss:$16 sps:$4 sm:$0xff]   ;;  %v1316_v9 = vld [vmem:[%s1510_s12 + $0x4c] ss:$16 sps:$4 sm:$0xff]  }
  0x1f   : > { %736 = vmatpush1.bf16.msra.mxu1 %v1246_v26  ;;  %v1318_v10 = vld [vmem:[%s1510_s12 + $0x40] ss:$16 sps:$4 sm:$0xff]   ;;  %v1319_v11 = vld [vmem:[%s1510_s12 + $0x48] ss:$16 sps:$4 sm:$0xff]   ;;  %v1320_v12 = vld [vmem:[%s1510_s12 + $0x64] ss:$16 sps:$4 sm:$0xff]  }
  0x20   : > { %809 = vmatpush1.bf16.msra.mxu0 %v1247_v27  ;;  %737 = vmatprep.subr.bf16.mxu1 %v1248_v28  ;;  %v1322_v13 = vld [vmem:[%s1510_s12 + $0x6c] ss:$16 sps:$4 sm:$0xff]   ;;  %v1324_v14 = vld [vmem:[%s1510_s12 + $0x60] ss:$16 sps:$4 sm:$0xff]   ;;  %v1325_v15 = vld [vmem:[%s1510_s12 + $0x68] ss:$16 sps:$4 sm:$0xff]  }
  0x21   : > { %810 = vmatprep.subr.bf16.mxu0 %v1250_v29  ;;  %v314_v17 = vshrl.u32 %v313_v16, 7  ;;  %v311_v19 = vld [vmem:[%s1644_s2] sm:$0x3] }
  0x22   : > { %v885_v25 = vld [vmem:[%s1596_s10] sm:$0xff] }
  0x23   : > { %738 = vmatpush1.bf16.msra.mxu1 %v1252_v30  ;;  %v315_v18 = vsub.s32 0, %v314_v17  ;;  %v319_v20 = vsub.s32 1, %v314_v17 }
  0x24   : > { %811 = vmatpush1.bf16.msra.mxu0 %v1253_v31  ;;  %739 = vmatprep.subr.bf16.mxu1 %v1254_v32  ;;  %v886_v32 = vld [vmem:[%s1596_s10 + $0x8] sm:$0xff] }
  0x25   : > { %812 = vmatprep.subr.bf16.mxu0 %v1256_v33  ;;  %v1589_v21 = vrot.slane %v311_v19, %v315_v18  ;;  %v1598_v22 = vrot.slane %v311_v19, %v319_v20 }
  0x27   : > { %740 = vmatpush1.bf16.msra.mxu1 %v1258_v34  ;;  %v893_v34 = vunpack.c.l.bf16 %v885_v25 }
  0x28   : > { %813 = vmatpush1.bf16.msra.mxu0 %v1259_v35  ;;  %741 = vmatprep.subr.bf16.mxu1 %v1260_v36 }
  0x29   : > { %814 = vmatprep.subr.bf16.mxu0 %v1262_v37 }
  0x2b   : > { %742 = vmatpush1.bf16.msra.mxu1 %v1264_v38 }
  0x2c   : > { %815 = vmatpush1.bf16.msra.mxu0 %v1265_v39  ;;  %743 = vmatprep.subr.bf16.mxu1 %v1266_v40  ;;  %v894_v39 = vunpack.c.h.bf16 %v885_v25 }
  0x2d   : > { %816 = vmatprep.subr.bf16.mxu0 %v1268_v41 }
  0x2f   : > { %744 = vmatpush1.bf16.msra.mxu1 %v1270_v42 }
  0x30   : > { %817 = vmatpush1.bf16.msra.mxu0 %v1271_v43  ;;  %745 = vmatprep.subr.bf16.mxu1 %v1272_v44  ;;  %v895_v43 = vunpack.c.l.bf16 %v886_v32 }
  0x31   : > { %818 = vmatprep.subr.bf16.mxu0 %v1274_v45 }
  0x33   : > { %746 = vmatpush1.bf16.msra.mxu1 %v1276_v46  ;;  %v896_v46 = vunpack.c.h.bf16 %v886_v32 }
  0x34   : > { %819 = vmatpush1.bf16.msra.mxu0 %v1277_v47  ;;  %747 = vmatprep.subr.bf16.mxu1 %v1278_v48 }
  0x35   : > { %820 = vmatprep.subr.bf16.mxu0 %v1280_v50 }
  0x37   : > { %748 = vmatpush1.bf16.msra.mxu1 %v1282_v52 }
  0x38   : > { %821 = vmatpush1.bf16.msra.mxu0 %v1283_v53  ;;  %749 = vmatprep.subr.bf16.mxu1 %v1284_v54  ;;  %v887_v53 = vld [vmem:[%s1596_s10 + $0x10] sm:$0xff] }
  0x39   : > { %822 = vmatprep.subr.bf16.mxu0 %v1286_v55 }
  0x3b   : > { %750 = vmatpush1.bf16.msra.mxu1 %v1288_v56 }
  0x3c   : > { %823 = vmatpush1.bf16.msra.mxu0 %v1289_v57  ;;  %751 = vmatprep.subr.bf16.mxu1 %v1290_v58 }
  0x3d   : > { %824 = vmatprep.subr.bf16.mxu0 %v1292_v59 }
  0x3f   : > { %752 = vmatpush1.bf16.msra.mxu1 %v1294_v60 }
  0x40   : > { %825 = vmatpush1.bf16.msra.mxu0 %v1295_v61  ;;  %753 = vmatprep.subr.bf16.mxu1 %v1296_v62 }
  0x41   : > { %826 = vmatprep.subr.bf16.mxu0 %v1298_v63  ;;  %v888_v63 = vld [vmem:[%s1596_s10 + $0x18] sm:$0xff] }
  0x43   : > { %754 = vmatpush1.bf16.msra.mxu1 %v1300_v0 }
  0x44   : > { %827 = vmatpush1.bf16.msra.mxu0 %v1301_v1  ;;  %v897_v1 = vunpack.c.l.bf16 %v887_v53 }
  0x46   : > { %756 = vmatmul.mubr.bf16.vlgmr.msra.gmra.mrb[0].mxu1 %v1302_v2 }
  0x47   : > { %829 = vmatmul.mubr.bf16.vlgmr.msra.gmra.mrb[0].mxu0 %v1305_v3  ;;  %765 = vmatprep.mubr.bf16.mxu1 %v1308_v4 }
  0x48   : > { %838 = vmatprep.mubr.bf16.mxu0 %v1310_v5 }
  0x4e   : > { %766 = vmatmul.mubr.bf16.gmra.mrb[4].mxu1 %v1312_v6 }
  0x4f   : > { %839 = vmatmul.mubr.bf16.gmra.mrb[4].mxu0 %v1313_v7  ;;  %775 = vmatprep.mubr.bf16.mxu1 %v1314_v8  ;;  %v898_v7 = vunpack.c.h.bf16 %v887_v53 }
  0x50   : > { %848 = vmatprep.mubr.bf16.mxu0 %v1316_v9 }
  0x56   : > { %776 = vmatmul.mubr.bf16.gmra.mrb[8].mxu1 %v1318_v10 }
  0x57   : > { %849 = vmatmul.mubr.bf16.gmra.mrb[8].mxu0 %v1319_v11  ;;  %785 = vmatprep.mubr.bf16.mxu1 %v1320_v12  ;;  %v899_v11 = vunpack.c.l.bf16 %v888_v63 }
  0x58   : > { %858 = vmatprep.mubr.bf16.mxu0 %v1322_v13 }
  0x5e   : > { %786 = vmatmul.mubr.bf16.gmra.mrb[12].mxu1 %v1324_v14  ;;  %v900_v14 = vunpack.c.h.bf16 %v888_v63 }
  0x5f   : > { %859 = vmatmul.mubr.bf16.gmra.mrb[12].mxu0 %v1325_v15 }
 0x119   : > { %v757_v23 = vpop.f32.mrb[0].mxu1 }
 0x11a   : > { %v830_v24 = vpop.f32.mrb[0].mxu0  ;;  %v758_v26 = vadd.f32 %v757_v23, %v1589_v21  ;;  %v759_v27 = vpop.f32.mrb[1].mxu1  ;;  %v889_v23 = vld [vmem:[%s1596_s10 + $0x20] sm:$0xff] }
 0x11b   : > { %v832_v28 = vpop.f32.mrb[1].mxu0  ;;  %v760_v29 = vadd.f32 %v759_v27, %v1598_v22  ;;  %v761_v30 = vpop.f32.mrb[2].mxu1 }
 0x11c   : > { %v834_v31 = vpop.f32.mrb[2].mxu0  ;;  %v831_v33 = vadd.f32 %v830_v24, %v758_v26  ;;  %v762_v35 = vadd.f32 %v761_v30, %v1589_v21  ;;  %v763_v36 = vpop.f32.mrb[3].mxu1 }
 0x11d   : > { %v836_v37 = vpop.f32.mrb[3].mxu0  ;;  %v833_v38 = vadd.f32 %v832_v28, %v760_v29  ;;  %v764_v40 = vadd.f32 %v763_v36, %v1598_v22 }
 0x11e   : > { %v869_v41 = vmax.f32 %v831_v33, 0.0  ;;  %v835_v42 = vadd.f32 %v834_v31, %v762_v35  ;;  %v890_v33 = vld [vmem:[%s1596_s10 + $0x28] sm:$0xff]  ;;  %v901_v35 = vunpack.c.l.bf16 %v889_v23 }
 0x11f   : > { %v870_v44 = vmax.f32 %v833_v38, 0.0  ;;  %v837_v45 = vadd.f32 %v836_v37, %v764_v40 }
 0x120   : > { %v909_v47 = vadd.f32 %v893_v34, %v869_v41  ;;  %v871_v48 = vmax.f32 %v835_v42, 0.0  ;;  %v902_v41 = vunpack.c.h.bf16 %v889_v23 }
 0x121   : > { %v910_v49 = vadd.f32 %v894_v39, %v870_v44  ;;  %v872_v50 = vmax.f32 %v837_v45, 0.0  ;;  %v767_v51 = vpop.f32.mrb[4].mxu1  ;;  %v903_v45 = vunpack.c.l.bf16 %v890_v33 }
 0x122   : > { %v840_v52 = vpop.f32.mrb[4].mxu0  ;;  %v911_v54 = vadd.f32 %v895_v43, %v871_v48  ;;  %v768_v55 = vadd.f32 %v767_v51, %v1589_v21  ;;  %v769_v56 = vpop.f32.mrb[5].mxu1  ;;  %v904_v48 = vunpack.c.h.bf16 %v890_v33 }
 0x123   : > { %v842_v57 = vpop.f32.mrb[5].mxu0  ;;  %v1158_v58 = vpack.c.bf16 %v910_v49, %v909_v47  ;;  %v912_v59 = vadd.f32 %v896_v46, %v872_v50  ;;  %v770_v60 = vadd.f32 %v769_v56, %v1598_v22  ;;  %v771_v61 = vpop.f32.mrb[6].mxu1 }
 0x124   : > { %v844_v62 = vpop.f32.mrb[6].mxu0  ;;  %v841_v0 = vadd.f32 %v840_v52, %v768_v55  ;;  %v772_v2 = vadd.f32 %v771_v61, %v1589_v21  ;;  %v773_v3 = vpop.f32.mrb[7].mxu1  ;;  %v891_v55 = vld [vmem:[%s1596_s10 + $0x30] sm:$0xff] }
 0x125   : > { %v846_v4 = vpop.f32.mrb[7].mxu0  ;;  %973 = vst [vmem:[%s1612_s16] sm:$0xff] %v1158_v58  ;;  %v1159_v5 = vpack.c.bf16 %v912_v59, %v911_v54  ;;  %v843_v6 = vadd.f32 %v842_v57, %v770_v60  ;;  %v774_v8 = vadd.f32 %v773_v3, %v1598_v22  ;;  %v905_v3 = vunpack.c.l.bf16 %v891_v55 }
 0x126   : > { %v873_v9 = vmax.f32 %v841_v0, 0.0  ;;  %v845_v10 = vadd.f32 %v844_v62, %v772_v2 }
 0x127   : > { %974 = vst [vmem:[%s1612_s16 + $0x8] sm:$0xff] %v1159_v5  ;;  %v874_v12 = vmax.f32 %v843_v6, 0.0  ;;  %v847_v13 = vadd.f32 %v846_v4, %v774_v8 }
 0x128   : > { %v913_v15 = vadd.f32 %v897_v1, %v873_v9  ;;  %v875_v16 = vmax.f32 %v845_v10, 0.0  ;;  %v892_v1 = vld [vmem:[%s1596_s10 + $0x38] sm:$0xff]  ;;  %v906_v9 = vunpack.c.h.bf16 %v891_v55 }
 0x129   : > { %v914_v17 = vadd.f32 %v898_v7, %v874_v12  ;;  %v876_v18 = vmax.f32 %v847_v13, 0.0  ;;  %v777_v19 = vpop.f32.mrb[8].mxu1  ;;  %v907_v13 = vunpack.c.l.bf16 %v892_v1 }
 0x12a   : > { %v850_v20 = vpop.f32.mrb[8].mxu0  ;;  %v915_v24 = vadd.f32 %v899_v11, %v875_v16  ;;  %v778_v25 = vadd.f32 %v777_v19, %v1589_v21  ;;  %v779_v26 = vpop.f32.mrb[9].mxu1  ;;  %v908_v16 = vunpack.c.h.bf16 %v892_v1 }
 0x12b   : > { %v852_v27 = vpop.f32.mrb[9].mxu0  ;;  %v1160_v28 = vpack.c.bf16 %v914_v17, %v913_v15  ;;  %v916_v29 = vadd.f32 %v900_v14, %v876_v18  ;;  %v780_v30 = vadd.f32 %v779_v26, %v1598_v22  ;;  %v781_v31 = vpop.f32.mrb[10].mxu1 }
 0x12c   : > { %v854_v32 = vpop.f32.mrb[10].mxu0  ;;  %v851_v34 = vadd.f32 %v850_v20, %v778_v25  ;;  %v782_v36 = vadd.f32 %v781_v31, %v1589_v21  ;;  %v783_v37 = vpop.f32.mrb[11].mxu1 }
 0x12d   : > { %v856_v38 = vpop.f32.mrb[11].mxu0  ;;  %975 = vst [vmem:[%s1612_s16 + $0x10] sm:$0xff] %v1160_v28  ;;  %v1161_v39 = vpack.c.bf16 %v916_v29, %v915_v24  ;;  %v853_v40 = vadd.f32 %v852_v27, %v780_v30  ;;  %v784_v42 = vadd.f32 %v783_v37, %v1598_v22 }
 0x12e   : > { %v877_v43 = vmax.f32 %v851_v34, 0.0  ;;  %v855_v44 = vadd.f32 %v854_v32, %v782_v36 }
 0x12f   : > { %976 = vst [vmem:[%s1612_s16 + $0x18] sm:$0xff] %v1161_v39  ;;  %v878_v46 = vmax.f32 %v853_v40, 0.0  ;;  %v857_v47 = vadd.f32 %v856_v38, %v784_v42 }
 0x130   : > { %v917_v49 = vadd.f32 %v901_v35, %v877_v43  ;;  %v879_v50 = vmax.f32 %v855_v44, 0.0 }
 0x131   : > { %v918_v51 = vadd.f32 %v902_v41, %v878_v46  ;;  %v880_v52 = vmax.f32 %v857_v47, 0.0  ;;  %v787_v53 = vpop.f32.mrb[12].mxu1 }
 0x132   : > { %v860_v54 = vpop.f32.mrb[12].mxu0  ;;  %v919_v56 = vadd.f32 %v903_v45, %v879_v50  ;;  %v788_v57 = vadd.f32 %v787_v53, %v1589_v21  ;;  %v789_v58 = vpop.f32.mrb[13].mxu1 }
 0x133   : > { %v862_v59 = vpop.f32.mrb[13].mxu0  ;;  %v1162_v60 = vpack.c.bf16 %v918_v51, %v917_v49  ;;  %v920_v61 = vadd.f32 %v904_v48, %v880_v52  ;;  %v790_v62 = vadd.f32 %v789_v58, %v1598_v22  ;;  %v791_v63 = vpop.f32.mrb[14].mxu1 }
 0x134   : > { %v864_v0 = vpop.f32.mrb[14].mxu0  ;;  %v861_v2 = vadd.f32 %v860_v54, %v788_v57  ;;  %v792_v4 = vadd.f32 %v791_v63, %v1589_v21  ;;  %v793_v5 = vpop.f32.mrb[15].mxu1 }
 0x135   : > { %v866_v6 = vpop.f32.mrb[15].mxu0  ;;  %977 = vst [vmem:[%s1612_s16 + $0x20] sm:$0xff] %v1162_v60  ;;  %v1163_v7 = vpack.c.bf16 %v920_v61, %v919_v56  ;;  %v863_v8 = vadd.f32 %v862_v59, %v790_v62  ;;  %v794_v10 = vadd.f32 %v793_v5, %v1598_v22 }
 0x136   : > { %v881_v11 = vmax.f32 %v861_v2, 0.0  ;;  %v865_v12 = vadd.f32 %v864_v0, %v792_v4 }
 0x137   : > { %978 = vst [vmem:[%s1612_s16 + $0x28] sm:$0xff] %v1163_v7  ;;  %v882_v14 = vmax.f32 %v863_v8, 0.0  ;;  %v867_v15 = vadd.f32 %v866_v6, %v794_v10 }
 0x138   : > { %v921_v17 = vadd.f32 %v905_v3, %v881_v11  ;;  %v883_v18 = vmax.f32 %v865_v12, 0.0 }
 0x139   : > { %v922_v21 = vadd.f32 %v906_v9, %v882_v14  ;;  %v884_v19 = vmax.f32 %v867_v15, 0.0 }
 0x13a   : > { %v923_v20 = vadd.f32 %v907_v13, %v883_v18 }
 0x13b   : > { %v1164_v23 = vpack.c.bf16 %v922_v21, %v921_v17  ;;  %v924_v24 = vadd.f32 %v908_v16, %v884_v19 }
 0x13d   : > { %979 = vst [vmem:[%s1612_s16 + $0x30] sm:$0xff] %v1164_v23  ;;  %v1165_v25 = vpack.c.bf16 %v924_v24, %v923_v20 }
 0x13f   : > { %980 = vst [vmem:[%s1612_s16 + $0x38] sm:$0xff] %v1165_v25 }
 0x140 PF: > { %s14_s15 = sadd.s32 1, %s1332_s15  }
 0x141   : > { %p11_p4 = scmp.ge.s32.totalorder %s14_s15, 4  }
 0x143   :  { %13 = sbr.rel (!%p11_p4) target bundleno = 1 (0x1), region = 69 }

// kernel: fpn_forward.9
= control target key start
LH: loop header
LB: loop body
LE: loop exit
PB: predicated region body
PF: predicated region fallthrough
CT: control target
= control target key end

     0   :  { %s4907_s12 = smov 0   ;;  %s6199_s0 = inlined_call_operand.vmem [shape: bf16[2,10,10,256], index: 0, kind: input, shape index: {}]   ;;  %s6200_s1 = inlined_call_operand.vmem [shape: bf16[3,3,256,256], index: 1, kind: input, shape index: {}]   ;;  %s6201_s2 = inlined_call_operand.vmem [shape: f32[1,256], index: 2, kind: input, shape index: {}]   ;;  %s6202_s3 = inlined_call_operand.vmem [shape: bf16[2,8,4,256], index: 3, kind: output, shape index: {}]  }
   0x1 LB: > { %s3625_s13 = sadd.s32 4294967295, %s4885_s12   ;;  %p3629_p0 = scmp.ge.s32.totalorder %s4885_s12, 1  ;;  %s4885_s12 = sphi %s4907_s12, %s13_s12  }
   0x2   : > { %p137_p1 = scmp.lt.s32.totalorder %s4885_s12, 3 }
   0x4   : > { %p138_p2 = pnand %p3629_p0, %p137_p1 }
   0x5   : > { %v4429_v0 = vld [vmem:[%s6200_s1 + $0x4] ss:$8 sps:$4 sm:$0xff] (!%p138_p2)   ;;  %v4433_v2 = vld [vmem:[%s6200_s1] ss:$8 sps:$4 sm:$0xff] (!%p138_p2)   ;;  %v4435_v4 = vld [vmem:[%s6200_s1 + $0x14] ss:$8 sps:$4 sm:$0xff] (!%p138_p2)  }
   0x6   : > { %141 = sbr.rel (%p138_p2) target bundleno = 559 (0x22f), region = 32  ;;  %v4431_v1 = vld [vmem:[%s6200_s1 + $0x404] ss:$8 sps:$4 sm:$0xff] (!%p138_p2)   ;;  %413 = vmatprep.subr.bf16.mxu1 (!%p138_p2), %v4429_v0  ;;  %v4434_v3 = vld [vmem:[%s6200_s1 + $0x400] ss:$8 sps:$4 sm:$0xff] (!%p138_p2)   ;;  %p161_p3 = scmp.lt.s32.totalorder (!%p138_p2), %s3625_s13, 1 }
   0x7   : > { %1862 = vmatprep.subr.bf16.mxu0 (!%p138_p2), %v4431_v1  ;;  %414 = vmatpush1.bf16.msra.mxu1 (!%p138_p2), %v4433_v2  ;;  %v4437_v5 = vld [vmem:[%s6200_s1 + $0x414] ss:$8 sps:$4 sm:$0xff] (!%p138_p2)   ;;  %v4439_v6 = vld [vmem:[%s6200_s1 + $0x10] ss:$8 sps:$4 sm:$0xff] (!%p138_p2)   ;;  %v4441_v8 = vld [vmem:[%s6200_s1 + $0x24] ss:$8 sps:$4 sm:$0xff] (!%p138_p2)  }
   0x8   : > { %1863 = vmatpush1.bf16.msra.mxu0 (!%p138_p2), %v4434_v3  ;;  %415 = vmatprep.subr.bf16.mxu1 (!%p138_p2), %v4435_v4  ;;  %v4440_v7 = vld [vmem:[%s6200_s1 + $0x410] ss:$8 sps:$4 sm:$0xff] (!%p138_p2)   ;;  %v4443_v9 = vld [vmem:[%s6200_s1 + $0x424] ss:$8 sps:$4 sm:$0xff] (!%p138_p2)   ;;  %v4445_v10 = vld [vmem:[%s6200_s1 + $0x20] ss:$8 sps:$4 sm:$0xff] (!%p138_p2)  }
   0x9   : > { %1864 = vmatprep.subr.bf16.mxu0 (!%p138_p2), %v4437_v5  ;;  %v4446_v11 = vld [vmem:[%s6200_s1 + $0x420] ss:$8 sps:$4 sm:$0xff] (!%p138_p2)   ;;  %v4447_v12 = vld [vmem:[%s6200_s1 + $0x34] ss:$8 sps:$4 sm:$0xff] (!%p138_p2)   ;;  %v4451_v14 = vld [vmem:[%s6200_s1 + $0x30] ss:$8 sps:$4 sm:$0xff] (!%p138_p2)  }
   0xa   : > { %v4449_v13 = vld [vmem:[%s6200_s1 + $0x434] ss:$8 sps:$4 sm:$0xff] (!%p138_p2)   ;;  %v4452_v15 = vld [vmem:[%s6200_s1 + $0x430] ss:$8 sps:$4 sm:$0xff] (!%p138_p2)   ;;  %v4453_v16 = vld [vmem:[%s6200_s1 + $0x44] ss:$8 sps:$4 sm:$0xff] (!%p138_p2)  }
   0xb   : > { %416 = vmatpush1.bf16.msra.mxu1 (!%p138_p2), %v4439_v6  ;;  %v4455_v17 = vld [vmem:[%s6200_s1 + $0x444] ss:$8 sps:$4 sm:$0xff] (!%p138_p2)   ;;  %v4457_v18 = vld [vmem:[%s6200_s1 + $0x40] ss:$8 sps:$4 sm:$0xff] (!%p138_p2)   ;;  %v4459_v20 = vld [vmem:[%s6200_s1 + $0x54] ss:$8 sps:$4 sm:$0xff] (!%p138_p2)  }
   0xc   : > { %1865 = vmatpush1.bf16.msra.mxu0 (!%p138_p2), %v4440_v7  ;;  %417 = vmatprep.subr.bf16.mxu1 (!%p138_p2), %v4441_v8  ;;  %v4458_v19 = vld [vmem:[%s6200_s1 + $0x440] ss:$8 sps:$4 sm:$0xff] (!%p138_p2)   ;;  %v4461_v21 = vld [vmem:[%s6200_s1 + $0x454] ss:$8 sps:$4 sm:$0xff] (!%p138_p2)   ;;  %v4463_v22 = vld [vmem:[%s6200_s1 + $0x50] ss:$8 sps:$4 sm:$0xff] (!%p138_p2)  }
   0xd   : > { %1866 = vmatprep.subr.bf16.mxu0 %v4443_v9  ;;  %v4464_v23 = vld [vmem:[%s6200_s1 + $0x450] ss:$8 sps:$4 sm:$0xff]   ;;  %v4465_v24 = vld [vmem:[%s6200_s1 + $0x64] ss:$8 sps:$4 sm:$0xff]   ;;  %v4469_v26 = vld [vmem:[%s6200_s1 + $0x60] ss:$8 sps:$4 sm:$0xff]  }
   0xe   : > { %v4467_v25 = vld [vmem:[%s6200_s1 + $0x464] ss:$8 sps:$4 sm:$0xff]   ;;  %v4470_v27 = vld [vmem:[%s6200_s1 + $0x460] ss:$8 sps:$4 sm:$0xff]   ;;  %v4471_v28 = vld [vmem:[%s6200_s1 + $0x74] ss:$8 sps:$4 sm:$0xff]  }
   0xf   : > { %418 = vmatpush1.bf16.msra.mxu1 %v4445_v10  ;;  %v4473_v29 = vld [vmem:[%s6200_s1 + $0x474] ss:$8 sps:$4 sm:$0xff]   ;;  %v4475_v30 = vld [vmem:[%s6200_s1 + $0x70] ss:$8 sps:$4 sm:$0xff]   ;;  %v4477_v32 = vld [vmem:[%s6200_s1 + $0x84] ss:$8 sps:$4 sm:$0xff]  }
  0x10   : > { %1867 = vmatpush1.bf16.msra.mxu0 %v4446_v11  ;;  %419 = vmatprep.subr.bf16.mxu1 %v4447_v12  ;;  %v4476_v31 = vld [vmem:[%s6200_s1 + $0x470] ss:$8 sps:$4 sm:$0xff]   ;;  %v4479_v33 = vld [vmem:[%s6200_s1 + $0x484] ss:$8 sps:$4 sm:$0xff]   ;;  %v4481_v34 = vld [vmem:[%s6200_s1 + $0x80] ss:$8 sps:$4 sm:$0xff]  }
  0x11   : > { %1868 = vmatprep.subr.bf16.mxu0 %v4449_v13  ;;  %v4482_v35 = vld [vmem:[%s6200_s1 + $0x480] ss:$8 sps:$4 sm:$0xff]   ;;  %v4483_v36 = vld [vmem:[%s6200_s1 + $0x94] ss:$8 sps:$4 sm:$0xff]   ;;  %s6208_s13 = smov (!%p161_p3, %s3625_s13), 1  ;;  %vm2353_vm3 = vcmask 1042432  }
  0x12   : > { %v4485_v37 = vld [vmem:[%s6200_s1 + $0x494] ss:$8 sps:$4 sm:$0xff]   ;;  %v4487_v38 = vld [vmem:[%s6200_s1 + $0x90] ss:$8 sps:$4 sm:$0xff]   ;;  %v4489_v40 = vld [vmem:[%s6200_s1 + $0xa4] ss:$8 sps:$4 sm:$0xff]  }
  0x13   : > { %420 = vmatpush1.bf16.msra.mxu1 %v4451_v14  ;;  %v4488_v39 = vld [vmem:[%s6200_s1 + $0x490] ss:$8 sps:$4 sm:$0xff]   ;;  %s4420_s21 = smul.u32 160, %s6208_s13  ;;  %v4491_v41 = vld [vmem:[%s6200_s1 + $0x4a4] ss:$8 sps:$4 sm:$0xff]   ;;  %vm2354_vm4 = vcmask 1046532  }
  0x14   : > { %1869 = vmatpush1.bf16.msra.mxu0 %v4452_v15  ;;  %421 = vmatprep.subr.bf16.mxu1 %v4453_v16  ;;  %v4493_v42 = vld [vmem:[%s6200_s1 + $0xa0] ss:$8 sps:$4 sm:$0xff]   ;;  %v4495_v44 = vld [vmem:[%s6200_s1 + $0xb4] ss:$8 sps:$4 sm:$0xff]   ;;  %v4499_v46 = vld [vmem:[%s6200_s1 + $0xb0] ss:$8 sps:$4 sm:$0xff]  }
  0x15   : > { %1870 = vmatprep.subr.bf16.mxu0 %v4455_v17  ;;  %v4494_v43 = vld [vmem:[%s6200_s1 + $0x4a0] ss:$8 sps:$4 sm:$0xff]   ;;  %s5060_s5 = scalar_lea.vmem %s6199_s0, %s4420_s21  ;;  %v4497_v45 = vld [vmem:[%s6200_s1 + $0x4b4] ss:$8 sps:$4 sm:$0xff]   ;;  %v4500_v47 = vld [vmem:[%s6200_s1 + $0x4b0] ss:$8 sps:$4 sm:$0xff]  }
  0x16   : > { %v5072_v48 = vld [vmem:[%s5060_s5] sm:$0xff]  ;;  %v5075_v49 = vld [vmem:[%s5060_s5 + $0x10] sm:$0xff]  ;;  %vm1176_vm0 = vsmask.f32 3328  ;;  %v1159_v56 = vld [vmem:[%s5060_s5 + $0x18] sm:$0x11] }
  0x17   : > { %422 = vmatpush1.bf16.msra.mxu1 %v4457_v18  ;;  %v5078_v50 = vld [vmem:[%s5060_s5 + $0x20] sm:$0xff]  ;;  %v3634_v53 = vcombine.high %v5072_v48, %v5075_v49  ;;  %v1194_v55 = vshrl.u32 %v5075_v49, 16  ;;  %v1161_v57 = vld [vmem:[%s5060_s5 + $0x28] sm:$0x11]  ;;  %v1197_v58 = vshll.u32 %v5075_v49, 16  ;;  %v1203_v60 = vshll.u32 %v1159_v56, 16  ;;  %vm5583_vm5 = vmor %vm2353_vm3, %vm2354_vm4 }
  0x18   : > { %1871 = vmatpush1.bf16.msra.mxu0 %v4458_v19  ;;  %423 = vmatprep.subr.bf16.mxu1 %v4459_v20  ;;  %v4501_v51 = vld [vmem:[%s6200_s1 + $0xc4] ss:$8 sps:$4 sm:$0xff]   ;;  %v3705_v54 = vcombine.low %v5075_v49, %v5078_v50  ;;  %v1208_v61 = vshrl.u32 %v5078_v50, 16  ;;  %v1211_v62 = vshll.u32 %v5078_v50, 16  ;;  %vm1177_vm1 = vsmask.f32 7440 }
  0x19   : > { %1872 = vmatprep.subr.bf16.mxu0 %v4461_v21  ;;  %v4503_v52 = vld [vmem:[%s6200_s1 + $0x4c4] ss:$8 sps:$4 sm:$0xff]   ;;  %445 = vmatprep.mubr.bf16.mxu1 %v3634_v53  ;;  %v1196_v59 = vrot.slane %v1194_v55, 4  ;;  %v1199_v63 = vrot.slane %v1197_v58, 5  ;;  %v1217_v0 = vshll.u32 %v1161_v57, 16  ;;  %v1205_v8 = vrot.slane %v1203_v60, 5  ;;  %vm5110_vm2 = vmor %vm1176_vm0, %vm1177_vm1 }
  0x1a   : > { %v4505_v1 = vld [vmem:[%s6200_s1 + $0xc0] ss:$8 sps:$4 sm:$0xff]   ;;  %v1210_v3 = vrot.slane %v1208_v61, 4  ;;  %v1213_v4 = vrot.slane %v1211_v62, 5  ;;  %v4507_v5 = vld [vmem:[%s6200_s1 + $0xd4] ss:$8 sps:$4 sm:$0xff]  }
  0x1b   : > { %424 = vmatpush1.bf16.msra.mxu1 %v4463_v22  ;;  %v4506_v2 = vld [vmem:[%s6200_s1 + $0x4c0] ss:$8 sps:$4 sm:$0xff]   ;;  %v4509_v6 = vld [vmem:[%s6200_s1 + $0x4d4] ss:$8 sps:$4 sm:$0xff]   ;;  %v1200_v7 = vor.u32 %v1199_v63, %v1196_v59  ;;  %v1219_v11 = vrot.slane %v1217_v0, 5  ;;  %s4259_s15 = sshll.u32 %s6208_s13, 5 }
  0x1c   : > { %1873 = vmatpush1.bf16.msra.mxu0 %v4464_v23  ;;  %425 = vmatprep.subr.bf16.mxu1 %v4465_v24  ;;  %v1214_v10 = vor.u32 %v1213_v4, %v1210_v3  ;;  %v4511_v12 = vld [vmem:[%s6200_s1 + $0xd0] ss:$8 sps:$4 sm:$0xff]   ;;  %v4513_v16 = vld [vmem:[%s6200_s1 + $0xe4] ss:$8 sps:$4 sm:$0xff]   ;;  %v4517_v20 = vld [vmem:[%s6200_s1 + $0xe0] ss:$8 sps:$4 sm:$0xff]   ;;  %s6172_s17 = scalar_lea.vmem %s6202_s3, %s4259_s15 }
  0x1d   : > { %1874 = vmatprep.subr.bf16.mxu0 %v4467_v25  ;;  %v1201_v13 = vrot.slane %v1200_v7, 4  ;;  %v4512_v14 = vld [vmem:[%s6200_s1 + $0x4d0] ss:$8 sps:$4 sm:$0xff]   ;;  %v4515_v17 = vld [vmem:[%s6200_s1 + $0x4e4] ss:$8 sps:$4 sm:$0xff]  }
  0x1e   : > { %v1215_v15 = vrot.slane %v1214_v10, 4  ;;  %v4518_v22 = vld [vmem:[%s6200_s1 + $0x4e0] ss:$8 sps:$4 sm:$0xff]   ;;  %v4519_v23 = vld [vmem:[%s6200_s1 + $0xf4] ss:$8 sps:$4 sm:$0xff]  }
  0x1f   : > { %426 = vmatpush1.bf16.msra.mxu1 %v4469_v26  ;;  %v5128_v18 = vsel %vm5110_vm2, %v1201_v13, %v1205_v8  ;;  %v4521_v24 = vld [vmem:[%s6200_s1 + $0x4f4] ss:$8 sps:$4 sm:$0xff]   ;;  %v4523_v25 = vld [vmem:[%s6200_s1 + $0xf0] ss:$8 sps:$4 sm:$0xff]   ;;  %v5222_v58 = vld [vmem:[%s5060_s5 + $0x40] sm:$0xff] }
  0x20   : > { %1875 = vmatpush1.bf16.msra.mxu0 %v4470_v27  ;;  %427 = vmatprep.subr.bf16.mxu1 %v4471_v28  ;;  %v5132_v19 = vsel %vm5110_vm2, %v1215_v15, %v1219_v11  ;;  %v4524_v26 = vld [vmem:[%s6200_s1 + $0x4f0] ss:$8 sps:$4 sm:$0xff]   ;;  %v4530_v27 = vld [vmem:[%s6200_s1 + $0x304] ss:$8 sps:$4 sm:$0xff]   ;;  %v1236_v61 = vshrl.u32 %v5222_v58, 16  ;;  %v1239_v62 = vshll.u32 %v5222_v58, 16 }
  0x21   : > { %1876 = vmatprep.subr.bf16.mxu0 %v4473_v29  ;;  %v3916_v21 = vcombine.high %v5128_v18, %v5132_v19  ;;  %v4533_v28 = vld [vmem:[%s6200_s1 + $0x704] ss:$8 sps:$4 sm:$0xff]   ;;  %v4528_v29 = vld [vmem:[%s6200_s1 + $0x300] ss:$8 sps:$4 sm:$0xff]   ;;  %v4546_v56 = vld [vmem:[%s6200_s1 + $0x330] ss:$8 sps:$4 sm:$0xff]  }
  0x22   : > { %v4549_v57 = vld [vmem:[%s6200_s1 + $0x730] ss:$8 sps:$4 sm:$0xff]   ;;  %v1165_v59 = vld [vmem:[%s5060_s5 + $0x48] sm:$0x11]  ;;  %v1238_v3 = vrot.slane %v1236_v61, 4  ;;  %v1241_v4 = vrot.slane %v1239_v62, 5 }
  0x23   : > { %428 = vmatpush1.bf16.msra.mxu1 %v4475_v30  ;;  %1894 = vmatprep.mubr.bf16.mxu0 %v3916_v21  ;;  %v3633_v30 = vcombine.low %v5072_v48, %v5075_v49  ;;  %v4543_v48 = vld [vmem:[%s6200_s1 + $0x720] ss:$8 sps:$4 sm:$0xff]   ;;  %v4554_v60 = vld [vmem:[%s6200_s1 + $0x344] ss:$8 sps:$4 sm:$0xff]   ;;  %v1245_v63 = vshll.u32 %v1165_v59, 16  ;;  %v5241_v10 = vld [vmem:[%s5060_s5 + $0x50] sm:$0xff] }
  0x24   : > { %1877 = vmatpush1.bf16.msra.mxu0 %v4476_v31  ;;  %429 = vmatprep.subr.bf16.mxu1 %v4477_v32  ;;  %v5166_v31 = vld [vmem:[%s5060_s5 + $0x30] sm:$0xff]  ;;  %v3915_v32 = vcombine.low %v5128_v18, %v5132_v19  ;;  %v4557_v0 = vld [vmem:[%s6200_s1 + $0x744] ss:$8 sps:$4 sm:$0xff]   ;;  %v1242_v7 = vor.u32 %v1241_v4, %v1238_v3  ;;  %v5251_v13 = vcombine.high %v5222_v58, %v5241_v10 }
  0x25   : > { %1878 = vmatprep.subr.bf16.mxu0 %v4479_v33  ;;  %v4531_v33 = vld [vmem:[%s6200_s1 + $0x700] ss:$8 sps:$4 sm:$0xff]   ;;  %v1247_v8 = vrot.slane %v1245_v63, 5  ;;  %v4560_v11 = vld [vmem:[%s6200_s1 + $0x354] ss:$8 sps:$4 sm:$0xff]  }
  0x26   : > { %v5263_v21 = vld [vmem:[%s5060_s5 + $0x60] sm:$0xff]  ;;  %v1173_v61 = vld [vmem:[%s5060_s5 + $0x88] sm:$0x11]  ;;  %v4780_v9 = vld [vmem:[%s6200_s1 + $0x574] ss:$8 sps:$4 sm:$0xff]  }
  0x27   : > { %430 = vmatpush1.bf16.msra.mxu1 %v4481_v34  ;;  %v4536_v34 = vld [vmem:[%s6200_s1 + $0x314] ss:$8 sps:$4 sm:$0xff]  }
  0x28   : > { %1879 = vmatpush1.bf16.msra.mxu0 %v4482_v35  ;;  %431 = vmatprep.subr.bf16.mxu1 %v4483_v36  ;;  %v4539_v35 = vld [vmem:[%s6200_s1 + $0x714] ss:$8 sps:$4 sm:$0xff]   ;;  %v1222_v36 = vshrl.u32 %v5166_v31, 16 }
  0x29   : > { %1880 = vmatprep.subr.bf16.mxu0 %v4485_v37  ;;  %v1225_v37 = vshll.u32 %v5166_v31, 16 }
  0x2b   : > { %432 = vmatpush1.bf16.msra.mxu1 %v4487_v38  ;;  %v5183_v38 = vcombine.high %v5078_v50, %v5166_v31 }
  0x2c   : > { %1881 = vmatpush1.bf16.msra.mxu0 %v4488_v39  ;;  %433 = vmatprep.subr.bf16.mxu1 %v4489_v40  ;;  %v4534_v39 = vld [vmem:[%s6200_s1 + $0x310] ss:$8 sps:$4 sm:$0xff]  }
  0x2d   : > { %1882 = vmatprep.subr.bf16.mxu0 %v4491_v41  ;;  %v4537_v40 = vld [vmem:[%s6200_s1 + $0x710] ss:$8 sps:$4 sm:$0xff]   ;;  %v4542_v41 = vld [vmem:[%s6200_s1 + $0x324] ss:$8 sps:$4 sm:$0xff]  }
  0x2f   : > { %434 = vmatpush1.bf16.msra.mxu1 %v4493_v42  ;;  %v4545_v42 = vld [vmem:[%s6200_s1 + $0x724] ss:$8 sps:$4 sm:$0xff]  }
  0x30   : > { %1883 = vmatpush1.bf16.msra.mxu0 %v4494_v43  ;;  %435 = vmatprep.subr.bf16.mxu1 %v4495_v44  ;;  %v1163_v43 = vld [vmem:[%s5060_s5 + $0x38] sm:$0x11]  ;;  %v1224_v44 = vrot.slane %v1222_v36, 4 }
  0x31   : > { %1884 = vmatprep.subr.bf16.mxu0 %v4497_v45  ;;  %v1227_v45 = vrot.slane %v1225_v37, 5  ;;  %v1231_v55 = vshll.u32 %v1163_v43, 16 }
  0x33   : > { %436 = vmatpush1.bf16.msra.mxu1 %v4499_v46  ;;  %v4540_v46 = vld [vmem:[%s6200_s1 + $0x320] ss:$8 sps:$4 sm:$0xff]   ;;  %v1228_v53 = vor.u32 %v1227_v45, %v1224_v44 }
  0x34   : > { %1885 = vmatpush1.bf16.msra.mxu0 %v4500_v47  ;;  %437 = vmatprep.subr.bf16.mxu1 %v4501_v51  ;;  %v5204_v47 = vcombine.low %v5078_v50, %v5166_v31  ;;  %v4548_v51 = vld [vmem:[%s6200_s1 + $0x334] ss:$8 sps:$4 sm:$0xff]  }
  0x35   : > { %1886 = vmatprep.subr.bf16.mxu0 %v4503_v52  ;;  %v4551_v52 = vld [vmem:[%s6200_s1 + $0x734] ss:$8 sps:$4 sm:$0xff]  }
  0x37   : > { %438 = vmatpush1.bf16.msra.mxu1 %v4505_v1  ;;  %v1229_v1 = vrot.slane %v1228_v53, 4 }
  0x38   : > { %1887 = vmatpush1.bf16.msra.mxu0 %v4506_v2  ;;  %439 = vmatprep.subr.bf16.mxu1 %v4507_v5  ;;  %v1233_v2 = vrot.slane %v1231_v55, 5  ;;  %v4552_v5 = vld [vmem:[%s6200_s1 + $0x340] ss:$8 sps:$4 sm:$0xff]  }
  0x39   : > { %1888 = vmatprep.subr.bf16.mxu0 %v4509_v6  ;;  %v4555_v6 = vld [vmem:[%s6200_s1 + $0x740] ss:$8 sps:$4 sm:$0xff]  }
  0x3a   : > { %v5256_v15 = vsel %vm5110_vm2, %v1229_v1, %v1233_v2 }
  0x3b   : > { %440 = vmatpush1.bf16.msra.mxu1 %v4511_v12  ;;  %v4563_v12 = vld [vmem:[%s6200_s1 + $0x754] ss:$8 sps:$4 sm:$0xff]  }
  0x3c   : > { %1889 = vmatpush1.bf16.msra.mxu0 %v4512_v14  ;;  %441 = vmatprep.subr.bf16.mxu1 %v4513_v16  ;;  %v1250_v14 = vshrl.u32 %v5241_v10, 16  ;;  %v4558_v16 = vld [vmem:[%s6200_s1 + $0x350] ss:$8 sps:$4 sm:$0xff]  }
  0x3d   : > { %1890 = vmatprep.subr.bf16.mxu0 %v4515_v17  ;;  %v1243_v17 = vrot.slane %v1242_v7, 4 }
  0x3f   : > { %442 = vmatpush1.bf16.msra.mxu1 %v4517_v20  ;;  %v1167_v20 = vld [vmem:[%s5060_s5 + $0x58] sm:$0x11] }
  0x40   : > { %1891 = vmatpush1.bf16.msra.mxu0 %v4518_v22  ;;  %443 = vmatprep.subr.bf16.mxu1 %v4519_v23  ;;  %v1169_v22 = vld [vmem:[%s5060_s5 + $0x68] sm:$0x11]  ;;  %v5268_v23 = vcombine.low %v5222_v58, %v5241_v10 }
  0x41   : > { %1892 = vmatprep.subr.bf16.mxu0 %v4521_v24  ;;  %v1252_v24 = vrot.slane %v1250_v14, 4  ;;  %v4581_v14 = vld [vmem:[%s6200_s1 + $0x784] ss:$8 sps:$4 sm:$0xff]  }
  0x43   : > { %444 = vmatpush1.bf16.msra.mxu1 %v4523_v25  ;;  %v1253_v25 = vshll.u32 %v5241_v10, 16 }
  0x44   : > { %1893 = vmatpush1.bf16.msra.mxu0 %v4524_v26  ;;  %714 = vmatprep.subr.bf16.mxu1 %v4530_v27  ;;  %v1259_v26 = vshll.u32 %v1167_v20, 16  ;;  %v1264_v27 = vshrl.u32 %v5263_v21, 16 }
  0x45   : > { %2196 = vmatprep.subr.bf16.mxu0 %v4533_v28  ;;  %v4561_v28 = vld [vmem:[%s6200_s1 + $0x750] ss:$8 sps:$4 sm:$0xff]   ;;  %v1255_v36 = vrot.slane %v1253_v25, 5  ;;  %v4576_v25 = vld [vmem:[%s6200_s1 + $0x380] ss:$8 sps:$4 sm:$0xff]  }
  0x46   : > { %446 = vmatmul.mubr.bf16.vlgmr.msra.gmra.mrb[0].mxu1 %v3633_v30  ;;  %v5281_v30 = vsel %vm5110_vm2, %v1243_v17, %v1247_v8  ;;  %v1261_v44 = vrot.slane %v1259_v26, 5  ;;  %v4579_v26 = vld [vmem:[%s6200_s1 + $0x780] ss:$8 sps:$4 sm:$0xff]  }
  0x47   : > { %1895 = vmatmul.mubr.bf16.vlgmr.msra.gmra.mrb[0].mxu0 %v3915_v32  ;;  %715 = vmatpush1.bf16.msra.mxu1 %v4528_v29  ;;  %v4566_v29 = vld [vmem:[%s6200_s1 + $0x364] ss:$8 sps:$4 sm:$0xff]   ;;  %v1267_v32 = vshll.u32 %v5263_v21, 16  ;;  %v3917_v37 = vcombine.low %v5256_v15, %v5281_v30  ;;  %v1256_v43 = vor.u32 %v1255_v36, %v1252_v24 }
  0x48   : > { %2197 = vmatpush1.bf16.msra.mxu0 %v4531_v33  ;;  %716 = vmatprep.subr.bf16.mxu1 %v4536_v34  ;;  %v1273_v33 = vshll.u32 %v1169_v22, 16  ;;  %v4569_v34 = vld [vmem:[%s6200_s1 + $0x764] ss:$8 sps:$4 sm:$0xff]  }
  0x49   : > { %2198 = vmatprep.subr.bf16.mxu0 %v4539_v35  ;;  %455 = vmatprep.mubr.bf16.mxu1 %v5183_v38  ;;  %v3918_v35 = vcombine.high %v5256_v15, %v5281_v30  ;;  %v1257_v53 = vrot.slane %v1256_v43, 4  ;;  %v4594_v43 = vld [vmem:[%s6200_s1 + $0x7a4] ss:$8 sps:$4 sm:$0xff]  }
  0x4b   : > { %717 = vmatpush1.bf16.msra.mxu1 %v4534_v39  ;;  %v1266_v39 = vrot.slane %v1264_v27, 4  ;;  %1904 = vmatprep.mubr.bf16.mxu0 %v3918_v35  ;;  %v5328_v1 = vsel %vm5110_vm2, %v1257_v53, %v1261_v44  ;;  %v4598_v53 = vld [vmem:[%s6200_s1 + $0x3b4] ss:$8 sps:$4 sm:$0xff]  }
  0x4c   : > { %2199 = vmatpush1.bf16.msra.mxu0 %v4537_v40  ;;  %718 = vmatprep.subr.bf16.mxu1 %v4542_v41  ;;  %v1269_v40 = vrot.slane %v1267_v32, 5  ;;  %v4564_v41 = vld [vmem:[%s6200_s1 + $0x360] ss:$8 sps:$4 sm:$0xff]  }
  0x4d   : > { %2200 = vmatprep.subr.bf16.mxu0 %v4545_v42  ;;  %v4567_v42 = vld [vmem:[%s6200_s1 + $0x760] ss:$8 sps:$4 sm:$0xff]  }
  0x4e   : > { %456 = vmatmul.mubr.bf16.gmra.mrb[4].mxu1 %v5204_v47  ;;  %v1270_v45 = vor.u32 %v1269_v40, %v1266_v39  ;;  %v4585_v39 = vld [vmem:[%s6200_s1 + $0x790] ss:$8 sps:$4 sm:$0xff]  }
  0x4f   : > { %719 = vmatpush1.bf16.msra.mxu1 %v4540_v46  ;;  %465 = vmatprep.mubr.bf16.mxu1 %v5251_v13  ;;  %v1275_v46 = vrot.slane %v1273_v33, 5 }
  0x50   : > { %2201 = vmatpush1.bf16.msra.mxu0 %v4543_v48  ;;  %720 = vmatprep.subr.bf16.mxu1 %v4548_v51  ;;  %v5299_v48 = vld [vmem:[%s5060_s5 + $0x70] sm:$0xff]  ;;  %v1271_v59 = vrot.slane %v1270_v45, 4 }
  0x51   : > { %2202 = vmatprep.subr.bf16.mxu0 %v4551_v52  ;;  %v4572_v51 = vld [vmem:[%s6200_s1 + $0x374] ss:$8 sps:$4 sm:$0xff]   ;;  %v5309_v55 = vcombine.high %v5263_v21, %v5299_v48  ;;  %1905 = vmatmul.mubr.bf16.gmra.mrb[4].mxu0 %v3917_v37  ;;  %v1278_v62 = vshrl.u32 %v5299_v48, 16  ;;  %v5322_v63 = vcombine.low %v5263_v21, %v5299_v48  ;;  %v1281_v2 = vshll.u32 %v5299_v48, 16  ;;  %v4582_v37 = vld [vmem:[%s6200_s1 + $0x390] ss:$8 sps:$4 sm:$0xff]  }
  0x52   : > { %v4575_v52 = vld [vmem:[%s6200_s1 + $0x774] ss:$8 sps:$4 sm:$0xff]  }
  0x53   : > { %721 = vmatpush1.bf16.msra.mxu1 %v4546_v56  ;;  %v5312_v56 = vld [vmem:[%s5060_s5 + $0x80] sm:$0xff]  ;;  %v1280_v7 = vrot.slane %v1278_v62, 4  ;;  %v1283_v17 = vrot.slane %v1281_v2, 5 }
  0x54   : > { %2203 = vmatpush1.bf16.msra.mxu0 %v4549_v57  ;;  %722 = vmatprep.subr.bf16.mxu1 %v4554_v60  ;;  %v4570_v57 = vld [vmem:[%s6200_s1 + $0x370] ss:$8 sps:$4 sm:$0xff]   ;;  %v1638_v4 = vshrl.u32 %v5312_v56, 16  ;;  %v1641_v8 = vshll.u32 %v5312_v56, 16  ;;  %v4608_v62 = vld [vmem:[%s6200_s1 + $0x7c4] ss:$8 sps:$4 sm:$0xff]  }
  0x55   : > { %2204 = vmatprep.subr.bf16.mxu0 %v4557_v0  ;;  %v1171_v60 = vld [vmem:[%s5060_s5 + $0x78] sm:$0x11]  ;;  %v3706_v0 = vcombine.high %v5075_v49, %v5078_v50  ;;  %v1284_v27 = vor.u32 %v1283_v17, %v1280_v7  ;;  %v4606_v2 = vld [vmem:[%s6200_s1 + $0x7c0] ss:$8 sps:$4 sm:$0xff]   ;;  %v4648_v49 = vld [vmem:[%s6200_s1 + $0x224] ss:$8 sps:$4 sm:$0xff]  }
  0x56   : > { %466 = vmatmul.mubr.bf16.gmra.mrb[8].mxu1 %v5268_v23  ;;  %v1287_v3 = vshll.u32 %v1171_v60, 16  ;;  %v1640_v22 = vrot.slane %v1638_v4, 4  ;;  %v1643_v24 = vrot.slane %v1641_v8, 5  ;;  %v4599_v60 = vld [vmem:[%s6200_s1 + $0x7b0] ss:$8 sps:$4 sm:$0xff]  }
  0x57   : > { %723 = vmatpush1.bf16.msra.mxu1 %v4552_v5  ;;  %475 = vmatprep.mubr.bf16.mxu1 %v5309_v55  ;;  %v4573_v5 = vld [vmem:[%s6200_s1 + $0x770] ss:$8 sps:$4 sm:$0xff]   ;;  %v1285_v35 = vrot.slane %v1284_v27, 4  ;;  %v4615_v4 = vld [vmem:[%s6200_s1 + $0x7d4] ss:$8 sps:$4 sm:$0xff]  }
  0x58   : > { %2205 = vmatpush1.bf16.msra.mxu0 %v4555_v6  ;;  %724 = vmatprep.subr.bf16.mxu1 %v4560_v11  ;;  %v5338_v6 = vsel %vm5110_vm2, %v1271_v59, %v1275_v46  ;;  %v1647_v11 = vshll.u32 %v1173_v61, 16  ;;  %v1644_v32 = vor.u32 %v1643_v24, %v1640_v22  ;;  %v4589_v46 = vld [vmem:[%s6200_s1 + $0x3a0] ss:$8 sps:$4 sm:$0xff]   ;;  %v4596_v59 = vld [vmem:[%s6200_s1 + $0x3b0] ss:$8 sps:$4 sm:$0xff]  }
  0x59   : > { %2206 = vmatprep.subr.bf16.mxu0 %v4563_v12  ;;  %v4578_v12 = vld [vmem:[%s6200_s1 + $0x384] ss:$8 sps:$4 sm:$0xff]   ;;  %v3919_v20 = vcombine.low %v5328_v1, %v5338_v6  ;;  %v4613_v7 = vld [vmem:[%s6200_s1 + $0x7d0] ss:$8 sps:$4 sm:$0xff]   ;;  %v4629_v17 = vld [vmem:[%s6200_s1 + $0x7f4] ss:$8 sps:$4 sm:$0xff]  }
  0x5a   : > { %v1649_v33 = vrot.slane %v1647_v11, 5  ;;  %v1645_v36 = vrot.slane %v1644_v32, 4  ;;  %v4605_v61 = vld [vmem:[%s6200_s1 + $0x3c4] ss:$8 sps:$4 sm:$0xff]   ;;  %v4627_v22 = vld [vmem:[%s6200_s1 + $0x7f0] ss:$8 sps:$4 sm:$0xff]   ;;  %v5485_v32 = vcombine.high %v5281_v30, %v5328_v1 }
  0x5b   : > { %725 = vmatpush1.bf16.msra.mxu1 %v4558_v16  ;;  %v3920_v16 = vcombine.high %v5328_v1, %v5338_v6  ;;  %v4619_v8 = vld [vmem:[%s6200_s1 + $0x3e4] ss:$8 sps:$4 sm:$0xff]   ;;  %v4631_v27 = vld [vmem:[%s6200_s1 + $0x600] ss:$8 sps:$4 sm:$0xff]  }
  0x5c   : > { %2207 = vmatpush1.bf16.msra.mxu0 %v4561_v28  ;;  %726 = vmatprep.subr.bf16.mxu1 %v4566_v29  ;;  %v1289_v28 = vrot.slane %v1287_v3, 5  ;;  %v4584_v29 = vld [vmem:[%s6200_s1 + $0x394] ss:$8 sps:$4 sm:$0xff]   ;;  %v4622_v11 = vld [vmem:[%s6200_s1 + $0x7e4] ss:$8 sps:$4 sm:$0xff]  }
  0x5d   : > { %2208 = vmatprep.subr.bf16.mxu0 %v4569_v34  ;;  %1914 = vmatprep.mubr.bf16.mxu0 %v3920_v16  ;;  %v4587_v34 = vld [vmem:[%s6200_s1 + $0x794] ss:$8 sps:$4 sm:$0xff]   ;;  %v4633_v24 = vld [vmem:[%s6200_s1 + $0x604] ss:$8 sps:$4 sm:$0xff]   ;;  %v4643_v50 = vld [vmem:[%s6200_s1 + $0x620] ss:$8 sps:$4 sm:$0xff]  }
  0x5e   : > { %476 = vmatmul.mubr.bf16.gmra.mrb[12].mxu1 %v5322_v63  ;;  %1915 = vmatmul.mubr.bf16.gmra.mrb[8].mxu0 %v3919_v20  ;;  %v5372_v40 = vsel %vm5110_vm2, %v1285_v35, %v1289_v28  ;;  %v4612_v3 = vld [vmem:[%s6200_s1 + $0x3d4] ss:$8 sps:$4 sm:$0xff]   ;;  %v4624_v20 = vld [vmem:[%s6200_s1 + $0x3f0] ss:$8 sps:$4 sm:$0xff]   ;;  %v4634_v28 = vld [vmem:[%s6200_s1 + $0x200] ss:$8 sps:$4 sm:$0xff]  }
  0x5f   : > { %727 = vmatpush1.bf16.msra.mxu1 %v4564_v41  ;;  %746 = vmatprep.mubr.bf16.mxu1 %v3706_v0  ;;  %v4591_v41 = vld [vmem:[%s6200_s1 + $0x3a4] ss:$8 sps:$4 sm:$0xff]   ;;  %v4603_v0 = vld [vmem:[%s6200_s1 + $0x3c0] ss:$8 sps:$4 sm:$0xff]   ;;  %v4626_v16 = vld [vmem:[%s6200_s1 + $0x3f4] ss:$8 sps:$4 sm:$0xff]  }
  0x60   : > { %2209 = vmatpush1.bf16.msra.mxu0 %v4567_v42  ;;  %728 = vmatprep.subr.bf16.mxu1 %v4572_v51  ;;  %v5379_v42 = vsel %vm5110_vm2, %v1645_v36, %v1649_v33  ;;  %v4592_v51 = vld [vmem:[%s6200_s1 + $0x7a0] ss:$8 sps:$4 sm:$0xff]   ;;  %v4637_v33 = vld [vmem:[%s6200_s1 + $0x610] ss:$8 sps:$4 sm:$0xff]   ;;  %v4645_v35 = vld [vmem:[%s6200_s1 + $0x624] ss:$8 sps:$4 sm:$0xff]   ;;  %v5511_v36 = vcombine.low %v5281_v30, %v5328_v1 }
  0x61   : > { %2210 = vmatprep.subr.bf16.mxu0 %v4575_v52  ;;  %v3922_v44 = vcombine.high %v5372_v40, %v5379_v42  ;;  %v3921_v45 = vcombine.low %v5372_v40, %v5379_v42  ;;  %v5396_v52 = vcombine.high %v5132_v19, %v5256_v15  ;;  %v4654_v1 = vld [vmem:[%s6200_s1 + $0x234] ss:$8 sps:$4 sm:$0xff]  }
  0x63   : > { %729 = vmatpush1.bf16.msra.mxu1 %v4570_v57  ;;  %1924 = vmatprep.mubr.bf16.mxu0 %v3922_v44  ;;  %v4601_v57 = vld [vmem:[%s6200_s1 + $0x7b4] ss:$8 sps:$4 sm:$0xff]  }
  0x64   : > { %2211 = vmatpush1.bf16.msra.mxu0 %v4573_v5  ;;  %730 = vmatprep.subr.bf16.mxu1 %v4578_v12  ;;  %v4610_v5 = vld [vmem:[%s6200_s1 + $0x3d0] ss:$8 sps:$4 sm:$0xff]   ;;  %v4617_v12 = vld [vmem:[%s6200_s1 + $0x3e0] ss:$8 sps:$4 sm:$0xff]  }
  0x65   : > { %2212 = vmatprep.subr.bf16.mxu0 %v4581_v14  ;;  %v4620_v14 = vld [vmem:[%s6200_s1 + $0x7e0] ss:$8 sps:$4 sm:$0xff]  }
  0x66   : > { %1925 = vmatmul.mubr.bf16.gmra.mrb[12].mxu0 %v3921_v45 }
  0x67   : > { %731 = vmatpush1.bf16.msra.mxu1 %v4576_v25  ;;  %2228 = vmatprep.mubr.bf16.mxu0 %v5396_v52  ;;  %v4636_v25 = vld [vmem:[%s6200_s1 + $0x204] ss:$8 sps:$4 sm:$0xff]  }
  0x68   : > { %2213 = vmatpush1.bf16.msra.mxu0 %v4579_v26  ;;  %732 = vmatprep.subr.bf16.mxu1 %v4584_v29  ;;  %v5467_v26 = vcombine.low %v5132_v19, %v5256_v15  ;;  %v4639_v29 = vld [vmem:[%s6200_s1 + $0x614] ss:$8 sps:$4 sm:$0xff]   ;;  %v3708_v15 = vcombine.high %v5166_v31, %v5222_v58 }
  0x69   : > { %2214 = vmatprep.subr.bf16.mxu0 %v4587_v34  ;;  %v4642_v19 = vld [vmem:[%s6200_s1 + $0x214] ss:$8 sps:$4 sm:$0xff]   ;;  %v4640_v34 = vld [vmem:[%s6200_s1 + $0x210] ss:$8 sps:$4 sm:$0xff]  }
  0x6b   : > { %733 = vmatpush1.bf16.msra.mxu1 %v4582_v37  ;;  %v5514_v37 = vld [vmem:[%s5060_s5 + $0x90] sm:$0xff] }
  0x6c   : > { %2215 = vmatpush1.bf16.msra.mxu0 %v4585_v39  ;;  %734 = vmatprep.subr.bf16.mxu1 %v4591_v41  ;;  %v1175_v39 = vld [vmem:[%s5060_s5 + $0x98] sm:$0x11]  ;;  %v1984_v41 = vshrl.u32 %v5514_v37, 16  ;;  %v3778_v44 = vcombine.high %v5312_v56, %v5514_v37  ;;  %v3777_v45 = vcombine.low %v5312_v56, %v5514_v37 }
  0x6d   : > { %2216 = vmatprep.subr.bf16.mxu0 %v4594_v43  ;;  %v1987_v43 = vshll.u32 %v5514_v37, 16  ;;  %v1993_v30 = vshll.u32 %v1175_v39, 16  ;;  %v4781_v37 = vld [vmem:[%s6200_s1 + $0x180] ss:$8 sps:$4 sm:$0xff]  }
  0x6f   : > { %735 = vmatpush1.bf16.msra.mxu1 %v4589_v46  ;;  %v1986_v46 = vrot.slane %v1984_v41, 4  ;;  %v4673_v41 = vld [vmem:[%s6200_s1 + $0x670] ss:$8 sps:$4 sm:$0xff]  }
  0x70   : > { %2217 = vmatpush1.bf16.msra.mxu0 %v4592_v51  ;;  %736 = vmatprep.subr.bf16.mxu1 %v4598_v53  ;;  %v1989_v51 = vrot.slane %v1987_v43, 5  ;;  %v3710_v53 = vcombine.high %v5241_v10, %v5263_v21  ;;  %v4676_v43 = vld [vmem:[%s6200_s1 + $0x270] ss:$8 sps:$4 sm:$0xff]  }
  0x71   : > { %2218 = vmatprep.subr.bf16.mxu0 %v4601_v57  ;;  %v5536_v57 = vcombine.high %v5338_v6, %v5372_v40 }
  0x73   : > { %737 = vmatpush1.bf16.msra.mxu1 %v4596_v59  ;;  %v1990_v59 = vor.u32 %v1989_v51, %v1986_v46  ;;  %v4687_v46 = vld [vmem:[%s6200_s1 + $0x694] ss:$8 sps:$4 sm:$0xff]   ;;  %v4685_v51 = vld [vmem:[%s6200_s1 + $0x690] ss:$8 sps:$4 sm:$0xff]  }
  0x74   : > { %2219 = vmatpush1.bf16.msra.mxu0 %v4599_v60  ;;  %738 = vmatprep.subr.bf16.mxu1 %v4605_v61  ;;  %v1995_v60 = vrot.slane %v1993_v30, 5  ;;  %v4649_v61 = vld [vmem:[%s6200_s1 + $0x630] ss:$8 sps:$4 sm:$0xff]   ;;  %v4679_v30 = vld [vmem:[%s6200_s1 + $0x680] ss:$8 sps:$4 sm:$0xff]  }
  0x75   : > { %2220 = vmatprep.subr.bf16.mxu0 %v4608_v62  ;;  %v4652_v62 = vld [vmem:[%s6200_s1 + $0x230] ss:$8 sps:$4 sm:$0xff]  }
  0x77   : > { %739 = vmatpush1.bf16.msra.mxu1 %v4603_v0  ;;  %v4657_v0 = vld [vmem:[%s6200_s1 + $0x644] ss:$8 sps:$4 sm:$0xff]  }
  0x78   : > { %2221 = vmatpush1.bf16.msra.mxu0 %v4606_v2  ;;  %740 = vmatprep.subr.bf16.mxu1 %v4612_v3  ;;  %v4660_v2 = vld [vmem:[%s6200_s1 + $0x244] ss:$8 sps:$4 sm:$0xff]   ;;  %v1991_v3 = vrot.slane %v1990_v59, 4 }
  0x79   : > { %2222 = vmatprep.subr.bf16.mxu0 %v4615_v4  ;;  %v4655_v4 = vld [vmem:[%s6200_s1 + $0x640] ss:$8 sps:$4 sm:$0xff]   ;;  %v4694_v59 = vld [vmem:[%s6200_s1 + $0x6a4] ss:$8 sps:$4 sm:$0xff]  }
  0x7b   : > { %741 = vmatpush1.bf16.msra.mxu1 %v4610_v5  ;;  %v4658_v5 = vld [vmem:[%s6200_s1 + $0x240] ss:$8 sps:$4 sm:$0xff]  }
  0x7c   : > { %2223 = vmatpush1.bf16.msra.mxu0 %v4613_v7  ;;  %742 = vmatprep.subr.bf16.mxu1 %v4619_v8  ;;  %v4663_v7 = vld [vmem:[%s6200_s1 + $0x654] ss:$8 sps:$4 sm:$0xff]   ;;  %v3709_v8 = vcombine.low %v5241_v10, %v5263_v21  ;;  %v4661_v21 = vld [vmem:[%s6200_s1 + $0x650] ss:$8 sps:$4 sm:$0xff]  }
  0x7d   : > { %2224 = vmatprep.subr.bf16.mxu0 %v4622_v11  ;;  %v5565_v11 = vcombine.low %v5338_v6, %v5372_v40  ;;  %v4666_v10 = vld [vmem:[%s6200_s1 + $0x254] ss:$8 sps:$4 sm:$0xff]   ;;  %v3712_v6 = vcombine.high %v5299_v48, %v5312_v56 }
  0x7f   : > { %743 = vmatpush1.bf16.msra.mxu1 %v4617_v12  ;;  %v1996_v12 = vsel %vm5110_vm2, %v1991_v3, %v1995_v60  ;;  %v4697_v60 = vld [vmem:[%s6200_s1 + $0x2a4] ss:$8 sps:$4 sm:$0xff]   ;;  %v4699_v3 = vld [vmem:[%s6200_s1 + $0x6b0] ss:$8 sps:$4 sm:$0xff]  }
  0x80   : > { %2225 = vmatpush1.bf16.msra.mxu0 %v4620_v14  ;;  %744 = vmatprep.subr.bf16.mxu1 %v4626_v16  ;;  %v2317_v14 = vld [vmem:[%s5060_s5] sm:$0xee]  ;;  %v2318_v16 = vld [vmem:[%s5060_s5 + $0x8] sm:$0x11]  ;;  %v3988_v40 = vcombine.high %v5379_v42, %v1996_v12 }
  0x81   : > { %2226 = vmatprep.subr.bf16.mxu0 %v4629_v17  ;;  %v2319_v17 = vld [vmem:[%s5060_s5 + $0x10] sm:$0xee] }
  0x83   : > { %745 = vmatpush1.bf16.msra.mxu1 %v4624_v20  ;;  %v2320_v20 = vld [vmem:[%s5060_s5 + $0x18] sm:$0x11] }
  0x84   : > { %2227 = vmatpush1.bf16.msra.mxu0 %v4627_v22  ;;  %1035 = vmatprep.subr.bf16.mxu1 %v4633_v24  ;;  %v4021_v24 = vrot.slane %v2317_v14, 9  ;;  %v4715_v14 = vld [vmem:[%s6200_s1 + $0x6d4] ss:$8 sps:$4 sm:$0xff]  }
  0x85   : > { %2613 = vmatprep.subr.bf16.mxu0 %v4636_v25  ;;  %v2358_v25 = vrot.slane %v2318_v16, 5  ;;  %v4718_v16 = vld [vmem:[%s6200_s1 + $0x2d4] ss:$8 sps:$4 sm:$0xff]  }
  0x86   : > { %747 = vmatmul.mubr.bf16.vlgmr.msra.gmra.mrb[0].mxu1 %v3705_v54  ;;  %v3707_v54 = vcombine.low %v5166_v31, %v5222_v58  ;;  %v4646_v31 = vld [vmem:[%s6200_s1 + $0x220] ss:$8 sps:$4 sm:$0xff]   ;;  %v4651_v58 = vld [vmem:[%s6200_s1 + $0x634] ss:$8 sps:$4 sm:$0xff]  }
  0x87   : > { %2229 = vmatmul.mubr.bf16.vlgmr.msra.gmra.mrb[0].mxu0 %v5467_v26  ;;  %1036 = vmatpush1.bf16.msra.mxu1 %v4631_v27  ;;  %v4022_v27 = vrot.slane %v2319_v17, 9  ;;  %v4713_v17 = vld [vmem:[%s6200_s1 + $0x6d0] ss:$8 sps:$4 sm:$0xff]  }
  0x88   : > { %2614 = vmatpush1.bf16.msra.mxu0 %v4634_v28  ;;  %1037 = vmatprep.subr.bf16.mxu1 %v4639_v29  ;;  %v2362_v28 = vrot.slane %v2320_v20, 5  ;;  %v4664_v29 = vld [vmem:[%s6200_s1 + $0x250] ss:$8 sps:$4 sm:$0xff]  }
  0x89   : > { %2615 = vmatprep.subr.bf16.mxu0 %v4642_v19  ;;  %756 = vmatprep.mubr.bf16.mxu1 %v3708_v15  ;;  %v4669_v19 = vld [vmem:[%s6200_s1 + $0x664] ss:$8 sps:$4 sm:$0xff]   ;;  %v4716_v20 = vld [vmem:[%s6200_s1 + $0x2d0] ss:$8 sps:$4 sm:$0xff]  }
  0x8a   : > { %2238 = vmatprep.mubr.bf16.mxu0 %v5485_v32  ;;  %v4672_v15 = vld [vmem:[%s6200_s1 + $0x264] ss:$8 sps:$4 sm:$0xff]  }
  0x8b   : > { %1038 = vmatpush1.bf16.msra.mxu1 %v4637_v33  ;;  %v4667_v33 = vld [vmem:[%s6200_s1 + $0x660] ss:$8 sps:$4 sm:$0xff]  }
  0x8c   : > { %2616 = vmatpush1.bf16.msra.mxu0 %v4640_v34  ;;  %1039 = vmatprep.subr.bf16.mxu1 %v4645_v35  ;;  %v3711_v34 = vcombine.low %v5299_v48, %v5312_v56  ;;  %v3987_v35 = vcombine.low %v5379_v42, %v1996_v12  ;;  %v4675_v48 = vld [vmem:[%s6200_s1 + $0x674] ss:$8 sps:$4 sm:$0xff]   ;;  %v4709_v12 = vld [vmem:[%s6200_s1 + $0x2c0] ss:$8 sps:$4 sm:$0xff]   ;;  %v4786_v56 = vld [vmem:[%s6200_s1 + $0x584] ss:$8 sps:$4 sm:$0xff]  }
  0x8d   : > { %2617 = vmatprep.subr.bf16.mxu0 %v4648_v49  ;;  %v5604_v49 = vsel %vm5583_vm5, %v4021_v24, %v2358_v25  ;;  %v4678_v42 = vld [vmem:[%s6200_s1 + $0x274] ss:$8 sps:$4 sm:$0xff]   ;;  %v2321_v24 = vld [vmem:[%s5060_s5 + $0x20] sm:$0xee]  ;;  %v2322_v25 = vld [vmem:[%s5060_s5 + $0x28] sm:$0x11] }
  0x8e   : > { %757 = vmatmul.mubr.bf16.gmra.mrb[4].mxu1 %v3707_v54  ;;  %v4670_v54 = vld [vmem:[%s6200_s1 + $0x260] ss:$8 sps:$4 sm:$0xff]  }
  0x8f   : > { %2239 = vmatmul.mubr.bf16.gmra.mrb[4].mxu0 %v5511_v36  ;;  %1040 = vmatpush1.bf16.msra.mxu1 %v4643_v50  ;;  %v5608_v50 = vsel %vm5583_vm5, %v4022_v27, %v2362_v28  ;;  %v2323_v27 = vld [vmem:[%s5060_s5 + $0x30] sm:$0xee]  ;;  %v2324_v28 = vld [vmem:[%s5060_s5 + $0x38] sm:$0x11] }
  0x90   : > { %2618 = vmatpush1.bf16.msra.mxu0 %v4646_v31  ;;  %1041 = vmatprep.subr.bf16.mxu1 %v4651_v58  ;;  %v4062_v39 = vcombine.high %v5604_v49, %v5608_v50  ;;  %v4681_v31 = vld [vmem:[%s6200_s1 + $0x684] ss:$8 sps:$4 sm:$0xff]  }
  0x91   : > { %2619 = vmatprep.subr.bf16.mxu0 %v4654_v1  ;;  %766 = vmatprep.mubr.bf16.mxu1 %v3710_v53  ;;  %v4684_v58 = vld [vmem:[%s6200_s1 + $0x284] ss:$8 sps:$4 sm:$0xff]   ;;  %v4682_v1 = vld [vmem:[%s6200_s1 + $0x280] ss:$8 sps:$4 sm:$0xff]   ;;  %v4688_v53 = vld [vmem:[%s6200_s1 + $0x290] ss:$8 sps:$4 sm:$0xff]  }
  0x92   : > { %2248 = vmatprep.mubr.bf16.mxu0 %v5536_v57 }
  0x93   : > { %1042 = vmatpush1.bf16.msra.mxu1 %v4649_v61  ;;  %v4692_v61 = vld [vmem:[%s6200_s1 + $0x6a0] ss:$8 sps:$4 sm:$0xff]  }
  0x94   : > { %2620 = vmatpush1.bf16.msra.mxu0 %v4652_v62  ;;  %1043 = vmatprep.subr.bf16.mxu1 %v4657_v0  ;;  %v4695_v62 = vld [vmem:[%s6200_s1 + $0x2a0] ss:$8 sps:$4 sm:$0xff]   ;;  %v4701_v0 = vld [vmem:[%s6200_s1 + $0x6b4] ss:$8 sps:$4 sm:$0xff]  }
  0x95   : > { %2621 = vmatprep.subr.bf16.mxu0 %v4660_v2  ;;  %v4704_v2 = vld [vmem:[%s6200_s1 + $0x2b4] ss:$8 sps:$4 sm:$0xff]  }
  0x96   : > { %767 = vmatmul.mubr.bf16.gmra.mrb[8].mxu1 %v3709_v8  ;;  %v4706_v8 = vld [vmem:[%s6200_s1 + $0x6c0] ss:$8 sps:$4 sm:$0xff]  }
  0x97   : > { %2249 = vmatmul.mubr.bf16.gmra.mrb[8].mxu0 %v5565_v11  ;;  %1044 = vmatpush1.bf16.msra.mxu1 %v4655_v4  ;;  %v4702_v4 = vld [vmem:[%s6200_s1 + $0x2b0] ss:$8 sps:$4 sm:$0xff]  }
  0x98   : > { %2622 = vmatpush1.bf16.msra.mxu0 %v4658_v5  ;;  %1045 = vmatprep.subr.bf16.mxu1 %v4663_v7  ;;  %v4708_v5 = vld [vmem:[%s6200_s1 + $0x6c4] ss:$8 sps:$4 sm:$0xff]  }
  0x99   : > { %2623 = vmatprep.subr.bf16.mxu0 %v4666_v10  ;;  %776 = vmatprep.mubr.bf16.mxu1 %v3712_v6  ;;  %v4711_v7 = vld [vmem:[%s6200_s1 + $0x2c4] ss:$8 sps:$4 sm:$0xff]   ;;  %v4720_v6 = vld [vmem:[%s6200_s1 + $0x6e0] ss:$8 sps:$4 sm:$0xff]  }
  0x9a   : > { %2258 = vmatprep.mubr.bf16.mxu0 %v3988_v40  ;;  %v4722_v10 = vld [vmem:[%s6200_s1 + $0x6e4] ss:$8 sps:$4 sm:$0xff]   ;;  %v4723_v40 = vld [vmem:[%s6200_s1 + $0x2e0] ss:$8 sps:$4 sm:$0xff]  }
  0x9b   : > { %1046 = vmatpush1.bf16.msra.mxu1 %v4661_v21  ;;  %v4725_v21 = vld [vmem:[%s6200_s1 + $0x2e4] ss:$8 sps:$4 sm:$0xff]  }
  0x9c   : > { %2624 = vmatpush1.bf16.msra.mxu0 %v4664_v29  ;;  %1047 = vmatprep.subr.bf16.mxu1 %v4669_v19  ;;  %v4729_v29 = vld [vmem:[%s6200_s1 + $0x6f4] ss:$8 sps:$4 sm:$0xff]  }
  0x9d   : > { %2625 = vmatprep.subr.bf16.mxu0 %v4672_v15  ;;  %v4732_v19 = vld [vmem:[%s6200_s1 + $0x2f4] ss:$8 sps:$4 sm:$0xff]   ;;  %v4023_v15 = vrot.slane %v2321_v24, 9 }
  0x9e   : > { %777 = vmatmul.mubr.bf16.gmra.mrb[12].mxu1 %v3711_v34  ;;  %v4024_v34 = vrot.slane %v2323_v27, 9  ;;  %v4756_v24 = vld [vmem:[%s6200_s1 + $0x534] ss:$8 sps:$4 sm:$0xff]  }
  0x9f   : > { %2259 = vmatmul.mubr.bf16.gmra.mrb[12].mxu0 %v3987_v35  ;;  %1048 = vmatpush1.bf16.msra.mxu1 %v4667_v33  ;;  %v2366_v33 = vrot.slane %v2322_v25, 5  ;;  %v2370_v35 = vrot.slane %v2324_v28, 5  ;;  %v4751_v25 = vld [vmem:[%s6200_s1 + $0x130] ss:$8 sps:$4 sm:$0xff]  }
  0xa0   : > { %2626 = vmatpush1.bf16.msra.mxu0 %v4670_v54  ;;  %1049 = vmatprep.subr.bf16.mxu1 %v4675_v48  ;;  %v4727_v54 = vld [vmem:[%s6200_s1 + $0x6f0] ss:$8 sps:$4 sm:$0xff]  }
  0xa1   : > { %2627 = vmatprep.subr.bf16.mxu0 %v4678_v42  ;;  %1067 = vmatprep.mubr.bf16.mxu1 %v5183_v38  ;;  %v4690_v38 = vld [vmem:[%s6200_s1 + $0x294] ss:$8 sps:$4 sm:$0xff]   ;;  %v4730_v48 = vld [vmem:[%s6200_s1 + $0x2f0] ss:$8 sps:$4 sm:$0xff]   ;;  %v4735_v42 = vld [vmem:[%s6200_s1 + $0x104] ss:$8 sps:$4 sm:$0xff]  }
  0xa2   : > { %2645 = vmatprep.mubr.bf16.mxu0 %v4062_v39  ;;  %v4738_v39 = vld [vmem:[%s6200_s1 + $0x504] ss:$8 sps:$4 sm:$0xff]  }
  0xa3   : > { %1050 = vmatpush1.bf16.msra.mxu1 %v4673_v41  ;;  %v4733_v41 = vld [vmem:[%s6200_s1 + $0x100] ss:$8 sps:$4 sm:$0xff]  }
  0xa4   : > { %2628 = vmatpush1.bf16.msra.mxu0 %v4676_v43  ;;  %1051 = vmatprep.subr.bf16.mxu1 %v4681_v31  ;;  %v4736_v43 = vld [vmem:[%s6200_s1 + $0x500] ss:$8 sps:$4 sm:$0xff]  }
  0xa5   : > { %2629 = vmatprep.subr.bf16.mxu0 %v4684_v58  ;;  %v2325_v31 = vld [vmem:[%s5060_s5 + $0x40] sm:$0xee]  ;;  %v4061_v58 = vcombine.low %v5604_v49, %v5608_v50  ;;  %v4744_v49 = vld [vmem:[%s6200_s1 + $0x514] ss:$8 sps:$4 sm:$0xff]  }
  0xa7   : > { %1052 = vmatpush1.bf16.msra.mxu1 %v4679_v30  ;;  %v4741_v30 = vld [vmem:[%s6200_s1 + $0x114] ss:$8 sps:$4 sm:$0xff]  }
  0xa8   : > { %2630 = vmatpush1.bf16.msra.mxu0 %v4682_v1  ;;  %1053 = vmatprep.subr.bf16.mxu1 %v4687_v46  ;;  %v5748_v1 = vsel %vm5583_vm5, %v4023_v15, %v2366_v33  ;;  %v5752_v46 = vsel %vm5583_vm5, %v4024_v34, %v2370_v35  ;;  %v4754_v35 = vld [vmem:[%s6200_s1 + $0x530] ss:$8 sps:$4 sm:$0xff]  }
  0xa9   : > { %2631 = vmatprep.subr.bf16.mxu0 %v4690_v38  ;;  %v2326_v38 = vld [vmem:[%s5060_s5 + $0x48] sm:$0x11] }
  0xab   : > { %1054 = vmatpush1.bf16.msra.mxu1 %v4685_v51  ;;  %v2327_v51 = vld [vmem:[%s5060_s5 + $0x50] sm:$0xee] }
  0xac   : > { %2632 = vmatpush1.bf16.msra.mxu0 %v4688_v53  ;;  %1055 = vmatprep.subr.bf16.mxu1 %v4694_v59  ;;  %v2328_v53 = vld [vmem:[%s5060_s5 + $0x58] sm:$0x11] }
  0xad   : > { %2633 = vmatprep.subr.bf16.mxu0 %v4697_v60  ;;  %v4739_v59 = vld [vmem:[%s6200_s1 + $0x110] ss:$8 sps:$4 sm:$0xff]  }
  0xae   : > { %v4742_v60 = vld [vmem:[%s6200_s1 + $0x510] ss:$8 sps:$4 sm:$0xff]  }
  0xaf   : > { %1056 = vmatpush1.bf16.msra.mxu1 %v4692_v61  ;;  %v5768_v61 = vcombine.high %v5748_v1, %v5752_v46 }
  0xb0   : > { %2634 = vmatpush1.bf16.msra.mxu0 %v4695_v62  ;;  %1057 = vmatprep.subr.bf16.mxu1 %v4701_v0  ;;  %v4025_v62 = vrot.slane %v2325_v31, 9  ;;  %v2374_v0 = vrot.slane %v2326_v38, 5  ;;  %v4768_v38 = vld [vmem:[%s6200_s1 + $0x554] ss:$8 sps:$4 sm:$0xff]  }
  0xb1   : > { %2635 = vmatprep.subr.bf16.mxu0 %v4704_v2  ;;  %v4026_v2 = vrot.slane %v2327_v51, 9 }
  0xb3   : > { %1058 = vmatpush1.bf16.msra.mxu1 %v4699_v3  ;;  %v2378_v3 = vrot.slane %v2328_v53, 5 }
  0xb4   : > { %2636 = vmatpush1.bf16.msra.mxu0 %v4702_v4  ;;  %1059 = vmatprep.subr.bf16.mxu1 %v4708_v5  ;;  %v1156_v4 = vld [vmem:[%s5060_s5] sm:$0xff] }
  0xb5   : > { %2637 = vmatprep.subr.bf16.mxu0 %v4711_v7  ;;  %v4747_v5 = vld [vmem:[%s6200_s1 + $0x124] ss:$8 sps:$4 sm:$0xff]   ;;  %v4745_v7 = vld [vmem:[%s6200_s1 + $0x120] ss:$8 sps:$4 sm:$0xff]  }
  0xb7   : > { %1060 = vmatpush1.bf16.msra.mxu1 %v4706_v8  ;;  %v4748_v8 = vld [vmem:[%s6200_s1 + $0x520] ss:$8 sps:$4 sm:$0xff]  }
  0xb8   : > { %2638 = vmatpush1.bf16.msra.mxu0 %v4709_v12  ;;  %1061 = vmatprep.subr.bf16.mxu1 %v4715_v14  ;;  %v5788_v12 = vcombine.low %v5748_v1, %v5752_v46  ;;  %v2329_v14 = vld [vmem:[%s5060_s5 + $0x60] sm:$0xee] }
  0xb9   : > { %2639 = vmatprep.subr.bf16.mxu0 %v4718_v16  ;;  %v5793_v16 = vsel %vm5583_vm5, %v4025_v62, %v2374_v0  ;;  %v4027_v28 = vrot.slane %v2329_v14, 9  ;;  %v4774_v62 = vld [vmem:[%s6200_s1 + $0x564] ss:$8 sps:$4 sm:$0xff]  }
  0xba   : > { %v4783_v14 = vld [vmem:[%s6200_s1 + $0x184] ss:$8 sps:$4 sm:$0xff]  }
  0xbb   : > { %1062 = vmatpush1.bf16.msra.mxu1 %v4713_v17  ;;  %v5797_v17 = vsel %vm5583_vm5, %v4026_v2, %v2378_v3  ;;  %v4769_v3 = vld [vmem:[%s6200_s1 + $0x160] ss:$8 sps:$4 sm:$0xff]  }
  0xbc   : > { %2640 = vmatpush1.bf16.msra.mxu0 %v4716_v20  ;;  %1063 = vmatprep.subr.bf16.mxu1 %v4722_v10  ;;  %v2330_v20 = vld [vmem:[%s5060_s5 + $0x68] sm:$0x11]  ;;  %v1180_v10 = vshrl.u32 %v1156_v4, 16  ;;  %v5813_v27 = vcombine.high %v5793_v16, %v5797_v17 }
  0xbd   : > { %2641 = vmatprep.subr.bf16.mxu0 %v4725_v21  ;;  %v1183_v21 = vshll.u32 %v1156_v4, 16  ;;  %v4777_v4 = vld [vmem:[%s6200_s1 + $0x174] ss:$8 sps:$4 sm:$0xff]  }
  0xbe   : > { %v1182_v33 = vrot.slane %v1180_v10, 4  ;;  %v4792_v10 = vld [vmem:[%s6200_s1 + $0x594] ss:$8 sps:$4 sm:$0xff]  }
  0xbf   : > { %1064 = vmatpush1.bf16.msra.mxu1 %v4720_v6  ;;  %v2332_v6 = vld [vmem:[%s5060_s5 + $0x78] sm:$0x11]  ;;  %v1185_v34 = vrot.slane %v1183_v21, 5 }
  0xc0   : > { %2642 = vmatpush1.bf16.msra.mxu0 %v4723_v40  ;;  %1065 = vmatprep.subr.bf16.mxu1 %v4729_v29  ;;  %v4753_v40 = vld [vmem:[%s6200_s1 + $0x134] ss:$8 sps:$4 sm:$0xff]   ;;  %v2382_v29 = vrot.slane %v2330_v20, 5  ;;  %v2386_v15 = vrot.slane %v2332_v6, 5  ;;  %v4787_v21 = vld [vmem:[%s6200_s1 + $0x190] ss:$8 sps:$4 sm:$0xff]  }
  0xc1   : > { %2643 = vmatprep.subr.bf16.mxu0 %v4732_v19  ;;  %v4789_v20 = vld [vmem:[%s6200_s1 + $0x194] ss:$8 sps:$4 sm:$0xff]   ;;  %v4795_v6 = vld [vmem:[%s6200_s1 + $0x1a4] ss:$8 sps:$4 sm:$0xff]  }
  0xc3   : > { %1066 = vmatpush1.bf16.msra.mxu1 %v4727_v54  ;;  %v1157_v54 = vld [vmem:[%s5060_s5 + $0x8] sm:$0x11] }
  0xc4   : > { %2644 = vmatpush1.bf16.msra.mxu0 %v4730_v48  ;;  %1516 = vmatprep.subr.bf16.mxu1 %v4735_v42  ;;  %v4759_v48 = vld [vmem:[%s6200_s1 + $0x144] ss:$8 sps:$4 sm:$0xff]   ;;  %v5831_v42 = vcombine.low %v5793_v16, %v5797_v17  ;;  %v1189_v31 = vshll.u32 %v1157_v54, 16  ;;  %v4808_v54 = vld [vmem:[%s6200_s1 + $0x5c0] ss:$8 sps:$4 sm:$0xff]  }
  0xc5   : > { %2951 = vmatprep.subr.bf16.mxu0 %v4738_v39  ;;  %v5835_v39 = vsel %vm5583_vm5, %v4027_v28, %v2382_v29  ;;  %v4801_v28 = vld [vmem:[%s6200_s1 + $0x1b4] ss:$8 sps:$4 sm:$0xff]  }
  0xc6   : > { %1068 = vmatmul.mubr.bf16.vlgmr.msra.gmra.mrb[0].mxu1 %v5204_v47  ;;  %v4750_v47 = vld [vmem:[%s6200_s1 + $0x524] ss:$8 sps:$4 sm:$0xff]   ;;  %v4804_v29 = vld [vmem:[%s6200_s1 + $0x5b4] ss:$8 sps:$4 sm:$0xff]  }
  0xc7   : > { %2646 = vmatmul.mubr.bf16.vlgmr.msra.gmra.mrb[0].mxu0 %v4061_v58  ;;  %1517 = vmatpush1.bf16.msra.mxu1 %v4733_v41  ;;  %v4760_v58 = vld [vmem:[%s6200_s1 + $0x540] ss:$8 sps:$4 sm:$0xff]  }
  0xc8   : > { %2952 = vmatpush1.bf16.msra.mxu0 %v4736_v43  ;;  %1518 = vmatprep.subr.bf16.mxu1 %v4741_v30  ;;  %v1186_v43 = vor.u32 %v1185_v34, %v1182_v33  ;;  %v4765_v30 = vld [vmem:[%s6200_s1 + $0x154] ss:$8 sps:$4 sm:$0xff]   ;;  %v4807_v33 = vld [vmem:[%s6200_s1 + $0x1c4] ss:$8 sps:$4 sm:$0xff]  }
  0xc9   : > { %2953 = vmatprep.subr.bf16.mxu0 %v4744_v49  ;;  %1077 = vmatprep.mubr.bf16.mxu1 %v5251_v13  ;;  %v2331_v13 = vld [vmem:[%s5060_s5 + $0x70] sm:$0xee]  ;;  %v1191_v49 = vrot.slane %v1189_v31, 5  ;;  %v4810_v34 = vld [vmem:[%s6200_s1 + $0x5c4] ss:$8 sps:$4 sm:$0xff]  }
  0xca   : > { %2655 = vmatprep.mubr.bf16.mxu0 %v5768_v61  ;;  %v4028_v19 = vrot.slane %v2331_v13, 9  ;;  %v1187_v53 = vrot.slane %v1186_v43, 4  ;;  %v4790_v13 = vld [vmem:[%s6200_s1 + $0x590] ss:$8 sps:$4 sm:$0xff]  }
  0xcb   : > { %1519 = vmatpush1.bf16.msra.mxu1 %v4739_v59  ;;  %v4763_v59 = vld [vmem:[%s6200_s1 + $0x150] ss:$8 sps:$4 sm:$0xff]  }
  0xcc   : > { %2954 = vmatpush1.bf16.msra.mxu0 %v4742_v60  ;;  %1520 = vmatprep.subr.bf16.mxu1 %v4747_v5  ;;  %v5839_v41 = vsel %vm5583_vm5, %v4028_v19, %v2386_v15  ;;  %v4766_v60 = vld [vmem:[%s6200_s1 + $0x550] ss:$8 sps:$4 sm:$0xff]   ;;  %v5881_v2 = vsel %vm5110_vm2, %v1187_v53, %v1191_v49  ;;  %v4827_v53 = vld [vmem:[%s6200_s1 + $0x1f4] ss:$8 sps:$4 sm:$0xff]  }
  0xcd   : > { %2955 = vmatprep.subr.bf16.mxu0 %v4750_v47  ;;  %v5855_v51 = vcombine.high %v5835_v39, %v5839_v41  ;;  %v5877_v0 = vcombine.low %v5835_v39, %v5839_v41  ;;  %v3844_v5 = vcombine.high %v5881_v2, %v5128_v18  ;;  %v4135_v47 = vcombine.high %v5608_v50, %v5748_v1  ;;  %v4799_v19 = vld [vmem:[%s6200_s1 + $0x1b0] ss:$8 sps:$4 sm:$0xff]   ;;  %v4830_v49 = vld [vmem:[%s6200_s1 + $0x5f4] ss:$8 sps:$4 sm:$0xff]  }
  0xce   : > { %1078 = vmatmul.mubr.bf16.gmra.mrb[4].mxu1 %v5268_v23  ;;  %v4762_v23 = vld [vmem:[%s6200_s1 + $0x544] ss:$8 sps:$4 sm:$0xff]   ;;  %v4802_v15 = vld [vmem:[%s6200_s1 + $0x5b0] ss:$8 sps:$4 sm:$0xff]  }
  0xcf   : > { %2656 = vmatmul.mubr.bf16.gmra.mrb[4].mxu0 %v5788_v12  ;;  %1521 = vmatpush1.bf16.msra.mxu1 %v4745_v7  ;;  %v4775_v7 = vld [vmem:[%s6200_s1 + $0x170] ss:$8 sps:$4 sm:$0xff]  }
  0xd0   : > { %2956 = vmatpush1.bf16.msra.mxu0 %v4748_v8  ;;  %1522 = vmatprep.subr.bf16.mxu1 %v4753_v40  ;;  %v4778_v8 = vld [vmem:[%s6200_s1 + $0x570] ss:$8 sps:$4 sm:$0xff]   ;;  %v4798_v40 = vld [vmem:[%s6200_s1 + $0x5a4] ss:$8 sps:$4 sm:$0xff]  }
  0xd1   : > { %2957 = vmatprep.subr.bf16.mxu0 %v4756_v24  ;;  %1087 = vmatprep.mubr.bf16.mxu1 %v5309_v55  ;;  %v4757_v55 = vld [vmem:[%s6200_s1 + $0x140] ss:$8 sps:$4 sm:$0xff]   ;;  %v4811_v43 = vld [vmem:[%s6200_s1 + $0x1d0] ss:$8 sps:$4 sm:$0xff]  }
  0xd2   : > { %2665 = vmatprep.mubr.bf16.mxu0 %v5813_v27  ;;  %v4793_v24 = vld [vmem:[%s6200_s1 + $0x1a0] ss:$8 sps:$4 sm:$0xff]   ;;  %v4814_v31 = vld [vmem:[%s6200_s1 + $0x5d0] ss:$8 sps:$4 sm:$0xff]  }
  0xd3   : > { %1523 = vmatpush1.bf16.msra.mxu1 %v4751_v25  ;;  %v4796_v25 = vld [vmem:[%s6200_s1 + $0x5a0] ss:$8 sps:$4 sm:$0xff]  }
  0xd4   : > { %2958 = vmatpush1.bf16.msra.mxu0 %v4754_v35  ;;  %1524 = vmatprep.subr.bf16.mxu1 %v4759_v48  ;;  %v4805_v35 = vld [vmem:[%s6200_s1 + $0x1c0] ss:$8 sps:$4 sm:$0xff]   ;;  %v4813_v48 = vld [vmem:[%s6200_s1 + $0x1d4] ss:$8 sps:$4 sm:$0xff]  }
  0xd5   : > { %2959 = vmatprep.subr.bf16.mxu0 %v4762_v23  ;;  %v4816_v23 = vld [vmem:[%s6200_s1 + $0x5d4] ss:$8 sps:$4 sm:$0xff]  }
  0xd6   : > { %1088 = vmatmul.mubr.bf16.gmra.mrb[8].mxu1 %v5322_v63  ;;  %v4771_v63 = vld [vmem:[%s6200_s1 + $0x164] ss:$8 sps:$4 sm:$0xff]  }
  0xd7   : > { %2666 = vmatmul.mubr.bf16.gmra.mrb[8].mxu0 %v5831_v42  ;;  %1525 = vmatpush1.bf16.msra.mxu1 %v4757_v55  ;;  %v4821_v55 = vld [vmem:[%s6200_s1 + $0x1e4] ss:$8 sps:$4 sm:$0xff]  }
  0xd8   : > { %2960 = vmatpush1.bf16.msra.mxu0 %v4760_v58  ;;  %1526 = vmatprep.subr.bf16.mxu1 %v4765_v30  ;;  %v4824_v58 = vld [vmem:[%s6200_s1 + $0x5e4] ss:$8 sps:$4 sm:$0xff]   ;;  %v4819_v30 = vld [vmem:[%s6200_s1 + $0x1e0] ss:$8 sps:$4 sm:$0xff]  }
  0xd9   : > { %2961 = vmatprep.subr.bf16.mxu0 %v4768_v38  ;;  %1097 = vmatprep.mubr.bf16.mxu1 %v3778_v44  ;;  %v4772_v44 = vld [vmem:[%s6200_s1 + $0x560] ss:$8 sps:$4 sm:$0xff]  }
  0xda   : > { %2675 = vmatprep.mubr.bf16.mxu0 %v5855_v51  ;;  %v4822_v38 = vld [vmem:[%s6200_s1 + $0x5e0] ss:$8 sps:$4 sm:$0xff]  }
  0xdb   : > { %1527 = vmatpush1.bf16.msra.mxu1 %v4763_v59  ;;  %v4825_v59 = vld [vmem:[%s6200_s1 + $0x1f0] ss:$8 sps:$4 sm:$0xff]  }
  0xdc   : > { %2962 = vmatpush1.bf16.msra.mxu0 %v4766_v60  ;;  %1528 = vmatprep.subr.bf16.mxu1 %v4771_v63  ;;  %v4828_v60 = vld [vmem:[%s6200_s1 + $0x5f0] ss:$8 sps:$4 sm:$0xff]   ;;  %v4833_v63 = vld [vmem:[%s6200_s1 + $0x804] ss:$8 sps:$4 sm:$0xff]  }
  0xdd   : > { %2963 = vmatprep.subr.bf16.mxu0 %v4774_v62  ;;  %v3843_v62 = vcombine.low %v5881_v2, %v5128_v18  ;;  %v4834_v18 = vld [vmem:[%s6200_s1 + $0x810] ss:$8 sps:$4 sm:$0xff]   ;;  %v4837_v2 = vld [vmem:[%s6200_s1 + $0x820] ss:$8 sps:$4 sm:$0xff]  }
  0xde   : > { %1098 = vmatmul.mubr.bf16.gmra.mrb[12].mxu1 %v3777_v45  ;;  %v4784_v45 = vld [vmem:[%s6200_s1 + $0x580] ss:$8 sps:$4 sm:$0xff]  }
  0xdf   : > { %2676 = vmatmul.mubr.bf16.gmra.mrb[12].mxu0 %v5877_v0  ;;  %1529 = vmatpush1.bf16.msra.mxu1 %v4769_v3  ;;  %v4134_v3 = vcombine.low %v5608_v50, %v5748_v1  ;;  %v4839_v50 = vld [vmem:[%s6200_s1 + $0x824] ss:$8 sps:$4 sm:$0xff]   ;;  %v4136_v1 = vcombine.low %v5752_v46, %v5793_v16 }
  0xe0   : > { %2964 = vmatpush1.bf16.msra.mxu0 %v4772_v44  ;;  %1530 = vmatprep.subr.bf16.mxu1 %v4777_v4  ;;  %v4831_v44 = vld [vmem:[%s6200_s1 + $0x800] ss:$8 sps:$4 sm:$0xff]   ;;  %v4836_v4 = vld [vmem:[%s6200_s1 + $0x814] ss:$8 sps:$4 sm:$0xff]  }
  0xe1   : > { %2965 = vmatprep.subr.bf16.mxu0 %v4780_v9  ;;  %1548 = vmatprep.mubr.bf16.mxu1 %v3844_v5  ;;  %v4137_v9 = vcombine.high %v5752_v46, %v5793_v16  ;;  %v2333_v5 = vld [vmem:[%s5060_s5 + $0x80] sm:$0xee] }
  0xe2   : > { %2983 = vmatprep.mubr.bf16.mxu0 %v4135_v47  ;;  %v2334_v47 = vld [vmem:[%s5060_s5 + $0x88] sm:$0x11]  ;;  %v4101_v46 = vrot.slane %v2333_v5, 9 }
  0xe3   : > { %1531 = vmatpush1.bf16.msra.mxu1 %v4775_v7  ;;  %v4842_v7 = vld [vmem:[%s6200_s1 + $0x834] ss:$8 sps:$4 sm:$0xff]   ;;  %v2738_v16 = vrot.slane %v2334_v47, 5 }
  0xe4   : > { %2966 = vmatpush1.bf16.msra.mxu0 %v4778_v8  ;;  %1532 = vmatprep.subr.bf16.mxu1 %v4783_v14  ;;  %v4840_v8 = vld [vmem:[%s6200_s1 + $0x830] ss:$8 sps:$4 sm:$0xff]   ;;  %v4845_v14 = vld [vmem:[%s6200_s1 + $0x844] ss:$8 sps:$4 sm:$0xff]  }
  0xe5   : > { %2967 = vmatprep.subr.bf16.mxu0 %v4786_v56  ;;  %v6051_v56 = vsel %vm5583_vm5, %v4101_v46, %v2738_v16 }
  0xe7   : > { %1533 = vmatpush1.bf16.msra.mxu1 %v4781_v37  ;;  %v4843_v37 = vld [vmem:[%s6200_s1 + $0x840] ss:$8 sps:$4 sm:$0xff]  }
  0xe8   : > { %2968 = vmatpush1.bf16.msra.mxu0 %v4784_v45  ;;  %1534 = vmatprep.subr.bf16.mxu1 %v4789_v20  ;;  %v4141_v45 = vcombine.high %v5839_v41, %v6051_v56  ;;  %v4140_v20 = vcombine.low %v5839_v41, %v6051_v56  ;;  %v4857_v41 = vld [vmem:[%s6200_s1 + $0x884] ss:$8 sps:$4 sm:$0xff]  }
  0xe9   : > { %2969 = vmatprep.subr.bf16.mxu0 %v4792_v10  ;;  %v4854_v10 = vld [vmem:[%s6200_s1 + $0x874] ss:$8 sps:$4 sm:$0xff]  }
  0xeb   : > { %1535 = vmatpush1.bf16.msra.mxu1 %v4787_v21  ;;  %v4860_v21 = vld [vmem:[%s6200_s1 + $0x894] ss:$8 sps:$4 sm:$0xff]  }
  0xec   : > { %2970 = vmatpush1.bf16.msra.mxu0 %v4790_v13  ;;  %1536 = vmatprep.subr.bf16.mxu1 %v4795_v6  ;;  %v4861_v13 = vld [vmem:[%s6200_s1 + $0x8a0] ss:$8 sps:$4 sm:$0xff]   ;;  %v4866_v6 = vld [vmem:[%s6200_s1 + $0x8b4] ss:$8 sps:$4 sm:$0xff]  }
  0xed   : > { %2971 = vmatprep.subr.bf16.mxu0 %v4798_v40  ;;  %v4864_v40 = vld [vmem:[%s6200_s1 + $0x8b0] ss:$8 sps:$4 sm:$0xff]  }
  0xef   : > { %1537 = vmatpush1.bf16.msra.mxu1 %v4793_v24  ;;  %v4869_v24 = vld [vmem:[%s6200_s1 + $0x8c4] ss:$8 sps:$4 sm:$0xff]  }
  0xf0   : > { %2972 = vmatpush1.bf16.msra.mxu0 %v4796_v25  ;;  %1538 = vmatprep.subr.bf16.mxu1 %v4801_v28  ;;  %v4867_v25 = vld [vmem:[%s6200_s1 + $0x8c0] ss:$8 sps:$4 sm:$0xff]   ;;  %v4872_v28 = vld [vmem:[%s6200_s1 + $0x8d4] ss:$8 sps:$4 sm:$0xff]  }
  0xf1   : > { %2973 = vmatprep.subr.bf16.mxu0 %v4804_v29  ;;  %v4870_v29 = vld [vmem:[%s6200_s1 + $0x8d0] ss:$8 sps:$4 sm:$0xff]  }
  0xf3   : > { %1539 = vmatpush1.bf16.msra.mxu1 %v4799_v19  ;;  %v4875_v19 = vld [vmem:[%s6200_s1 + $0x8e4] ss:$8 sps:$4 sm:$0xff]  }
  0xf4   : > { %2974 = vmatpush1.bf16.msra.mxu0 %v4802_v15  ;;  %1540 = vmatprep.subr.bf16.mxu1 %v4807_v33  ;;  %v2335_v15 = vld [vmem:[%s5060_s5 + $0x90] sm:$0xee]  ;;  %v2336_v33 = vld [vmem:[%s5060_s5 + $0x98] sm:$0x11] }
  0xf5   : > { %2975 = vmatprep.subr.bf16.mxu0 %v4810_v34  ;;  %v4873_v34 = vld [vmem:[%s6200_s1 + $0x8e0] ss:$8 sps:$4 sm:$0xff]  }
  0xf7   : > { %1541 = vmatpush1.bf16.msra.mxu1 %v4805_v35  ;;  %v4878_v35 = vld [vmem:[%s6200_s1 + $0x8f4] ss:$8 sps:$4 sm:$0xff]  }
  0xf8   : > { %2976 = vmatpush1.bf16.msra.mxu0 %v4808_v54  ;;  %1542 = vmatprep.subr.bf16.mxu1 %v4813_v48  ;;  %v4174_v54 = vrot.slane %v2335_v15, 9  ;;  %v3076_v48 = vrot.slane %v2336_v33, 5 }
  0xf9   : > { %2977 = vmatprep.subr.bf16.mxu0 %v4816_v23  ;;  %v4876_v23 = vld [vmem:[%s6200_s1 + $0x8f0] ss:$8 sps:$4 sm:$0xff]  }
  0xfb   : > { %1543 = vmatpush1.bf16.msra.mxu1 %v4811_v43  ;;  %v3077_v43 = vsel %vm5583_vm5, %v4174_v54, %v3076_v48 }
  0xfc   : > { %2978 = vmatpush1.bf16.msra.mxu0 %v4814_v31  ;;  %1544 = vmatprep.subr.bf16.mxu1 %v4821_v55  ;;  %v4208_v31 = vcombine.high %v6051_v56, %v3077_v43  ;;  %v4207_v55 = vcombine.low %v6051_v56, %v3077_v43 }
  0xfd   : > { %2979 = vmatprep.subr.bf16.mxu0 %v4824_v58 }
  0xff   : > { %1545 = vmatpush1.bf16.msra.mxu1 %v4819_v30 }
 0x100   : > { %2980 = vmatpush1.bf16.msra.mxu0 %v4822_v38  ;;  %1546 = vmatprep.subr.bf16.mxu1 %v4827_v53 }
 0x101   : > { %2981 = vmatprep.subr.bf16.mxu0 %v4830_v49 }
 0x103   : > { %1547 = vmatpush1.bf16.msra.mxu1 %v4825_v59 }
 0x104   : > { %2982 = vmatpush1.bf16.msra.mxu0 %v4828_v60  ;;  %4260 = vmatprep.subr.bf16.mxu1 %v4833_v63 }
 0x105   : > { %3277 = vmatprep.subr.bf16.mxu0 %v4833_v63 }
 0x106   : > { %1549 = vmatmul.mubr.bf16.vlgmr.msra.gmra.mrb[0].mxu1 %v3843_v62 }
 0x107   : > { %2984 = vmatmul.mubr.bf16.vlgmr.msra.gmra.mrb[0].mxu0 %v4134_v3  ;;  %4276 = vmatpush1.bf16.msra.mxu1 %v4831_v44 }
 0x108   : > { %3278 = vmatpush1.bf16.msra.mxu0 %v4831_v44  ;;  %4261 = vmatprep.subr.bf16.mxu1 %v4836_v4 }
 0x109   : > { %3279 = vmatprep.subr.bf16.mxu0 %v4836_v4  ;;  %1558 = vmatprep.mubr.bf16.mxu1 %v5396_v52  ;;  %v4139_v52 = vcombine.high %v5797_v17, %v5835_v39 }
 0x10a   : > { %2993 = vmatprep.mubr.bf16.mxu0 %v4137_v9 }
 0x10b   : > { %4277 = vmatpush1.bf16.msra.mxu1 %v4834_v18 }
 0x10c   : > { %3280 = vmatpush1.bf16.msra.mxu0 %v4834_v18  ;;  %4262 = vmatprep.subr.bf16.mxu1 %v4839_v50 }
 0x10d   : > { %3281 = vmatprep.subr.bf16.mxu0 %v4839_v50 }
 0x10e   : > { %1559 = vmatmul.mubr.bf16.gmra.mrb[4].mxu1 %v5467_v26  ;;  %v4138_v26 = vcombine.low %v5797_v17, %v5835_v39  ;;  %v4846_v17 = vld [vmem:[%s6200_s1 + $0x850] ss:$8 sps:$4 sm:$0xff]   ;;  %v4851_v39 = vld [vmem:[%s6200_s1 + $0x864] ss:$8 sps:$4 sm:$0xff]  }
 0x10f   : > { %2994 = vmatmul.mubr.bf16.gmra.mrb[4].mxu0 %v4136_v1  ;;  %4278 = vmatpush1.bf16.msra.mxu1 %v4837_v2 }
 0x110   : > { %3282 = vmatpush1.bf16.msra.mxu0 %v4837_v2  ;;  %4263 = vmatprep.subr.bf16.mxu1 %v4842_v7 }
 0x111   : > { %3283 = vmatprep.subr.bf16.mxu0 %v4842_v7  ;;  %1568 = vmatprep.mubr.bf16.mxu1 %v5485_v32  ;;  %v4848_v32 = vld [vmem:[%s6200_s1 + $0x854] ss:$8 sps:$4 sm:$0xff]  }
 0x112   : > { %3003 = vmatprep.mubr.bf16.mxu0 %v4139_v52 }
 0x113   : > { %4279 = vmatpush1.bf16.msra.mxu1 %v4840_v8 }
 0x114   : > { %3284 = vmatpush1.bf16.msra.mxu0 %v4840_v8  ;;  %4264 = vmatprep.subr.bf16.mxu1 %v4845_v14 }
 0x115   : > { %3285 = vmatprep.subr.bf16.mxu0 %v4845_v14 }
 0x116   : > { %1569 = vmatmul.mubr.bf16.gmra.mrb[8].mxu1 %v5511_v36  ;;  %v4849_v36 = vld [vmem:[%s6200_s1 + $0x860] ss:$8 sps:$4 sm:$0xff]  }
 0x117   : > { %3004 = vmatmul.mubr.bf16.gmra.mrb[8].mxu0 %v4138_v26  ;;  %4280 = vmatpush1.bf16.msra.mxu1 %v4843_v37 }
 0x118   : > { %3286 = vmatpush1.bf16.msra.mxu0 %v4843_v37  ;;  %4265 = vmatprep.subr.bf16.mxu1 %v4848_v32  ;;  %v3416_v37 = vlaneseq }
 0x119   : > { %3287 = vmatprep.subr.bf16.mxu0 %v4848_v32  ;;  %1578 = vmatprep.mubr.bf16.mxu1 %v5536_v57  ;;  %v4852_v57 = vld [vmem:[%s6200_s1 + $0x870] ss:$8 sps:$4 sm:$0xff]  }
 0x11a   : > { %3013 = vmatprep.mubr.bf16.mxu0 %v4141_v45  ;;  %v3417_v32 = vshrl.u32 %v3416_v37, 7 }
 0x11b   : > { %4281 = vmatpush1.bf16.msra.mxu1 %v4846_v17 }
 0x11c   : > { %3288 = vmatpush1.bf16.msra.mxu0 %v4846_v17  ;;  %4266 = vmatprep.subr.bf16.mxu1 %v4851_v39  ;;  %v3418_v45 = vsub.s32 0, %v3417_v32  ;;  %v3414_v17 = vld [vmem:[%s6201_s2] sm:$0x3] }
 0x11d   : > { %3289 = vmatprep.subr.bf16.mxu0 %v4851_v39  ;;  %v3422_v39 = vsub.s32 1, %v3417_v32 }
 0x11e   : > { %1579 = vmatmul.mubr.bf16.gmra.mrb[12].mxu1 %v5565_v11  ;;  %v4855_v11 = vld [vmem:[%s6200_s1 + $0x880] ss:$8 sps:$4 sm:$0xff]  }
 0x11f   : > { %3014 = vmatmul.mubr.bf16.gmra.mrb[12].mxu0 %v4140_v20  ;;  %4282 = vmatpush1.bf16.msra.mxu1 %v4849_v36  ;;  %v6156_v20 = vrot.slane %v3414_v17, %v3418_v45 }
 0x120   : > { %3290 = vmatpush1.bf16.msra.mxu0 %v4849_v36  ;;  %4267 = vmatprep.subr.bf16.mxu1 %v4854_v10 }
 0x121   : > { %3291 = vmatprep.subr.bf16.mxu0 %v4854_v10  ;;  %3309 = vmatprep.mubr.bf16.mxu0 %v5768_v61  ;;  %v4858_v61 = vld [vmem:[%s6200_s1 + $0x890] ss:$8 sps:$4 sm:$0xff]  }
 0x122   : > { %3329 = vmatprep.mubr.bf16.mxu1 %v5855_v51  ;;  %v4863_v51 = vld [vmem:[%s6200_s1 + $0x8a4] ss:$8 sps:$4 sm:$0xff]  }
 0x123   : > { %4283 = vmatpush1.bf16.msra.mxu1 %v4852_v57 }
 0x124   : > { %3292 = vmatpush1.bf16.msra.mxu0 %v4852_v57  ;;  %4268 = vmatprep.subr.bf16.mxu1 %v4857_v41  ;;  %v6158_v57 = vrot.slane %v3414_v17, %v3422_v39 }
 0x125   : > { %3293 = vmatprep.subr.bf16.mxu0 %v4857_v41 }
 0x127   : > { %4284 = vmatpush1.bf16.msra.mxu1 %v4855_v11 }
 0x128   : > { %3294 = vmatpush1.bf16.msra.mxu0 %v4855_v11  ;;  %4269 = vmatprep.subr.bf16.mxu1 %v4860_v21 }
 0x129   : > { %3295 = vmatprep.subr.bf16.mxu0 %v4860_v21 }
 0x12b   : > { %4285 = vmatpush1.bf16.msra.mxu1 %v4858_v61 }
 0x12c   : > { %3296 = vmatpush1.bf16.msra.mxu0 %v4858_v61  ;;  %4270 = vmatprep.subr.bf16.mxu1 %v4863_v51 }
 0x12d   : > { %3297 = vmatprep.subr.bf16.mxu0 %v4863_v51 }
 0x12f   : > { %4286 = vmatpush1.bf16.msra.mxu1 %v4861_v13 }
 0x130   : > { %3298 = vmatpush1.bf16.msra.mxu0 %v4861_v13  ;;  %4271 = vmatprep.subr.bf16.mxu1 %v4866_v6 }
 0x131   : > { %3299 = vmatprep.subr.bf16.mxu0 %v4866_v6 }
 0x133   : > { %4287 = vmatpush1.bf16.msra.mxu1 %v4864_v40 }
 0x134   : > { %3300 = vmatpush1.bf16.msra.mxu0 %v4864_v40  ;;  %4272 = vmatprep.subr.bf16.mxu1 %v4869_v24 }
 0x135   : > { %3301 = vmatprep.subr.bf16.mxu0 %v4869_v24 }
 0x137   : > { %4288 = vmatpush1.bf16.msra.mxu1 %v4867_v25 }
 0x138   : > { %3302 = vmatpush1.bf16.msra.mxu0 %v4867_v25  ;;  %4273 = vmatprep.subr.bf16.mxu1 %v4872_v28 }
 0x139   : > { %3303 = vmatprep.subr.bf16.mxu0 %v4872_v28 }
 0x13b   : > { %4289 = vmatpush1.bf16.msra.mxu1 %v4870_v29 }
 0x13c   : > { %3304 = vmatpush1.bf16.msra.mxu0 %v4870_v29  ;;  %4274 = vmatprep.subr.bf16.mxu1 %v4875_v19 }
 0x13d   : > { %3305 = vmatprep.subr.bf16.mxu0 %v4875_v19 }
 0x13f   : > { %4290 = vmatpush1.bf16.msra.mxu1 %v4873_v34 }
 0x140   : > { %3306 = vmatpush1.bf16.msra.mxu0 %v4873_v34  ;;  %4275 = vmatprep.subr.bf16.mxu1 %v4878_v35 }
 0x141   : > { %3307 = vmatprep.subr.bf16.mxu0 %v4878_v35 }
 0x143   : > { %4291 = vmatpush1.bf16.msra.mxu1 %v4876_v23 }
 0x144   : > { %3308 = vmatpush1.bf16.msra.mxu0 %v4876_v23 }
 0x146   : > { %3330 = vmatmul.mubr.bf16.vlgmr.msra.gmra.mrb[16].mxu1 %v5877_v0 }
 0x147   : > { %3310 = vmatmul.mubr.bf16.vlgmr.msra.gmra.mrb[0].mxu0 %v5788_v12  ;;  %3339 = vmatprep.mubr.bf16.mxu1 %v4208_v31 }
 0x148   : > { %3319 = vmatprep.mubr.bf16.mxu0 %v5813_v27 }
 0x14e   : > { %3340 = vmatmul.mubr.bf16.gmra.mrb[20].mxu1 %v4207_v55 }
 0x14f   : > { %3320 = vmatmul.mubr.bf16.gmra.mrb[4].mxu0 %v5831_v42 }
 0x1d9   : > { %v1550_v58 = vpop.f32.mrb[0].mxu1 }
 0x1da   : > { %v1552_v30 = vpop.f32.mrb[1].mxu1 }
 0x1db   : > { %v1554_v22 = vpop.f32.mrb[2].mxu1 }
 0x1dc   : > { %v1556_v38 = vpop.f32.mrb[3].mxu1 }
 0x1e1   : > { %v6141_v53 = vpop.f32.mrb[4].mxu1 }
 0x1e2   : > { %v6143_v49 = vpop.f32.mrb[5].mxu1 }
 0x1e3   : > { %v6145_v59 = vpop.f32.mrb[6].mxu1 }
 0x1e4   : > { %v6147_v12 = vpop.f32.mrb[7].mxu1 }
 0x1e9   : > { %v1570_v0 = vpop.f32.mrb[8].mxu1 }
 0x1ea   : > { %v3005_v27 = vpop.f32.mrb[8].mxu0  ;;  %v1572_v63 = vpop.f32.mrb[9].mxu1 }
 0x1eb   : > { %v4300_v60 = vadd.f32 %v3005_v27, %v1570_v0  ;;  %v3007_v62 = vpop.f32.mrb[9].mxu0  ;;  %v1574_v42 = vpop.f32.mrb[10].mxu1 }
 0x1ec   : > { %v4302_v3 = vadd.f32 %v3007_v62, %v1572_v63  ;;  %v3009_v44 = vpop.f32.mrb[10].mxu0  ;;  %v1576_v9 = vpop.f32.mrb[11].mxu1 }
 0x1ed   : > { %v4304_v4 = vadd.f32 %v3009_v44, %v1574_v42  ;;  %v3011_v18 = vpop.f32.mrb[11].mxu0 }
 0x1ee   : > { %v4306_v50 = vadd.f32 %v3011_v18, %v1576_v9 }
 0x1f1   : > { %v1580_v1 = vpop.f32.mrb[12].mxu1 }
 0x1f2   : > { %v3015_v2 = vpop.f32.mrb[12].mxu0  ;;  %v1582_v47 = vpop.f32.mrb[13].mxu1 }
 0x1f3   : > { %v4308_v5 = vadd.f32 %v3015_v2, %v1580_v1  ;;  %v3017_v7 = vpop.f32.mrb[13].mxu0  ;;  %v1584_v46 = vpop.f32.mrb[14].mxu1 }
 0x1f4   : > { %v4310_v52 = vadd.f32 %v3017_v7, %v1582_v47  ;;  %v3019_v16 = vpop.f32.mrb[14].mxu0  ;;  %v1586_v14 = vpop.f32.mrb[15].mxu1 }
 0x1f5   : > { %v6149_v8 = vadd.f32 %v3019_v16, %v1584_v46  ;;  %v3021_v26 = vpop.f32.mrb[15].mxu0 }
 0x1f6   : > { %v6151_v56 = vadd.f32 %v3021_v26, %v1586_v14 }
 0x219   : > { %v3331_v10 = vpop.f32.mrb[16].mxu1 }
 0x21a   : > { %v3311_v36 = vpop.f32.mrb[0].mxu0  ;;  %v4301_v11 = vadd.f32 %v4300_v60, %v3331_v10  ;;  %v3333_v61 = vpop.f32.mrb[17].mxu1 }
 0x21b   : > { %v4292_v41 = vadd.f32 %v3311_v36, %v1550_v58  ;;  %v3313_v21 = vpop.f32.mrb[1].mxu0  ;;  %v4303_v13 = vadd.f32 %v4302_v3, %v3333_v61  ;;  %v3335_v40 = vpop.f32.mrb[18].mxu1 }
 0x21c   : > { %v4293_v51 = vadd.f32 %v3313_v21, %v1552_v30  ;;  %v3315_v6 = vpop.f32.mrb[2].mxu0  ;;  %v3434_v25 = vadd.f32 %v4301_v11, %v6156_v20  ;;  %v4305_v29 = vadd.f32 %v4304_v4, %v3335_v40  ;;  %v3337_v15 = vpop.f32.mrb[19].mxu1 }
 0x21d   : > { %v3426_v24 = vadd.f32 %v4292_v41, %v6156_v20  ;;  %v4294_v28 = vadd.f32 %v3315_v6, %v1554_v22  ;;  %v3317_v19 = vpop.f32.mrb[3].mxu0  ;;  %v3435_v34 = vadd.f32 %v4303_v13, %v6158_v57  ;;  %v4307_v54 = vadd.f32 %v4306_v50, %v3337_v15 }
 0x21e   : > { %v3427_v33 = vadd.f32 %v4293_v51, %v6158_v57  ;;  %v4295_v35 = vadd.f32 %v3317_v19, %v1556_v38  ;;  %v3450_v23 = vmax.f32 %v3434_v25, 0.0  ;;  %v3436_v31 = vadd.f32 %v4305_v29, %v6156_v20 }
 0x21f   : > { %v3442_v48 = vmax.f32 %v3426_v24, 0.0  ;;  %v3428_v43 = vadd.f32 %v4294_v28, %v6156_v20  ;;  %v3451_v58 = vmax.f32 %v3435_v34, 0.0  ;;  %v3437_v22 = vadd.f32 %v4307_v54, %v6158_v57 }
 0x220   : > { %v3443_v55 = vmax.f32 %v3427_v33, 0.0  ;;  %v3429_v30 = vadd.f32 %v4295_v35, %v6158_v57  ;;  %v3452_v0 = vmax.f32 %v3436_v31, 0.0 }
 0x221   : > { %v3444_v38 = vmax.f32 %v3428_v43, 0.0  ;;  %v4245_v60 = vpack.c.bf16 %v3451_v58, %v3450_v23  ;;  %v3453_v62 = vmax.f32 %v3437_v22, 0.0  ;;  %v3341_v42 = vpop.f32.mrb[20].mxu1 }
 0x222   : > { %v4241_v27 = vpack.c.bf16 %v3443_v55, %v3442_v48  ;;  %v3445_v63 = vmax.f32 %v3429_v30, 0.0  ;;  %v3321_v3 = vpop.f32.mrb[4].mxu0  ;;  %v4309_v4 = vadd.f32 %v4308_v5, %v3341_v42  ;;  %v3343_v18 = vpop.f32.mrb[21].mxu1 }
 0x223   : > { %v4296_v44 = vadd.f32 %v3321_v3, %v6141_v53  ;;  %v3323_v9 = vpop.f32.mrb[5].mxu0  ;;  %4253 = vst.sshfl [vmem:[%s6172_s17 + $0x10] sm:$0x33 pattern:$0x76325410] %v4245_v60  ;;  %v4246_v1 = vpack.c.bf16 %v3453_v62, %v3452_v0  ;;  %v4311_v47 = vadd.f32 %v4310_v52, %v3343_v18  ;;  %v3345_v46 = vpop.f32.mrb[22].mxu1 }
 0x224   : > { %4249 = vst.sshfl [vmem:[%s6172_s17] sm:$0x33 pattern:$0x76325410] %v4241_v27  ;;  %v4242_v50 = vpack.c.bf16 %v3445_v63, %v3444_v38  ;;  %v4297_v2 = vadd.f32 %v3323_v9, %v6143_v49  ;;  %v3325_v7 = vpop.f32.mrb[6].mxu0  ;;  %v3438_v14 = vadd.f32 %v4309_v4, %v6156_v20  ;;  %v4313_v5 = vadd.f32 %v6149_v8, %v3345_v46  ;;  %v3347_v37 = vpop.f32.mrb[23].mxu1 }
 0x225   : > { %v3430_v16 = vadd.f32 %v4296_v44, %v6156_v20  ;;  %v4298_v53 = vadd.f32 %v3325_v7, %v6145_v59  ;;  %v3327_v26 = vpop.f32.mrb[7].mxu0  ;;  %4254 = vst.sshfl [vmem:[%s6172_s17 + $0x14] sm:$0x33 pattern:$0x76325410] %v4246_v1  ;;  %v3439_v45 = vadd.f32 %v4311_v47, %v6158_v57  ;;  %v4315_v52 = vadd.f32 %v6151_v56, %v3347_v37 }
 0x226   : > { %4250 = vst.sshfl [vmem:[%s6172_s17 + $0x4] sm:$0x33 pattern:$0x76325410] %v4242_v50  ;;  %v3431_v32 = vadd.f32 %v4297_v2, %v6158_v57  ;;  %v4299_v49 = vadd.f32 %v3327_v26, %v6147_v12  ;;  %v3454_v39 = vmax.f32 %v3438_v14, 0.0  ;;  %v3440_v8 = vadd.f32 %v4313_v5, %v6156_v20 }
 0x227   : > { %v3446_v17 = vmax.f32 %v3430_v16, 0.0  ;;  %v3432_v59 = vadd.f32 %v4298_v53, %v6156_v20  ;;  %v3455_v10 = vmax.f32 %v3439_v45, 0.0  ;;  %v3441_v11 = vadd.f32 %v4315_v52, %v6158_v57 }
 0x228   : > { %v3447_v36 = vmax.f32 %v3431_v32, 0.0  ;;  %v3433_v41 = vadd.f32 %v4299_v49, %v6158_v57  ;;  %v3456_v12 = vmax.f32 %v3440_v8, 0.0 }
 0x229   : > { %v3448_v21 = vmax.f32 %v3432_v59, 0.0  ;;  %v4247_v51 = vpack.c.bf16 %v3455_v10, %v3454_v39  ;;  %v3457_v13 = vmax.f32 %v3441_v11, 0.0 }
 0x22a   : > { %v4243_v61 = vpack.c.bf16 %v3447_v36, %v3446_v17  ;;  %v3449_v56 = vmax.f32 %v3433_v41, 0.0 }
 0x22b   : > { %4255 = vst.sshfl [vmem:[%s6172_s17 + $0x18] sm:$0x33 pattern:$0x76325410] %v4247_v51  ;;  %v4248_v40 = vpack.c.bf16 %v3457_v13, %v3456_v12 }
 0x22c   : > { %4251 = vst.sshfl [vmem:[%s6172_s17 + $0x8] sm:$0x33 pattern:$0x76325410] %v4243_v61  ;;  %v4244_v6 = vpack.c.bf16 %v3449_v56, %v3448_v21 }
 0x22d   : > { %4256 = vst.sshfl [vmem:[%s6172_s17 + $0x1c] sm:$0x33 pattern:$0x76325410] %v4248_v40 }
 0x22e   : > { %4252 = vst.sshfl [vmem:[%s6172_s17 + $0xc] sm:$0x33 pattern:$0x76325410] %v4244_v6 }
 0x22f PF: > { %s13_s12 = sadd.s32 1, %s4885_s12  }
 0x230   : > { %p10_p4 = scmp.ge.s32.totalorder %s13_s12, 4  }
 0x232   :  { %12 = sbr.rel (!%p10_p4) target bundleno = 1 (0x1), region = 70 }

// kernel: fpn_forward.11
= control target key start
LH: loop header
LB: loop body
LE: loop exit
PB: predicated region body
PF: predicated region fallthrough
CT: control target
= control target key end

     0   :  { %s4867_s12 = smov 0   ;;  %s6159_s0 = inlined_call_operand.vmem [shape: bf16[2,10,10,256], index: 0, kind: input, shape index: {}]   ;;  %s6160_s1 = inlined_call_operand.vmem [shape: bf16[3,3,256,256], index: 1, kind: input, shape index: {}]   ;;  %s6161_s2 = inlined_call_operand.vmem [shape: f32[1,256], index: 2, kind: input, shape index: {}]   ;;  %s6162_s3 = inlined_call_operand.vmem [shape: bf16[2,8,8,256], index: 3, kind: output, shape index: {}]  }
   0x1 LB: > { %s3585_s13 = sadd.s32 4294967295, %s4845_s12   ;;  %p3589_p0 = scmp.ge.s32.totalorder %s4845_s12, 1  ;;  %s4845_s12 = sphi %s4867_s12, %s13_s12  }
   0x2   : > { %p137_p1 = scmp.lt.s32.totalorder %s4845_s12, 3 }
   0x4   : > { %p138_p2 = pnand %p3589_p0, %p137_p1 }
   0x5   : > { %v4389_v0 = vld [vmem:[%s6160_s1 + $0x4] ss:$8 sps:$4 sm:$0xff] (!%p138_p2)   ;;  %v4393_v2 = vld [vmem:[%s6160_s1] ss:$8 sps:$4 sm:$0xff] (!%p138_p2)   ;;  %v4395_v4 = vld [vmem:[%s6160_s1 + $0x14] ss:$8 sps:$4 sm:$0xff] (!%p138_p2)  }
   0x6   : > { %141 = sbr.rel (%p138_p2) target bundleno = 559 (0x22f), region = 32  ;;  %v4391_v1 = vld [vmem:[%s6160_s1 + $0x404] ss:$8 sps:$4 sm:$0xff] (!%p138_p2)   ;;  %413 = vmatprep.subr.bf16.mxu1 (!%p138_p2), %v4389_v0  ;;  %v4394_v3 = vld [vmem:[%s6160_s1 + $0x400] ss:$8 sps:$4 sm:$0xff] (!%p138_p2)   ;;  %p161_p3 = scmp.lt.s32.totalorder (!%p138_p2), %s3585_s13, 1 }
   0x7   : > { %1862 = vmatprep.subr.bf16.mxu0 (!%p138_p2), %v4391_v1  ;;  %414 = vmatpush1.bf16.msra.mxu1 (!%p138_p2), %v4393_v2  ;;  %v4397_v5 = vld [vmem:[%s6160_s1 + $0x414] ss:$8 sps:$4 sm:$0xff] (!%p138_p2)   ;;  %v4399_v6 = vld [vmem:[%s6160_s1 + $0x10] ss:$8 sps:$4 sm:$0xff] (!%p138_p2)   ;;  %v4401_v8 = vld [vmem:[%s6160_s1 + $0x24] ss:$8 sps:$4 sm:$0xff] (!%p138_p2)  }
   0x8   : > { %1863 = vmatpush1.bf16.msra.mxu0 (!%p138_p2), %v4394_v3  ;;  %415 = vmatprep.subr.bf16.mxu1 (!%p138_p2), %v4395_v4  ;;  %v4400_v7 = vld [vmem:[%s6160_s1 + $0x410] ss:$8 sps:$4 sm:$0xff] (!%p138_p2)   ;;  %v4403_v9 = vld [vmem:[%s6160_s1 + $0x424] ss:$8 sps:$4 sm:$0xff] (!%p138_p2)   ;;  %v4405_v10 = vld [vmem:[%s6160_s1 + $0x20] ss:$8 sps:$4 sm:$0xff] (!%p138_p2)  }
   0x9   : > { %1864 = vmatprep.subr.bf16.mxu0 (!%p138_p2), %v4397_v5  ;;  %v4406_v11 = vld [vmem:[%s6160_s1 + $0x420] ss:$8 sps:$4 sm:$0xff] (!%p138_p2)   ;;  %v4407_v12 = vld [vmem:[%s6160_s1 + $0x34] ss:$8 sps:$4 sm:$0xff] (!%p138_p2)   ;;  %v4411_v14 = vld [vmem:[%s6160_s1 + $0x30] ss:$8 sps:$4 sm:$0xff] (!%p138_p2)  }
   0xa   : > { %v4409_v13 = vld [vmem:[%s6160_s1 + $0x434] ss:$8 sps:$4 sm:$0xff] (!%p138_p2)   ;;  %v4412_v15 = vld [vmem:[%s6160_s1 + $0x430] ss:$8 sps:$4 sm:$0xff] (!%p138_p2)   ;;  %v4413_v16 = vld [vmem:[%s6160_s1 + $0x44] ss:$8 sps:$4 sm:$0xff] (!%p138_p2)  }
   0xb   : > { %416 = vmatpush1.bf16.msra.mxu1 (!%p138_p2), %v4399_v6  ;;  %v4415_v17 = vld [vmem:[%s6160_s1 + $0x444] ss:$8 sps:$4 sm:$0xff] (!%p138_p2)   ;;  %v4417_v18 = vld [vmem:[%s6160_s1 + $0x40] ss:$8 sps:$4 sm:$0xff] (!%p138_p2)   ;;  %v4419_v20 = vld [vmem:[%s6160_s1 + $0x54] ss:$8 sps:$4 sm:$0xff] (!%p138_p2)  }
   0xc   : > { %1865 = vmatpush1.bf16.msra.mxu0 (!%p138_p2), %v4400_v7  ;;  %417 = vmatprep.subr.bf16.mxu1 (!%p138_p2), %v4401_v8  ;;  %v4418_v19 = vld [vmem:[%s6160_s1 + $0x440] ss:$8 sps:$4 sm:$0xff] (!%p138_p2)   ;;  %v4421_v21 = vld [vmem:[%s6160_s1 + $0x454] ss:$8 sps:$4 sm:$0xff] (!%p138_p2)   ;;  %v4423_v22 = vld [vmem:[%s6160_s1 + $0x50] ss:$8 sps:$4 sm:$0xff] (!%p138_p2)  }
   0xd   : > { %1866 = vmatprep.subr.bf16.mxu0 %v4403_v9  ;;  %v4424_v23 = vld [vmem:[%s6160_s1 + $0x450] ss:$8 sps:$4 sm:$0xff]   ;;  %v4425_v24 = vld [vmem:[%s6160_s1 + $0x64] ss:$8 sps:$4 sm:$0xff]   ;;  %v4429_v26 = vld [vmem:[%s6160_s1 + $0x60] ss:$8 sps:$4 sm:$0xff]  }
   0xe   : > { %v4427_v25 = vld [vmem:[%s6160_s1 + $0x464] ss:$8 sps:$4 sm:$0xff]   ;;  %v4430_v27 = vld [vmem:[%s6160_s1 + $0x460] ss:$8 sps:$4 sm:$0xff]   ;;  %v4431_v28 = vld [vmem:[%s6160_s1 + $0x74] ss:$8 sps:$4 sm:$0xff]  }
   0xf   : > { %418 = vmatpush1.bf16.msra.mxu1 %v4405_v10  ;;  %v4433_v29 = vld [vmem:[%s6160_s1 + $0x474] ss:$8 sps:$4 sm:$0xff]   ;;  %v4435_v30 = vld [vmem:[%s6160_s1 + $0x70] ss:$8 sps:$4 sm:$0xff]   ;;  %v4437_v32 = vld [vmem:[%s6160_s1 + $0x84] ss:$8 sps:$4 sm:$0xff]  }
  0x10   : > { %1867 = vmatpush1.bf16.msra.mxu0 %v4406_v11  ;;  %419 = vmatprep.subr.bf16.mxu1 %v4407_v12  ;;  %v4436_v31 = vld [vmem:[%s6160_s1 + $0x470] ss:$8 sps:$4 sm:$0xff]   ;;  %v4439_v33 = vld [vmem:[%s6160_s1 + $0x484] ss:$8 sps:$4 sm:$0xff]   ;;  %v4441_v34 = vld [vmem:[%s6160_s1 + $0x80] ss:$8 sps:$4 sm:$0xff]  }
  0x11   : > { %1868 = vmatprep.subr.bf16.mxu0 %v4409_v13  ;;  %v4442_v35 = vld [vmem:[%s6160_s1 + $0x480] ss:$8 sps:$4 sm:$0xff]   ;;  %v4443_v36 = vld [vmem:[%s6160_s1 + $0x94] ss:$8 sps:$4 sm:$0xff]   ;;  %s6168_s13 = smov (!%p161_p3, %s3585_s13), 1  ;;  %vm2353_vm3 = vcmask 1042432  }
  0x12   : > { %v4445_v37 = vld [vmem:[%s6160_s1 + $0x494] ss:$8 sps:$4 sm:$0xff]   ;;  %v4447_v38 = vld [vmem:[%s6160_s1 + $0x90] ss:$8 sps:$4 sm:$0xff]   ;;  %v4449_v40 = vld [vmem:[%s6160_s1 + $0xa4] ss:$8 sps:$4 sm:$0xff]  }
  0x13   : > { %420 = vmatpush1.bf16.msra.mxu1 %v4411_v14  ;;  %v4448_v39 = vld [vmem:[%s6160_s1 + $0x490] ss:$8 sps:$4 sm:$0xff]   ;;  %s4380_s21 = smul.u32 160, %s6168_s13  ;;  %v4451_v41 = vld [vmem:[%s6160_s1 + $0x4a4] ss:$8 sps:$4 sm:$0xff]   ;;  %vm2354_vm4 = vcmask 1046532  }
  0x14   : > { %1869 = vmatpush1.bf16.msra.mxu0 %v4412_v15  ;;  %421 = vmatprep.subr.bf16.mxu1 %v4413_v16  ;;  %v4453_v42 = vld [vmem:[%s6160_s1 + $0xa0] ss:$8 sps:$4 sm:$0xff]   ;;  %v4455_v44 = vld [vmem:[%s6160_s1 + $0xb4] ss:$8 sps:$4 sm:$0xff]   ;;  %v4459_v46 = vld [vmem:[%s6160_s1 + $0xb0] ss:$8 sps:$4 sm:$0xff]  }
  0x15   : > { %1870 = vmatprep.subr.bf16.mxu0 %v4415_v17  ;;  %v4454_v43 = vld [vmem:[%s6160_s1 + $0x4a0] ss:$8 sps:$4 sm:$0xff]   ;;  %s5020_s5 = scalar_lea.vmem %s6159_s0, %s4380_s21  ;;  %v4457_v45 = vld [vmem:[%s6160_s1 + $0x4b4] ss:$8 sps:$4 sm:$0xff]   ;;  %v4460_v47 = vld [vmem:[%s6160_s1 + $0x4b0] ss:$8 sps:$4 sm:$0xff]  }
  0x16   : > { %v5032_v48 = vld [vmem:[%s5020_s5] sm:$0xff]  ;;  %v5035_v49 = vld [vmem:[%s5020_s5 + $0x10] sm:$0xff]  ;;  %vm1176_vm0 = vsmask.f32 3328  ;;  %v1159_v56 = vld [vmem:[%s5020_s5 + $0x18] sm:$0x11] }
  0x17   : > { %422 = vmatpush1.bf16.msra.mxu1 %v4417_v18  ;;  %v5038_v50 = vld [vmem:[%s5020_s5 + $0x20] sm:$0xff]  ;;  %v3594_v53 = vcombine.high %v5032_v48, %v5035_v49  ;;  %v1194_v55 = vshrl.u32 %v5035_v49, 16  ;;  %v1161_v57 = vld [vmem:[%s5020_s5 + $0x28] sm:$0x11]  ;;  %v1197_v58 = vshll.u32 %v5035_v49, 16  ;;  %v1203_v60 = vshll.u32 %v1159_v56, 16  ;;  %vm5543_vm5 = vmor %vm2353_vm3, %vm2354_vm4 }
  0x18   : > { %1871 = vmatpush1.bf16.msra.mxu0 %v4418_v19  ;;  %423 = vmatprep.subr.bf16.mxu1 %v4419_v20  ;;  %v4461_v51 = vld [vmem:[%s6160_s1 + $0xc4] ss:$8 sps:$4 sm:$0xff]   ;;  %v3665_v54 = vcombine.low %v5035_v49, %v5038_v50  ;;  %v1208_v61 = vshrl.u32 %v5038_v50, 16  ;;  %v1211_v62 = vshll.u32 %v5038_v50, 16  ;;  %vm1177_vm1 = vsmask.f32 7440 }
  0x19   : > { %1872 = vmatprep.subr.bf16.mxu0 %v4421_v21  ;;  %v4463_v52 = vld [vmem:[%s6160_s1 + $0x4c4] ss:$8 sps:$4 sm:$0xff]   ;;  %445 = vmatprep.mubr.bf16.mxu1 %v3594_v53  ;;  %v1196_v59 = vrot.slane %v1194_v55, 4  ;;  %v1199_v63 = vrot.slane %v1197_v58, 5  ;;  %v1217_v0 = vshll.u32 %v1161_v57, 16  ;;  %v1205_v8 = vrot.slane %v1203_v60, 5  ;;  %vm5070_vm2 = vmor %vm1176_vm0, %vm1177_vm1 }
  0x1a   : > { %v4465_v1 = vld [vmem:[%s6160_s1 + $0xc0] ss:$8 sps:$4 sm:$0xff]   ;;  %v1210_v3 = vrot.slane %v1208_v61, 4  ;;  %v1213_v4 = vrot.slane %v1211_v62, 5  ;;  %v4467_v5 = vld [vmem:[%s6160_s1 + $0xd4] ss:$8 sps:$4 sm:$0xff]  }
  0x1b   : > { %424 = vmatpush1.bf16.msra.mxu1 %v4423_v22  ;;  %v4466_v2 = vld [vmem:[%s6160_s1 + $0x4c0] ss:$8 sps:$4 sm:$0xff]   ;;  %v4469_v6 = vld [vmem:[%s6160_s1 + $0x4d4] ss:$8 sps:$4 sm:$0xff]   ;;  %v1200_v7 = vor.u32 %v1199_v63, %v1196_v59  ;;  %v1219_v11 = vrot.slane %v1217_v0, 5  ;;  %s4211_s15 = sshll.u32 %s6168_s13, 6 }
  0x1c   : > { %1873 = vmatpush1.bf16.msra.mxu0 %v4424_v23  ;;  %425 = vmatprep.subr.bf16.mxu1 %v4425_v24  ;;  %v1214_v10 = vor.u32 %v1213_v4, %v1210_v3  ;;  %v4471_v12 = vld [vmem:[%s6160_s1 + $0xd0] ss:$8 sps:$4 sm:$0xff]   ;;  %v4473_v16 = vld [vmem:[%s6160_s1 + $0xe4] ss:$8 sps:$4 sm:$0xff]   ;;  %v4477_v20 = vld [vmem:[%s6160_s1 + $0xe0] ss:$8 sps:$4 sm:$0xff]   ;;  %s6132_s17 = scalar_lea.vmem %s6162_s3, %s4211_s15 }
  0x1d   : > { %1874 = vmatprep.subr.bf16.mxu0 %v4427_v25  ;;  %v1201_v13 = vrot.slane %v1200_v7, 4  ;;  %v4472_v14 = vld [vmem:[%s6160_s1 + $0x4d0] ss:$8 sps:$4 sm:$0xff]   ;;  %v4475_v17 = vld [vmem:[%s6160_s1 + $0x4e4] ss:$8 sps:$4 sm:$0xff]  }
  0x1e   : > { %v1215_v15 = vrot.slane %v1214_v10, 4  ;;  %v4478_v22 = vld [vmem:[%s6160_s1 + $0x4e0] ss:$8 sps:$4 sm:$0xff]   ;;  %v4479_v23 = vld [vmem:[%s6160_s1 + $0xf4] ss:$8 sps:$4 sm:$0xff]  }
  0x1f   : > { %426 = vmatpush1.bf16.msra.mxu1 %v4429_v26  ;;  %v5088_v18 = vsel %vm5070_vm2, %v1201_v13, %v1205_v8  ;;  %v4481_v24 = vld [vmem:[%s6160_s1 + $0x4f4] ss:$8 sps:$4 sm:$0xff]   ;;  %v4483_v25 = vld [vmem:[%s6160_s1 + $0xf0] ss:$8 sps:$4 sm:$0xff]   ;;  %v5182_v58 = vld [vmem:[%s5020_s5 + $0x40] sm:$0xff] }
  0x20   : > { %1875 = vmatpush1.bf16.msra.mxu0 %v4430_v27  ;;  %427 = vmatprep.subr.bf16.mxu1 %v4431_v28  ;;  %v5092_v19 = vsel %vm5070_vm2, %v1215_v15, %v1219_v11  ;;  %v4484_v26 = vld [vmem:[%s6160_s1 + $0x4f0] ss:$8 sps:$4 sm:$0xff]   ;;  %v4490_v27 = vld [vmem:[%s6160_s1 + $0x304] ss:$8 sps:$4 sm:$0xff]   ;;  %v1236_v61 = vshrl.u32 %v5182_v58, 16  ;;  %v1239_v62 = vshll.u32 %v5182_v58, 16 }
  0x21   : > { %1876 = vmatprep.subr.bf16.mxu0 %v4433_v29  ;;  %v3876_v21 = vcombine.high %v5088_v18, %v5092_v19  ;;  %v4493_v28 = vld [vmem:[%s6160_s1 + $0x704] ss:$8 sps:$4 sm:$0xff]   ;;  %v4488_v29 = vld [vmem:[%s6160_s1 + $0x300] ss:$8 sps:$4 sm:$0xff]   ;;  %v4506_v56 = vld [vmem:[%s6160_s1 + $0x330] ss:$8 sps:$4 sm:$0xff]  }
  0x22   : > { %v4509_v57 = vld [vmem:[%s6160_s1 + $0x730] ss:$8 sps:$4 sm:$0xff]   ;;  %v1165_v59 = vld [vmem:[%s5020_s5 + $0x48] sm:$0x11]  ;;  %v1238_v3 = vrot.slane %v1236_v61, 4  ;;  %v1241_v4 = vrot.slane %v1239_v62, 5 }
  0x23   : > { %428 = vmatpush1.bf16.msra.mxu1 %v4435_v30  ;;  %1894 = vmatprep.mubr.bf16.mxu0 %v3876_v21  ;;  %v3593_v30 = vcombine.low %v5032_v48, %v5035_v49  ;;  %v4503_v48 = vld [vmem:[%s6160_s1 + $0x720] ss:$8 sps:$4 sm:$0xff]   ;;  %v4514_v60 = vld [vmem:[%s6160_s1 + $0x344] ss:$8 sps:$4 sm:$0xff]   ;;  %v1245_v63 = vshll.u32 %v1165_v59, 16  ;;  %v5201_v10 = vld [vmem:[%s5020_s5 + $0x50] sm:$0xff] }
  0x24   : > { %1877 = vmatpush1.bf16.msra.mxu0 %v4436_v31  ;;  %429 = vmatprep.subr.bf16.mxu1 %v4437_v32  ;;  %v5126_v31 = vld [vmem:[%s5020_s5 + $0x30] sm:$0xff]  ;;  %v3875_v32 = vcombine.low %v5088_v18, %v5092_v19  ;;  %v4517_v0 = vld [vmem:[%s6160_s1 + $0x744] ss:$8 sps:$4 sm:$0xff]   ;;  %v1242_v7 = vor.u32 %v1241_v4, %v1238_v3  ;;  %v5211_v13 = vcombine.high %v5182_v58, %v5201_v10 }
  0x25   : > { %1878 = vmatprep.subr.bf16.mxu0 %v4439_v33  ;;  %v4491_v33 = vld [vmem:[%s6160_s1 + $0x700] ss:$8 sps:$4 sm:$0xff]   ;;  %v1247_v8 = vrot.slane %v1245_v63, 5  ;;  %v4520_v11 = vld [vmem:[%s6160_s1 + $0x354] ss:$8 sps:$4 sm:$0xff]  }
  0x26   : > { %v5223_v21 = vld [vmem:[%s5020_s5 + $0x60] sm:$0xff]  ;;  %v1173_v61 = vld [vmem:[%s5020_s5 + $0x88] sm:$0x11]  ;;  %v4740_v9 = vld [vmem:[%s6160_s1 + $0x574] ss:$8 sps:$4 sm:$0xff]  }
  0x27   : > { %430 = vmatpush1.bf16.msra.mxu1 %v4441_v34  ;;  %v4496_v34 = vld [vmem:[%s6160_s1 + $0x314] ss:$8 sps:$4 sm:$0xff]  }
  0x28   : > { %1879 = vmatpush1.bf16.msra.mxu0 %v4442_v35  ;;  %431 = vmatprep.subr.bf16.mxu1 %v4443_v36  ;;  %v4499_v35 = vld [vmem:[%s6160_s1 + $0x714] ss:$8 sps:$4 sm:$0xff]   ;;  %v1222_v36 = vshrl.u32 %v5126_v31, 16 }
  0x29   : > { %1880 = vmatprep.subr.bf16.mxu0 %v4445_v37  ;;  %v1225_v37 = vshll.u32 %v5126_v31, 16 }
  0x2b   : > { %432 = vmatpush1.bf16.msra.mxu1 %v4447_v38  ;;  %v5143_v38 = vcombine.high %v5038_v50, %v5126_v31 }
  0x2c   : > { %1881 = vmatpush1.bf16.msra.mxu0 %v4448_v39  ;;  %433 = vmatprep.subr.bf16.mxu1 %v4449_v40  ;;  %v4494_v39 = vld [vmem:[%s6160_s1 + $0x310] ss:$8 sps:$4 sm:$0xff]  }
  0x2d   : > { %1882 = vmatprep.subr.bf16.mxu0 %v4451_v41  ;;  %v4497_v40 = vld [vmem:[%s6160_s1 + $0x710] ss:$8 sps:$4 sm:$0xff]   ;;  %v4502_v41 = vld [vmem:[%s6160_s1 + $0x324] ss:$8 sps:$4 sm:$0xff]  }
  0x2f   : > { %434 = vmatpush1.bf16.msra.mxu1 %v4453_v42  ;;  %v4505_v42 = vld [vmem:[%s6160_s1 + $0x724] ss:$8 sps:$4 sm:$0xff]  }
  0x30   : > { %1883 = vmatpush1.bf16.msra.mxu0 %v4454_v43  ;;  %435 = vmatprep.subr.bf16.mxu1 %v4455_v44  ;;  %v1163_v43 = vld [vmem:[%s5020_s5 + $0x38] sm:$0x11]  ;;  %v1224_v44 = vrot.slane %v1222_v36, 4 }
  0x31   : > { %1884 = vmatprep.subr.bf16.mxu0 %v4457_v45  ;;  %v1227_v45 = vrot.slane %v1225_v37, 5  ;;  %v1231_v55 = vshll.u32 %v1163_v43, 16 }
  0x33   : > { %436 = vmatpush1.bf16.msra.mxu1 %v4459_v46  ;;  %v4500_v46 = vld [vmem:[%s6160_s1 + $0x320] ss:$8 sps:$4 sm:$0xff]   ;;  %v1228_v53 = vor.u32 %v1227_v45, %v1224_v44 }
  0x34   : > { %1885 = vmatpush1.bf16.msra.mxu0 %v4460_v47  ;;  %437 = vmatprep.subr.bf16.mxu1 %v4461_v51  ;;  %v5164_v47 = vcombine.low %v5038_v50, %v5126_v31  ;;  %v4508_v51 = vld [vmem:[%s6160_s1 + $0x334] ss:$8 sps:$4 sm:$0xff]  }
  0x35   : > { %1886 = vmatprep.subr.bf16.mxu0 %v4463_v52  ;;  %v4511_v52 = vld [vmem:[%s6160_s1 + $0x734] ss:$8 sps:$4 sm:$0xff]  }
  0x37   : > { %438 = vmatpush1.bf16.msra.mxu1 %v4465_v1  ;;  %v1229_v1 = vrot.slane %v1228_v53, 4 }
  0x38   : > { %1887 = vmatpush1.bf16.msra.mxu0 %v4466_v2  ;;  %439 = vmatprep.subr.bf16.mxu1 %v4467_v5  ;;  %v1233_v2 = vrot.slane %v1231_v55, 5  ;;  %v4512_v5 = vld [vmem:[%s6160_s1 + $0x340] ss:$8 sps:$4 sm:$0xff]  }
  0x39   : > { %1888 = vmatprep.subr.bf16.mxu0 %v4469_v6  ;;  %v4515_v6 = vld [vmem:[%s6160_s1 + $0x740] ss:$8 sps:$4 sm:$0xff]  }
  0x3a   : > { %v5216_v15 = vsel %vm5070_vm2, %v1229_v1, %v1233_v2 }
  0x3b   : > { %440 = vmatpush1.bf16.msra.mxu1 %v4471_v12  ;;  %v4523_v12 = vld [vmem:[%s6160_s1 + $0x754] ss:$8 sps:$4 sm:$0xff]  }
  0x3c   : > { %1889 = vmatpush1.bf16.msra.mxu0 %v4472_v14  ;;  %441 = vmatprep.subr.bf16.mxu1 %v4473_v16  ;;  %v1250_v14 = vshrl.u32 %v5201_v10, 16  ;;  %v4518_v16 = vld [vmem:[%s6160_s1 + $0x350] ss:$8 sps:$4 sm:$0xff]  }
  0x3d   : > { %1890 = vmatprep.subr.bf16.mxu0 %v4475_v17  ;;  %v1243_v17 = vrot.slane %v1242_v7, 4 }
  0x3f   : > { %442 = vmatpush1.bf16.msra.mxu1 %v4477_v20  ;;  %v1167_v20 = vld [vmem:[%s5020_s5 + $0x58] sm:$0x11] }
  0x40   : > { %1891 = vmatpush1.bf16.msra.mxu0 %v4478_v22  ;;  %443 = vmatprep.subr.bf16.mxu1 %v4479_v23  ;;  %v1169_v22 = vld [vmem:[%s5020_s5 + $0x68] sm:$0x11]  ;;  %v5228_v23 = vcombine.low %v5182_v58, %v5201_v10 }
  0x41   : > { %1892 = vmatprep.subr.bf16.mxu0 %v4481_v24  ;;  %v1252_v24 = vrot.slane %v1250_v14, 4  ;;  %v4541_v14 = vld [vmem:[%s6160_s1 + $0x784] ss:$8 sps:$4 sm:$0xff]  }
  0x43   : > { %444 = vmatpush1.bf16.msra.mxu1 %v4483_v25  ;;  %v1253_v25 = vshll.u32 %v5201_v10, 16 }
  0x44   : > { %1893 = vmatpush1.bf16.msra.mxu0 %v4484_v26  ;;  %714 = vmatprep.subr.bf16.mxu1 %v4490_v27  ;;  %v1259_v26 = vshll.u32 %v1167_v20, 16  ;;  %v1264_v27 = vshrl.u32 %v5223_v21, 16 }
  0x45   : > { %2196 = vmatprep.subr.bf16.mxu0 %v4493_v28  ;;  %v4521_v28 = vld [vmem:[%s6160_s1 + $0x750] ss:$8 sps:$4 sm:$0xff]   ;;  %v1255_v36 = vrot.slane %v1253_v25, 5  ;;  %v4536_v25 = vld [vmem:[%s6160_s1 + $0x380] ss:$8 sps:$4 sm:$0xff]  }
  0x46   : > { %446 = vmatmul.mubr.bf16.vlgmr.msra.gmra.mrb[0].mxu1 %v3593_v30  ;;  %v5241_v30 = vsel %vm5070_vm2, %v1243_v17, %v1247_v8  ;;  %v1261_v44 = vrot.slane %v1259_v26, 5  ;;  %v4539_v26 = vld [vmem:[%s6160_s1 + $0x780] ss:$8 sps:$4 sm:$0xff]  }
  0x47   : > { %1895 = vmatmul.mubr.bf16.vlgmr.msra.gmra.mrb[0].mxu0 %v3875_v32  ;;  %715 = vmatpush1.bf16.msra.mxu1 %v4488_v29  ;;  %v4526_v29 = vld [vmem:[%s6160_s1 + $0x364] ss:$8 sps:$4 sm:$0xff]   ;;  %v1267_v32 = vshll.u32 %v5223_v21, 16  ;;  %v3877_v37 = vcombine.low %v5216_v15, %v5241_v30  ;;  %v1256_v43 = vor.u32 %v1255_v36, %v1252_v24 }
  0x48   : > { %2197 = vmatpush1.bf16.msra.mxu0 %v4491_v33  ;;  %716 = vmatprep.subr.bf16.mxu1 %v4496_v34  ;;  %v1273_v33 = vshll.u32 %v1169_v22, 16  ;;  %v4529_v34 = vld [vmem:[%s6160_s1 + $0x764] ss:$8 sps:$4 sm:$0xff]  }
  0x49   : > { %2198 = vmatprep.subr.bf16.mxu0 %v4499_v35  ;;  %455 = vmatprep.mubr.bf16.mxu1 %v5143_v38  ;;  %v3878_v35 = vcombine.high %v5216_v15, %v5241_v30  ;;  %v1257_v53 = vrot.slane %v1256_v43, 4  ;;  %v4554_v43 = vld [vmem:[%s6160_s1 + $0x7a4] ss:$8 sps:$4 sm:$0xff]  }
  0x4b   : > { %717 = vmatpush1.bf16.msra.mxu1 %v4494_v39  ;;  %v1266_v39 = vrot.slane %v1264_v27, 4  ;;  %1904 = vmatprep.mubr.bf16.mxu0 %v3878_v35  ;;  %v5288_v1 = vsel %vm5070_vm2, %v1257_v53, %v1261_v44  ;;  %v4558_v53 = vld [vmem:[%s6160_s1 + $0x3b4] ss:$8 sps:$4 sm:$0xff]  }
  0x4c   : > { %2199 = vmatpush1.bf16.msra.mxu0 %v4497_v40  ;;  %718 = vmatprep.subr.bf16.mxu1 %v4502_v41  ;;  %v1269_v40 = vrot.slane %v1267_v32, 5  ;;  %v4524_v41 = vld [vmem:[%s6160_s1 + $0x360] ss:$8 sps:$4 sm:$0xff]  }
  0x4d   : > { %2200 = vmatprep.subr.bf16.mxu0 %v4505_v42  ;;  %v4527_v42 = vld [vmem:[%s6160_s1 + $0x760] ss:$8 sps:$4 sm:$0xff]  }
  0x4e   : > { %456 = vmatmul.mubr.bf16.gmra.mrb[4].mxu1 %v5164_v47  ;;  %v1270_v45 = vor.u32 %v1269_v40, %v1266_v39  ;;  %v4545_v39 = vld [vmem:[%s6160_s1 + $0x790] ss:$8 sps:$4 sm:$0xff]  }
  0x4f   : > { %719 = vmatpush1.bf16.msra.mxu1 %v4500_v46  ;;  %465 = vmatprep.mubr.bf16.mxu1 %v5211_v13  ;;  %v1275_v46 = vrot.slane %v1273_v33, 5 }
  0x50   : > { %2201 = vmatpush1.bf16.msra.mxu0 %v4503_v48  ;;  %720 = vmatprep.subr.bf16.mxu1 %v4508_v51  ;;  %v5259_v48 = vld [vmem:[%s5020_s5 + $0x70] sm:$0xff]  ;;  %v1271_v59 = vrot.slane %v1270_v45, 4 }
  0x51   : > { %2202 = vmatprep.subr.bf16.mxu0 %v4511_v52  ;;  %v4532_v51 = vld [vmem:[%s6160_s1 + $0x374] ss:$8 sps:$4 sm:$0xff]   ;;  %v5269_v55 = vcombine.high %v5223_v21, %v5259_v48  ;;  %1905 = vmatmul.mubr.bf16.gmra.mrb[4].mxu0 %v3877_v37  ;;  %v1278_v62 = vshrl.u32 %v5259_v48, 16  ;;  %v5282_v63 = vcombine.low %v5223_v21, %v5259_v48  ;;  %v1281_v2 = vshll.u32 %v5259_v48, 16  ;;  %v4542_v37 = vld [vmem:[%s6160_s1 + $0x390] ss:$8 sps:$4 sm:$0xff]  }
  0x52   : > { %v4535_v52 = vld [vmem:[%s6160_s1 + $0x774] ss:$8 sps:$4 sm:$0xff]  }
  0x53   : > { %721 = vmatpush1.bf16.msra.mxu1 %v4506_v56  ;;  %v5272_v56 = vld [vmem:[%s5020_s5 + $0x80] sm:$0xff]  ;;  %v1280_v7 = vrot.slane %v1278_v62, 4  ;;  %v1283_v17 = vrot.slane %v1281_v2, 5 }
  0x54   : > { %2203 = vmatpush1.bf16.msra.mxu0 %v4509_v57  ;;  %722 = vmatprep.subr.bf16.mxu1 %v4514_v60  ;;  %v4530_v57 = vld [vmem:[%s6160_s1 + $0x370] ss:$8 sps:$4 sm:$0xff]   ;;  %v1638_v4 = vshrl.u32 %v5272_v56, 16  ;;  %v1641_v8 = vshll.u32 %v5272_v56, 16  ;;  %v4568_v62 = vld [vmem:[%s6160_s1 + $0x7c4] ss:$8 sps:$4 sm:$0xff]  }
  0x55   : > { %2204 = vmatprep.subr.bf16.mxu0 %v4517_v0  ;;  %v1171_v60 = vld [vmem:[%s5020_s5 + $0x78] sm:$0x11]  ;;  %v3666_v0 = vcombine.high %v5035_v49, %v5038_v50  ;;  %v1284_v27 = vor.u32 %v1283_v17, %v1280_v7  ;;  %v4566_v2 = vld [vmem:[%s6160_s1 + $0x7c0] ss:$8 sps:$4 sm:$0xff]   ;;  %v4608_v49 = vld [vmem:[%s6160_s1 + $0x224] ss:$8 sps:$4 sm:$0xff]  }
  0x56   : > { %466 = vmatmul.mubr.bf16.gmra.mrb[8].mxu1 %v5228_v23  ;;  %v1287_v3 = vshll.u32 %v1171_v60, 16  ;;  %v1640_v22 = vrot.slane %v1638_v4, 4  ;;  %v1643_v24 = vrot.slane %v1641_v8, 5  ;;  %v4559_v60 = vld [vmem:[%s6160_s1 + $0x7b0] ss:$8 sps:$4 sm:$0xff]  }
  0x57   : > { %723 = vmatpush1.bf16.msra.mxu1 %v4512_v5  ;;  %475 = vmatprep.mubr.bf16.mxu1 %v5269_v55  ;;  %v4533_v5 = vld [vmem:[%s6160_s1 + $0x770] ss:$8 sps:$4 sm:$0xff]   ;;  %v1285_v35 = vrot.slane %v1284_v27, 4  ;;  %v4575_v4 = vld [vmem:[%s6160_s1 + $0x7d4] ss:$8 sps:$4 sm:$0xff]  }
  0x58   : > { %2205 = vmatpush1.bf16.msra.mxu0 %v4515_v6  ;;  %724 = vmatprep.subr.bf16.mxu1 %v4520_v11  ;;  %v5298_v6 = vsel %vm5070_vm2, %v1271_v59, %v1275_v46  ;;  %v1647_v11 = vshll.u32 %v1173_v61, 16  ;;  %v1644_v32 = vor.u32 %v1643_v24, %v1640_v22  ;;  %v4549_v46 = vld [vmem:[%s6160_s1 + $0x3a0] ss:$8 sps:$4 sm:$0xff]   ;;  %v4556_v59 = vld [vmem:[%s6160_s1 + $0x3b0] ss:$8 sps:$4 sm:$0xff]  }
  0x59   : > { %2206 = vmatprep.subr.bf16.mxu0 %v4523_v12  ;;  %v4538_v12 = vld [vmem:[%s6160_s1 + $0x384] ss:$8 sps:$4 sm:$0xff]   ;;  %v3879_v20 = vcombine.low %v5288_v1, %v5298_v6  ;;  %v4573_v7 = vld [vmem:[%s6160_s1 + $0x7d0] ss:$8 sps:$4 sm:$0xff]   ;;  %v4589_v17 = vld [vmem:[%s6160_s1 + $0x7f4] ss:$8 sps:$4 sm:$0xff]  }
  0x5a   : > { %v1649_v33 = vrot.slane %v1647_v11, 5  ;;  %v1645_v36 = vrot.slane %v1644_v32, 4  ;;  %v4565_v61 = vld [vmem:[%s6160_s1 + $0x3c4] ss:$8 sps:$4 sm:$0xff]   ;;  %v4587_v22 = vld [vmem:[%s6160_s1 + $0x7f0] ss:$8 sps:$4 sm:$0xff]   ;;  %v5445_v32 = vcombine.high %v5241_v30, %v5288_v1 }
  0x5b   : > { %725 = vmatpush1.bf16.msra.mxu1 %v4518_v16  ;;  %v3880_v16 = vcombine.high %v5288_v1, %v5298_v6  ;;  %v4579_v8 = vld [vmem:[%s6160_s1 + $0x3e4] ss:$8 sps:$4 sm:$0xff]   ;;  %v4591_v27 = vld [vmem:[%s6160_s1 + $0x600] ss:$8 sps:$4 sm:$0xff]  }
  0x5c   : > { %2207 = vmatpush1.bf16.msra.mxu0 %v4521_v28  ;;  %726 = vmatprep.subr.bf16.mxu1 %v4526_v29  ;;  %v1289_v28 = vrot.slane %v1287_v3, 5  ;;  %v4544_v29 = vld [vmem:[%s6160_s1 + $0x394] ss:$8 sps:$4 sm:$0xff]   ;;  %v4582_v11 = vld [vmem:[%s6160_s1 + $0x7e4] ss:$8 sps:$4 sm:$0xff]  }
  0x5d   : > { %2208 = vmatprep.subr.bf16.mxu0 %v4529_v34  ;;  %1914 = vmatprep.mubr.bf16.mxu0 %v3880_v16  ;;  %v4547_v34 = vld [vmem:[%s6160_s1 + $0x794] ss:$8 sps:$4 sm:$0xff]   ;;  %v4593_v24 = vld [vmem:[%s6160_s1 + $0x604] ss:$8 sps:$4 sm:$0xff]   ;;  %v4603_v50 = vld [vmem:[%s6160_s1 + $0x620] ss:$8 sps:$4 sm:$0xff]  }
  0x5e   : > { %476 = vmatmul.mubr.bf16.gmra.mrb[12].mxu1 %v5282_v63  ;;  %1915 = vmatmul.mubr.bf16.gmra.mrb[8].mxu0 %v3879_v20  ;;  %v5332_v40 = vsel %vm5070_vm2, %v1285_v35, %v1289_v28  ;;  %v4572_v3 = vld [vmem:[%s6160_s1 + $0x3d4] ss:$8 sps:$4 sm:$0xff]   ;;  %v4584_v20 = vld [vmem:[%s6160_s1 + $0x3f0] ss:$8 sps:$4 sm:$0xff]   ;;  %v4594_v28 = vld [vmem:[%s6160_s1 + $0x200] ss:$8 sps:$4 sm:$0xff]  }
  0x5f   : > { %727 = vmatpush1.bf16.msra.mxu1 %v4524_v41  ;;  %746 = vmatprep.mubr.bf16.mxu1 %v3666_v0  ;;  %v4551_v41 = vld [vmem:[%s6160_s1 + $0x3a4] ss:$8 sps:$4 sm:$0xff]   ;;  %v4563_v0 = vld [vmem:[%s6160_s1 + $0x3c0] ss:$8 sps:$4 sm:$0xff]   ;;  %v4586_v16 = vld [vmem:[%s6160_s1 + $0x3f4] ss:$8 sps:$4 sm:$0xff]  }
  0x60   : > { %2209 = vmatpush1.bf16.msra.mxu0 %v4527_v42  ;;  %728 = vmatprep.subr.bf16.mxu1 %v4532_v51  ;;  %v5339_v42 = vsel %vm5070_vm2, %v1645_v36, %v1649_v33  ;;  %v4552_v51 = vld [vmem:[%s6160_s1 + $0x7a0] ss:$8 sps:$4 sm:$0xff]   ;;  %v4597_v33 = vld [vmem:[%s6160_s1 + $0x610] ss:$8 sps:$4 sm:$0xff]   ;;  %v4605_v35 = vld [vmem:[%s6160_s1 + $0x624] ss:$8 sps:$4 sm:$0xff]   ;;  %v5471_v36 = vcombine.low %v5241_v30, %v5288_v1 }
  0x61   : > { %2210 = vmatprep.subr.bf16.mxu0 %v4535_v52  ;;  %v3882_v44 = vcombine.high %v5332_v40, %v5339_v42  ;;  %v3881_v45 = vcombine.low %v5332_v40, %v5339_v42  ;;  %v5356_v52 = vcombine.high %v5092_v19, %v5216_v15  ;;  %v4614_v1 = vld [vmem:[%s6160_s1 + $0x234] ss:$8 sps:$4 sm:$0xff]  }
  0x63   : > { %729 = vmatpush1.bf16.msra.mxu1 %v4530_v57  ;;  %1924 = vmatprep.mubr.bf16.mxu0 %v3882_v44  ;;  %v4561_v57 = vld [vmem:[%s6160_s1 + $0x7b4] ss:$8 sps:$4 sm:$0xff]  }
  0x64   : > { %2211 = vmatpush1.bf16.msra.mxu0 %v4533_v5  ;;  %730 = vmatprep.subr.bf16.mxu1 %v4538_v12  ;;  %v4570_v5 = vld [vmem:[%s6160_s1 + $0x3d0] ss:$8 sps:$4 sm:$0xff]   ;;  %v4577_v12 = vld [vmem:[%s6160_s1 + $0x3e0] ss:$8 sps:$4 sm:$0xff]  }
  0x65   : > { %2212 = vmatprep.subr.bf16.mxu0 %v4541_v14  ;;  %v4580_v14 = vld [vmem:[%s6160_s1 + $0x7e0] ss:$8 sps:$4 sm:$0xff]  }
  0x66   : > { %1925 = vmatmul.mubr.bf16.gmra.mrb[12].mxu0 %v3881_v45 }
  0x67   : > { %731 = vmatpush1.bf16.msra.mxu1 %v4536_v25  ;;  %2228 = vmatprep.mubr.bf16.mxu0 %v5356_v52  ;;  %v4596_v25 = vld [vmem:[%s6160_s1 + $0x204] ss:$8 sps:$4 sm:$0xff]  }
  0x68   : > { %2213 = vmatpush1.bf16.msra.mxu0 %v4539_v26  ;;  %732 = vmatprep.subr.bf16.mxu1 %v4544_v29  ;;  %v5427_v26 = vcombine.low %v5092_v19, %v5216_v15  ;;  %v4599_v29 = vld [vmem:[%s6160_s1 + $0x614] ss:$8 sps:$4 sm:$0xff]   ;;  %v3668_v15 = vcombine.high %v5126_v31, %v5182_v58 }
  0x69   : > { %2214 = vmatprep.subr.bf16.mxu0 %v4547_v34  ;;  %v4602_v19 = vld [vmem:[%s6160_s1 + $0x214] ss:$8 sps:$4 sm:$0xff]   ;;  %v4600_v34 = vld [vmem:[%s6160_s1 + $0x210] ss:$8 sps:$4 sm:$0xff]  }
  0x6b   : > { %733 = vmatpush1.bf16.msra.mxu1 %v4542_v37  ;;  %v5474_v37 = vld [vmem:[%s5020_s5 + $0x90] sm:$0xff] }
  0x6c   : > { %2215 = vmatpush1.bf16.msra.mxu0 %v4545_v39  ;;  %734 = vmatprep.subr.bf16.mxu1 %v4551_v41  ;;  %v1175_v39 = vld [vmem:[%s5020_s5 + $0x98] sm:$0x11]  ;;  %v1984_v41 = vshrl.u32 %v5474_v37, 16  ;;  %v3738_v44 = vcombine.high %v5272_v56, %v5474_v37  ;;  %v3737_v45 = vcombine.low %v5272_v56, %v5474_v37 }
  0x6d   : > { %2216 = vmatprep.subr.bf16.mxu0 %v4554_v43  ;;  %v1987_v43 = vshll.u32 %v5474_v37, 16  ;;  %v1993_v30 = vshll.u32 %v1175_v39, 16  ;;  %v4741_v37 = vld [vmem:[%s6160_s1 + $0x180] ss:$8 sps:$4 sm:$0xff]  }
  0x6f   : > { %735 = vmatpush1.bf16.msra.mxu1 %v4549_v46  ;;  %v1986_v46 = vrot.slane %v1984_v41, 4  ;;  %v4633_v41 = vld [vmem:[%s6160_s1 + $0x670] ss:$8 sps:$4 sm:$0xff]  }
  0x70   : > { %2217 = vmatpush1.bf16.msra.mxu0 %v4552_v51  ;;  %736 = vmatprep.subr.bf16.mxu1 %v4558_v53  ;;  %v1989_v51 = vrot.slane %v1987_v43, 5  ;;  %v3670_v53 = vcombine.high %v5201_v10, %v5223_v21  ;;  %v4636_v43 = vld [vmem:[%s6160_s1 + $0x270] ss:$8 sps:$4 sm:$0xff]  }
  0x71   : > { %2218 = vmatprep.subr.bf16.mxu0 %v4561_v57  ;;  %v5496_v57 = vcombine.high %v5298_v6, %v5332_v40 }
  0x73   : > { %737 = vmatpush1.bf16.msra.mxu1 %v4556_v59  ;;  %v1990_v59 = vor.u32 %v1989_v51, %v1986_v46  ;;  %v4647_v46 = vld [vmem:[%s6160_s1 + $0x694] ss:$8 sps:$4 sm:$0xff]   ;;  %v4645_v51 = vld [vmem:[%s6160_s1 + $0x690] ss:$8 sps:$4 sm:$0xff]  }
  0x74   : > { %2219 = vmatpush1.bf16.msra.mxu0 %v4559_v60  ;;  %738 = vmatprep.subr.bf16.mxu1 %v4565_v61  ;;  %v1995_v60 = vrot.slane %v1993_v30, 5  ;;  %v4609_v61 = vld [vmem:[%s6160_s1 + $0x630] ss:$8 sps:$4 sm:$0xff]   ;;  %v4639_v30 = vld [vmem:[%s6160_s1 + $0x680] ss:$8 sps:$4 sm:$0xff]  }
  0x75   : > { %2220 = vmatprep.subr.bf16.mxu0 %v4568_v62  ;;  %v4612_v62 = vld [vmem:[%s6160_s1 + $0x230] ss:$8 sps:$4 sm:$0xff]  }
  0x77   : > { %739 = vmatpush1.bf16.msra.mxu1 %v4563_v0  ;;  %v4617_v0 = vld [vmem:[%s6160_s1 + $0x644] ss:$8 sps:$4 sm:$0xff]  }
  0x78   : > { %2221 = vmatpush1.bf16.msra.mxu0 %v4566_v2  ;;  %740 = vmatprep.subr.bf16.mxu1 %v4572_v3  ;;  %v4620_v2 = vld [vmem:[%s6160_s1 + $0x244] ss:$8 sps:$4 sm:$0xff]   ;;  %v1991_v3 = vrot.slane %v1990_v59, 4 }
  0x79   : > { %2222 = vmatprep.subr.bf16.mxu0 %v4575_v4  ;;  %v4615_v4 = vld [vmem:[%s6160_s1 + $0x640] ss:$8 sps:$4 sm:$0xff]   ;;  %v4654_v59 = vld [vmem:[%s6160_s1 + $0x6a4] ss:$8 sps:$4 sm:$0xff]  }
  0x7b   : > { %741 = vmatpush1.bf16.msra.mxu1 %v4570_v5  ;;  %v4618_v5 = vld [vmem:[%s6160_s1 + $0x240] ss:$8 sps:$4 sm:$0xff]  }
  0x7c   : > { %2223 = vmatpush1.bf16.msra.mxu0 %v4573_v7  ;;  %742 = vmatprep.subr.bf16.mxu1 %v4579_v8  ;;  %v4623_v7 = vld [vmem:[%s6160_s1 + $0x654] ss:$8 sps:$4 sm:$0xff]   ;;  %v3669_v8 = vcombine.low %v5201_v10, %v5223_v21  ;;  %v4621_v21 = vld [vmem:[%s6160_s1 + $0x650] ss:$8 sps:$4 sm:$0xff]  }
  0x7d   : > { %2224 = vmatprep.subr.bf16.mxu0 %v4582_v11  ;;  %v5525_v11 = vcombine.low %v5298_v6, %v5332_v40  ;;  %v4626_v10 = vld [vmem:[%s6160_s1 + $0x254] ss:$8 sps:$4 sm:$0xff]   ;;  %v3672_v6 = vcombine.high %v5259_v48, %v5272_v56 }
  0x7f   : > { %743 = vmatpush1.bf16.msra.mxu1 %v4577_v12  ;;  %v1996_v12 = vsel %vm5070_vm2, %v1991_v3, %v1995_v60  ;;  %v4657_v60 = vld [vmem:[%s6160_s1 + $0x2a4] ss:$8 sps:$4 sm:$0xff]   ;;  %v4659_v3 = vld [vmem:[%s6160_s1 + $0x6b0] ss:$8 sps:$4 sm:$0xff]  }
  0x80   : > { %2225 = vmatpush1.bf16.msra.mxu0 %v4580_v14  ;;  %744 = vmatprep.subr.bf16.mxu1 %v4586_v16  ;;  %v2317_v14 = vld [vmem:[%s5020_s5] sm:$0xee]  ;;  %v2318_v16 = vld [vmem:[%s5020_s5 + $0x8] sm:$0x11]  ;;  %v3948_v40 = vcombine.high %v5339_v42, %v1996_v12 }
  0x81   : > { %2226 = vmatprep.subr.bf16.mxu0 %v4589_v17  ;;  %v2319_v17 = vld [vmem:[%s5020_s5 + $0x10] sm:$0xee] }
  0x83   : > { %745 = vmatpush1.bf16.msra.mxu1 %v4584_v20  ;;  %v2320_v20 = vld [vmem:[%s5020_s5 + $0x18] sm:$0x11] }
  0x84   : > { %2227 = vmatpush1.bf16.msra.mxu0 %v4587_v22  ;;  %1035 = vmatprep.subr.bf16.mxu1 %v4593_v24  ;;  %v3981_v24 = vrot.slane %v2317_v14, 9  ;;  %v4675_v14 = vld [vmem:[%s6160_s1 + $0x6d4] ss:$8 sps:$4 sm:$0xff]  }
  0x85   : > { %2613 = vmatprep.subr.bf16.mxu0 %v4596_v25  ;;  %v2358_v25 = vrot.slane %v2318_v16, 5  ;;  %v4678_v16 = vld [vmem:[%s6160_s1 + $0x2d4] ss:$8 sps:$4 sm:$0xff]  }
  0x86   : > { %747 = vmatmul.mubr.bf16.vlgmr.msra.gmra.mrb[0].mxu1 %v3665_v54  ;;  %v3667_v54 = vcombine.low %v5126_v31, %v5182_v58  ;;  %v4606_v31 = vld [vmem:[%s6160_s1 + $0x220] ss:$8 sps:$4 sm:$0xff]   ;;  %v4611_v58 = vld [vmem:[%s6160_s1 + $0x634] ss:$8 sps:$4 sm:$0xff]  }
  0x87   : > { %2229 = vmatmul.mubr.bf16.vlgmr.msra.gmra.mrb[0].mxu0 %v5427_v26  ;;  %1036 = vmatpush1.bf16.msra.mxu1 %v4591_v27  ;;  %v3982_v27 = vrot.slane %v2319_v17, 9  ;;  %v4673_v17 = vld [vmem:[%s6160_s1 + $0x6d0] ss:$8 sps:$4 sm:$0xff]  }
  0x88   : > { %2614 = vmatpush1.bf16.msra.mxu0 %v4594_v28  ;;  %1037 = vmatprep.subr.bf16.mxu1 %v4599_v29  ;;  %v2362_v28 = vrot.slane %v2320_v20, 5  ;;  %v4624_v29 = vld [vmem:[%s6160_s1 + $0x250] ss:$8 sps:$4 sm:$0xff]  }
  0x89   : > { %2615 = vmatprep.subr.bf16.mxu0 %v4602_v19  ;;  %756 = vmatprep.mubr.bf16.mxu1 %v3668_v15  ;;  %v4629_v19 = vld [vmem:[%s6160_s1 + $0x664] ss:$8 sps:$4 sm:$0xff]   ;;  %v4676_v20 = vld [vmem:[%s6160_s1 + $0x2d0] ss:$8 sps:$4 sm:$0xff]  }
  0x8a   : > { %2238 = vmatprep.mubr.bf16.mxu0 %v5445_v32  ;;  %v4632_v15 = vld [vmem:[%s6160_s1 + $0x264] ss:$8 sps:$4 sm:$0xff]  }
  0x8b   : > { %1038 = vmatpush1.bf16.msra.mxu1 %v4597_v33  ;;  %v4627_v33 = vld [vmem:[%s6160_s1 + $0x660] ss:$8 sps:$4 sm:$0xff]  }
  0x8c   : > { %2616 = vmatpush1.bf16.msra.mxu0 %v4600_v34  ;;  %1039 = vmatprep.subr.bf16.mxu1 %v4605_v35  ;;  %v3671_v34 = vcombine.low %v5259_v48, %v5272_v56  ;;  %v3947_v35 = vcombine.low %v5339_v42, %v1996_v12  ;;  %v4635_v48 = vld [vmem:[%s6160_s1 + $0x674] ss:$8 sps:$4 sm:$0xff]   ;;  %v4669_v12 = vld [vmem:[%s6160_s1 + $0x2c0] ss:$8 sps:$4 sm:$0xff]   ;;  %v4746_v56 = vld [vmem:[%s6160_s1 + $0x584] ss:$8 sps:$4 sm:$0xff]  }
  0x8d   : > { %2617 = vmatprep.subr.bf16.mxu0 %v4608_v49  ;;  %v5564_v49 = vsel %vm5543_vm5, %v3981_v24, %v2358_v25  ;;  %v4638_v42 = vld [vmem:[%s6160_s1 + $0x274] ss:$8 sps:$4 sm:$0xff]   ;;  %v2321_v24 = vld [vmem:[%s5020_s5 + $0x20] sm:$0xee]  ;;  %v2322_v25 = vld [vmem:[%s5020_s5 + $0x28] sm:$0x11] }
  0x8e   : > { %757 = vmatmul.mubr.bf16.gmra.mrb[4].mxu1 %v3667_v54  ;;  %v4630_v54 = vld [vmem:[%s6160_s1 + $0x260] ss:$8 sps:$4 sm:$0xff]  }
  0x8f   : > { %2239 = vmatmul.mubr.bf16.gmra.mrb[4].mxu0 %v5471_v36  ;;  %1040 = vmatpush1.bf16.msra.mxu1 %v4603_v50  ;;  %v5568_v50 = vsel %vm5543_vm5, %v3982_v27, %v2362_v28  ;;  %v2323_v27 = vld [vmem:[%s5020_s5 + $0x30] sm:$0xee]  ;;  %v2324_v28 = vld [vmem:[%s5020_s5 + $0x38] sm:$0x11] }
  0x90   : > { %2618 = vmatpush1.bf16.msra.mxu0 %v4606_v31  ;;  %1041 = vmatprep.subr.bf16.mxu1 %v4611_v58  ;;  %v4022_v39 = vcombine.high %v5564_v49, %v5568_v50  ;;  %v4641_v31 = vld [vmem:[%s6160_s1 + $0x684] ss:$8 sps:$4 sm:$0xff]  }
  0x91   : > { %2619 = vmatprep.subr.bf16.mxu0 %v4614_v1  ;;  %766 = vmatprep.mubr.bf16.mxu1 %v3670_v53  ;;  %v4644_v58 = vld [vmem:[%s6160_s1 + $0x284] ss:$8 sps:$4 sm:$0xff]   ;;  %v4642_v1 = vld [vmem:[%s6160_s1 + $0x280] ss:$8 sps:$4 sm:$0xff]   ;;  %v4648_v53 = vld [vmem:[%s6160_s1 + $0x290] ss:$8 sps:$4 sm:$0xff]  }
  0x92   : > { %2248 = vmatprep.mubr.bf16.mxu0 %v5496_v57 }
  0x93   : > { %1042 = vmatpush1.bf16.msra.mxu1 %v4609_v61  ;;  %v4652_v61 = vld [vmem:[%s6160_s1 + $0x6a0] ss:$8 sps:$4 sm:$0xff]  }
  0x94   : > { %2620 = vmatpush1.bf16.msra.mxu0 %v4612_v62  ;;  %1043 = vmatprep.subr.bf16.mxu1 %v4617_v0  ;;  %v4655_v62 = vld [vmem:[%s6160_s1 + $0x2a0] ss:$8 sps:$4 sm:$0xff]   ;;  %v4661_v0 = vld [vmem:[%s6160_s1 + $0x6b4] ss:$8 sps:$4 sm:$0xff]  }
  0x95   : > { %2621 = vmatprep.subr.bf16.mxu0 %v4620_v2  ;;  %v4664_v2 = vld [vmem:[%s6160_s1 + $0x2b4] ss:$8 sps:$4 sm:$0xff]  }
  0x96   : > { %767 = vmatmul.mubr.bf16.gmra.mrb[8].mxu1 %v3669_v8  ;;  %v4666_v8 = vld [vmem:[%s6160_s1 + $0x6c0] ss:$8 sps:$4 sm:$0xff]  }
  0x97   : > { %2249 = vmatmul.mubr.bf16.gmra.mrb[8].mxu0 %v5525_v11  ;;  %1044 = vmatpush1.bf16.msra.mxu1 %v4615_v4  ;;  %v4662_v4 = vld [vmem:[%s6160_s1 + $0x2b0] ss:$8 sps:$4 sm:$0xff]  }
  0x98   : > { %2622 = vmatpush1.bf16.msra.mxu0 %v4618_v5  ;;  %1045 = vmatprep.subr.bf16.mxu1 %v4623_v7  ;;  %v4668_v5 = vld [vmem:[%s6160_s1 + $0x6c4] ss:$8 sps:$4 sm:$0xff]  }
  0x99   : > { %2623 = vmatprep.subr.bf16.mxu0 %v4626_v10  ;;  %776 = vmatprep.mubr.bf16.mxu1 %v3672_v6  ;;  %v4671_v7 = vld [vmem:[%s6160_s1 + $0x2c4] ss:$8 sps:$4 sm:$0xff]   ;;  %v4680_v6 = vld [vmem:[%s6160_s1 + $0x6e0] ss:$8 sps:$4 sm:$0xff]  }
  0x9a   : > { %2258 = vmatprep.mubr.bf16.mxu0 %v3948_v40  ;;  %v4682_v10 = vld [vmem:[%s6160_s1 + $0x6e4] ss:$8 sps:$4 sm:$0xff]   ;;  %v4683_v40 = vld [vmem:[%s6160_s1 + $0x2e0] ss:$8 sps:$4 sm:$0xff]  }
  0x9b   : > { %1046 = vmatpush1.bf16.msra.mxu1 %v4621_v21  ;;  %v4685_v21 = vld [vmem:[%s6160_s1 + $0x2e4] ss:$8 sps:$4 sm:$0xff]  }
  0x9c   : > { %2624 = vmatpush1.bf16.msra.mxu0 %v4624_v29  ;;  %1047 = vmatprep.subr.bf16.mxu1 %v4629_v19  ;;  %v4689_v29 = vld [vmem:[%s6160_s1 + $0x6f4] ss:$8 sps:$4 sm:$0xff]  }
  0x9d   : > { %2625 = vmatprep.subr.bf16.mxu0 %v4632_v15  ;;  %v4692_v19 = vld [vmem:[%s6160_s1 + $0x2f4] ss:$8 sps:$4 sm:$0xff]   ;;  %v3983_v15 = vrot.slane %v2321_v24, 9 }
  0x9e   : > { %777 = vmatmul.mubr.bf16.gmra.mrb[12].mxu1 %v3671_v34  ;;  %v3984_v34 = vrot.slane %v2323_v27, 9  ;;  %v4716_v24 = vld [vmem:[%s6160_s1 + $0x534] ss:$8 sps:$4 sm:$0xff]  }
  0x9f   : > { %2259 = vmatmul.mubr.bf16.gmra.mrb[12].mxu0 %v3947_v35  ;;  %1048 = vmatpush1.bf16.msra.mxu1 %v4627_v33  ;;  %v2366_v33 = vrot.slane %v2322_v25, 5  ;;  %v2370_v35 = vrot.slane %v2324_v28, 5  ;;  %v4711_v25 = vld [vmem:[%s6160_s1 + $0x130] ss:$8 sps:$4 sm:$0xff]  }
  0xa0   : > { %2626 = vmatpush1.bf16.msra.mxu0 %v4630_v54  ;;  %1049 = vmatprep.subr.bf16.mxu1 %v4635_v48  ;;  %v4687_v54 = vld [vmem:[%s6160_s1 + $0x6f0] ss:$8 sps:$4 sm:$0xff]  }
  0xa1   : > { %2627 = vmatprep.subr.bf16.mxu0 %v4638_v42  ;;  %1067 = vmatprep.mubr.bf16.mxu1 %v5143_v38  ;;  %v4650_v38 = vld [vmem:[%s6160_s1 + $0x294] ss:$8 sps:$4 sm:$0xff]   ;;  %v4690_v48 = vld [vmem:[%s6160_s1 + $0x2f0] ss:$8 sps:$4 sm:$0xff]   ;;  %v4695_v42 = vld [vmem:[%s6160_s1 + $0x104] ss:$8 sps:$4 sm:$0xff]  }
  0xa2   : > { %2645 = vmatprep.mubr.bf16.mxu0 %v4022_v39  ;;  %v4698_v39 = vld [vmem:[%s6160_s1 + $0x504] ss:$8 sps:$4 sm:$0xff]  }
  0xa3   : > { %1050 = vmatpush1.bf16.msra.mxu1 %v4633_v41  ;;  %v4693_v41 = vld [vmem:[%s6160_s1 + $0x100] ss:$8 sps:$4 sm:$0xff]  }
  0xa4   : > { %2628 = vmatpush1.bf16.msra.mxu0 %v4636_v43  ;;  %1051 = vmatprep.subr.bf16.mxu1 %v4641_v31  ;;  %v4696_v43 = vld [vmem:[%s6160_s1 + $0x500] ss:$8 sps:$4 sm:$0xff]  }
  0xa5   : > { %2629 = vmatprep.subr.bf16.mxu0 %v4644_v58  ;;  %v2325_v31 = vld [vmem:[%s5020_s5 + $0x40] sm:$0xee]  ;;  %v4021_v58 = vcombine.low %v5564_v49, %v5568_v50  ;;  %v4704_v49 = vld [vmem:[%s6160_s1 + $0x514] ss:$8 sps:$4 sm:$0xff]  }
  0xa7   : > { %1052 = vmatpush1.bf16.msra.mxu1 %v4639_v30  ;;  %v4701_v30 = vld [vmem:[%s6160_s1 + $0x114] ss:$8 sps:$4 sm:$0xff]  }
  0xa8   : > { %2630 = vmatpush1.bf16.msra.mxu0 %v4642_v1  ;;  %1053 = vmatprep.subr.bf16.mxu1 %v4647_v46  ;;  %v5708_v1 = vsel %vm5543_vm5, %v3983_v15, %v2366_v33  ;;  %v5712_v46 = vsel %vm5543_vm5, %v3984_v34, %v2370_v35  ;;  %v4714_v35 = vld [vmem:[%s6160_s1 + $0x530] ss:$8 sps:$4 sm:$0xff]  }
  0xa9   : > { %2631 = vmatprep.subr.bf16.mxu0 %v4650_v38  ;;  %v2326_v38 = vld [vmem:[%s5020_s5 + $0x48] sm:$0x11] }
  0xab   : > { %1054 = vmatpush1.bf16.msra.mxu1 %v4645_v51  ;;  %v2327_v51 = vld [vmem:[%s5020_s5 + $0x50] sm:$0xee] }
  0xac   : > { %2632 = vmatpush1.bf16.msra.mxu0 %v4648_v53  ;;  %1055 = vmatprep.subr.bf16.mxu1 %v4654_v59  ;;  %v2328_v53 = vld [vmem:[%s5020_s5 + $0x58] sm:$0x11] }
  0xad   : > { %2633 = vmatprep.subr.bf16.mxu0 %v4657_v60  ;;  %v4699_v59 = vld [vmem:[%s6160_s1 + $0x110] ss:$8 sps:$4 sm:$0xff]  }
  0xae   : > { %v4702_v60 = vld [vmem:[%s6160_s1 + $0x510] ss:$8 sps:$4 sm:$0xff]  }
  0xaf   : > { %1056 = vmatpush1.bf16.msra.mxu1 %v4652_v61  ;;  %v5728_v61 = vcombine.high %v5708_v1, %v5712_v46 }
  0xb0   : > { %2634 = vmatpush1.bf16.msra.mxu0 %v4655_v62  ;;  %1057 = vmatprep.subr.bf16.mxu1 %v4661_v0  ;;  %v3985_v62 = vrot.slane %v2325_v31, 9  ;;  %v2374_v0 = vrot.slane %v2326_v38, 5  ;;  %v4728_v38 = vld [vmem:[%s6160_s1 + $0x554] ss:$8 sps:$4 sm:$0xff]  }
  0xb1   : > { %2635 = vmatprep.subr.bf16.mxu0 %v4664_v2  ;;  %v3986_v2 = vrot.slane %v2327_v51, 9 }
  0xb3   : > { %1058 = vmatpush1.bf16.msra.mxu1 %v4659_v3  ;;  %v2378_v3 = vrot.slane %v2328_v53, 5 }
  0xb4   : > { %2636 = vmatpush1.bf16.msra.mxu0 %v4662_v4  ;;  %1059 = vmatprep.subr.bf16.mxu1 %v4668_v5  ;;  %v1156_v4 = vld [vmem:[%s5020_s5] sm:$0xff] }
  0xb5   : > { %2637 = vmatprep.subr.bf16.mxu0 %v4671_v7  ;;  %v4707_v5 = vld [vmem:[%s6160_s1 + $0x124] ss:$8 sps:$4 sm:$0xff]   ;;  %v4705_v7 = vld [vmem:[%s6160_s1 + $0x120] ss:$8 sps:$4 sm:$0xff]  }
  0xb7   : > { %1060 = vmatpush1.bf16.msra.mxu1 %v4666_v8  ;;  %v4708_v8 = vld [vmem:[%s6160_s1 + $0x520] ss:$8 sps:$4 sm:$0xff]  }
  0xb8   : > { %2638 = vmatpush1.bf16.msra.mxu0 %v4669_v12  ;;  %1061 = vmatprep.subr.bf16.mxu1 %v4675_v14  ;;  %v5748_v12 = vcombine.low %v5708_v1, %v5712_v46  ;;  %v2329_v14 = vld [vmem:[%s5020_s5 + $0x60] sm:$0xee] }
  0xb9   : > { %2639 = vmatprep.subr.bf16.mxu0 %v4678_v16  ;;  %v5753_v16 = vsel %vm5543_vm5, %v3985_v62, %v2374_v0  ;;  %v3987_v28 = vrot.slane %v2329_v14, 9  ;;  %v4734_v62 = vld [vmem:[%s6160_s1 + $0x564] ss:$8 sps:$4 sm:$0xff]  }
  0xba   : > { %v4743_v14 = vld [vmem:[%s6160_s1 + $0x184] ss:$8 sps:$4 sm:$0xff]  }
  0xbb   : > { %1062 = vmatpush1.bf16.msra.mxu1 %v4673_v17  ;;  %v5757_v17 = vsel %vm5543_vm5, %v3986_v2, %v2378_v3  ;;  %v4729_v3 = vld [vmem:[%s6160_s1 + $0x160] ss:$8 sps:$4 sm:$0xff]  }
  0xbc   : > { %2640 = vmatpush1.bf16.msra.mxu0 %v4676_v20  ;;  %1063 = vmatprep.subr.bf16.mxu1 %v4682_v10  ;;  %v2330_v20 = vld [vmem:[%s5020_s5 + $0x68] sm:$0x11]  ;;  %v1180_v10 = vshrl.u32 %v1156_v4, 16  ;;  %v5773_v27 = vcombine.high %v5753_v16, %v5757_v17 }
  0xbd   : > { %2641 = vmatprep.subr.bf16.mxu0 %v4685_v21  ;;  %v1183_v21 = vshll.u32 %v1156_v4, 16  ;;  %v4737_v4 = vld [vmem:[%s6160_s1 + $0x174] ss:$8 sps:$4 sm:$0xff]  }
  0xbe   : > { %v1182_v33 = vrot.slane %v1180_v10, 4  ;;  %v4752_v10 = vld [vmem:[%s6160_s1 + $0x594] ss:$8 sps:$4 sm:$0xff]  }
  0xbf   : > { %1064 = vmatpush1.bf16.msra.mxu1 %v4680_v6  ;;  %v2332_v6 = vld [vmem:[%s5020_s5 + $0x78] sm:$0x11]  ;;  %v1185_v34 = vrot.slane %v1183_v21, 5 }
  0xc0   : > { %2642 = vmatpush1.bf16.msra.mxu0 %v4683_v40  ;;  %1065 = vmatprep.subr.bf16.mxu1 %v4689_v29  ;;  %v4713_v40 = vld [vmem:[%s6160_s1 + $0x134] ss:$8 sps:$4 sm:$0xff]   ;;  %v2382_v29 = vrot.slane %v2330_v20, 5  ;;  %v2386_v15 = vrot.slane %v2332_v6, 5  ;;  %v4747_v21 = vld [vmem:[%s6160_s1 + $0x190] ss:$8 sps:$4 sm:$0xff]  }
  0xc1   : > { %2643 = vmatprep.subr.bf16.mxu0 %v4692_v19  ;;  %v4749_v20 = vld [vmem:[%s6160_s1 + $0x194] ss:$8 sps:$4 sm:$0xff]   ;;  %v4755_v6 = vld [vmem:[%s6160_s1 + $0x1a4] ss:$8 sps:$4 sm:$0xff]  }
  0xc3   : > { %1066 = vmatpush1.bf16.msra.mxu1 %v4687_v54  ;;  %v1157_v54 = vld [vmem:[%s5020_s5 + $0x8] sm:$0x11] }
  0xc4   : > { %2644 = vmatpush1.bf16.msra.mxu0 %v4690_v48  ;;  %1516 = vmatprep.subr.bf16.mxu1 %v4695_v42  ;;  %v4719_v48 = vld [vmem:[%s6160_s1 + $0x144] ss:$8 sps:$4 sm:$0xff]   ;;  %v5791_v42 = vcombine.low %v5753_v16, %v5757_v17  ;;  %v1189_v31 = vshll.u32 %v1157_v54, 16  ;;  %v4768_v54 = vld [vmem:[%s6160_s1 + $0x5c0] ss:$8 sps:$4 sm:$0xff]  }
  0xc5   : > { %2951 = vmatprep.subr.bf16.mxu0 %v4698_v39  ;;  %v5795_v39 = vsel %vm5543_vm5, %v3987_v28, %v2382_v29  ;;  %v4761_v28 = vld [vmem:[%s6160_s1 + $0x1b4] ss:$8 sps:$4 sm:$0xff]  }
  0xc6   : > { %1068 = vmatmul.mubr.bf16.vlgmr.msra.gmra.mrb[0].mxu1 %v5164_v47  ;;  %v4710_v47 = vld [vmem:[%s6160_s1 + $0x524] ss:$8 sps:$4 sm:$0xff]   ;;  %v4764_v29 = vld [vmem:[%s6160_s1 + $0x5b4] ss:$8 sps:$4 sm:$0xff]  }
  0xc7   : > { %2646 = vmatmul.mubr.bf16.vlgmr.msra.gmra.mrb[0].mxu0 %v4021_v58  ;;  %1517 = vmatpush1.bf16.msra.mxu1 %v4693_v41  ;;  %v4720_v58 = vld [vmem:[%s6160_s1 + $0x540] ss:$8 sps:$4 sm:$0xff]  }
  0xc8   : > { %2952 = vmatpush1.bf16.msra.mxu0 %v4696_v43  ;;  %1518 = vmatprep.subr.bf16.mxu1 %v4701_v30  ;;  %v1186_v43 = vor.u32 %v1185_v34, %v1182_v33  ;;  %v4725_v30 = vld [vmem:[%s6160_s1 + $0x154] ss:$8 sps:$4 sm:$0xff]   ;;  %v4767_v33 = vld [vmem:[%s6160_s1 + $0x1c4] ss:$8 sps:$4 sm:$0xff]  }
  0xc9   : > { %2953 = vmatprep.subr.bf16.mxu0 %v4704_v49  ;;  %1077 = vmatprep.mubr.bf16.mxu1 %v5211_v13  ;;  %v2331_v13 = vld [vmem:[%s5020_s5 + $0x70] sm:$0xee]  ;;  %v1191_v49 = vrot.slane %v1189_v31, 5  ;;  %v4770_v34 = vld [vmem:[%s6160_s1 + $0x5c4] ss:$8 sps:$4 sm:$0xff]  }
  0xca   : > { %2655 = vmatprep.mubr.bf16.mxu0 %v5728_v61  ;;  %v3988_v19 = vrot.slane %v2331_v13, 9  ;;  %v1187_v53 = vrot.slane %v1186_v43, 4  ;;  %v4750_v13 = vld [vmem:[%s6160_s1 + $0x590] ss:$8 sps:$4 sm:$0xff]  }
  0xcb   : > { %1519 = vmatpush1.bf16.msra.mxu1 %v4699_v59  ;;  %v4723_v59 = vld [vmem:[%s6160_s1 + $0x150] ss:$8 sps:$4 sm:$0xff]  }
  0xcc   : > { %2954 = vmatpush1.bf16.msra.mxu0 %v4702_v60  ;;  %1520 = vmatprep.subr.bf16.mxu1 %v4707_v5  ;;  %v5799_v41 = vsel %vm5543_vm5, %v3988_v19, %v2386_v15  ;;  %v4726_v60 = vld [vmem:[%s6160_s1 + $0x550] ss:$8 sps:$4 sm:$0xff]   ;;  %v5841_v2 = vsel %vm5070_vm2, %v1187_v53, %v1191_v49  ;;  %v4787_v53 = vld [vmem:[%s6160_s1 + $0x1f4] ss:$8 sps:$4 sm:$0xff]  }
  0xcd   : > { %2955 = vmatprep.subr.bf16.mxu0 %v4710_v47  ;;  %v5815_v51 = vcombine.high %v5795_v39, %v5799_v41  ;;  %v5837_v0 = vcombine.low %v5795_v39, %v5799_v41  ;;  %v3804_v5 = vcombine.high %v5841_v2, %v5088_v18  ;;  %v4095_v47 = vcombine.high %v5568_v50, %v5708_v1  ;;  %v4759_v19 = vld [vmem:[%s6160_s1 + $0x1b0] ss:$8 sps:$4 sm:$0xff]   ;;  %v4790_v49 = vld [vmem:[%s6160_s1 + $0x5f4] ss:$8 sps:$4 sm:$0xff]  }
  0xce   : > { %1078 = vmatmul.mubr.bf16.gmra.mrb[4].mxu1 %v5228_v23  ;;  %v4722_v23 = vld [vmem:[%s6160_s1 + $0x544] ss:$8 sps:$4 sm:$0xff]   ;;  %v4762_v15 = vld [vmem:[%s6160_s1 + $0x5b0] ss:$8 sps:$4 sm:$0xff]  }
  0xcf   : > { %2656 = vmatmul.mubr.bf16.gmra.mrb[4].mxu0 %v5748_v12  ;;  %1521 = vmatpush1.bf16.msra.mxu1 %v4705_v7  ;;  %v4735_v7 = vld [vmem:[%s6160_s1 + $0x170] ss:$8 sps:$4 sm:$0xff]  }
  0xd0   : > { %2956 = vmatpush1.bf16.msra.mxu0 %v4708_v8  ;;  %1522 = vmatprep.subr.bf16.mxu1 %v4713_v40  ;;  %v4738_v8 = vld [vmem:[%s6160_s1 + $0x570] ss:$8 sps:$4 sm:$0xff]   ;;  %v4758_v40 = vld [vmem:[%s6160_s1 + $0x5a4] ss:$8 sps:$4 sm:$0xff]  }
  0xd1   : > { %2957 = vmatprep.subr.bf16.mxu0 %v4716_v24  ;;  %1087 = vmatprep.mubr.bf16.mxu1 %v5269_v55  ;;  %v4717_v55 = vld [vmem:[%s6160_s1 + $0x140] ss:$8 sps:$4 sm:$0xff]   ;;  %v4771_v43 = vld [vmem:[%s6160_s1 + $0x1d0] ss:$8 sps:$4 sm:$0xff]  }
  0xd2   : > { %2665 = vmatprep.mubr.bf16.mxu0 %v5773_v27  ;;  %v4753_v24 = vld [vmem:[%s6160_s1 + $0x1a0] ss:$8 sps:$4 sm:$0xff]   ;;  %v4774_v31 = vld [vmem:[%s6160_s1 + $0x5d0] ss:$8 sps:$4 sm:$0xff]  }
  0xd3   : > { %1523 = vmatpush1.bf16.msra.mxu1 %v4711_v25  ;;  %v4756_v25 = vld [vmem:[%s6160_s1 + $0x5a0] ss:$8 sps:$4 sm:$0xff]  }
  0xd4   : > { %2958 = vmatpush1.bf16.msra.mxu0 %v4714_v35  ;;  %1524 = vmatprep.subr.bf16.mxu1 %v4719_v48  ;;  %v4765_v35 = vld [vmem:[%s6160_s1 + $0x1c0] ss:$8 sps:$4 sm:$0xff]   ;;  %v4773_v48 = vld [vmem:[%s6160_s1 + $0x1d4] ss:$8 sps:$4 sm:$0xff]  }
  0xd5   : > { %2959 = vmatprep.subr.bf16.mxu0 %v4722_v23  ;;  %v4776_v23 = vld [vmem:[%s6160_s1 + $0x5d4] ss:$8 sps:$4 sm:$0xff]  }
  0xd6   : > { %1088 = vmatmul.mubr.bf16.gmra.mrb[8].mxu1 %v5282_v63  ;;  %v4731_v63 = vld [vmem:[%s6160_s1 + $0x164] ss:$8 sps:$4 sm:$0xff]  }
  0xd7   : > { %2666 = vmatmul.mubr.bf16.gmra.mrb[8].mxu0 %v5791_v42  ;;  %1525 = vmatpush1.bf16.msra.mxu1 %v4717_v55  ;;  %v4781_v55 = vld [vmem:[%s6160_s1 + $0x1e4] ss:$8 sps:$4 sm:$0xff]  }
  0xd8   : > { %2960 = vmatpush1.bf16.msra.mxu0 %v4720_v58  ;;  %1526 = vmatprep.subr.bf16.mxu1 %v4725_v30  ;;  %v4784_v58 = vld [vmem:[%s6160_s1 + $0x5e4] ss:$8 sps:$4 sm:$0xff]   ;;  %v4779_v30 = vld [vmem:[%s6160_s1 + $0x1e0] ss:$8 sps:$4 sm:$0xff]  }
  0xd9   : > { %2961 = vmatprep.subr.bf16.mxu0 %v4728_v38  ;;  %1097 = vmatprep.mubr.bf16.mxu1 %v3738_v44  ;;  %v4732_v44 = vld [vmem:[%s6160_s1 + $0x560] ss:$8 sps:$4 sm:$0xff]  }
  0xda   : > { %2675 = vmatprep.mubr.bf16.mxu0 %v5815_v51  ;;  %v4782_v38 = vld [vmem:[%s6160_s1 + $0x5e0] ss:$8 sps:$4 sm:$0xff]  }
  0xdb   : > { %1527 = vmatpush1.bf16.msra.mxu1 %v4723_v59  ;;  %v4785_v59 = vld [vmem:[%s6160_s1 + $0x1f0] ss:$8 sps:$4 sm:$0xff]  }
  0xdc   : > { %2962 = vmatpush1.bf16.msra.mxu0 %v4726_v60  ;;  %1528 = vmatprep.subr.bf16.mxu1 %v4731_v63  ;;  %v4788_v60 = vld [vmem:[%s6160_s1 + $0x5f0] ss:$8 sps:$4 sm:$0xff]   ;;  %v4793_v63 = vld [vmem:[%s6160_s1 + $0x804] ss:$8 sps:$4 sm:$0xff]  }
  0xdd   : > { %2963 = vmatprep.subr.bf16.mxu0 %v4734_v62  ;;  %v3803_v62 = vcombine.low %v5841_v2, %v5088_v18  ;;  %v4794_v18 = vld [vmem:[%s6160_s1 + $0x810] ss:$8 sps:$4 sm:$0xff]   ;;  %v4797_v2 = vld [vmem:[%s6160_s1 + $0x820] ss:$8 sps:$4 sm:$0xff]  }
  0xde   : > { %1098 = vmatmul.mubr.bf16.gmra.mrb[12].mxu1 %v3737_v45  ;;  %v4744_v45 = vld [vmem:[%s6160_s1 + $0x580] ss:$8 sps:$4 sm:$0xff]  }
  0xdf   : > { %2676 = vmatmul.mubr.bf16.gmra.mrb[12].mxu0 %v5837_v0  ;;  %1529 = vmatpush1.bf16.msra.mxu1 %v4729_v3  ;;  %v4094_v3 = vcombine.low %v5568_v50, %v5708_v1  ;;  %v4799_v50 = vld [vmem:[%s6160_s1 + $0x824] ss:$8 sps:$4 sm:$0xff]   ;;  %v4096_v1 = vcombine.low %v5712_v46, %v5753_v16 }
  0xe0   : > { %2964 = vmatpush1.bf16.msra.mxu0 %v4732_v44  ;;  %1530 = vmatprep.subr.bf16.mxu1 %v4737_v4  ;;  %v4791_v44 = vld [vmem:[%s6160_s1 + $0x800] ss:$8 sps:$4 sm:$0xff]   ;;  %v4796_v4 = vld [vmem:[%s6160_s1 + $0x814] ss:$8 sps:$4 sm:$0xff]  }
  0xe1   : > { %2965 = vmatprep.subr.bf16.mxu0 %v4740_v9  ;;  %1548 = vmatprep.mubr.bf16.mxu1 %v3804_v5  ;;  %v4097_v9 = vcombine.high %v5712_v46, %v5753_v16  ;;  %v2333_v5 = vld [vmem:[%s5020_s5 + $0x80] sm:$0xee] }
  0xe2   : > { %2983 = vmatprep.mubr.bf16.mxu0 %v4095_v47  ;;  %v2334_v47 = vld [vmem:[%s5020_s5 + $0x88] sm:$0x11]  ;;  %v4061_v46 = vrot.slane %v2333_v5, 9 }
  0xe3   : > { %1531 = vmatpush1.bf16.msra.mxu1 %v4735_v7  ;;  %v4802_v7 = vld [vmem:[%s6160_s1 + $0x834] ss:$8 sps:$4 sm:$0xff]   ;;  %v2738_v16 = vrot.slane %v2334_v47, 5 }
  0xe4   : > { %2966 = vmatpush1.bf16.msra.mxu0 %v4738_v8  ;;  %1532 = vmatprep.subr.bf16.mxu1 %v4743_v14  ;;  %v4800_v8 = vld [vmem:[%s6160_s1 + $0x830] ss:$8 sps:$4 sm:$0xff]   ;;  %v4805_v14 = vld [vmem:[%s6160_s1 + $0x844] ss:$8 sps:$4 sm:$0xff]  }
  0xe5   : > { %2967 = vmatprep.subr.bf16.mxu0 %v4746_v56  ;;  %v6011_v56 = vsel %vm5543_vm5, %v4061_v46, %v2738_v16 }
  0xe7   : > { %1533 = vmatpush1.bf16.msra.mxu1 %v4741_v37  ;;  %v4803_v37 = vld [vmem:[%s6160_s1 + $0x840] ss:$8 sps:$4 sm:$0xff]  }
  0xe8   : > { %2968 = vmatpush1.bf16.msra.mxu0 %v4744_v45  ;;  %1534 = vmatprep.subr.bf16.mxu1 %v4749_v20  ;;  %v4101_v45 = vcombine.high %v5799_v41, %v6011_v56  ;;  %v4100_v20 = vcombine.low %v5799_v41, %v6011_v56  ;;  %v4817_v41 = vld [vmem:[%s6160_s1 + $0x884] ss:$8 sps:$4 sm:$0xff]  }
  0xe9   : > { %2969 = vmatprep.subr.bf16.mxu0 %v4752_v10  ;;  %v4814_v10 = vld [vmem:[%s6160_s1 + $0x874] ss:$8 sps:$4 sm:$0xff]  }
  0xeb   : > { %1535 = vmatpush1.bf16.msra.mxu1 %v4747_v21  ;;  %v4820_v21 = vld [vmem:[%s6160_s1 + $0x894] ss:$8 sps:$4 sm:$0xff]  }
  0xec   : > { %2970 = vmatpush1.bf16.msra.mxu0 %v4750_v13  ;;  %1536 = vmatprep.subr.bf16.mxu1 %v4755_v6  ;;  %v4821_v13 = vld [vmem:[%s6160_s1 + $0x8a0] ss:$8 sps:$4 sm:$0xff]   ;;  %v4826_v6 = vld [vmem:[%s6160_s1 + $0x8b4] ss:$8 sps:$4 sm:$0xff]  }
  0xed   : > { %2971 = vmatprep.subr.bf16.mxu0 %v4758_v40  ;;  %v4824_v40 = vld [vmem:[%s6160_s1 + $0x8b0] ss:$8 sps:$4 sm:$0xff]  }
  0xef   : > { %1537 = vmatpush1.bf16.msra.mxu1 %v4753_v24  ;;  %v4829_v24 = vld [vmem:[%s6160_s1 + $0x8c4] ss:$8 sps:$4 sm:$0xff]  }
  0xf0   : > { %2972 = vmatpush1.bf16.msra.mxu0 %v4756_v25  ;;  %1538 = vmatprep.subr.bf16.mxu1 %v4761_v28  ;;  %v4827_v25 = vld [vmem:[%s6160_s1 + $0x8c0] ss:$8 sps:$4 sm:$0xff]   ;;  %v4832_v28 = vld [vmem:[%s6160_s1 + $0x8d4] ss:$8 sps:$4 sm:$0xff]  }
  0xf1   : > { %2973 = vmatprep.subr.bf16.mxu0 %v4764_v29  ;;  %v4830_v29 = vld [vmem:[%s6160_s1 + $0x8d0] ss:$8 sps:$4 sm:$0xff]  }
  0xf3   : > { %1539 = vmatpush1.bf16.msra.mxu1 %v4759_v19  ;;  %v4835_v19 = vld [vmem:[%s6160_s1 + $0x8e4] ss:$8 sps:$4 sm:$0xff]  }
  0xf4   : > { %2974 = vmatpush1.bf16.msra.mxu0 %v4762_v15  ;;  %1540 = vmatprep.subr.bf16.mxu1 %v4767_v33  ;;  %v2335_v15 = vld [vmem:[%s5020_s5 + $0x90] sm:$0xee]  ;;  %v2336_v33 = vld [vmem:[%s5020_s5 + $0x98] sm:$0x11] }
  0xf5   : > { %2975 = vmatprep.subr.bf16.mxu0 %v4770_v34  ;;  %v4833_v34 = vld [vmem:[%s6160_s1 + $0x8e0] ss:$8 sps:$4 sm:$0xff]  }
  0xf7   : > { %1541 = vmatpush1.bf16.msra.mxu1 %v4765_v35  ;;  %v4838_v35 = vld [vmem:[%s6160_s1 + $0x8f4] ss:$8 sps:$4 sm:$0xff]  }
  0xf8   : > { %2976 = vmatpush1.bf16.msra.mxu0 %v4768_v54  ;;  %1542 = vmatprep.subr.bf16.mxu1 %v4773_v48  ;;  %v4134_v54 = vrot.slane %v2335_v15, 9  ;;  %v3076_v48 = vrot.slane %v2336_v33, 5 }
  0xf9   : > { %2977 = vmatprep.subr.bf16.mxu0 %v4776_v23  ;;  %v4836_v23 = vld [vmem:[%s6160_s1 + $0x8f0] ss:$8 sps:$4 sm:$0xff]  }
  0xfb   : > { %1543 = vmatpush1.bf16.msra.mxu1 %v4771_v43  ;;  %v3077_v43 = vsel %vm5543_vm5, %v4134_v54, %v3076_v48 }
  0xfc   : > { %2978 = vmatpush1.bf16.msra.mxu0 %v4774_v31  ;;  %1544 = vmatprep.subr.bf16.mxu1 %v4781_v55  ;;  %v4168_v31 = vcombine.high %v6011_v56, %v3077_v43  ;;  %v4167_v55 = vcombine.low %v6011_v56, %v3077_v43 }
  0xfd   : > { %2979 = vmatprep.subr.bf16.mxu0 %v4784_v58 }
  0xff   : > { %1545 = vmatpush1.bf16.msra.mxu1 %v4779_v30 }
 0x100   : > { %2980 = vmatpush1.bf16.msra.mxu0 %v4782_v38  ;;  %1546 = vmatprep.subr.bf16.mxu1 %v4787_v53 }
 0x101   : > { %2981 = vmatprep.subr.bf16.mxu0 %v4790_v49 }
 0x103   : > { %1547 = vmatpush1.bf16.msra.mxu1 %v4785_v59 }
 0x104   : > { %2982 = vmatpush1.bf16.msra.mxu0 %v4788_v60  ;;  %4220 = vmatprep.subr.bf16.mxu1 %v4793_v63 }
 0x105   : > { %3277 = vmatprep.subr.bf16.mxu0 %v4793_v63 }
 0x106   : > { %1549 = vmatmul.mubr.bf16.vlgmr.msra.gmra.mrb[0].mxu1 %v3803_v62 }
 0x107   : > { %2984 = vmatmul.mubr.bf16.vlgmr.msra.gmra.mrb[0].mxu0 %v4094_v3  ;;  %4236 = vmatpush1.bf16.msra.mxu1 %v4791_v44 }
 0x108   : > { %3278 = vmatpush1.bf16.msra.mxu0 %v4791_v44  ;;  %4221 = vmatprep.subr.bf16.mxu1 %v4796_v4 }
 0x109   : > { %3279 = vmatprep.subr.bf16.mxu0 %v4796_v4  ;;  %1558 = vmatprep.mubr.bf16.mxu1 %v5356_v52  ;;  %v4099_v52 = vcombine.high %v5757_v17, %v5795_v39 }
 0x10a   : > { %2993 = vmatprep.mubr.bf16.mxu0 %v4097_v9 }
 0x10b   : > { %4237 = vmatpush1.bf16.msra.mxu1 %v4794_v18 }
 0x10c   : > { %3280 = vmatpush1.bf16.msra.mxu0 %v4794_v18  ;;  %4222 = vmatprep.subr.bf16.mxu1 %v4799_v50 }
 0x10d   : > { %3281 = vmatprep.subr.bf16.mxu0 %v4799_v50 }
 0x10e   : > { %1559 = vmatmul.mubr.bf16.gmra.mrb[4].mxu1 %v5427_v26  ;;  %v4098_v26 = vcombine.low %v5757_v17, %v5795_v39  ;;  %v4806_v17 = vld [vmem:[%s6160_s1 + $0x850] ss:$8 sps:$4 sm:$0xff]   ;;  %v4811_v39 = vld [vmem:[%s6160_s1 + $0x864] ss:$8 sps:$4 sm:$0xff]  }
 0x10f   : > { %2994 = vmatmul.mubr.bf16.gmra.mrb[4].mxu0 %v4096_v1  ;;  %4238 = vmatpush1.bf16.msra.mxu1 %v4797_v2 }
 0x110   : > { %3282 = vmatpush1.bf16.msra.mxu0 %v4797_v2  ;;  %4223 = vmatprep.subr.bf16.mxu1 %v4802_v7 }
 0x111   : > { %3283 = vmatprep.subr.bf16.mxu0 %v4802_v7  ;;  %1568 = vmatprep.mubr.bf16.mxu1 %v5445_v32  ;;  %v4808_v32 = vld [vmem:[%s6160_s1 + $0x854] ss:$8 sps:$4 sm:$0xff]  }
 0x112   : > { %3003 = vmatprep.mubr.bf16.mxu0 %v4099_v52 }
 0x113   : > { %4239 = vmatpush1.bf16.msra.mxu1 %v4800_v8 }
 0x114   : > { %3284 = vmatpush1.bf16.msra.mxu0 %v4800_v8  ;;  %4224 = vmatprep.subr.bf16.mxu1 %v4805_v14 }
 0x115   : > { %3285 = vmatprep.subr.bf16.mxu0 %v4805_v14 }
 0x116   : > { %1569 = vmatmul.mubr.bf16.gmra.mrb[8].mxu1 %v5471_v36  ;;  %v4809_v36 = vld [vmem:[%s6160_s1 + $0x860] ss:$8 sps:$4 sm:$0xff]  }
 0x117   : > { %3004 = vmatmul.mubr.bf16.gmra.mrb[8].mxu0 %v4098_v26  ;;  %4240 = vmatpush1.bf16.msra.mxu1 %v4803_v37 }
 0x118   : > { %3286 = vmatpush1.bf16.msra.mxu0 %v4803_v37  ;;  %4225 = vmatprep.subr.bf16.mxu1 %v4808_v32  ;;  %v3416_v37 = vlaneseq }
 0x119   : > { %3287 = vmatprep.subr.bf16.mxu0 %v4808_v32  ;;  %1578 = vmatprep.mubr.bf16.mxu1 %v5496_v57  ;;  %v4812_v57 = vld [vmem:[%s6160_s1 + $0x870] ss:$8 sps:$4 sm:$0xff]  }
 0x11a   : > { %3013 = vmatprep.mubr.bf16.mxu0 %v4101_v45  ;;  %v3417_v32 = vshrl.u32 %v3416_v37, 7 }
 0x11b   : > { %4241 = vmatpush1.bf16.msra.mxu1 %v4806_v17 }
 0x11c   : > { %3288 = vmatpush1.bf16.msra.mxu0 %v4806_v17  ;;  %4226 = vmatprep.subr.bf16.mxu1 %v4811_v39  ;;  %v3418_v45 = vsub.s32 0, %v3417_v32  ;;  %v3414_v17 = vld [vmem:[%s6161_s2] sm:$0x3] }
 0x11d   : > { %3289 = vmatprep.subr.bf16.mxu0 %v4811_v39  ;;  %v3422_v39 = vsub.s32 1, %v3417_v32 }
 0x11e   : > { %1579 = vmatmul.mubr.bf16.gmra.mrb[12].mxu1 %v5525_v11  ;;  %v4815_v11 = vld [vmem:[%s6160_s1 + $0x880] ss:$8 sps:$4 sm:$0xff]  }
 0x11f   : > { %3014 = vmatmul.mubr.bf16.gmra.mrb[12].mxu0 %v4100_v20  ;;  %4242 = vmatpush1.bf16.msra.mxu1 %v4809_v36  ;;  %v6116_v20 = vrot.slane %v3414_v17, %v3418_v45 }
 0x120   : > { %3290 = vmatpush1.bf16.msra.mxu0 %v4809_v36  ;;  %4227 = vmatprep.subr.bf16.mxu1 %v4814_v10 }
 0x121   : > { %3291 = vmatprep.subr.bf16.mxu0 %v4814_v10  ;;  %3309 = vmatprep.mubr.bf16.mxu0 %v5728_v61  ;;  %v4818_v61 = vld [vmem:[%s6160_s1 + $0x890] ss:$8 sps:$4 sm:$0xff]  }
 0x122   : > { %3329 = vmatprep.mubr.bf16.mxu1 %v5815_v51  ;;  %v4823_v51 = vld [vmem:[%s6160_s1 + $0x8a4] ss:$8 sps:$4 sm:$0xff]  }
 0x123   : > { %4243 = vmatpush1.bf16.msra.mxu1 %v4812_v57 }
 0x124   : > { %3292 = vmatpush1.bf16.msra.mxu0 %v4812_v57  ;;  %4228 = vmatprep.subr.bf16.mxu1 %v4817_v41  ;;  %v6118_v57 = vrot.slane %v3414_v17, %v3422_v39 }
 0x125   : > { %3293 = vmatprep.subr.bf16.mxu0 %v4817_v41 }
 0x127   : > { %4244 = vmatpush1.bf16.msra.mxu1 %v4815_v11 }
 0x128   : > { %3294 = vmatpush1.bf16.msra.mxu0 %v4815_v11  ;;  %4229 = vmatprep.subr.bf16.mxu1 %v4820_v21 }
 0x129   : > { %3295 = vmatprep.subr.bf16.mxu0 %v4820_v21 }
 0x12b   : > { %4245 = vmatpush1.bf16.msra.mxu1 %v4818_v61 }
 0x12c   : > { %3296 = vmatpush1.bf16.msra.mxu0 %v4818_v61  ;;  %4230 = vmatprep.subr.bf16.mxu1 %v4823_v51 }
 0x12d   : > { %3297 = vmatprep.subr.bf16.mxu0 %v4823_v51 }
 0x12f   : > { %4246 = vmatpush1.bf16.msra.mxu1 %v4821_v13 }
 0x130   : > { %3298 = vmatpush1.bf16.msra.mxu0 %v4821_v13  ;;  %4231 = vmatprep.subr.bf16.mxu1 %v4826_v6 }
 0x131   : > { %3299 = vmatprep.subr.bf16.mxu0 %v4826_v6 }
 0x133   : > { %4247 = vmatpush1.bf16.msra.mxu1 %v4824_v40 }
 0x134   : > { %3300 = vmatpush1.bf16.msra.mxu0 %v4824_v40  ;;  %4232 = vmatprep.subr.bf16.mxu1 %v4829_v24 }
 0x135   : > { %3301 = vmatprep.subr.bf16.mxu0 %v4829_v24 }
 0x137   : > { %4248 = vmatpush1.bf16.msra.mxu1 %v4827_v25 }
 0x138   : > { %3302 = vmatpush1.bf16.msra.mxu0 %v4827_v25  ;;  %4233 = vmatprep.subr.bf16.mxu1 %v4832_v28 }
 0x139   : > { %3303 = vmatprep.subr.bf16.mxu0 %v4832_v28 }
 0x13b   : > { %4249 = vmatpush1.bf16.msra.mxu1 %v4830_v29 }
 0x13c   : > { %3304 = vmatpush1.bf16.msra.mxu0 %v4830_v29  ;;  %4234 = vmatprep.subr.bf16.mxu1 %v4835_v19 }
 0x13d   : > { %3305 = vmatprep.subr.bf16.mxu0 %v4835_v19 }
 0x13f   : > { %4250 = vmatpush1.bf16.msra.mxu1 %v4833_v34 }
 0x140   : > { %3306 = vmatpush1.bf16.msra.mxu0 %v4833_v34  ;;  %4235 = vmatprep.subr.bf16.mxu1 %v4838_v35 }
 0x141   : > { %3307 = vmatprep.subr.bf16.mxu0 %v4838_v35 }
 0x143   : > { %4251 = vmatpush1.bf16.msra.mxu1 %v4836_v23 }
 0x144   : > { %3308 = vmatpush1.bf16.msra.mxu0 %v4836_v23 }
 0x146   : > { %3330 = vmatmul.mubr.bf16.vlgmr.msra.gmra.mrb[16].mxu1 %v5837_v0 }
 0x147   : > { %3310 = vmatmul.mubr.bf16.vlgmr.msra.gmra.mrb[0].mxu0 %v5748_v12  ;;  %3339 = vmatprep.mubr.bf16.mxu1 %v4168_v31 }
 0x148   : > { %3319 = vmatprep.mubr.bf16.mxu0 %v5773_v27 }
 0x14e   : > { %3340 = vmatmul.mubr.bf16.gmra.mrb[20].mxu1 %v4167_v55 }
 0x14f   : > { %3320 = vmatmul.mubr.bf16.gmra.mrb[4].mxu0 %v5791_v42 }
 0x1d9   : > { %v1550_v58 = vpop.f32.mrb[0].mxu1 }
 0x1da   : > { %v1552_v30 = vpop.f32.mrb[1].mxu1 }
 0x1db   : > { %v1554_v22 = vpop.f32.mrb[2].mxu1 }
 0x1dc   : > { %v1556_v38 = vpop.f32.mrb[3].mxu1 }
 0x1e1   : > { %v6101_v53 = vpop.f32.mrb[4].mxu1 }
 0x1e2   : > { %v6103_v49 = vpop.f32.mrb[5].mxu1 }
 0x1e3   : > { %v6105_v59 = vpop.f32.mrb[6].mxu1 }
 0x1e4   : > { %v6107_v12 = vpop.f32.mrb[7].mxu1 }
 0x1e9   : > { %v1570_v0 = vpop.f32.mrb[8].mxu1 }
 0x1ea   : > { %v3005_v27 = vpop.f32.mrb[8].mxu0  ;;  %v1572_v63 = vpop.f32.mrb[9].mxu1 }
 0x1eb   : > { %v4260_v60 = vadd.f32 %v3005_v27, %v1570_v0  ;;  %v3007_v62 = vpop.f32.mrb[9].mxu0  ;;  %v1574_v42 = vpop.f32.mrb[10].mxu1 }
 0x1ec   : > { %v4262_v3 = vadd.f32 %v3007_v62, %v1572_v63  ;;  %v3009_v44 = vpop.f32.mrb[10].mxu0  ;;  %v1576_v9 = vpop.f32.mrb[11].mxu1 }
 0x1ed   : > { %v4264_v4 = vadd.f32 %v3009_v44, %v1574_v42  ;;  %v3011_v18 = vpop.f32.mrb[11].mxu0 }
 0x1ee   : > { %v4266_v50 = vadd.f32 %v3011_v18, %v1576_v9 }
 0x1f1   : > { %v1580_v1 = vpop.f32.mrb[12].mxu1 }
 0x1f2   : > { %v3015_v2 = vpop.f32.mrb[12].mxu0  ;;  %v1582_v47 = vpop.f32.mrb[13].mxu1 }
 0x1f3   : > { %v4268_v5 = vadd.f32 %v3015_v2, %v1580_v1  ;;  %v3017_v7 = vpop.f32.mrb[13].mxu0  ;;  %v1584_v46 = vpop.f32.mrb[14].mxu1 }
 0x1f4   : > { %v4270_v52 = vadd.f32 %v3017_v7, %v1582_v47  ;;  %v3019_v16 = vpop.f32.mrb[14].mxu0  ;;  %v1586_v14 = vpop.f32.mrb[15].mxu1 }
 0x1f5   : > { %v6109_v8 = vadd.f32 %v3019_v16, %v1584_v46  ;;  %v3021_v26 = vpop.f32.mrb[15].mxu0 }
 0x1f6   : > { %v6111_v56 = vadd.f32 %v3021_v26, %v1586_v14 }
 0x219   : > { %v3331_v10 = vpop.f32.mrb[16].mxu1 }
 0x21a   : > { %v3311_v36 = vpop.f32.mrb[0].mxu0  ;;  %v4261_v11 = vadd.f32 %v4260_v60, %v3331_v10  ;;  %v3333_v61 = vpop.f32.mrb[17].mxu1 }
 0x21b   : > { %v4252_v41 = vadd.f32 %v3311_v36, %v1550_v58  ;;  %v3313_v21 = vpop.f32.mrb[1].mxu0  ;;  %v4263_v13 = vadd.f32 %v4262_v3, %v3333_v61  ;;  %v3335_v40 = vpop.f32.mrb[18].mxu1 }
 0x21c   : > { %v4253_v51 = vadd.f32 %v3313_v21, %v1552_v30  ;;  %v3315_v6 = vpop.f32.mrb[2].mxu0  ;;  %v3434_v25 = vadd.f32 %v4261_v11, %v6116_v20  ;;  %v4265_v29 = vadd.f32 %v4264_v4, %v3335_v40  ;;  %v3337_v15 = vpop.f32.mrb[19].mxu1 }
 0x21d   : > { %v3426_v24 = vadd.f32 %v4252_v41, %v6116_v20  ;;  %v4254_v28 = vadd.f32 %v3315_v6, %v1554_v22  ;;  %v3317_v19 = vpop.f32.mrb[3].mxu0  ;;  %v3435_v34 = vadd.f32 %v4263_v13, %v6118_v57  ;;  %v4267_v54 = vadd.f32 %v4266_v50, %v3337_v15 }
 0x21e   : > { %v3427_v33 = vadd.f32 %v4253_v51, %v6118_v57  ;;  %v4255_v35 = vadd.f32 %v3317_v19, %v1556_v38  ;;  %v3450_v23 = vmax.f32 %v3434_v25, 0.0  ;;  %v3436_v31 = vadd.f32 %v4265_v29, %v6116_v20 }
 0x21f   : > { %v3442_v48 = vmax.f32 %v3426_v24, 0.0  ;;  %v3428_v43 = vadd.f32 %v4254_v28, %v6116_v20  ;;  %v3451_v58 = vmax.f32 %v3435_v34, 0.0  ;;  %v3437_v22 = vadd.f32 %v4267_v54, %v6118_v57 }
 0x220   : > { %v3443_v55 = vmax.f32 %v3427_v33, 0.0  ;;  %v3429_v30 = vadd.f32 %v4255_v35, %v6118_v57  ;;  %v3452_v0 = vmax.f32 %v3436_v31, 0.0 }
 0x221   : > { %v3444_v38 = vmax.f32 %v3428_v43, 0.0  ;;  %v4216_v60 = vpack.c.bf16 %v3451_v58, %v3450_v23  ;;  %v3453_v62 = vmax.f32 %v3437_v22, 0.0  ;;  %v3341_v42 = vpop.f32.mrb[20].mxu1 }
 0x222   : > { %v4212_v27 = vpack.c.bf16 %v3443_v55, %v3442_v48  ;;  %v3445_v63 = vmax.f32 %v3429_v30, 0.0  ;;  %v3321_v3 = vpop.f32.mrb[4].mxu0  ;;  %v4269_v4 = vadd.f32 %v4268_v5, %v3341_v42  ;;  %v3343_v18 = vpop.f32.mrb[21].mxu1 }
 0x223   : > { %v4256_v44 = vadd.f32 %v3321_v3, %v6101_v53  ;;  %v3323_v9 = vpop.f32.mrb[5].mxu0  ;;  %3526 = vst [vmem:[%s6132_s17 + $0x20] sm:$0xff] %v4216_v60  ;;  %v4217_v1 = vpack.c.bf16 %v3453_v62, %v3452_v0  ;;  %v4271_v47 = vadd.f32 %v4270_v52, %v3343_v18  ;;  %v3345_v46 = vpop.f32.mrb[22].mxu1 }
 0x224   : > { %3522 = vst [vmem:[%s6132_s17] sm:$0xff] %v4212_v27  ;;  %v4213_v50 = vpack.c.bf16 %v3445_v63, %v3444_v38  ;;  %v4257_v2 = vadd.f32 %v3323_v9, %v6103_v49  ;;  %v3325_v7 = vpop.f32.mrb[6].mxu0  ;;  %v3438_v14 = vadd.f32 %v4269_v4, %v6116_v20  ;;  %v4273_v5 = vadd.f32 %v6109_v8, %v3345_v46  ;;  %v3347_v37 = vpop.f32.mrb[23].mxu1 }
 0x225   : > { %v3430_v16 = vadd.f32 %v4256_v44, %v6116_v20  ;;  %v4258_v53 = vadd.f32 %v3325_v7, %v6105_v59  ;;  %v3327_v26 = vpop.f32.mrb[7].mxu0  ;;  %3527 = vst [vmem:[%s6132_s17 + $0x28] sm:$0xff] %v4217_v1  ;;  %v3439_v45 = vadd.f32 %v4271_v47, %v6118_v57  ;;  %v4275_v52 = vadd.f32 %v6111_v56, %v3347_v37 }
 0x226   : > { %3523 = vst [vmem:[%s6132_s17 + $0x8] sm:$0xff] %v4213_v50  ;;  %v3431_v32 = vadd.f32 %v4257_v2, %v6118_v57  ;;  %v4259_v49 = vadd.f32 %v3327_v26, %v6107_v12  ;;  %v3454_v39 = vmax.f32 %v3438_v14, 0.0  ;;  %v3440_v8 = vadd.f32 %v4273_v5, %v6116_v20 }
 0x227   : > { %v3446_v17 = vmax.f32 %v3430_v16, 0.0  ;;  %v3432_v59 = vadd.f32 %v4258_v53, %v6116_v20  ;;  %v3455_v10 = vmax.f32 %v3439_v45, 0.0  ;;  %v3441_v11 = vadd.f32 %v4275_v52, %v6118_v57 }
 0x228   : > { %v3447_v36 = vmax.f32 %v3431_v32, 0.0  ;;  %v3433_v41 = vadd.f32 %v4259_v49, %v6118_v57  ;;  %v3456_v12 = vmax.f32 %v3440_v8, 0.0 }
 0x229   : > { %v3448_v21 = vmax.f32 %v3432_v59, 0.0  ;;  %v4218_v51 = vpack.c.bf16 %v3455_v10, %v3454_v39  ;;  %v3457_v13 = vmax.f32 %v3441_v11, 0.0 }
 0x22a   : > { %v4214_v61 = vpack.c.bf16 %v3447_v36, %v3446_v17  ;;  %v3449_v56 = vmax.f32 %v3433_v41, 0.0 }
 0x22b   : > { %3528 = vst [vmem:[%s6132_s17 + $0x30] sm:$0xff] %v4218_v51  ;;  %v4219_v40 = vpack.c.bf16 %v3457_v13, %v3456_v12 }
 0x22c   : > { %3524 = vst [vmem:[%s6132_s17 + $0x10] sm:$0xff] %v4214_v61  ;;  %v4215_v6 = vpack.c.bf16 %v3449_v56, %v3448_v21 }
 0x22d   : > { %3529 = vst [vmem:[%s6132_s17 + $0x38] sm:$0xff] %v4219_v40 }
 0x22e   : > { %3525 = vst [vmem:[%s6132_s17 + $0x18] sm:$0xff] %v4215_v6 }
 0x22f PF: > { %s13_s12 = sadd.s32 1, %s4845_s12  }
 0x230   : > { %p10_p4 = scmp.ge.s32.totalorder %s13_s12, 4  }
 0x232   :  { %12 = sbr.rel (!%p10_p4) target bundleno = 1 (0x1), region = 70 }

// kernel: fpn_forward.12
= control target key start
LH: loop header
LB: loop body
LE: loop exit
PB: predicated region body
PF: predicated region fallthrough
CT: control target
= control target key end

     0   :  { %s1654_s15 = smov 0   ;;  %s2188_s0 = inlined_call_operand.vmem [shape: bf16[512,256], index: 0, kind: input, shape index: {}]   ;;  %s2189_s1 = inlined_call_operand.vmem [shape: bf16[256,256], index: 1, kind: input, shape index: {}]   ;;  %s2190_s2 = inlined_call_operand.vmem [shape: f32[1,256], index: 2, kind: input, shape index: {}]   ;;  %s2191_s3 = inlined_call_operand.vmem [shape: bf16[512,256], index: 3, kind: input, shape index: {}]   ;;  %s2192_s4 = inlined_call_operand.vmem [shape: bf16[512,256], index: 4, kind: output, shape index: {}]  }
   0x1 LB: > { %s1338_s16 = sadd.s32 4294967295, %s1627_s15   ;;  %p1342_p0 = scmp.ge.s32.totalorder %s1627_s15, 1  ;;  %s1627_s15 = sphi %s1654_s15, %s14_s15  }
   0x2   : > { %p176_p1 = scmp.lt.s32.totalorder %s1627_s15, 3 }
   0x4   : > { %p177_p2 = pnand %p1342_p0, %p176_p1 }
   0x5   : > { %v1525_v0 = vld [vmem:[%s2189_s1 + $0x4] ss:$8 sps:$4 sm:$0xff] (!%p177_p2)   ;;  %v1527_v1 = vld [vmem:[%s2189_s1] ss:$8 sps:$4 sm:$0xff] (!%p177_p2)   ;;  %v1528_v2 = vld [vmem:[%s2189_s1 + $0x14] ss:$8 sps:$4 sm:$0xff] (!%p177_p2)  }
   0x6   : > { %180 = sbr.rel (%p177_p2) target bundleno = 353 (0x161), region = 36  ;;  %627 = vmatprep.subr.bf16.mxu0 (!%p177_p2), %v1525_v0  ;;  %1485 = vmatprep.subr.bf16.mxu1 (!%p177_p2), %v1525_v0  ;;  %v1530_v3 = vld [vmem:[%s2189_s1 + $0x10] ss:$8 sps:$4 sm:$0xff] (!%p177_p2)   ;;  %v1531_v4 = vld [vmem:[%s2189_s1 + $0x24] ss:$8 sps:$4 sm:$0xff] (!%p177_p2)   ;;  %s1343_s27 = sshll.u32 (!%p177_p2), %s1338_s16, 5  ;;  %v297_v0 = vlaneseq (!%p177_p2) }
   0x7   : > { %628 = vmatpush1.bf16.msra.mxu0 (!%p177_p2), %v1527_v1  ;;  %1501 = vmatpush1.bf16.msra.mxu1 (!%p177_p2), %v1527_v1  ;;  %v1533_v5 = vld [vmem:[%s2189_s1 + $0x20] ss:$8 sps:$4 sm:$0xff] (!%p177_p2)   ;;  %v1534_v6 = vld [vmem:[%s2189_s1 + $0x34] ss:$8 sps:$4 sm:$0xff] (!%p177_p2)   ;;  %p211_p3 = scmp.lt.s32.totalorder (!%p177_p2), %s1343_s27, 63 }
   0x8   : > { %629 = vmatprep.subr.bf16.mxu0 (!%p177_p2), %v1528_v2  ;;  %1486 = vmatprep.subr.bf16.mxu1 (!%p177_p2), %v1528_v2  ;;  %v1536_v7 = vld [vmem:[%s2189_s1 + $0x30] ss:$8 sps:$4 sm:$0xff] (!%p177_p2)   ;;  %v1537_v8 = vld [vmem:[%s2189_s1 + $0x44] ss:$8 sps:$4 sm:$0xff] (!%p177_p2)   ;;  %v1539_v9 = vld [vmem:[%s2189_s1 + $0x40] ss:$8 sps:$4 sm:$0xff] (!%p177_p2)  }
   0x9   : > { %v1540_v10 = vld [vmem:[%s2189_s1 + $0x54] ss:$8 sps:$4 sm:$0xff] (!%p177_p2)   ;;  %v1542_v11 = vld [vmem:[%s2189_s1 + $0x50] ss:$8 sps:$4 sm:$0xff] (!%p177_p2)   ;;  %v1543_v12 = vld [vmem:[%s2189_s1 + $0x64] ss:$8 sps:$4 sm:$0xff] (!%p177_p2)  }
   0xa   : > { %v1545_v14 = vld [vmem:[%s2189_s1 + $0x60] ss:$8 sps:$4 sm:$0xff] (!%p177_p2)   ;;  %v1546_v16 = vld [vmem:[%s2189_s1 + $0x74] ss:$8 sps:$4 sm:$0xff] (!%p177_p2)   ;;  %v1548_v17 = vld [vmem:[%s2189_s1 + $0x70] ss:$8 sps:$4 sm:$0xff] (!%p177_p2)  }
   0xb   : > { %630 = vmatpush1.bf16.msra.mxu0 (!%p177_p2), %v1530_v3  ;;  %1502 = vmatpush1.bf16.msra.mxu1 (!%p177_p2), %v1530_v3  ;;  %v1549_v18 = vld [vmem:[%s2189_s1 + $0x84] ss:$8 sps:$4 sm:$0xff] (!%p177_p2)   ;;  %v1551_v19 = vld [vmem:[%s2189_s1 + $0x80] ss:$8 sps:$4 sm:$0xff] (!%p177_p2)   ;;  %v1552_v20 = vld [vmem:[%s2189_s1 + $0x94] ss:$8 sps:$4 sm:$0xff] (!%p177_p2)  }
   0xc   : > { %631 = vmatprep.subr.bf16.mxu0 (!%p177_p2), %v1531_v4  ;;  %1487 = vmatprep.subr.bf16.mxu1 (!%p177_p2), %v1531_v4  ;;  %v1554_v21 = vld [vmem:[%s2189_s1 + $0x90] ss:$8 sps:$4 sm:$0xff] (!%p177_p2)   ;;  %v1555_v22 = vld [vmem:[%s2189_s1 + $0xa4] ss:$8 sps:$4 sm:$0xff] (!%p177_p2)   ;;  %v1557_v23 = vld [vmem:[%s2189_s1 + $0xa0] ss:$8 sps:$4 sm:$0xff] (!%p177_p2)  }
   0xd   : > { %s2204_s27 = smov (!%p211_p3, %s1343_s27), 63  ;;  %v1558_v24 = vld [vmem:[%s2189_s1 + $0xb4] ss:$8 sps:$4 sm:$0xff]   ;;  %v1560_v25 = vld [vmem:[%s2189_s1 + $0xb0] ss:$8 sps:$4 sm:$0xff]   ;;  %v298_v1 = vshrl.u32 %v297_v0, 7 }
   0xe   : > { %s1695_s14 = sshll.u32 %s2204_s27, 3  ;;  %v1561_v26 = vld [vmem:[%s2189_s1 + $0xc4] ss:$8 sps:$4 sm:$0xff]   ;;  %v1563_v27 = vld [vmem:[%s2189_s1 + $0xc0] ss:$8 sps:$4 sm:$0xff]  }
   0xf   : > { %632 = vmatpush1.bf16.msra.mxu0 %v1533_v5  ;;  %1503 = vmatpush1.bf16.msra.mxu1 %v1533_v5  ;;  %s1704_s20 = scalar_lea.vmem %s2188_s0, %s1695_s14  ;;  %v1564_v28 = vld [vmem:[%s2189_s1 + $0xd4] ss:$8 sps:$4 sm:$0xff]   ;;  %v1566_v29 = vld [vmem:[%s2189_s1 + $0xd0] ss:$8 sps:$4 sm:$0xff]   ;;  %v1567_v30 = vld [vmem:[%s2189_s1 + $0xe4] ss:$8 sps:$4 sm:$0xff]   ;;  %s1802_s16 = scalar_lea.vmem %s2191_s3, %s1695_s14 }
  0x10   : > { %633 = vmatprep.subr.bf16.mxu0 %v1534_v6  ;;  %1488 = vmatprep.subr.bf16.mxu1 %v1534_v6  ;;  %v1575_v13 = vld [vmem:[%s1704_s20 + $0x4] ss:$8 sps:$4 sm:$0xff]   ;;  %v1569_v31 = vld [vmem:[%s2189_s1 + $0xe0] ss:$8 sps:$4 sm:$0xff]   ;;  %v1570_v32 = vld [vmem:[%s2189_s1 + $0xf4] ss:$8 sps:$4 sm:$0xff]   ;;  %s1927_s21 = scalar_lea.vmem %s2192_s4, %s1695_s14 }
  0x11   : > { %v1578_v15 = vld [vmem:[%s1704_s20 + $0x84] ss:$8 sps:$4 sm:$0xff]   ;;  %659 = vmatprep.mubr.bf16.mxu0 %v1575_v13  ;;  %v1572_v33 = vld [vmem:[%s2189_s1 + $0xf0] ss:$8 sps:$4 sm:$0xff]   ;;  %v1573_v34 = vld [vmem:[%s1704_s20] ss:$8 sps:$4 sm:$0xff]  }
  0x12   : > { %739 = vmatprep.mubr.bf16.mxu1 %v1578_v15  ;;  %v1576_v35 = vld [vmem:[%s1704_s20 + $0x80] ss:$8 sps:$4 sm:$0xff]   ;;  %v1579_v36 = vld [vmem:[%s1704_s20 + $0x14] ss:$8 sps:$4 sm:$0xff]   ;;  %v1583_v38 = vld [vmem:[%s1704_s20 + $0x10] ss:$8 sps:$4 sm:$0xff]  }
  0x13   : > { %634 = vmatpush1.bf16.msra.mxu0 %v1536_v7  ;;  %1504 = vmatpush1.bf16.msra.mxu1 %v1536_v7  ;;  %v1581_v37 = vld [vmem:[%s1704_s20 + $0x94] ss:$8 sps:$4 sm:$0xff]   ;;  %v1584_v39 = vld [vmem:[%s1704_s20 + $0x90] ss:$8 sps:$4 sm:$0xff]   ;;  %v1585_v40 = vld [vmem:[%s1704_s20 + $0x24] ss:$8 sps:$4 sm:$0xff]  }
  0x14   : > { %635 = vmatprep.subr.bf16.mxu0 %v1537_v8  ;;  %1489 = vmatprep.subr.bf16.mxu1 %v1537_v8  ;;  %v1587_v41 = vld [vmem:[%s1704_s20 + $0xa4] ss:$8 sps:$4 sm:$0xff]   ;;  %v1589_v42 = vld [vmem:[%s1704_s20 + $0x20] ss:$8 sps:$4 sm:$0xff]   ;;  %v1591_v44 = vld [vmem:[%s1704_s20 + $0x34] ss:$8 sps:$4 sm:$0xff]  }
  0x15   : > { %v1590_v43 = vld [vmem:[%s1704_s20 + $0xa0] ss:$8 sps:$4 sm:$0xff]   ;;  %v1593_v45 = vld [vmem:[%s1704_s20 + $0xb4] ss:$8 sps:$4 sm:$0xff]   ;;  %v1595_v46 = vld [vmem:[%s1704_s20 + $0x30] ss:$8 sps:$4 sm:$0xff]  }
  0x16   : > { %v1596_v47 = vld [vmem:[%s1704_s20 + $0xb0] ss:$8 sps:$4 sm:$0xff]   ;;  %v1597_v48 = vld [vmem:[%s1704_s20 + $0x44] ss:$8 sps:$4 sm:$0xff]   ;;  %v1601_v50 = vld [vmem:[%s1704_s20 + $0x40] ss:$8 sps:$4 sm:$0xff]  }
  0x17   : > { %636 = vmatpush1.bf16.msra.mxu0 %v1539_v9  ;;  %1505 = vmatpush1.bf16.msra.mxu1 %v1539_v9  ;;  %v1599_v49 = vld [vmem:[%s1704_s20 + $0xc4] ss:$8 sps:$4 sm:$0xff]   ;;  %v1602_v51 = vld [vmem:[%s1704_s20 + $0xc0] ss:$8 sps:$4 sm:$0xff]   ;;  %v1603_v52 = vld [vmem:[%s1704_s20 + $0x54] ss:$8 sps:$4 sm:$0xff]  }
  0x18   : > { %637 = vmatprep.subr.bf16.mxu0 %v1540_v10  ;;  %1490 = vmatprep.subr.bf16.mxu1 %v1540_v10  ;;  %v1605_v53 = vld [vmem:[%s1704_s20 + $0xd4] ss:$8 sps:$4 sm:$0xff]   ;;  %v1607_v54 = vld [vmem:[%s1704_s20 + $0x50] ss:$8 sps:$4 sm:$0xff]   ;;  %v1609_v56 = vld [vmem:[%s1704_s20 + $0x64] ss:$8 sps:$4 sm:$0xff]  }
  0x19   : > { %v1608_v55 = vld [vmem:[%s1704_s20 + $0xd0] ss:$8 sps:$4 sm:$0xff]   ;;  %v1611_v57 = vld [vmem:[%s1704_s20 + $0xe4] ss:$8 sps:$4 sm:$0xff]   ;;  %v1613_v58 = vld [vmem:[%s1704_s20 + $0x60] ss:$8 sps:$4 sm:$0xff]  }
  0x1a   : > { %v1614_v59 = vld [vmem:[%s1704_s20 + $0xe0] ss:$8 sps:$4 sm:$0xff]   ;;  %v1615_v60 = vld [vmem:[%s1704_s20 + $0x74] ss:$8 sps:$4 sm:$0xff]   ;;  %v1619_v62 = vld [vmem:[%s1704_s20 + $0x70] ss:$8 sps:$4 sm:$0xff]  }
  0x1b   : > { %638 = vmatpush1.bf16.msra.mxu0 %v1542_v11  ;;  %1506 = vmatpush1.bf16.msra.mxu1 %v1542_v11  ;;  %v1617_v61 = vld [vmem:[%s1704_s20 + $0xf4] ss:$8 sps:$4 sm:$0xff]   ;;  %v1620_v63 = vld [vmem:[%s1704_s20 + $0xf0] ss:$8 sps:$4 sm:$0xff]   ;;  %v299_v2 = vsub.s32 0, %v298_v1  ;;  %v303_v3 = vsub.s32 1, %v298_v1 }
  0x1c   : > { %639 = vmatprep.subr.bf16.mxu0 %v1543_v12  ;;  %1491 = vmatprep.subr.bf16.mxu1 %v1543_v12  ;;  %v295_v4 = vld [vmem:[%s2190_s2] sm:$0x3]  ;;  %v1814_v7 = vld [vmem:[%s1802_s16 + $0x8] sm:$0xff]  ;;  %v1824_v11 = vld [vmem:[%s1802_s16 + $0x10] sm:$0xff] }
  0x1d   : > { %v1808_v5 = vld [vmem:[%s1802_s16] sm:$0xff]  ;;  %v1817_v8 = vld [vmem:[%s1802_s16 + $0x88] sm:$0xff]  ;;  %v1819_v9 = vrot.slane %v295_v4, %v299_v2  ;;  %v1821_v10 = vrot.slane %v295_v4, %v303_v3  ;;  %v1827_v12 = vld [vmem:[%s1802_s16 + $0x90] sm:$0xff] }
  0x1e   : > { %v1811_v6 = vld [vmem:[%s1802_s16 + $0x80] sm:$0xff]  ;;  %v916_v13 = vunpack.c.l.bf16 %v1808_v5  ;;  %v917_v15 = vunpack.c.h.bf16 %v1808_v5 }
  0x1f   : > { %640 = vmatpush1.bf16.msra.mxu0 %v1545_v14  ;;  %1507 = vmatpush1.bf16.msra.mxu1 %v1545_v14  ;;  %v948_v14 = vunpack.c.l.bf16 %v1811_v6 }
  0x20   : > { %641 = vmatprep.subr.bf16.mxu0 %v1546_v16  ;;  %1492 = vmatprep.subr.bf16.mxu1 %v1546_v16  ;;  %v949_v16 = vunpack.c.h.bf16 %v1811_v6 }
  0x23   : > { %642 = vmatpush1.bf16.msra.mxu0 %v1548_v17  ;;  %1508 = vmatpush1.bf16.msra.mxu1 %v1548_v17  ;;  %v1834_v17 = vld [vmem:[%s1802_s16 + $0x18] sm:$0xff] }
  0x24   : > { %643 = vmatprep.subr.bf16.mxu0 %v1549_v18  ;;  %1493 = vmatprep.subr.bf16.mxu1 %v1549_v18  ;;  %v1837_v18 = vld [vmem:[%s1802_s16 + $0x98] sm:$0xff] }
  0x27   : > { %644 = vmatpush1.bf16.msra.mxu0 %v1551_v19  ;;  %1509 = vmatpush1.bf16.msra.mxu1 %v1551_v19  ;;  %v918_v19 = vunpack.c.l.bf16 %v1814_v7 }
  0x28   : > { %645 = vmatprep.subr.bf16.mxu0 %v1552_v20  ;;  %1494 = vmatprep.subr.bf16.mxu1 %v1552_v20  ;;  %v950_v20 = vunpack.c.l.bf16 %v1817_v8 }
  0x2b   : > { %646 = vmatpush1.bf16.msra.mxu0 %v1554_v21  ;;  %1510 = vmatpush1.bf16.msra.mxu1 %v1554_v21  ;;  %v919_v21 = vunpack.c.h.bf16 %v1814_v7 }
  0x2c   : > { %647 = vmatprep.subr.bf16.mxu0 %v1555_v22  ;;  %1495 = vmatprep.subr.bf16.mxu1 %v1555_v22  ;;  %v951_v22 = vunpack.c.h.bf16 %v1817_v8 }
  0x2f   : > { %648 = vmatpush1.bf16.msra.mxu0 %v1557_v23  ;;  %1511 = vmatpush1.bf16.msra.mxu1 %v1557_v23  ;;  %v1844_v23 = vld [vmem:[%s1802_s16 + $0x20] sm:$0xff] }
  0x30   : > { %649 = vmatprep.subr.bf16.mxu0 %v1558_v24  ;;  %1496 = vmatprep.subr.bf16.mxu1 %v1558_v24  ;;  %v1847_v24 = vld [vmem:[%s1802_s16 + $0xa0] sm:$0xff] }
  0x33   : > { %650 = vmatpush1.bf16.msra.mxu0 %v1560_v25  ;;  %1512 = vmatpush1.bf16.msra.mxu1 %v1560_v25  ;;  %v920_v25 = vunpack.c.l.bf16 %v1824_v11 }
  0x34   : > { %651 = vmatprep.subr.bf16.mxu0 %v1561_v26  ;;  %1497 = vmatprep.subr.bf16.mxu1 %v1561_v26  ;;  %v952_v26 = vunpack.c.l.bf16 %v1827_v12 }
  0x37   : > { %652 = vmatpush1.bf16.msra.mxu0 %v1563_v27  ;;  %1513 = vmatpush1.bf16.msra.mxu1 %v1563_v27  ;;  %v921_v27 = vunpack.c.h.bf16 %v1824_v11 }
  0x38   : > { %653 = vmatprep.subr.bf16.mxu0 %v1564_v28  ;;  %1498 = vmatprep.subr.bf16.mxu1 %v1564_v28  ;;  %v953_v28 = vunpack.c.h.bf16 %v1827_v12 }
  0x3b   : > { %654 = vmatpush1.bf16.msra.mxu0 %v1566_v29  ;;  %1514 = vmatpush1.bf16.msra.mxu1 %v1566_v29  ;;  %v1854_v29 = vld [vmem:[%s1802_s16 + $0x28] sm:$0xff] }
  0x3c   : > { %655 = vmatprep.subr.bf16.mxu0 %v1567_v30  ;;  %1499 = vmatprep.subr.bf16.mxu1 %v1567_v30  ;;  %v1857_v30 = vld [vmem:[%s1802_s16 + $0xa8] sm:$0xff] }
  0x3f   : > { %656 = vmatpush1.bf16.msra.mxu0 %v1569_v31  ;;  %1515 = vmatpush1.bf16.msra.mxu1 %v1569_v31  ;;  %v922_v31 = vunpack.c.l.bf16 %v1834_v17 }
  0x40   : > { %657 = vmatprep.subr.bf16.mxu0 %v1570_v32  ;;  %1500 = vmatprep.subr.bf16.mxu1 %v1570_v32  ;;  %v954_v32 = vunpack.c.l.bf16 %v1837_v18 }
  0x43   : > { %658 = vmatpush1.bf16.msra.mxu0 %v1572_v33  ;;  %1516 = vmatpush1.bf16.msra.mxu1 %v1572_v33  ;;  %v923_v33 = vunpack.c.h.bf16 %v1834_v17 }
  0x46   : > { %660 = vmatmul.mubr.bf16.vlgmr.msra.gmra.mrb[0].mxu0 %v1573_v34  ;;  %740 = vmatmul.mubr.bf16.vlgmr.msra.gmra.mrb[0].mxu1 %v1576_v35  ;;  %v955_v34 = vunpack.c.h.bf16 %v1837_v18  ;;  %v1864_v35 = vld [vmem:[%s1802_s16 + $0x30] sm:$0xff] }
  0x47   : > { %669 = vmatprep.mubr.bf16.mxu0 %v1579_v36  ;;  %749 = vmatprep.mubr.bf16.mxu1 %v1581_v37  ;;  %v1867_v36 = vld [vmem:[%s1802_s16 + $0xb0] sm:$0xff]  ;;  %v924_v37 = vunpack.c.l.bf16 %v1844_v23 }
  0x4e   : > { %670 = vmatmul.mubr.bf16.gmra.mrb[4].mxu0 %v1583_v38  ;;  %750 = vmatmul.mubr.bf16.gmra.mrb[4].mxu1 %v1584_v39  ;;  %v956_v38 = vunpack.c.l.bf16 %v1847_v24  ;;  %v925_v39 = vunpack.c.h.bf16 %v1844_v23 }
  0x4f   : > { %679 = vmatprep.mubr.bf16.mxu0 %v1585_v40  ;;  %759 = vmatprep.mubr.bf16.mxu1 %v1587_v41  ;;  %v957_v40 = vunpack.c.h.bf16 %v1847_v24  ;;  %v1874_v41 = vld [vmem:[%s1802_s16 + $0x38] sm:$0xff] }
  0x56   : > { %680 = vmatmul.mubr.bf16.gmra.mrb[8].mxu0 %v1589_v42  ;;  %760 = vmatmul.mubr.bf16.gmra.mrb[8].mxu1 %v1590_v43  ;;  %v1877_v42 = vld [vmem:[%s1802_s16 + $0xb8] sm:$0xff]  ;;  %v926_v43 = vunpack.c.l.bf16 %v1854_v29 }
  0x57   : > { %689 = vmatprep.mubr.bf16.mxu0 %v1591_v44  ;;  %769 = vmatprep.mubr.bf16.mxu1 %v1593_v45  ;;  %v958_v44 = vunpack.c.l.bf16 %v1857_v30  ;;  %v927_v45 = vunpack.c.h.bf16 %v1854_v29 }
  0x5e   : > { %690 = vmatmul.mubr.bf16.gmra.mrb[12].mxu0 %v1595_v46  ;;  %770 = vmatmul.mubr.bf16.gmra.mrb[12].mxu1 %v1596_v47  ;;  %v959_v46 = vunpack.c.h.bf16 %v1857_v30  ;;  %v1884_v47 = vld [vmem:[%s1802_s16 + $0x40] sm:$0xff] }
  0x5f   : > { %699 = vmatprep.mubr.bf16.mxu0 %v1597_v48  ;;  %779 = vmatprep.mubr.bf16.mxu1 %v1599_v49  ;;  %v1887_v48 = vld [vmem:[%s1802_s16 + $0xc0] sm:$0xff]  ;;  %v928_v49 = vunpack.c.l.bf16 %v1864_v35 }
  0x66   : > { %700 = vmatmul.mubr.bf16.gmra.mrb[16].mxu0 %v1601_v50  ;;  %780 = vmatmul.mubr.bf16.gmra.mrb[16].mxu1 %v1602_v51  ;;  %v1910_v50 = vld [vmem:[%s1802_s16 + $0x48] sm:$0xff] }
  0x67   : > { %709 = vmatprep.mubr.bf16.mxu0 %v1603_v52  ;;  %789 = vmatprep.mubr.bf16.mxu1 %v1605_v53  ;;  %v934_v5 = vunpack.c.l.bf16 %v1910_v50 }
  0x6e   : > { %710 = vmatmul.mubr.bf16.gmra.mrb[20].mxu0 %v1607_v54  ;;  %790 = vmatmul.mubr.bf16.gmra.mrb[20].mxu1 %v1608_v55 }
  0x6f   : > { %719 = vmatprep.mubr.bf16.mxu0 %v1609_v56  ;;  %799 = vmatprep.mubr.bf16.mxu1 %v1611_v57 }
  0x76   : > { %720 = vmatmul.mubr.bf16.gmra.mrb[24].mxu0 %v1613_v58  ;;  %800 = vmatmul.mubr.bf16.gmra.mrb[24].mxu1 %v1614_v59  ;;  %v1913_v58 = vld [vmem:[%s1802_s16 + $0xc8] sm:$0xff] }
  0x77   : > { %729 = vmatprep.mubr.bf16.mxu0 %v1615_v60  ;;  %809 = vmatprep.mubr.bf16.mxu1 %v1617_v61  ;;  %v966_v6 = vunpack.c.l.bf16 %v1913_v58 }
  0x7e   : > { %730 = vmatmul.mubr.bf16.gmra.mrb[28].mxu0 %v1619_v62  ;;  %810 = vmatmul.mubr.bf16.gmra.mrb[28].mxu1 %v1620_v63 }
 0x119   : > { %v661_v53 = vpop.f32.mrb[0].mxu0  ;;  %v741_v54 = vpop.f32.mrb[0].mxu1 }
 0x11a   : > { %v662_v59 = vadd.f32 %v661_v53, %v1819_v9  ;;  %v742_v60 = vadd.f32 %v741_v54, %v1819_v9  ;;  %v663_v61 = vpop.f32.mrb[1].mxu0  ;;  %v743_v62 = vpop.f32.mrb[1].mxu1  ;;  %v965_v53 = vunpack.c.h.bf16 %v1887_v48 }
 0x11b   : > { %v664_v1 = vadd.f32 %v663_v61, %v1821_v10  ;;  %v744_v2 = vadd.f32 %v743_v62, %v1821_v10  ;;  %v665_v3 = vpop.f32.mrb[2].mxu0  ;;  %v745_v4 = vpop.f32.mrb[2].mxu1 }
 0x11c   : > { %v820_v57 = vmax.f32 %v662_v59, 0.0  ;;  %v852_v54 = vmax.f32 %v742_v60, 0.0  ;;  %v666_v56 = vadd.f32 %v665_v3, %v1819_v9  ;;  %v746_v63 = vadd.f32 %v745_v4, %v1819_v9  ;;  %v667_v55 = vpop.f32.mrb[3].mxu0  ;;  %v747_v0 = vpop.f32.mrb[3].mxu1 }
 0x11d   : > { %v821_v61 = vmax.f32 %v664_v1, 0.0  ;;  %v853_v52 = vmax.f32 %v744_v2, 0.0  ;;  %v668_v62 = vadd.f32 %v667_v55, %v1821_v10  ;;  %v748_v51 = vadd.f32 %v747_v0, %v1821_v10 }
 0x11e   : > { %v980_v59 = vadd.f32 %v916_v13, %v820_v57  ;;  %v1012_v60 = vadd.f32 %v948_v14, %v852_v54  ;;  %v822_v3 = vmax.f32 %v666_v56, 0.0  ;;  %v854_v4 = vmax.f32 %v746_v63, 0.0 }
 0x11f   : > { %v981_v1 = vadd.f32 %v917_v15, %v821_v61  ;;  %v1013_v55 = vadd.f32 %v949_v16, %v853_v52  ;;  %v823_v2 = vmax.f32 %v668_v62, 0.0  ;;  %v855_v0 = vmax.f32 %v748_v51, 0.0 }
 0x120   : > { %v982_v13 = vadd.f32 %v918_v19, %v822_v3  ;;  %v1014_v14 = vadd.f32 %v950_v20, %v854_v4  ;;  %v935_v61 = vunpack.c.h.bf16 %v1910_v50  ;;  %v967_v62 = vunpack.c.h.bf16 %v1913_v58 }
 0x121   : > { %v1453_v15 = vpack.c.bf16 %v981_v1, %v980_v59  ;;  %v1469_v16 = vpack.c.bf16 %v1013_v55, %v1012_v60  ;;  %v983_v51 = vadd.f32 %v919_v21, %v823_v2  ;;  %v1015_v52 = vadd.f32 %v951_v22, %v855_v0  ;;  %v671_v56 = vpop.f32.mrb[4].mxu0  ;;  %v751_v57 = vpop.f32.mrb[4].mxu1 }
 0x122   : > { %v672_v19 = vadd.f32 %v671_v56, %v1819_v9  ;;  %v752_v63 = vadd.f32 %v751_v57, %v1819_v9  ;;  %v673_v20 = vpop.f32.mrb[5].mxu0  ;;  %v753_v54 = vpop.f32.mrb[5].mxu1 }
 0x123   : > { %1236 = vst [vmem:[%s1927_s21] sm:$0xff] %v1453_v15  ;;  %1252 = vst [vmem:[%s1927_s21 + $0x80] sm:$0xff] %v1469_v16  ;;  %v1454_v7 = vpack.c.bf16 %v983_v51, %v982_v13  ;;  %v1470_v21 = vpack.c.bf16 %v1015_v52, %v1014_v14  ;;  %v674_v8 = vadd.f32 %v673_v20, %v1821_v10  ;;  %v675_v59 = vpop.f32.mrb[6].mxu0  ;;  %v755_v60 = vpop.f32.mrb[6].mxu1  ;;  %v1954_v51 = vld [vmem:[%s1802_s16 + $0x50] sm:$0xff] }
 0x124   : > { %v754_v22 = vadd.f32 %v753_v54, %v1821_v10  ;;  %v824_v3 = vmax.f32 %v672_v19, 0.0  ;;  %v856_v4 = vmax.f32 %v752_v63, 0.0  ;;  %v676_v1 = vadd.f32 %v675_v59, %v1819_v9  ;;  %v677_v2 = vpop.f32.mrb[7].mxu0  ;;  %v757_v0 = vpop.f32.mrb[7].mxu1  ;;  %v1957_v52 = vld [vmem:[%s1802_s16 + $0xd0] sm:$0xff] }
 0x125   : > { %v756_v55 = vadd.f32 %v755_v60, %v1819_v9  ;;  %1237 = vst [vmem:[%s1927_s21 + $0x8] sm:$0xff] %v1454_v7  ;;  %1253 = vst [vmem:[%s1927_s21 + $0x88] sm:$0xff] %v1470_v21  ;;  %v825_v13 = vmax.f32 %v674_v8, 0.0  ;;  %v678_v15 = vadd.f32 %v677_v2, %v1821_v10  ;;  %v758_v16 = vadd.f32 %v757_v0, %v1821_v10 }
 0x126   : > { %v857_v14 = vmax.f32 %v754_v22, 0.0  ;;  %v984_v56 = vadd.f32 %v920_v25, %v824_v3  ;;  %v1016_v57 = vadd.f32 %v952_v26, %v856_v4  ;;  %v826_v19 = vmax.f32 %v676_v1, 0.0 }
 0x127   : > { %v858_v63 = vmax.f32 %v756_v55, 0.0  ;;  %v985_v20 = vadd.f32 %v921_v27, %v825_v13  ;;  %v827_v7 = vmax.f32 %v678_v15, 0.0  ;;  %v859_v21 = vmax.f32 %v758_v16, 0.0 }
 0x128   : > { %v1017_v54 = vadd.f32 %v953_v28, %v857_v14  ;;  %v986_v8 = vadd.f32 %v922_v31, %v826_v19  ;;  %v936_v26 = vunpack.c.l.bf16 %v1954_v51  ;;  %v968_v22 = vunpack.c.l.bf16 %v1957_v52 }
 0x129   : > { %v1018_v25 = vadd.f32 %v954_v32, %v858_v63  ;;  %v1455_v59 = vpack.c.bf16 %v985_v20, %v984_v56  ;;  %v987_v12 = vadd.f32 %v923_v33, %v827_v7  ;;  %v1019_v27 = vadd.f32 %v955_v34, %v859_v21  ;;  %v681_v28 = vpop.f32.mrb[8].mxu0  ;;  %v761_v60 = vpop.f32.mrb[8].mxu1  ;;  %v1992_v7 = vld [vmem:[%s1802_s16 + $0x58] sm:$0xff] }
 0x12a   : > { %v1471_v11 = vpack.c.bf16 %v1017_v54, %v1016_v57  ;;  %v682_v31 = vadd.f32 %v681_v28, %v1819_v9  ;;  %v762_v3 = vadd.f32 %v761_v60, %v1819_v9  ;;  %v683_v32 = vpop.f32.mrb[9].mxu0  ;;  %v763_v4 = vpop.f32.mrb[9].mxu1  ;;  %v937_v1 = vunpack.c.h.bf16 %v1954_v51  ;;  %v1995_v21 = vld [vmem:[%s1802_s16 + $0xd8] sm:$0xff] }
 0x12b   : > { %v969_v55 = vunpack.c.h.bf16 %v1957_v52  ;;  %1238 = vst [vmem:[%s1927_s21 + $0x10] sm:$0xff] %v1455_v59  ;;  %v1456_v17 = vpack.c.bf16 %v987_v12, %v986_v8  ;;  %v1472_v33 = vpack.c.bf16 %v1019_v27, %v1018_v25  ;;  %v684_v18 = vadd.f32 %v683_v32, %v1821_v10  ;;  %v685_v2 = vpop.f32.mrb[10].mxu0  ;;  %v765_v0 = vpop.f32.mrb[10].mxu1 }
 0x12c   : > { %1254 = vst [vmem:[%s1927_s21 + $0x90] sm:$0xff] %v1471_v11  ;;  %v764_v34 = vadd.f32 %v763_v4, %v1821_v10  ;;  %v828_v13 = vmax.f32 %v682_v31, 0.0  ;;  %v860_v14 = vmax.f32 %v762_v3, 0.0  ;;  %v686_v15 = vadd.f32 %v685_v2, %v1819_v9  ;;  %v687_v56 = vpop.f32.mrb[11].mxu0  ;;  %v767_v57 = vpop.f32.mrb[11].mxu1 }
 0x12d   : > { %v766_v16 = vadd.f32 %v765_v0, %v1819_v9  ;;  %1239 = vst [vmem:[%s1927_s21 + $0x18] sm:$0xff] %v1456_v17  ;;  %1255 = vst [vmem:[%s1927_s21 + $0x98] sm:$0xff] %v1472_v33  ;;  %v829_v19 = vmax.f32 %v684_v18, 0.0  ;;  %v688_v20 = vadd.f32 %v687_v56, %v1821_v10  ;;  %v768_v54 = vadd.f32 %v767_v57, %v1821_v10 }
 0x12e   : > { %v861_v63 = vmax.f32 %v764_v34, 0.0  ;;  %v988_v8 = vadd.f32 %v924_v37, %v828_v13  ;;  %v1020_v25 = vadd.f32 %v956_v38, %v860_v14  ;;  %v830_v59 = vmax.f32 %v686_v15, 0.0 }
 0x12f   : > { %v862_v11 = vmax.f32 %v766_v16, 0.0  ;;  %v989_v12 = vadd.f32 %v925_v39, %v829_v19  ;;  %v831_v28 = vmax.f32 %v688_v20, 0.0  ;;  %v863_v60 = vmax.f32 %v768_v54, 0.0 }
 0x130   : > { %v1021_v27 = vadd.f32 %v957_v40, %v861_v63  ;;  %v990_v31 = vadd.f32 %v926_v43, %v830_v59  ;;  %v938_v38 = vunpack.c.l.bf16 %v1992_v7  ;;  %v970_v3 = vunpack.c.l.bf16 %v1995_v21 }
 0x131   : > { %v1022_v37 = vadd.f32 %v958_v44, %v862_v11  ;;  %v1457_v32 = vpack.c.bf16 %v989_v12, %v988_v8  ;;  %v991_v24 = vadd.f32 %v927_v45, %v831_v28  ;;  %v1023_v39 = vadd.f32 %v959_v46, %v863_v60  ;;  %v691_v40 = vpop.f32.mrb[12].mxu0  ;;  %v771_v4 = vpop.f32.mrb[12].mxu1  ;;  %v2030_v8 = vld [vmem:[%s1802_s16 + $0x60] sm:$0xff] }
 0x132   : > { %v1473_v23 = vpack.c.bf16 %v1021_v27, %v1020_v25  ;;  %v692_v43 = vadd.f32 %v691_v40, %v1819_v9  ;;  %v772_v17 = vadd.f32 %v771_v4, %v1819_v9  ;;  %v693_v44 = vpop.f32.mrb[13].mxu0  ;;  %v773_v33 = vpop.f32.mrb[13].mxu1  ;;  %v939_v18 = vunpack.c.h.bf16 %v1992_v7  ;;  %v2033_v25 = vld [vmem:[%s1802_s16 + $0xe0] sm:$0xff] }
 0x133   : > { %v971_v34 = vunpack.c.h.bf16 %v1995_v21  ;;  %1240 = vst [vmem:[%s1927_s21 + $0x20] sm:$0xff] %v1457_v32  ;;  %v1458_v29 = vpack.c.bf16 %v991_v24, %v990_v31  ;;  %v1474_v45 = vpack.c.bf16 %v1023_v39, %v1022_v37  ;;  %v694_v30 = vadd.f32 %v693_v44, %v1821_v10  ;;  %v695_v2 = vpop.f32.mrb[14].mxu0  ;;  %v775_v0 = vpop.f32.mrb[14].mxu1 }
 0x134   : > { %1256 = vst [vmem:[%s1927_s21 + $0xa0] sm:$0xff] %v1473_v23  ;;  %v774_v46 = vadd.f32 %v773_v33, %v1821_v10  ;;  %v832_v13 = vmax.f32 %v692_v43, 0.0  ;;  %v864_v14 = vmax.f32 %v772_v17, 0.0  ;;  %v696_v15 = vadd.f32 %v695_v2, %v1819_v9  ;;  %v697_v56 = vpop.f32.mrb[15].mxu0  ;;  %v777_v57 = vpop.f32.mrb[15].mxu1 }
 0x135   : > { %v776_v16 = vadd.f32 %v775_v0, %v1819_v9  ;;  %1241 = vst [vmem:[%s1927_s21 + $0x28] sm:$0xff] %v1458_v29  ;;  %1257 = vst [vmem:[%s1927_s21 + $0xa8] sm:$0xff] %v1474_v45  ;;  %v833_v19 = vmax.f32 %v694_v30, 0.0  ;;  %v698_v20 = vadd.f32 %v697_v56, %v1821_v10  ;;  %v778_v54 = vadd.f32 %v777_v57, %v1821_v10 }
 0x136   : > { %v865_v63 = vmax.f32 %v774_v46, 0.0  ;;  %v992_v59 = vadd.f32 %v928_v49, %v832_v13  ;;  %v2193_v11 = vunpack.c.l.bf16 %v1867_v36  ;;  %v834_v27 = vmax.f32 %v696_v15, 0.0 }
 0x137   : > { %v866_v28 = vmax.f32 %v776_v16, 0.0  ;;  %v2194_v60 = vunpack.c.h.bf16 %v1864_v35  ;;  %v2195_v37 = vunpack.c.h.bf16 %v1867_v36  ;;  %v835_v23 = vmax.f32 %v698_v20, 0.0 }
 0x138   : > { %v1024_v12 = vadd.f32 %v2193_v11, %v864_v14  ;;  %v867_v24 = vmax.f32 %v778_v54, 0.0  ;;  %v2196_v39 = vunpack.c.l.bf16 %v1874_v41  ;;  %v2197_v4 = vunpack.c.l.bf16 %v1877_v42 }
 0x139   : > { %v993_v31 = vadd.f32 %v2194_v60, %v833_v19  ;;  %v1025_v32 = vadd.f32 %v2195_v37, %v865_v63  ;;  %v940_v43 = vunpack.c.l.bf16 %v2030_v8  ;;  %v972_v17 = vunpack.c.l.bf16 %v2033_v25  ;;  %v701_v30 = vpop.f32.mrb[16].mxu0  ;;  %v781_v46 = vpop.f32.mrb[16].mxu1 }
 0x13a   : > { %v994_v40 = vadd.f32 %v2196_v39, %v834_v27  ;;  %v1026_v49 = vadd.f32 %v2197_v4, %v866_v28  ;;  %v2198_v33 = vunpack.c.h.bf16 %v1874_v41  ;;  %v2199_v29 = vunpack.c.h.bf16 %v1877_v42  ;;  %v703_v13 = vpop.f32.mrb[17].mxu0  ;;  %v783_v14 = vpop.f32.mrb[17].mxu1 }
 0x13b   : > { %v1459_v44 = vpack.c.bf16 %v993_v31, %v992_v59  ;;  %v1475_v35 = vpack.c.bf16 %v1025_v32, %v1024_v12  ;;  %v702_v2 = vadd.f32 %v701_v30, %v1819_v9  ;;  %v782_v0 = vadd.f32 %v781_v46, %v1819_v9  ;;  %v705_v19 = vpop.f32.mrb[18].mxu0  ;;  %v785_v63 = vpop.f32.mrb[18].mxu1  ;;  %v2068_v32 = vld [vmem:[%s1802_s16 + $0x68] sm:$0xff] }
 0x13c   : > { %v995_v36 = vadd.f32 %v2198_v33, %v835_v23  ;;  %v1027_v45 = vadd.f32 %v2199_v29, %v867_v24  ;;  %v941_v15 = vunpack.c.h.bf16 %v2030_v8  ;;  %v973_v16 = vunpack.c.h.bf16 %v2033_v25  ;;  %v707_v12 = vpop.f32.mrb[19].mxu0  ;;  %v787_v27 = vpop.f32.mrb[19].mxu1  ;;  %v2071_v23 = vld [vmem:[%s1802_s16 + $0xe8] sm:$0xff] }
 0x13d   : > { %1242 = vst [vmem:[%s1927_s21 + $0x30] sm:$0xff] %v1459_v44  ;;  %1258 = vst [vmem:[%s1927_s21 + $0xb0] sm:$0xff] %v1475_v35  ;;  %v704_v42 = vadd.f32 %v703_v13, %v1821_v10  ;;  %v784_v57 = vadd.f32 %v783_v14, %v1821_v10  ;;  %v836_v20 = vmax.f32 %v702_v2, 0.0  ;;  %v868_v54 = vmax.f32 %v782_v0, 0.0 }
 0x13e   : > { %v1460_v41 = vpack.c.bf16 %v995_v36, %v994_v40  ;;  %v1476_v56 = vpack.c.bf16 %v1027_v45, %v1026_v49  ;;  %v706_v59 = vadd.f32 %v705_v19, %v1819_v9  ;;  %v786_v11 = vadd.f32 %v785_v63, %v1819_v9 }
 0x13f   : > { %v837_v28 = vmax.f32 %v704_v42, 0.0  ;;  %v869_v60 = vmax.f32 %v784_v57, 0.0  ;;  %v708_v31 = vadd.f32 %v707_v12, %v1821_v10  ;;  %v788_v37 = vadd.f32 %v787_v27, %v1821_v10 }
 0x140   : > { %1243 = vst [vmem:[%s1927_s21 + $0x38] sm:$0xff] %v1460_v41  ;;  %1259 = vst [vmem:[%s1927_s21 + $0xb8] sm:$0xff] %v1476_v56  ;;  %v2200_v24 = vunpack.c.l.bf16 %v1884_v47  ;;  %v2201_v40 = vunpack.c.l.bf16 %v1887_v48  ;;  %v838_v49 = vmax.f32 %v706_v59, 0.0  ;;  %v870_v44 = vmax.f32 %v786_v11, 0.0 }
 0x141   : > { %v2202_v35 = vunpack.c.h.bf16 %v1884_v47  ;;  %v1029_v36 = vadd.f32 %v965_v53, %v869_v60  ;;  %v839_v29 = vmax.f32 %v708_v31, 0.0  ;;  %v871_v45 = vmax.f32 %v788_v37, 0.0  ;;  %v711_v14 = vpop.f32.mrb[20].mxu0  ;;  %v791_v41 = vpop.f32.mrb[20].mxu1 }
 0x142   : > { %v996_v39 = vadd.f32 %v2200_v24, %v836_v20  ;;  %v1028_v4 = vadd.f32 %v2201_v40, %v868_v54  ;;  %v998_v30 = vadd.f32 %v934_v5, %v838_v49  ;;  %v1030_v46 = vadd.f32 %v966_v6, %v870_v44  ;;  %v713_v6 = vpop.f32.mrb[21].mxu0  ;;  %v793_v42 = vpop.f32.mrb[21].mxu1  ;;  %v2109_v40 = vld [vmem:[%s1802_s16 + $0xf0] sm:$0xff] }
 0x143   : > { %v997_v33 = vadd.f32 %v2202_v35, %v837_v28  ;;  %v942_v2 = vunpack.c.l.bf16 %v2068_v32  ;;  %v974_v0 = vunpack.c.l.bf16 %v2071_v23  ;;  %v999_v48 = vadd.f32 %v935_v61, %v839_v29  ;;  %v715_v63 = vpop.f32.mrb[22].mxu0  ;;  %v795_v20 = vpop.f32.mrb[22].mxu1 }
 0x144   : > { %v1477_v47 = vpack.c.bf16 %v1029_v36, %v1028_v4  ;;  %v1031_v53 = vadd.f32 %v967_v62, %v871_v45  ;;  %v712_v5 = vadd.f32 %v711_v14, %v1819_v9  ;;  %v792_v56 = vadd.f32 %v791_v41, %v1819_v9  ;;  %v717_v27 = vpop.f32.mrb[23].mxu0  ;;  %v797_v28 = vpop.f32.mrb[23].mxu1 }
 0x145   : > { %v1461_v13 = vpack.c.bf16 %v997_v33, %v996_v39  ;;  %v943_v57 = vunpack.c.h.bf16 %v2068_v32  ;;  %v975_v19 = vunpack.c.h.bf16 %v2071_v23  ;;  %v1462_v50 = vpack.c.bf16 %v999_v48, %v998_v30  ;;  %v2106_v39 = vld [vmem:[%s1802_s16 + $0x70] sm:$0xff] }
 0x146   : > { %1260 = vst [vmem:[%s1927_s21 + $0xc0] sm:$0xff] %v1477_v47  ;;  %v1478_v61 = vpack.c.bf16 %v1031_v53, %v1030_v46  ;;  %v714_v58 = vadd.f32 %v713_v6, %v1821_v10  ;;  %v794_v62 = vadd.f32 %v793_v42, %v1821_v10  ;;  %v840_v54 = vmax.f32 %v712_v5, 0.0 }
 0x147   : > { %1244 = vst [vmem:[%s1927_s21 + $0x40] sm:$0xff] %v1461_v13  ;;  %v872_v59 = vmax.f32 %v792_v56, 0.0  ;;  %v716_v11 = vadd.f32 %v715_v63, %v1819_v9  ;;  %v796_v12 = vadd.f32 %v795_v20, %v1819_v9  ;;  %1245 = vst [vmem:[%s1927_s21 + $0x48] sm:$0xff] %v1462_v50  ;;  %v718_v37 = vadd.f32 %v717_v27, %v1821_v10 }
 0x148   : > { %1261 = vst [vmem:[%s1927_s21 + $0xc8] sm:$0xff] %v1478_v61  ;;  %v841_v60 = vmax.f32 %v714_v58, 0.0  ;;  %v873_v31 = vmax.f32 %v794_v62, 0.0  ;;  %v798_v24 = vadd.f32 %v797_v28, %v1821_v10  ;;  %v1000_v4 = vadd.f32 %v936_v26, %v840_v54 }
 0x149   : > { %v1032_v49 = vadd.f32 %v968_v22, %v872_v59  ;;  %v842_v44 = vmax.f32 %v716_v11, 0.0  ;;  %v874_v35 = vmax.f32 %v796_v12, 0.0  ;;  %v843_v29 = vmax.f32 %v718_v37, 0.0  ;;  %v801_v47 = vpop.f32.mrb[24].mxu1  ;;  %v899_v11 = vld [vmem:[%s1802_s16 + $0x78] sm:$0xff] }
 0x14a   : > { %v1001_v33 = vadd.f32 %v937_v1, %v841_v60  ;;  %v1033_v36 = vadd.f32 %v969_v55, %v873_v31  ;;  %v875_v45 = vmax.f32 %v798_v24, 0.0  ;;  %v944_v22 = vunpack.c.l.bf16 %v2106_v39  ;;  %v721_v55 = vpop.f32.mrb[24].mxu0  ;;  %v803_v53 = vpop.f32.mrb[25].mxu1  ;;  %v915_v12 = vld [vmem:[%s1802_s16 + $0xf8] sm:$0xff] }
 0x14b   : > { %v1002_v30 = vadd.f32 %v938_v38, %v842_v44  ;;  %v1034_v26 = vadd.f32 %v970_v3, %v874_v35  ;;  %v976_v46 = vunpack.c.l.bf16 %v2109_v40  ;;  %v1003_v52 = vadd.f32 %v939_v18, %v843_v29  ;;  %v723_v3 = vpop.f32.mrb[25].mxu0  ;;  %v805_v56 = vpop.f32.mrb[26].mxu1 }
 0x14c   : > { %v1463_v13 = vpack.c.bf16 %v1001_v33, %v1000_v4  ;;  %v1479_v51 = vpack.c.bf16 %v1033_v36, %v1032_v49  ;;  %v1035_v1 = vadd.f32 %v971_v34, %v875_v45  ;;  %v722_v38 = vadd.f32 %v721_v55, %v1819_v9  ;;  %v725_v5 = vpop.f32.mrb[26].mxu0  ;;  %v807_v62 = vpop.f32.mrb[27].mxu1 }
 0x14d   : > { %v802_v48 = vadd.f32 %v801_v47, %v1819_v9  ;;  %v945_v14 = vunpack.c.h.bf16 %v2106_v39  ;;  %v977_v41 = vunpack.c.h.bf16 %v2109_v40  ;;  %v1464_v7 = vpack.c.bf16 %v1003_v52, %v1002_v30  ;;  %v727_v58 = vpop.f32.mrb[27].mxu0 }
 0x14e   : > { %1246 = vst [vmem:[%s1927_s21 + $0x50] sm:$0xff] %v1463_v13  ;;  %1262 = vst [vmem:[%s1927_s21 + $0xd0] sm:$0xff] %v1479_v51  ;;  %v1480_v18 = vpack.c.bf16 %v1035_v1, %v1034_v26  ;;  %v724_v21 = vadd.f32 %v723_v3, %v1821_v10  ;;  %v804_v34 = vadd.f32 %v803_v53, %v1821_v10  ;;  %v844_v6 = vmax.f32 %v722_v38, 0.0 }
 0x14f   : > { %v876_v42 = vmax.f32 %v802_v48, 0.0  ;;  %v726_v50 = vadd.f32 %v725_v5, %v1819_v9  ;;  %v806_v61 = vadd.f32 %v805_v56, %v1819_v9  ;;  %1247 = vst [vmem:[%s1927_s21 + $0x58] sm:$0xff] %v1464_v7  ;;  %v728_v54 = vadd.f32 %v727_v58, %v1821_v10 }
 0x150   : > { %1263 = vst [vmem:[%s1927_s21 + $0xd8] sm:$0xff] %v1480_v18  ;;  %v845_v63 = vmax.f32 %v724_v21, 0.0  ;;  %v877_v20 = vmax.f32 %v804_v34, 0.0  ;;  %v808_v59 = vadd.f32 %v807_v62, %v1821_v10  ;;  %v1004_v27 = vadd.f32 %v940_v43, %v844_v6 }
 0x151   : > { %v1036_v28 = vadd.f32 %v972_v17, %v876_v42  ;;  %v846_v60 = vmax.f32 %v726_v50, 0.0  ;;  %v878_v31 = vmax.f32 %v806_v61, 0.0  ;;  %v847_v4 = vmax.f32 %v728_v54, 0.0 }
 0x152   : > { %v1005_v37 = vadd.f32 %v941_v15, %v845_v63  ;;  %v1037_v24 = vadd.f32 %v973_v16, %v877_v20  ;;  %v879_v49 = vmax.f32 %v808_v59, 0.0  ;;  %v946_v35 = vunpack.c.l.bf16 %v899_v11  ;;  %v731_v15 = vpop.f32.mrb[28].mxu0  ;;  %v811_v16 = vpop.f32.mrb[28].mxu1 }
 0x153   : > { %v1006_v44 = vadd.f32 %v942_v2, %v846_v60  ;;  %v1038_v43 = vadd.f32 %v974_v0, %v878_v31  ;;  %v978_v17 = vunpack.c.l.bf16 %v915_v12  ;;  %v1007_v8 = vadd.f32 %v943_v57, %v847_v4  ;;  %v733_v45 = vpop.f32.mrb[29].mxu0  ;;  %v813_v30 = vpop.f32.mrb[29].mxu1 }
 0x154   : > { %v1465_v33 = vpack.c.bf16 %v1005_v37, %v1004_v27  ;;  %v1481_v36 = vpack.c.bf16 %v1037_v24, %v1036_v28  ;;  %v1039_v25 = vadd.f32 %v975_v19, %v879_v49  ;;  %v732_v29 = vadd.f32 %v731_v15, %v1819_v9  ;;  %v735_v19 = vpop.f32.mrb[30].mxu0  ;;  %v815_v51 = vpop.f32.mrb[30].mxu1 }
 0x155   : > { %v812_v2 = vadd.f32 %v811_v16, %v1819_v9  ;;  %v947_v0 = vunpack.c.h.bf16 %v899_v11  ;;  %v979_v26 = vunpack.c.h.bf16 %v915_v12  ;;  %v1466_v13 = vpack.c.bf16 %v1007_v8, %v1006_v44  ;;  %v737_v38 = vpop.f32.mrb[31].mxu0  ;;  %v817_v48 = vpop.f32.mrb[31].mxu1 }
 0x156   : > { %1248 = vst [vmem:[%s1927_s21 + $0x60] sm:$0xff] %v1465_v33  ;;  %1264 = vst [vmem:[%s1927_s21 + $0xe0] sm:$0xff] %v1481_v36  ;;  %v1482_v32 = vpack.c.bf16 %v1039_v25, %v1038_v43  ;;  %v734_v57 = vadd.f32 %v733_v45, %v1821_v10  ;;  %v814_v23 = vadd.f32 %v813_v30, %v1821_v10  ;;  %v848_v52 = vmax.f32 %v732_v29, 0.0 }
 0x157   : > { %v880_v1 = vmax.f32 %v812_v2, 0.0  ;;  %v736_v55 = vadd.f32 %v735_v19, %v1819_v9  ;;  %v816_v47 = vadd.f32 %v815_v51, %v1819_v9  ;;  %1249 = vst [vmem:[%s1927_s21 + $0x68] sm:$0xff] %v1466_v13  ;;  %v738_v7 = vadd.f32 %v737_v38, %v1821_v10 }
 0x158   : > { %1265 = vst [vmem:[%s1927_s21 + $0xe8] sm:$0xff] %v1482_v32  ;;  %v849_v3 = vmax.f32 %v734_v57, 0.0  ;;  %v881_v53 = vmax.f32 %v814_v23, 0.0  ;;  %v818_v18 = vadd.f32 %v817_v48, %v1821_v10  ;;  %v1008_v21 = vadd.f32 %v944_v22, %v848_v52 }
 0x159   : > { %v1040_v34 = vadd.f32 %v976_v46, %v880_v1  ;;  %v850_v5 = vmax.f32 %v736_v55, 0.0  ;;  %v882_v9 = vmax.f32 %v816_v47, 0.0  ;;  %v851_v42 = vmax.f32 %v738_v7, 0.0 }
 0x15a   : > { %v1009_v56 = vadd.f32 %v945_v14, %v849_v3  ;;  %v1041_v6 = vadd.f32 %v977_v41, %v881_v53  ;;  %v883_v50 = vmax.f32 %v818_v18, 0.0 }
 0x15b   : > { %v1010_v10 = vadd.f32 %v946_v35, %v850_v5  ;;  %v1042_v61 = vadd.f32 %v978_v17, %v882_v9  ;;  %v1011_v22 = vadd.f32 %v947_v0, %v851_v42 }
 0x15c   : > { %v1467_v58 = vpack.c.bf16 %v1009_v56, %v1008_v21  ;;  %v1483_v62 = vpack.c.bf16 %v1041_v6, %v1040_v34  ;;  %v1043_v63 = vadd.f32 %v979_v26, %v883_v50 }
 0x15d   : > { %v1468_v46 = vpack.c.bf16 %v1011_v22, %v1010_v10 }
 0x15e   : > { %1250 = vst [vmem:[%s1927_s21 + $0x70] sm:$0xff] %v1467_v58  ;;  %1266 = vst [vmem:[%s1927_s21 + $0xf0] sm:$0xff] %v1483_v62  ;;  %v1484_v20 = vpack.c.bf16 %v1043_v63, %v1042_v61 }
 0x15f   : > { %1251 = vst [vmem:[%s1927_s21 + $0x78] sm:$0xff] %v1468_v46 }
 0x160   : > { %1267 = vst [vmem:[%s1927_s21 + $0xf8] sm:$0xff] %v1484_v20 }
 0x161 PF: > { %s14_s15 = sadd.s32 1, %s1627_s15  }
 0x162   : > { %p11_p4 = scmp.ge.s32.totalorder %s14_s15, 4  }
 0x164   :  { %13 = sbr.rel (!%p11_p4) target bundleno = 1 (0x1), region = 69 }

// kernel: fpn_forward.13
= control target key start
LH: loop header
LB: loop body
LE: loop exit
PB: predicated region body
PF: predicated region fallthrough
CT: control target
= control target key end

     0   :  { %s6120_s12 = smov 0   ;;  %s7635_s0 = inlined_call_operand.vmem [shape: bf16[4,10,18,256], index: 0, kind: input, shape index: {}]   ;;  %s7636_s1 = inlined_call_operand.vmem [shape: bf16[3,3,256,256], index: 1, kind: input, shape index: {}]   ;;  %s7637_s2 = inlined_call_operand.vmem [shape: f32[1,256], index: 2, kind: input, shape index: {}]   ;;  %s7638_s3 = inlined_call_operand.vmem [shape: bf16[4,8,16,256], index: 3, kind: output, shape index: {}]  }
   0x1 LB: > { %s4685_s13 = sadd.s32 4294967295, %s6098_s12   ;;  %p4689_p0 = scmp.ge.s32.totalorder %s6098_s12, 1  ;;  %s6098_s12 = sphi %s6120_s12, %s13_s12  }
   0x2   : > { %p137_p1 = scmp.lt.s32.totalorder %s6098_s12, 5 }
   0x4   : > { %p138_p2 = pnand %p4689_p0, %p137_p1 }
   0x5   : > { %v5639_v0 = vld [vmem:[%s7636_s1 + $0x4] ss:$8 sps:$4 sm:$0xff] (!%p138_p2)   ;;  %v5643_v2 = vld [vmem:[%s7636_s1] ss:$8 sps:$4 sm:$0xff] (!%p138_p2)   ;;  %v5645_v4 = vld [vmem:[%s7636_s1 + $0x14] ss:$8 sps:$4 sm:$0xff] (!%p138_p2)  }
   0x6   : > { %141 = sbr.rel (%p138_p2) target bundleno = 575 (0x23f), region = 32  ;;  %v5641_v1 = vld [vmem:[%s7636_s1 + $0x404] ss:$8 sps:$4 sm:$0xff] (!%p138_p2)   ;;  %463 = vmatprep.subr.bf16.mxu1 (!%p138_p2), %v5639_v0  ;;  %v5644_v3 = vld [vmem:[%s7636_s1 + $0x400] ss:$8 sps:$4 sm:$0xff] (!%p138_p2)   ;;  %p161_p3 = scmp.lt.s32.totalorder (!%p138_p2), %s4685_s13, 3 }
   0x7   : > { %2348 = vmatprep.subr.bf16.mxu0 (!%p138_p2), %v5641_v1  ;;  %464 = vmatpush1.bf16.msra.mxu1 (!%p138_p2), %v5643_v2  ;;  %v5647_v5 = vld [vmem:[%s7636_s1 + $0x414] ss:$8 sps:$4 sm:$0xff] (!%p138_p2)   ;;  %v5649_v6 = vld [vmem:[%s7636_s1 + $0x10] ss:$8 sps:$4 sm:$0xff] (!%p138_p2)   ;;  %v5651_v8 = vld [vmem:[%s7636_s1 + $0x24] ss:$8 sps:$4 sm:$0xff] (!%p138_p2)  }
   0x8   : > { %2349 = vmatpush1.bf16.msra.mxu0 (!%p138_p2), %v5644_v3  ;;  %465 = vmatprep.subr.bf16.mxu1 (!%p138_p2), %v5645_v4  ;;  %v5650_v7 = vld [vmem:[%s7636_s1 + $0x410] ss:$8 sps:$4 sm:$0xff] (!%p138_p2)   ;;  %v5653_v9 = vld [vmem:[%s7636_s1 + $0x424] ss:$8 sps:$4 sm:$0xff] (!%p138_p2)   ;;  %v5655_v10 = vld [vmem:[%s7636_s1 + $0x20] ss:$8 sps:$4 sm:$0xff] (!%p138_p2)  }
   0x9   : > { %2350 = vmatprep.subr.bf16.mxu0 (!%p138_p2), %v5647_v5  ;;  %v5656_v11 = vld [vmem:[%s7636_s1 + $0x420] ss:$8 sps:$4 sm:$0xff] (!%p138_p2)   ;;  %v5657_v12 = vld [vmem:[%s7636_s1 + $0x34] ss:$8 sps:$4 sm:$0xff] (!%p138_p2)   ;;  %v5661_v14 = vld [vmem:[%s7636_s1 + $0x30] ss:$8 sps:$4 sm:$0xff] (!%p138_p2)  }
   0xa   : > { %v5659_v13 = vld [vmem:[%s7636_s1 + $0x434] ss:$8 sps:$4 sm:$0xff] (!%p138_p2)   ;;  %v5662_v15 = vld [vmem:[%s7636_s1 + $0x430] ss:$8 sps:$4 sm:$0xff] (!%p138_p2)   ;;  %v5663_v16 = vld [vmem:[%s7636_s1 + $0x44] ss:$8 sps:$4 sm:$0xff] (!%p138_p2)  }
   0xb   : > { %466 = vmatpush1.bf16.msra.mxu1 (!%p138_p2), %v5649_v6  ;;  %v5665_v17 = vld [vmem:[%s7636_s1 + $0x444] ss:$8 sps:$4 sm:$0xff] (!%p138_p2)   ;;  %v5667_v18 = vld [vmem:[%s7636_s1 + $0x40] ss:$8 sps:$4 sm:$0xff] (!%p138_p2)   ;;  %v5669_v20 = vld [vmem:[%s7636_s1 + $0x54] ss:$8 sps:$4 sm:$0xff] (!%p138_p2)  }
   0xc   : > { %2351 = vmatpush1.bf16.msra.mxu0 (!%p138_p2), %v5650_v7  ;;  %467 = vmatprep.subr.bf16.mxu1 (!%p138_p2), %v5651_v8  ;;  %v5668_v19 = vld [vmem:[%s7636_s1 + $0x440] ss:$8 sps:$4 sm:$0xff] (!%p138_p2)   ;;  %v5671_v21 = vld [vmem:[%s7636_s1 + $0x454] ss:$8 sps:$4 sm:$0xff] (!%p138_p2)   ;;  %v5673_v22 = vld [vmem:[%s7636_s1 + $0x50] ss:$8 sps:$4 sm:$0xff] (!%p138_p2)  }
   0xd   : > { %2352 = vmatprep.subr.bf16.mxu0 %v5653_v9  ;;  %v5674_v23 = vld [vmem:[%s7636_s1 + $0x450] ss:$8 sps:$4 sm:$0xff]   ;;  %v5675_v24 = vld [vmem:[%s7636_s1 + $0x64] ss:$8 sps:$4 sm:$0xff]   ;;  %v5679_v26 = vld [vmem:[%s7636_s1 + $0x60] ss:$8 sps:$4 sm:$0xff]  }
   0xe   : > { %v5677_v25 = vld [vmem:[%s7636_s1 + $0x464] ss:$8 sps:$4 sm:$0xff]   ;;  %v5680_v27 = vld [vmem:[%s7636_s1 + $0x460] ss:$8 sps:$4 sm:$0xff]   ;;  %v5681_v28 = vld [vmem:[%s7636_s1 + $0x74] ss:$8 sps:$4 sm:$0xff]  }
   0xf   : > { %468 = vmatpush1.bf16.msra.mxu1 %v5655_v10  ;;  %v5683_v29 = vld [vmem:[%s7636_s1 + $0x474] ss:$8 sps:$4 sm:$0xff]   ;;  %v5685_v30 = vld [vmem:[%s7636_s1 + $0x70] ss:$8 sps:$4 sm:$0xff]   ;;  %v5687_v32 = vld [vmem:[%s7636_s1 + $0x84] ss:$8 sps:$4 sm:$0xff]  }
  0x10   : > { %2353 = vmatpush1.bf16.msra.mxu0 %v5656_v11  ;;  %469 = vmatprep.subr.bf16.mxu1 %v5657_v12  ;;  %v5686_v31 = vld [vmem:[%s7636_s1 + $0x470] ss:$8 sps:$4 sm:$0xff]   ;;  %v5689_v33 = vld [vmem:[%s7636_s1 + $0x484] ss:$8 sps:$4 sm:$0xff]   ;;  %v5691_v34 = vld [vmem:[%s7636_s1 + $0x80] ss:$8 sps:$4 sm:$0xff]  }
  0x11   : > { %2354 = vmatprep.subr.bf16.mxu0 %v5659_v13  ;;  %v5692_v35 = vld [vmem:[%s7636_s1 + $0x480] ss:$8 sps:$4 sm:$0xff]   ;;  %v5693_v36 = vld [vmem:[%s7636_s1 + $0x94] ss:$8 sps:$4 sm:$0xff]   ;;  %s7644_s13 = smov (!%p161_p3, %s4685_s13), 3  ;;  %vm3045_vm3 = vcmask 1042432  }
  0x12   : > { %v5695_v37 = vld [vmem:[%s7636_s1 + $0x494] ss:$8 sps:$4 sm:$0xff]   ;;  %v5697_v38 = vld [vmem:[%s7636_s1 + $0x90] ss:$8 sps:$4 sm:$0xff]   ;;  %v5699_v40 = vld [vmem:[%s7636_s1 + $0xa4] ss:$8 sps:$4 sm:$0xff]  }
  0x13   : > { %470 = vmatpush1.bf16.msra.mxu1 %v5661_v14  ;;  %v5698_v39 = vld [vmem:[%s7636_s1 + $0x490] ss:$8 sps:$4 sm:$0xff]   ;;  %v5701_v41 = vld [vmem:[%s7636_s1 + $0x4a4] ss:$8 sps:$4 sm:$0xff]   ;;  %s5630_s23 = smul.u32 240, %s7644_s13  ;;  %vm3046_vm4 = vcmask 1046532  }
  0x14   : > { %2355 = vmatpush1.bf16.msra.mxu0 %v5662_v15  ;;  %471 = vmatprep.subr.bf16.mxu1 %v5663_v16  ;;  %v5703_v42 = vld [vmem:[%s7636_s1 + $0xa0] ss:$8 sps:$4 sm:$0xff]   ;;  %v5705_v44 = vld [vmem:[%s7636_s1 + $0xb4] ss:$8 sps:$4 sm:$0xff]   ;;  %v5709_v46 = vld [vmem:[%s7636_s1 + $0xb0] ss:$8 sps:$4 sm:$0xff]  }
  0x15   : > { %2356 = vmatprep.subr.bf16.mxu0 %v5665_v17  ;;  %v5704_v43 = vld [vmem:[%s7636_s1 + $0x4a0] ss:$8 sps:$4 sm:$0xff]   ;;  %v5707_v45 = vld [vmem:[%s7636_s1 + $0x4b4] ss:$8 sps:$4 sm:$0xff]   ;;  %s6276_s7 = scalar_lea.vmem %s7635_s0, %s5630_s23  ;;  %v5710_v47 = vld [vmem:[%s7636_s1 + $0x4b0] ss:$8 sps:$4 sm:$0xff]  }
  0x16   : > { %v5711_v48 = vld [vmem:[%s7636_s1 + $0xc4] ss:$8 sps:$4 sm:$0xff]   ;;  %v6292_v51 = vld [vmem:[%s6276_s7 + $0x18] sm:$0xff]  ;;  %vm1462_vm0 = vsmask.f32 3328  ;;  %v6327_v11 = vld [vmem:[%s6276_s7 + $0x30] sm:$0xff] }
  0x17   : > { %472 = vmatpush1.bf16.msra.mxu1 %v5667_v18  ;;  %v5713_v49 = vld [vmem:[%s7636_s1 + $0x4c4] ss:$8 sps:$4 sm:$0xff]   ;;  %v1490_v54 = vshrl.u32 %v6292_v51, 16  ;;  %v1493_v55 = vshll.u32 %v6292_v51, 16  ;;  %vm1463_vm1 = vsmask.f32 7440  ;;  %vm6989_vm5 = vmor %vm3045_vm3, %vm3046_vm4 }
  0x18   : > { %2357 = vmatpush1.bf16.msra.mxu0 %v5668_v19  ;;  %473 = vmatprep.subr.bf16.mxu1 %v5669_v20  ;;  %v5737_v50 = vld [vmem:[%s6276_s7 + $0x4] ss:$8 sps:$4 sm:$0xff]   ;;  %v5715_v63 = vld [vmem:[%s7636_s1 + $0xc0] ss:$8 sps:$4 sm:$0xff]   ;;  %v5717_v1 = vld [vmem:[%s7636_s1 + $0xd4] ss:$8 sps:$4 sm:$0xff]  }
  0x19   : > { %2358 = vmatprep.subr.bf16.mxu0 %v5671_v21  ;;  %v6295_v52 = vld [vmem:[%s6276_s7 + $0x20] sm:$0xff]  ;;  %v1437_v53 = vld [vmem:[%s6276_s7 + $0x28] sm:$0x11]  ;;  %495 = vmatprep.mubr.bf16.mxu1 %v5737_v50  ;;  %v1492_v59 = vrot.slane %v1490_v54, 4  ;;  %v1495_v60 = vrot.slane %v1493_v55, 5  ;;  %vm6322_vm2 = vmor %vm1462_vm0, %vm1463_vm1  ;;  %v1514_v14 = vshrl.u32 %v6327_v11, 16 }
  0x1a   : > { %v1499_v56 = vshll.u32 %v6295_v52, 16  ;;  %v1503_v57 = vshrl.u32 %v6295_v52, 16  ;;  %v1509_v58 = vshll.u32 %v1437_v53, 16  ;;  %v5716_v0 = vld [vmem:[%s7636_s1 + $0x4c0] ss:$8 sps:$4 sm:$0xff]   ;;  %v6330_v12 = vld [vmem:[%s6276_s7 + $0x38] sm:$0xff] }
  0x1b   : > { %474 = vmatpush1.bf16.msra.mxu1 %v5673_v22  ;;  %v5719_v2 = vld [vmem:[%s7636_s1 + $0x4d4] ss:$8 sps:$4 sm:$0xff]   ;;  %v1496_v3 = vor.u32 %v1495_v60, %v1492_v59  ;;  %v5721_v6 = vld [vmem:[%s7636_s1 + $0xd0] ss:$8 sps:$4 sm:$0xff]   ;;  %v1440_v13 = vld [vmem:[%s6276_s7 + $0x40] sm:$0x11] }
  0x1c   : > { %2359 = vmatpush1.bf16.msra.mxu0 %v5674_v23  ;;  %475 = vmatprep.subr.bf16.mxu1 %v5675_v24  ;;  %v1501_v61 = vrot.slane %v1499_v56, 5  ;;  %v1505_v62 = vrot.slane %v1503_v57, 4  ;;  %v1511_v5 = vrot.slane %v1509_v58, 5  ;;  %v5722_v7 = vld [vmem:[%s7636_s1 + $0x4d0] ss:$8 sps:$4 sm:$0xff]   ;;  %v1517_v15 = vshll.u32 %v6327_v11, 16 }
  0x1d   : > { %2360 = vmatprep.subr.bf16.mxu0 %v5677_v25  ;;  %v1497_v9 = vrot.slane %v1496_v3, 4  ;;  %v1523_v16 = vshll.u32 %v6330_v12, 16  ;;  %v1527_v17 = vshrl.u32 %v6330_v12, 16  ;;  %v5723_v18 = vld [vmem:[%s7636_s1 + $0xe4] ss:$8 sps:$4 sm:$0xff]   ;;  %v1516_v23 = vrot.slane %v1514_v14, 4 }
  0x1e   : > { %v1506_v4 = vor.u32 %v1505_v62, %v1501_v61  ;;  %v5725_v19 = vld [vmem:[%s7636_s1 + $0x4e4] ss:$8 sps:$4 sm:$0xff]   ;;  %v1519_v24 = vrot.slane %v1517_v15, 5  ;;  %v1533_v25 = vshll.u32 %v1440_v13, 16  ;;  %v5735_v53 = vld [vmem:[%s6276_s7] ss:$8 sps:$4 sm:$0xff]  }
  0x1f   : > { %476 = vmatpush1.bf16.msra.mxu1 %v5679_v26  ;;  %v1502_v20 = vsel %vm6322_vm2, %v1497_v9, %v1501_v61  ;;  %v1525_v26 = vrot.slane %v1523_v16, 5  ;;  %v5738_v56 = vld [vmem:[%s7636_s1 + $0x300] ss:$8 sps:$4 sm:$0xff]   ;;  %v5746_v62 = vld [vmem:[%s7636_s1 + $0x314] ss:$8 sps:$4 sm:$0xff]   ;;  %s5325_s15 = sshll.u32 %s7644_s13, 7 }
  0x20   : > { %2361 = vmatpush1.bf16.msra.mxu0 %v5680_v27  ;;  %477 = vmatprep.subr.bf16.mxu1 %v5681_v28  ;;  %v1507_v10 = vrot.slane %v1506_v4, 4  ;;  %v1529_v27 = vrot.slane %v1527_v17, 4  ;;  %v5727_v28 = vld [vmem:[%s7636_s1 + $0xe0] ss:$8 sps:$4 sm:$0xff]   ;;  %v5744_v4 = vld [vmem:[%s7636_s1 + $0x310] ss:$8 sps:$4 sm:$0xff]   ;;  %s7566_s17 = scalar_lea.vmem %s7638_s3, %s5325_s15 }
  0x21   : > { %2362 = vmatprep.subr.bf16.mxu0 %v5683_v29  ;;  %v5728_v29 = vld [vmem:[%s7636_s1 + $0x4e0] ss:$8 sps:$4 sm:$0xff]   ;;  %v5754_v14 = vld [vmem:[%s7636_s1 + $0x324] ss:$8 sps:$4 sm:$0xff]   ;;  %v6043_v8 = vld [vmem:[%s7636_s1 + $0x5f4] ss:$8 sps:$4 sm:$0xff]  }
  0x22   : > { %v1512_v21 = vsel %vm6322_vm2, %v1507_v10, %v1511_v5  ;;  %v5741_v57 = vld [vmem:[%s7636_s1 + $0x700] ss:$8 sps:$4 sm:$0xff]   ;;  %v5747_v5 = vld [vmem:[%s7636_s1 + $0x710] ss:$8 sps:$4 sm:$0xff]  }
  0x23   : > { %478 = vmatpush1.bf16.msra.mxu1 %v5685_v30  ;;  %v6347_v22 = vcombine.high %v1502_v20, %v1512_v21  ;;  %v1520_v30 = vor.u32 %v1519_v24, %v1516_v23  ;;  %v6386_v54 = vcombine.low %v1502_v20, %v1512_v21  ;;  %v6412_v3 = vld [vmem:[%s6276_s7 + $0x68] sm:$0xff] }
  0x24   : > { %2363 = vmatpush1.bf16.msra.mxu0 %v5686_v31  ;;  %479 = vmatprep.subr.bf16.mxu1 %v5687_v32  ;;  %v5729_v31 = vld [vmem:[%s7636_s1 + $0xf4] ss:$8 sps:$4 sm:$0xff]   ;;  %v1571_v13 = vshll.u32 %v6412_v3, 16  ;;  %v5757_v24 = vld [vmem:[%s7636_s1 + $0x724] ss:$8 sps:$4 sm:$0xff]  }
  0x25   : > { %2364 = vmatprep.subr.bf16.mxu0 %v5689_v33  ;;  %v5731_v32 = vld [vmem:[%s7636_s1 + $0x4f4] ss:$8 sps:$4 sm:$0xff]   ;;  %v1530_v33 = vor.u32 %v1529_v27, %v1525_v26  ;;  %2380 = vmatprep.mubr.bf16.mxu0 %v6347_v22  ;;  %v5752_v27 = vld [vmem:[%s7636_s1 + $0x320] ss:$8 sps:$4 sm:$0xff]  }
  0x26   : > { %v1573_v21 = vrot.slane %v1571_v13, 5  ;;  %v6521_v13 = vld [vmem:[%s6276_s7 + $0x98] sm:$0xff] }
  0x27   : > { %480 = vmatpush1.bf16.msra.mxu1 %v5691_v34  ;;  %v5733_v34 = vld [vmem:[%s7636_s1 + $0xf0] ss:$8 sps:$4 sm:$0xff]  }
  0x28   : > { %2365 = vmatpush1.bf16.msra.mxu0 %v5692_v35  ;;  %481 = vmatprep.subr.bf16.mxu1 %v5693_v36  ;;  %v5734_v35 = vld [vmem:[%s7636_s1 + $0x4f0] ss:$8 sps:$4 sm:$0xff]   ;;  %v1521_v36 = vrot.slane %v1520_v30, 4  ;;  %v5755_v30 = vld [vmem:[%s7636_s1 + $0x720] ss:$8 sps:$4 sm:$0xff]  }
  0x29   : > { %2366 = vmatprep.subr.bf16.mxu0 %v5695_v37  ;;  %v1535_v37 = vrot.slane %v1533_v25, 5 }
  0x2a   : > { %v1526_v58 = vsel %vm6322_vm2, %v1521_v36, %v1525_v26  ;;  %v6438_v26 = vcombine.low %v6292_v51, %v6295_v52  ;;  %v6463_v36 = vcombine.high %v6327_v11, %v6330_v12 }
  0x2b   : > { %482 = vmatpush1.bf16.msra.mxu1 %v5697_v38  ;;  %v6369_v38 = vld [vmem:[%s6276_s7 + $0x48] sm:$0xff] }
  0x2c   : > { %2367 = vmatpush1.bf16.msra.mxu0 %v5698_v39  ;;  %483 = vmatprep.subr.bf16.mxu1 %v5699_v40  ;;  %v6372_v39 = vld [vmem:[%s6276_s7 + $0x50] sm:$0xff]  ;;  %v5740_v40 = vld [vmem:[%s7636_s1 + $0x304] ss:$8 sps:$4 sm:$0xff]  }
  0x2d   : > { %2368 = vmatprep.subr.bf16.mxu0 %v5701_v41  ;;  %v1531_v41 = vrot.slane %v1530_v33, 4  ;;  %v5763_v33 = vld [vmem:[%s7636_s1 + $0x734] ss:$8 sps:$4 sm:$0xff]  }
  0x2f   : > { %484 = vmatpush1.bf16.msra.mxu1 %v5703_v42  ;;  %v1538_v42 = vshrl.u32 %v6369_v38, 16  ;;  %v1536_v59 = vsel %vm6322_vm2, %v1531_v41, %v1535_v37  ;;  %v1449_v41 = vld [vmem:[%s6276_s7 + $0x88] sm:$0x11] }
  0x30   : > { %2369 = vmatpush1.bf16.msra.mxu0 %v5704_v43  ;;  %485 = vmatprep.subr.bf16.mxu1 %v5705_v44  ;;  %v1541_v43 = vshll.u32 %v6369_v38, 16  ;;  %v1547_v44 = vshll.u32 %v6372_v39, 16 }
  0x31   : > { %2370 = vmatprep.subr.bf16.mxu0 %v5707_v45  ;;  %v5743_v45 = vld [vmem:[%s7636_s1 + $0x704] ss:$8 sps:$4 sm:$0xff]  }
  0x32   : > { %v1549_v50 = vrot.slane %v1547_v44, 5 }
  0x33   : > { %486 = vmatpush1.bf16.msra.mxu1 %v5709_v46  ;;  %v1443_v46 = vld [vmem:[%s6276_s7 + $0x58] sm:$0x11] }
  0x34   : > { %2371 = vmatpush1.bf16.msra.mxu0 %v5710_v47  ;;  %487 = vmatprep.subr.bf16.mxu1 %v5711_v48  ;;  %v1551_v47 = vshrl.u32 %v6372_v39, 16  ;;  %v1540_v48 = vrot.slane %v1538_v42, 4  ;;  %v1557_v61 = vshll.u32 %v1443_v46, 16 }
  0x35   : > { %2372 = vmatprep.subr.bf16.mxu0 %v5713_v49  ;;  %v1543_v49 = vrot.slane %v1541_v43, 5 }
  0x36   : > { %v1553_v55 = vrot.slane %v1551_v47, 4  ;;  %v1559_v17 = vrot.slane %v1557_v61, 5  ;;  %v5766_v61 = vld [vmem:[%s7636_s1 + $0x340] ss:$8 sps:$4 sm:$0xff]  }
  0x37   : > { %488 = vmatpush1.bf16.msra.mxu1 %v5715_v63  ;;  %v1544_v60 = vor.u32 %v1543_v49, %v1540_v48  ;;  %v5758_v48 = vld [vmem:[%s7636_s1 + $0x330] ss:$8 sps:$4 sm:$0xff]  }
  0x38   : > { %2373 = vmatpush1.bf16.msra.mxu0 %v5716_v0  ;;  %489 = vmatprep.subr.bf16.mxu1 %v5717_v1  ;;  %v1554_v63 = vor.u32 %v1553_v55, %v1549_v50  ;;  %v5749_v0 = vld [vmem:[%s7636_s1 + $0x714] ss:$8 sps:$4 sm:$0xff]   ;;  %v6406_v1 = vcombine.high %v6292_v51, %v6295_v52 }
  0x39   : > { %2374 = vmatprep.subr.bf16.mxu0 %v5719_v2  ;;  %v6409_v2 = vld [vmem:[%s6276_s7 + $0x60] sm:$0xff]  ;;  %v1545_v15 = vrot.slane %v1544_v60, 4  ;;  %v1605_v60 = vshll.u32 %v1449_v41, 16 }
  0x3a   : > { %v1562_v9 = vshrl.u32 %v6409_v2, 16  ;;  %v1565_v10 = vshll.u32 %v6409_v2, 16  ;;  %v1555_v16 = vrot.slane %v1554_v63, 4  ;;  %v5783_v41 = vld [vmem:[%s7636_s1 + $0x760] ss:$8 sps:$4 sm:$0xff]  }
  0x3b   : > { %490 = vmatpush1.bf16.msra.mxu1 %v5721_v6  ;;  %v6420_v6 = vcombine.high %v1526_v58, %v1536_v59 }
  0x3c   : > { %2375 = vmatpush1.bf16.msra.mxu0 %v5722_v7  ;;  %491 = vmatprep.subr.bf16.mxu1 %v5723_v18  ;;  %v1446_v7 = vld [vmem:[%s6276_s7 + $0x70] sm:$0x11]  ;;  %v1575_v18 = vshrl.u32 %v6412_v3, 16  ;;  %v1567_v20 = vrot.slane %v1565_v10, 5  ;;  %v1560_v51 = vsel %vm6322_vm2, %v1555_v16, %v1559_v17  ;;  %v1607_v17 = vrot.slane %v1605_v60, 5 }
  0x3d   : > { %2376 = vmatprep.subr.bf16.mxu0 %v5725_v19  ;;  %v1564_v19 = vrot.slane %v1562_v9, 4  ;;  %v1581_v23 = vshll.u32 %v1446_v7, 16  ;;  %v5769_v7 = vld [vmem:[%s7636_s1 + $0x740] ss:$8 sps:$4 sm:$0xff]   ;;  %v5774_v9 = vld [vmem:[%s7636_s1 + $0x354] ss:$8 sps:$4 sm:$0xff]  }
  0x3e   : > { %v1577_v25 = vrot.slane %v1575_v18, 4  ;;  %v6511_v10 = vld [vmem:[%s6276_s7 + $0x90] sm:$0xff]  ;;  %v1619_v18 = vshll.u32 %v6521_v13, 16 }
  0x3f   : > { %492 = vmatpush1.bf16.msra.mxu1 %v5727_v28  ;;  %v1568_v28 = vor.u32 %v1567_v20, %v1564_v19  ;;  %v1623_v19 = vshrl.u32 %v6521_v13, 16 }
  0x40   : > { %2377 = vmatpush1.bf16.msra.mxu0 %v5728_v29  ;;  %493 = vmatprep.subr.bf16.mxu1 %v5729_v31  ;;  %v6443_v29 = vcombine.low %v1526_v58, %v1536_v59  ;;  %v1550_v31 = vsel %vm6322_vm2, %v1545_v15, %v1549_v50  ;;  %v1578_v52 = vor.u32 %v1577_v25, %v1573_v21  ;;  %v5771_v58 = vld [vmem:[%s7636_s1 + $0x744] ss:$8 sps:$4 sm:$0xff]   ;;  %v1613_v15 = vshll.u32 %v6511_v10, 16 }
  0x41   : > { %2378 = vmatprep.subr.bf16.mxu0 %v5731_v32  ;;  %v5760_v32 = vld [vmem:[%s7636_s1 + $0x334] ss:$8 sps:$4 sm:$0xff]   ;;  %v1569_v37 = vrot.slane %v1568_v28, 4  ;;  %v6471_v44 = vcombine.high %v1550_v31, %v1560_v51  ;;  %v1621_v28 = vrot.slane %v1619_v18, 5 }
  0x42   : > { %v1615_v25 = vrot.slane %v1613_v15, 5  ;;  %v5796_v15 = vld [vmem:[%s7636_s1 + $0x384] ss:$8 sps:$4 sm:$0xff]  }
  0x43   : > { %494 = vmatpush1.bf16.msra.mxu1 %v5733_v34  ;;  %v1583_v34 = vrot.slane %v1581_v23, 5  ;;  %v1574_v59 = vsel %vm6322_vm2, %v1569_v37, %v1573_v21  ;;  %v1452_v23 = vld [vmem:[%s6276_s7 + $0xa0] sm:$0x11] }
  0x44   : > { %2379 = vmatpush1.bf16.msra.mxu0 %v5734_v35  ;;  %811 = vmatprep.subr.bf16.mxu1 %v5740_v40  ;;  %v6459_v35 = vld [vmem:[%s6276_s7 + $0x78] sm:$0xff]  ;;  %v6466_v40 = vld [vmem:[%s6276_s7 + $0x80] sm:$0xff] }
  0x45   : > { %2782 = vmatprep.subr.bf16.mxu0 %v5743_v45  ;;  %v1586_v42 = vshrl.u32 %v6459_v35, 16  ;;  %v1589_v43 = vshll.u32 %v6459_v35, 16  ;;  %v1579_v45 = vrot.slane %v1578_v52, 4  ;;  %v1595_v46 = vshll.u32 %v6466_v40, 16  ;;  %v5785_v52 = vld [vmem:[%s7636_s1 + $0x764] ss:$8 sps:$4 sm:$0xff]  }
  0x46   : > { %496 = vmatmul.mubr.bf16.vlgmr.msra.gmra.mrb[0].mxu1 %v5735_v53  ;;  %v1599_v47 = vshrl.u32 %v6466_v40, 16  ;;  %v5761_v53 = vld [vmem:[%s7636_s1 + $0x730] ss:$8 sps:$4 sm:$0xff]   ;;  %v5780_v37 = vld [vmem:[%s7636_s1 + $0x360] ss:$8 sps:$4 sm:$0xff]  }
  0x47   : > { %2381 = vmatmul.mubr.bf16.vlgmr.msra.gmra.mrb[0].mxu0 %v6386_v54  ;;  %812 = vmatpush1.bf16.msra.mxu1 %v5738_v56  ;;  %v1588_v49 = vrot.slane %v1586_v42, 4  ;;  %v1591_v50 = vrot.slane %v1589_v43, 5  ;;  %v1597_v55 = vrot.slane %v1595_v46, 5  ;;  %v6561_v46 = vcombine.low %v6369_v38, %v6372_v39 }
  0x48   : > { %2783 = vmatpush1.bf16.msra.mxu0 %v5741_v57  ;;  %813 = vmatprep.subr.bf16.mxu1 %v5746_v62  ;;  %v1601_v56 = vrot.slane %v1599_v47, 4  ;;  %v5768_v57 = vld [vmem:[%s7636_s1 + $0x344] ss:$8 sps:$4 sm:$0xff]   ;;  %v1584_v62 = vsel %vm6322_vm2, %v1579_v45, %v1583_v34  ;;  %v1629_v34 = vshll.u32 %v1452_v23, 16 }
  0x49   : > { %2784 = vmatprep.subr.bf16.mxu0 %v5749_v0  ;;  %505 = vmatprep.mubr.bf16.mxu1 %v6406_v1  ;;  %v1592_v63 = vor.u32 %v1591_v50, %v1588_v49  ;;  %v6525_v16 = vcombine.high %v1574_v59, %v1584_v62  ;;  %v6557_v45 = vld [vmem:[%s6276_s7 + $0xa8] sm:$0xff]  ;;  %v6563_v47 = vcombine.low %v1574_v59, %v1584_v62  ;;  %v5791_v49 = vld [vmem:[%s7636_s1 + $0x774] ss:$8 sps:$4 sm:$0xff]  }
  0x4a   : > { %2390 = vmatprep.mubr.bf16.mxu0 %v6420_v6  ;;  %v1602_v0 = vor.u32 %v1601_v56, %v1597_v55  ;;  %v6572_v50 = vld [vmem:[%s6276_s7 + $0xb0] sm:$0xff]  ;;  %v1631_v60 = vrot.slane %v1629_v34, 5  ;;  %v1457_v23 = vld [vmem:[%s6276_s7 + $0xc8] sm:$0xff]  ;;  %v6629_v34 = vcombine.high %v6459_v35, %v6466_v40 }
  0x4b   : > { %814 = vmatpush1.bf16.msra.mxu1 %v5744_v4  ;;  %v6500_v4 = vcombine.low %v6327_v11, %v6330_v12  ;;  %v5777_v11 = vld [vmem:[%s7636_s1 + $0x754] ss:$8 sps:$4 sm:$0xff]   ;;  %v6518_v12 = vcombine.high %v6369_v38, %v6372_v39  ;;  %v1593_v20 = vrot.slane %v1592_v63, 4  ;;  %v6578_v38 = vcombine.high %v6409_v2, %v6412_v3 }
  0x4c   : > { %2785 = vmatpush1.bf16.msra.mxu0 %v5747_v5  ;;  %815 = vmatprep.subr.bf16.mxu1 %v5754_v14  ;;  %v6502_v5 = vcombine.low %v1550_v31, %v1560_v51  ;;  %v1610_v14 = vshrl.u32 %v6511_v10, 16  ;;  %v1603_v21 = vrot.slane %v1602_v0, 4  ;;  %v5775_v31 = vld [vmem:[%s7636_s1 + $0x750] ss:$8 sps:$4 sm:$0xff]   ;;  %v5782_v51 = vld [vmem:[%s7636_s1 + $0x364] ss:$8 sps:$4 sm:$0xff]  }
  0x4d   : > { %2786 = vmatprep.subr.bf16.mxu0 %v5757_v24  ;;  %v1598_v42 = vsel %vm6322_vm2, %v1593_v20, %v1597_v55  ;;  %v1637_v55 = vshll.u32 %v6557_v45, 16  ;;  %v1643_v39 = vshll.u32 %v6572_v50, 16  ;;  %v1647_v56 = vshrl.u32 %v6572_v50, 16  ;;  %v1456_v20 = vld [vmem:[%s6276_s7 + $0xc0] sm:$0xff] }
  0x4e   : > { %506 = vmatmul.mubr.bf16.gmra.mrb[4].mxu1 %v6438_v26  ;;  %v1612_v24 = vrot.slane %v1610_v14, 4  ;;  %v1608_v43 = vsel %vm6322_vm2, %v1603_v21, %v1607_v17  ;;  %v6595_v14 = vcombine.low %v6409_v2, %v6412_v3  ;;  %v5799_v17 = vld [vmem:[%s7636_s1 + $0x784] ss:$8 sps:$4 sm:$0xff]  }
  0x4f   : > { %2391 = vmatmul.mubr.bf16.gmra.mrb[4].mxu0 %v6443_v29  ;;  %816 = vmatpush1.bf16.msra.mxu1 %v5752_v27  ;;  %v5772_v27 = vld [vmem:[%s7636_s1 + $0x350] ss:$8 sps:$4 sm:$0xff]   ;;  %v1639_v63 = vrot.slane %v1637_v55, 5  ;;  %v1645_v0 = vrot.slane %v1643_v39, 5 }
  0x50   : > { %2787 = vmatpush1.bf16.msra.mxu0 %v5755_v30  ;;  %817 = vmatprep.subr.bf16.mxu1 %v5760_v32  ;;  %v1625_v30 = vrot.slane %v1623_v19, 4  ;;  %v1616_v32 = vor.u32 %v1615_v25, %v1612_v24  ;;  %v2124_v24 = vshrl.u32 %v1456_v20, 16  ;;  %v6611_v25 = vcombine.low %v1598_v42, %v1608_v43 }
  0x51   : > { %2788 = vmatprep.subr.bf16.mxu0 %v5763_v33  ;;  %515 = vmatprep.mubr.bf16.mxu1 %v6463_v36 }
  0x52   : > { %2400 = vmatprep.mubr.bf16.mxu0 %v6471_v44  ;;  %v1626_v33 = vor.u32 %v1625_v30, %v1621_v28  ;;  %v2133_v30 = vshll.u32 %v1457_v23, 16 }
  0x53   : > { %818 = vmatpush1.bf16.msra.mxu1 %v5758_v48  ;;  %v5788_v48 = vld [vmem:[%s7636_s1 + $0x374] ss:$8 sps:$4 sm:$0xff]  }
  0x54   : > { %2789 = vmatpush1.bf16.msra.mxu0 %v5761_v53  ;;  %819 = vmatprep.subr.bf16.mxu1 %v5768_v57  ;;  %v1634_v53 = vshrl.u32 %v6557_v45, 16  ;;  %v6582_v57 = vcombine.high %v1598_v42, %v1608_v43  ;;  %v1627_v59 = vrot.slane %v1626_v33, 4  ;;  %v5805_v33 = vld [vmem:[%s7636_s1 + $0x794] ss:$8 sps:$4 sm:$0xff]   ;;  %v2135_v39 = vrot.slane %v2133_v30, 5 }
  0x55   : > { %2790 = vmatprep.subr.bf16.mxu0 %v5771_v58  ;;  %v1617_v58 = vrot.slane %v1616_v32, 4  ;;  %v6622_v32 = vcombine.high %v1456_v20, %v1457_v23  ;;  %v5827_v30 = vld [vmem:[%s7636_s1 + $0x7c4] ss:$8 sps:$4 sm:$0xff]  }
  0x56   : > { %516 = vmatmul.mubr.bf16.gmra.mrb[8].mxu1 %v6500_v4  ;;  %v1636_v62 = vrot.slane %v1634_v53, 4  ;;  %v1632_v2 = vsel %vm6322_vm2, %v1627_v59, %v1631_v60  ;;  %v2126_v53 = vrot.slane %v2124_v24, 4  ;;  %v1458_v59 = vld [vmem:[%s6276_s7 + $0xd0] sm:$0x11]  ;;  %v5810_v60 = vld [vmem:[%s7636_s1 + $0x3a4] ss:$8 sps:$4 sm:$0xff]  }
  0x57   : > { %2401 = vmatmul.mubr.bf16.gmra.mrb[8].mxu0 %v6502_v5  ;;  %820 = vmatpush1.bf16.msra.mxu1 %v5766_v61  ;;  %v1455_v61 = vld [vmem:[%s6276_s7 + $0xb8] sm:$0x11]  ;;  %v1622_v18 = vsel %vm6322_vm2, %v1617_v58, %v1621_v28  ;;  %v5794_v28 = vld [vmem:[%s7636_s1 + $0x380] ss:$8 sps:$4 sm:$0xff]  }
  0x58   : > { %2791 = vmatpush1.bf16.msra.mxu0 %v5769_v7  ;;  %821 = vmatprep.subr.bf16.mxu1 %v5774_v9  ;;  %v1649_v7 = vrot.slane %v1647_v56, 4  ;;  %v5786_v9 = vld [vmem:[%s7636_s1 + $0x370] ss:$8 sps:$4 sm:$0xff]   ;;  %v1653_v19 = vshll.u32 %v1455_v61, 16  ;;  %v1640_v3 = vor.u32 %v1639_v63, %v1636_v62  ;;  %v5813_v61 = vld [vmem:[%s7636_s1 + $0x7a4] ss:$8 sps:$4 sm:$0xff]   ;;  %v6654_v62 = vcombine.low %v6459_v35, %v6466_v40 }
  0x59   : > { %2792 = vmatprep.subr.bf16.mxu0 %v5777_v11  ;;  %525 = vmatprep.mubr.bf16.mxu1 %v6518_v12  ;;  %v5789_v11 = vld [vmem:[%s7636_s1 + $0x770] ss:$8 sps:$4 sm:$0xff]   ;;  %v6656_v63 = vcombine.low %v1622_v18, %v1632_v2  ;;  %v5811_v35 = vld [vmem:[%s7636_s1 + $0x7a0] ss:$8 sps:$4 sm:$0xff]   ;;  %v5816_v40 = vld [vmem:[%s7636_s1 + $0x3b4] ss:$8 sps:$4 sm:$0xff]  }
  0x5a   : > { %2410 = vmatprep.mubr.bf16.mxu0 %v6525_v16  ;;  %v1650_v21 = vor.u32 %v1649_v7, %v1645_v0  ;;  %v1641_v42 = vrot.slane %v1640_v3, 4  ;;  %v5803_v58 = vld [vmem:[%s7636_s1 + $0x790] ss:$8 sps:$4 sm:$0xff]  }
  0x5b   : > { %822 = vmatpush1.bf16.msra.mxu1 %v5772_v27  ;;  %v2127_v27 = vshll.u32 %v1456_v20, 16  ;;  %v5817_v24 = vld [vmem:[%s7636_s1 + $0x7b0] ss:$8 sps:$4 sm:$0xff]  }
  0x5c   : > { %2793 = vmatpush1.bf16.msra.mxu0 %v5775_v31  ;;  %823 = vmatprep.subr.bf16.mxu1 %v5782_v51  ;;  %v2137_v31 = vshrl.u32 %v1457_v23, 16  ;;  %v5797_v51 = vld [vmem:[%s7636_s1 + $0x780] ss:$8 sps:$4 sm:$0xff]   ;;  %v1651_v43 = vrot.slane %v1650_v21, 4  ;;  %v1646_v7 = vsel %vm6322_vm2, %v1641_v42, %v1645_v0  ;;  %v5819_v0 = vld [vmem:[%s7636_s1 + $0x7b4] ss:$8 sps:$4 sm:$0xff]   ;;  %v6720_v42 = vcombine.high %v6557_v45, %v6572_v50 }
  0x5d   : > { %2794 = vmatprep.subr.bf16.mxu0 %v5785_v52  ;;  %v5802_v52 = vld [vmem:[%s7636_s1 + $0x394] ss:$8 sps:$4 sm:$0xff]   ;;  %v2129_v55 = vrot.slane %v2127_v27, 5  ;;  %v5824_v27 = vld [vmem:[%s7636_s1 + $0x3c4] ss:$8 sps:$4 sm:$0xff]  }
  0x5e   : > { %526 = vmatmul.mubr.bf16.gmra.mrb[12].mxu1 %v6561_v46  ;;  %v2139_v56 = vrot.slane %v2137_v31, 4  ;;  %v6698_v31 = vcombine.low %v6511_v10, %v6521_v13 }
  0x5f   : > { %2411 = vmatmul.mubr.bf16.gmra.mrb[12].mxu0 %v6563_v47  ;;  %824 = vmatpush1.bf16.msra.mxu1 %v5780_v37  ;;  %v6631_v37 = vcombine.high %v1622_v18, %v1632_v2  ;;  %v6676_v18 = vcombine.high %v6511_v10, %v6521_v13  ;;  %v5830_v10 = vld [vmem:[%s7636_s1 + $0x3d4] ss:$8 sps:$4 sm:$0xff]  }
  0x60   : > { %2795 = vmatpush1.bf16.msra.mxu0 %v5783_v41  ;;  %825 = vmatprep.subr.bf16.mxu1 %v5788_v48  ;;  %v5800_v41 = vld [vmem:[%s7636_s1 + $0x390] ss:$8 sps:$4 sm:$0xff]   ;;  %v1655_v48 = vrot.slane %v1653_v19, 5  ;;  %v5808_v19 = vld [vmem:[%s7636_s1 + $0x3a0] ss:$8 sps:$4 sm:$0xff]  }
  0x61   : > { %2796 = vmatprep.subr.bf16.mxu0 %v5791_v49  ;;  %535 = vmatprep.mubr.bf16.mxu1 %v6578_v38  ;;  %v6636_v49 = vcombine.low %v1456_v20, %v1457_v23  ;;  %v5814_v23 = vld [vmem:[%s7636_s1 + $0x3b0] ss:$8 sps:$4 sm:$0xff]   ;;  %v5833_v13 = vld [vmem:[%s7636_s1 + $0x7d4] ss:$8 sps:$4 sm:$0xff]  }
  0x62   : > { %2420 = vmatprep.mubr.bf16.mxu0 %v6582_v57 }
  0x63   : > { %826 = vmatpush1.bf16.msra.mxu1 %v5786_v9  ;;  %v1656_v9 = vsel %vm6322_vm2, %v1651_v43, %v1655_v48  ;;  %v5828_v48 = vld [vmem:[%s7636_s1 + $0x3d0] ss:$8 sps:$4 sm:$0xff]  }
  0x64   : > { %2797 = vmatpush1.bf16.msra.mxu0 %v5789_v11  ;;  %827 = vmatprep.subr.bf16.mxu1 %v5796_v15  ;;  %v2130_v11 = vor.u32 %v2129_v55, %v2126_v53  ;;  %v2140_v15 = vor.u32 %v2139_v56, %v2135_v39  ;;  %v6678_v20 = vcombine.high %v1646_v7, %v1656_v9  ;;  %v5831_v53 = vld [vmem:[%s7636_s1 + $0x7d0] ss:$8 sps:$4 sm:$0xff]   ;;  %v5838_v55 = vld [vmem:[%s7636_s1 + $0x3e4] ss:$8 sps:$4 sm:$0xff]  }
  0x65   : > { %2798 = vmatprep.subr.bf16.mxu0 %v5799_v17  ;;  %v2143_v17 = vshll.u32 %v1458_v59, 16  ;;  %v6742_v56 = vcombine.low %v6557_v45, %v6572_v50  ;;  %v5836_v59 = vld [vmem:[%s7636_s1 + $0x3e0] ss:$8 sps:$4 sm:$0xff]   ;;  %v5847_v45 = vld [vmem:[%s7636_s1 + $0x7f4] ss:$8 sps:$4 sm:$0xff]  }
  0x66   : > { %536 = vmatmul.mubr.bf16.gmra.mrb[16].mxu1 %v6595_v14  ;;  %v2131_v2 = vrot.slane %v2130_v11, 4  ;;  %v2141_v3 = vrot.slane %v2140_v15, 4  ;;  %v5842_v50 = vld [vmem:[%s7636_s1 + $0x3f0] ss:$8 sps:$4 sm:$0xff]   ;;  %v5853_v11 = vld [vmem:[%s7636_s1 + $0x204] ss:$8 sps:$4 sm:$0xff]  }
  0x67   : > { %2421 = vmatmul.mubr.bf16.gmra.mrb[16].mxu0 %v6611_v25  ;;  %828 = vmatpush1.bf16.msra.mxu1 %v5794_v28  ;;  %v2145_v21 = vrot.slane %v2143_v17, 5  ;;  %v6700_v28 = vcombine.low %v1646_v7, %v1656_v9  ;;  %v5845_v7 = vld [vmem:[%s7636_s1 + $0x7f0] ss:$8 sps:$4 sm:$0xff]   ;;  %v5850_v9 = vld [vmem:[%s7636_s1 + $0x604] ss:$8 sps:$4 sm:$0xff]  }
  0x68   : > { %2799 = vmatpush1.bf16.msra.mxu0 %v5797_v51  ;;  %829 = vmatprep.subr.bf16.mxu1 %v5802_v52  ;;  %v2136_v51 = vsel %vm6322_vm2, %v2131_v2, %v2135_v39  ;;  %v5841_v39 = vld [vmem:[%s7636_s1 + $0x7e4] ss:$8 sps:$4 sm:$0xff]   ;;  %v5848_v15 = vld [vmem:[%s7636_s1 + $0x600] ss:$8 sps:$4 sm:$0xff]  }
  0x69   : > { %2800 = vmatprep.subr.bf16.mxu0 %v5805_v33  ;;  %545 = vmatprep.mubr.bf16.mxu1 %v6629_v34  ;;  %v2146_v52 = vsel %vm6322_vm2, %v2141_v3, %v2145_v21  ;;  %v5822_v33 = vld [vmem:[%s7636_s1 + $0x3c0] ss:$8 sps:$4 sm:$0xff]   ;;  %v5868_v21 = vld [vmem:[%s7636_s1 + $0x634] ss:$8 sps:$4 sm:$0xff]  }
  0x6a   : > { %2430 = vmatprep.mubr.bf16.mxu0 %v6631_v37  ;;  %v6722_v43 = vcombine.high %v2136_v51, %v2146_v52  ;;  %v5851_v17 = vld [vmem:[%s7636_s1 + $0x200] ss:$8 sps:$4 sm:$0xff]  }
  0x6b   : > { %830 = vmatpush1.bf16.msra.mxu1 %v5800_v41  ;;  %v5825_v41 = vld [vmem:[%s7636_s1 + $0x7c0] ss:$8 sps:$4 sm:$0xff]  }
  0x6c   : > { %2801 = vmatpush1.bf16.msra.mxu0 %v5803_v58  ;;  %831 = vmatprep.subr.bf16.mxu1 %v5810_v60  ;;  %v6744_v58 = vcombine.low %v2136_v51, %v2146_v52  ;;  %v5839_v60 = vld [vmem:[%s7636_s1 + $0x7e0] ss:$8 sps:$4 sm:$0xff]   ;;  %v5869_v51 = vld [vmem:[%s7636_s1 + $0x230] ss:$8 sps:$4 sm:$0xff]   ;;  %v5874_v52 = vld [vmem:[%s7636_s1 + $0x644] ss:$8 sps:$4 sm:$0xff]  }
  0x6d   : > { %2802 = vmatprep.subr.bf16.mxu0 %v5813_v61  ;;  %v5844_v61 = vld [vmem:[%s7636_s1 + $0x3f4] ss:$8 sps:$4 sm:$0xff]   ;;  %v5860_v2 = vld [vmem:[%s7636_s1 + $0x620] ss:$8 sps:$4 sm:$0xff]  }
  0x6e   : > { %546 = vmatmul.mubr.bf16.gmra.mrb[20].mxu1 %v6654_v62  ;;  %v5863_v3 = vld [vmem:[%s7636_s1 + $0x220] ss:$8 sps:$4 sm:$0xff]  }
  0x6f   : > { %2431 = vmatmul.mubr.bf16.gmra.mrb[20].mxu0 %v6656_v63  ;;  %832 = vmatpush1.bf16.msra.mxu1 %v5808_v19  ;;  %v5856_v19 = vld [vmem:[%s7636_s1 + $0x614] ss:$8 sps:$4 sm:$0xff]  }
  0x70   : > { %2803 = vmatpush1.bf16.msra.mxu0 %v5811_v35  ;;  %833 = vmatprep.subr.bf16.mxu1 %v5816_v40  ;;  %v5854_v35 = vld [vmem:[%s7636_s1 + $0x610] ss:$8 sps:$4 sm:$0xff]  }
  0x71   : > { %2804 = vmatprep.subr.bf16.mxu0 %v5819_v0  ;;  %555 = vmatprep.mubr.bf16.mxu1 %v6676_v18  ;;  %v5857_v40 = vld [vmem:[%s7636_s1 + $0x210] ss:$8 sps:$4 sm:$0xff]   ;;  %v5862_v0 = vld [vmem:[%s7636_s1 + $0x624] ss:$8 sps:$4 sm:$0xff]  }
  0x72   : > { %2440 = vmatprep.mubr.bf16.mxu0 %v6678_v20 }
  0x73   : > { %834 = vmatpush1.bf16.msra.mxu1 %v5814_v23  ;;  %v5871_v23 = vld [vmem:[%s7636_s1 + $0x234] ss:$8 sps:$4 sm:$0xff]  }
  0x74   : > { %2805 = vmatpush1.bf16.msra.mxu0 %v5817_v24  ;;  %835 = vmatprep.subr.bf16.mxu1 %v5824_v27  ;;  %v5866_v24 = vld [vmem:[%s7636_s1 + $0x630] ss:$8 sps:$4 sm:$0xff]  }
  0x75   : > { %2806 = vmatprep.subr.bf16.mxu0 %v5827_v30  ;;  %v6818_v27 = vld [vmem:[%s6276_s7 + $0xd8] sm:$0xff]  ;;  %v6823_v30 = vld [vmem:[%s6276_s7 + $0xe0] sm:$0xff] }
  0x76   : > { %556 = vmatmul.mubr.bf16.gmra.mrb[24].mxu1 %v6698_v31 }
  0x77   : > { %2441 = vmatmul.mubr.bf16.gmra.mrb[24].mxu0 %v6700_v28  ;;  %836 = vmatpush1.bf16.msra.mxu1 %v5822_v33  ;;  %v4840_v33 = vcombine.high %v6818_v27, %v6823_v30 }
  0x78   : > { %2807 = vmatpush1.bf16.msra.mxu0 %v5825_v41  ;;  %837 = vmatprep.subr.bf16.mxu1 %v5830_v10  ;;  %v4839_v41 = vcombine.low %v6818_v27, %v6823_v30  ;;  %v5877_v10 = vld [vmem:[%s7636_s1 + $0x244] ss:$8 sps:$4 sm:$0xff]  }
  0x79   : > { %2808 = vmatprep.subr.bf16.mxu0 %v5833_v13  ;;  %565 = vmatprep.mubr.bf16.mxu1 %v6720_v42  ;;  %v5872_v13 = vld [vmem:[%s7636_s1 + $0x640] ss:$8 sps:$4 sm:$0xff]  }
  0x7a   : > { %2450 = vmatprep.mubr.bf16.mxu0 %v6722_v43 }
  0x7b   : > { %838 = vmatpush1.bf16.msra.mxu1 %v5828_v48  ;;  %v5875_v48 = vld [vmem:[%s7636_s1 + $0x240] ss:$8 sps:$4 sm:$0xff]  }
  0x7c   : > { %2809 = vmatpush1.bf16.msra.mxu0 %v5831_v53  ;;  %839 = vmatprep.subr.bf16.mxu1 %v5838_v55  ;;  %v5880_v53 = vld [vmem:[%s7636_s1 + $0x654] ss:$8 sps:$4 sm:$0xff]  }
  0x7d   : > { %2810 = vmatprep.subr.bf16.mxu0 %v5841_v39  ;;  %v5883_v55 = vld [vmem:[%s7636_s1 + $0x254] ss:$8 sps:$4 sm:$0xff]   ;;  %v5878_v39 = vld [vmem:[%s7636_s1 + $0x650] ss:$8 sps:$4 sm:$0xff]  }
  0x7e   : > { %566 = vmatmul.mubr.bf16.gmra.mrb[28].mxu1 %v6742_v56 }
  0x7f   : > { %2451 = vmatmul.mubr.bf16.gmra.mrb[28].mxu0 %v6744_v58  ;;  %840 = vmatpush1.bf16.msra.mxu1 %v5836_v59  ;;  %v5881_v59 = vld [vmem:[%s7636_s1 + $0x250] ss:$8 sps:$4 sm:$0xff]  }
  0x80   : > { %2811 = vmatpush1.bf16.msra.mxu0 %v5839_v60  ;;  %841 = vmatprep.subr.bf16.mxu1 %v5844_v61  ;;  %v5886_v60 = vld [vmem:[%s7636_s1 + $0x664] ss:$8 sps:$4 sm:$0xff]  }
  0x81   : > { %2812 = vmatprep.subr.bf16.mxu0 %v5847_v45  ;;  %843 = vmatprep.mubr.bf16.mxu1 %v6406_v1  ;;  %v5859_v1 = vld [vmem:[%s7636_s1 + $0x214] ss:$8 sps:$4 sm:$0xff]   ;;  %v5889_v61 = vld [vmem:[%s7636_s1 + $0x264] ss:$8 sps:$4 sm:$0xff]   ;;  %v5884_v45 = vld [vmem:[%s7636_s1 + $0x660] ss:$8 sps:$4 sm:$0xff]  }
  0x82   : > { %2814 = vmatprep.mubr.bf16.mxu0 %v6420_v6 }
  0x83   : > { %842 = vmatpush1.bf16.msra.mxu1 %v5842_v50  ;;  %v5887_v50 = vld [vmem:[%s7636_s1 + $0x260] ss:$8 sps:$4 sm:$0xff]  }
  0x84   : > { %2813 = vmatpush1.bf16.msra.mxu0 %v5845_v7  ;;  %1223 = vmatprep.subr.bf16.mxu1 %v5850_v9  ;;  %v5892_v7 = vld [vmem:[%s7636_s1 + $0x674] ss:$8 sps:$4 sm:$0xff]  }
  0x85   : > { %3361 = vmatprep.subr.bf16.mxu0 %v5853_v11  ;;  %v5895_v9 = vld [vmem:[%s7636_s1 + $0x274] ss:$8 sps:$4 sm:$0xff]   ;;  %v5890_v11 = vld [vmem:[%s7636_s1 + $0x670] ss:$8 sps:$4 sm:$0xff]  }
  0x86   : > { %844 = vmatmul.mubr.bf16.vlgmr.msra.gmra.mrb[0].mxu1 %v6438_v26  ;;  %v5865_v26 = vld [vmem:[%s7636_s1 + $0x224] ss:$8 sps:$4 sm:$0xff]  }
  0x87   : > { %2815 = vmatmul.mubr.bf16.vlgmr.msra.gmra.mrb[0].mxu0 %v6443_v29  ;;  %1224 = vmatpush1.bf16.msra.mxu1 %v5848_v15  ;;  %v5893_v15 = vld [vmem:[%s7636_s1 + $0x270] ss:$8 sps:$4 sm:$0xff]  }
  0x88   : > { %3362 = vmatpush1.bf16.msra.mxu0 %v5851_v17  ;;  %1225 = vmatprep.subr.bf16.mxu1 %v5856_v19  ;;  %v5898_v17 = vld [vmem:[%s7636_s1 + $0x684] ss:$8 sps:$4 sm:$0xff]  }
  0x89   : > { %3363 = vmatprep.subr.bf16.mxu0 %v5859_v1  ;;  %853 = vmatprep.mubr.bf16.mxu1 %v6463_v36  ;;  %v5901_v19 = vld [vmem:[%s7636_s1 + $0x284] ss:$8 sps:$4 sm:$0xff]   ;;  %v5896_v1 = vld [vmem:[%s7636_s1 + $0x680] ss:$8 sps:$4 sm:$0xff]  }
  0x8a   : > { %2824 = vmatprep.mubr.bf16.mxu0 %v6471_v44 }
  0x8b   : > { %1226 = vmatpush1.bf16.msra.mxu1 %v5854_v35  ;;  %v2558_v35 = vshrl.u32 %v6818_v27, 16 }
  0x8c   : > { %3364 = vmatpush1.bf16.msra.mxu0 %v5857_v40  ;;  %1227 = vmatprep.subr.bf16.mxu1 %v5862_v0  ;;  %v2561_v40 = vshll.u32 %v6818_v27, 16  ;;  %v2567_v0 = vshll.u32 %v6823_v30, 16 }
  0x8d   : > { %3365 = vmatprep.subr.bf16.mxu0 %v5865_v26  ;;  %v2571_v26 = vshrl.u32 %v6823_v30, 16  ;;  %v6044_v30 = vld [vmem:[%s7636_s1 + $0x800] ss:$8 sps:$4 sm:$0xff]  }
  0x8e   : > { %854 = vmatmul.mubr.bf16.gmra.mrb[4].mxu1 %v6500_v4 }
  0x8f   : > { %2825 = vmatmul.mubr.bf16.gmra.mrb[4].mxu0 %v6502_v5  ;;  %1228 = vmatpush1.bf16.msra.mxu1 %v5860_v2  ;;  %v5899_v2 = vld [vmem:[%s7636_s1 + $0x280] ss:$8 sps:$4 sm:$0xff]  }
  0x90   : > { %3366 = vmatpush1.bf16.msra.mxu0 %v5863_v3  ;;  %1229 = vmatprep.subr.bf16.mxu1 %v5868_v21  ;;  %v5904_v3 = vld [vmem:[%s7636_s1 + $0x694] ss:$8 sps:$4 sm:$0xff]  }
  0x91   : > { %3367 = vmatprep.subr.bf16.mxu0 %v5871_v23  ;;  %863 = vmatprep.mubr.bf16.mxu1 %v6518_v12  ;;  %v5907_v21 = vld [vmem:[%s7636_s1 + $0x294] ss:$8 sps:$4 sm:$0xff]   ;;  %v5902_v23 = vld [vmem:[%s7636_s1 + $0x690] ss:$8 sps:$4 sm:$0xff]  }
  0x92   : > { %2834 = vmatprep.mubr.bf16.mxu0 %v6525_v16 }
  0x93   : > { %1230 = vmatpush1.bf16.msra.mxu1 %v5866_v24  ;;  %v5905_v24 = vld [vmem:[%s7636_s1 + $0x290] ss:$8 sps:$4 sm:$0xff]  }
  0x94   : > { %3368 = vmatpush1.bf16.msra.mxu0 %v5869_v51  ;;  %1231 = vmatprep.subr.bf16.mxu1 %v5874_v52  ;;  %v2560_v51 = vrot.slane %v2558_v35, 4  ;;  %v2563_v52 = vrot.slane %v2561_v40, 5  ;;  %v5922_v35 = vld [vmem:[%s7636_s1 + $0x6c4] ss:$8 sps:$4 sm:$0xff]  }
  0x95   : > { %3369 = vmatprep.subr.bf16.mxu0 %v5877_v10  ;;  %v2569_v10 = vrot.slane %v2567_v0, 5  ;;  %v5925_v40 = vld [vmem:[%s7636_s1 + $0x2c4] ss:$8 sps:$4 sm:$0xff]   ;;  %v5920_v0 = vld [vmem:[%s7636_s1 + $0x6c0] ss:$8 sps:$4 sm:$0xff]  }
  0x96   : > { %864 = vmatmul.mubr.bf16.gmra.mrb[8].mxu1 %v6561_v46 }
  0x97   : > { %2835 = vmatmul.mubr.bf16.gmra.mrb[8].mxu0 %v6563_v47  ;;  %1232 = vmatpush1.bf16.msra.mxu1 %v5872_v13  ;;  %v2573_v13 = vrot.slane %v2571_v26, 4 }
  0x98   : > { %3370 = vmatpush1.bf16.msra.mxu0 %v5875_v48  ;;  %1233 = vmatprep.subr.bf16.mxu1 %v5880_v53  ;;  %v5910_v48 = vld [vmem:[%s7636_s1 + $0x6a4] ss:$8 sps:$4 sm:$0xff]  }
  0x99   : > { %3371 = vmatprep.subr.bf16.mxu0 %v5883_v55  ;;  %873 = vmatprep.mubr.bf16.mxu1 %v6578_v38  ;;  %v5913_v53 = vld [vmem:[%s7636_s1 + $0x2a4] ss:$8 sps:$4 sm:$0xff]  }
  0x9a   : > { %2844 = vmatprep.mubr.bf16.mxu0 %v6582_v57  ;;  %v1461_v55 = vld [vmem:[%s6276_s7 + $0xe8] sm:$0x11] }
  0x9b   : > { %1234 = vmatpush1.bf16.msra.mxu1 %v5878_v39  ;;  %v5908_v39 = vld [vmem:[%s7636_s1 + $0x6a0] ss:$8 sps:$4 sm:$0xff]  }
  0x9c   : > { %3372 = vmatpush1.bf16.msra.mxu0 %v5881_v59  ;;  %1235 = vmatprep.subr.bf16.mxu1 %v5886_v60  ;;  %v2564_v59 = vor.u32 %v2563_v52, %v2560_v51  ;;  %v2574_v60 = vor.u32 %v2573_v13, %v2569_v10  ;;  %v5931_v51 = vld [vmem:[%s7636_s1 + $0x2d4] ss:$8 sps:$4 sm:$0xff]   ;;  %v5926_v52 = vld [vmem:[%s7636_s1 + $0x6d0] ss:$8 sps:$4 sm:$0xff]  }
  0x9d   : > { %3373 = vmatprep.subr.bf16.mxu0 %v5889_v61  ;;  %v2577_v61 = vshll.u32 %v1461_v55, 16  ;;  %v5929_v13 = vld [vmem:[%s7636_s1 + $0x2d0] ss:$8 sps:$4 sm:$0xff]  }
  0x9e   : > { %874 = vmatmul.mubr.bf16.gmra.mrb[12].mxu1 %v6595_v14 }
  0x9f   : > { %2845 = vmatmul.mubr.bf16.gmra.mrb[12].mxu0 %v6611_v25  ;;  %1236 = vmatpush1.bf16.msra.mxu1 %v5884_v45  ;;  %v5911_v45 = vld [vmem:[%s7636_s1 + $0x2a0] ss:$8 sps:$4 sm:$0xff]  }
  0xa0   : > { %3374 = vmatpush1.bf16.msra.mxu0 %v5887_v50  ;;  %1237 = vmatprep.subr.bf16.mxu1 %v5892_v7  ;;  %v5916_v50 = vld [vmem:[%s7636_s1 + $0x6b4] ss:$8 sps:$4 sm:$0xff]  }
  0xa1   : > { %3375 = vmatprep.subr.bf16.mxu0 %v5895_v9  ;;  %883 = vmatprep.mubr.bf16.mxu1 %v6629_v34  ;;  %v5919_v7 = vld [vmem:[%s7636_s1 + $0x2b4] ss:$8 sps:$4 sm:$0xff]   ;;  %v5914_v9 = vld [vmem:[%s7636_s1 + $0x6b0] ss:$8 sps:$4 sm:$0xff]  }
  0xa2   : > { %2854 = vmatprep.mubr.bf16.mxu0 %v6631_v37 }
  0xa3   : > { %1238 = vmatpush1.bf16.msra.mxu1 %v5890_v11  ;;  %v2565_v11 = vrot.slane %v2564_v59, 4  ;;  %v2995_v59 = vld [vmem:[%s6276_s7 + $0x20] sm:$0xff] }
  0xa4   : > { %3376 = vmatpush1.bf16.msra.mxu0 %v5893_v15  ;;  %1239 = vmatprep.subr.bf16.mxu1 %v5898_v17  ;;  %v2575_v15 = vrot.slane %v2574_v60, 4  ;;  %v2579_v17 = vrot.slane %v2577_v61, 5  ;;  %v5939_v60 = vld [vmem:[%s7636_s1 + $0x2e4] ss:$8 sps:$4 sm:$0xff]   ;;  %v5934_v61 = vld [vmem:[%s7636_s1 + $0x6e0] ss:$8 sps:$4 sm:$0xff]  }
  0xa5   : > { %3377 = vmatprep.subr.bf16.mxu0 %v5901_v19  ;;  %v5917_v19 = vld [vmem:[%s7636_s1 + $0x2b0] ss:$8 sps:$4 sm:$0xff]   ;;  %v2570_v26 = vsel %vm6322_vm2, %v2565_v11, %v2569_v10 }
  0xa6   : > { %884 = vmatmul.mubr.bf16.gmra.mrb[16].mxu1 %v6654_v62  ;;  %v2994_v11 = vld [vmem:[%s6276_s7 + $0x18] sm:$0xee] }
  0xa7   : > { %2855 = vmatmul.mubr.bf16.gmra.mrb[16].mxu0 %v6656_v63  ;;  %1240 = vmatpush1.bf16.msra.mxu1 %v5896_v1  ;;  %v6950_v1 = vld [vmem:[%s6276_s7 + $0x8] sm:$0xff] }
  0xa8   : > { %3378 = vmatpush1.bf16.msra.mxu0 %v5899_v2  ;;  %1241 = vmatprep.subr.bf16.mxu1 %v5904_v3  ;;  %v2580_v2 = vsel %vm6322_vm2, %v2575_v15, %v2579_v17  ;;  %v3050_v3 = vrot.slane %v6950_v1, 5  ;;  %v2996_v15 = vld [vmem:[%s6276_s7 + $0x28] sm:$0x11]  ;;  %v3057_v17 = vrot.slane %v2995_v59, 5  ;;  %v2999_v59 = vld [vmem:[%s6276_s7 + $0x40] sm:$0x11] }
  0xa9   : > { %3379 = vmatprep.subr.bf16.mxu0 %v5907_v21  ;;  %893 = vmatprep.mubr.bf16.mxu1 %v6676_v18  ;;  %v2991_v21 = vld [vmem:[%s6276_s7] sm:$0xee]  ;;  %v5052_v10 = vcombine.high %v2570_v26, %v2580_v2 }
  0xaa   : > { %2864 = vmatprep.mubr.bf16.mxu0 %v6678_v20  ;;  %v3052_v55 = vrot.slane %v3050_v3, 4 }
  0xab   : > { %1242 = vmatpush1.bf16.msra.mxu1 %v5902_v23  ;;  %v2993_v23 = vld [vmem:[%s6276_s7 + $0x10] sm:$0x11] }
  0xac   : > { %3380 = vmatpush1.bf16.msra.mxu0 %v5905_v24  ;;  %1243 = vmatprep.subr.bf16.mxu1 %v5910_v48  ;;  %v5928_v24 = vld [vmem:[%s7636_s1 + $0x6d4] ss:$8 sps:$4 sm:$0xff]  }
  0xad   : > { %3381 = vmatprep.subr.bf16.mxu0 %v5913_v53  ;;  %v5085_v53 = vrot.slane %v2991_v21, 9  ;;  %v2998_v21 = vld [vmem:[%s6276_s7 + $0x38] sm:$0xff] }
  0xae   : > { %894 = vmatmul.mubr.bf16.gmra.mrb[20].mxu1 %v6698_v31 }
  0xaf   : > { %2865 = vmatmul.mubr.bf16.gmra.mrb[20].mxu0 %v6700_v28  ;;  %1244 = vmatpush1.bf16.msra.mxu1 %v5908_v39  ;;  %v3053_v39 = vrot.slane %v2993_v23, 5  ;;  %v5948_v23 = vld [vmem:[%s7636_s1 + $0x104] ss:$8 sps:$4 sm:$0xff]  }
  0xb0   : > { %3382 = vmatpush1.bf16.msra.mxu0 %v5911_v45  ;;  %1245 = vmatprep.subr.bf16.mxu1 %v5916_v50  ;;  %v5937_v45 = vld [vmem:[%s7636_s1 + $0x2e0] ss:$8 sps:$4 sm:$0xff]   ;;  %v5051_v50 = vcombine.low %v2570_v26, %v2580_v2  ;;  %v5943_v26 = vld [vmem:[%s7636_s1 + $0x2f0] ss:$8 sps:$4 sm:$0xff]   ;;  %v5086_v2 = vrot.slane %v2994_v11, 9 }
  0xb1   : > { %3383 = vmatprep.subr.bf16.mxu0 %v5919_v7  ;;  %903 = vmatprep.mubr.bf16.mxu1 %v6720_v42  ;;  %v3051_v7 = vsel %vm6989_vm5, %v5085_v53, %v3050_v3  ;;  %v3059_v3 = vrot.slane %v3057_v17, 4  ;;  %v3001_v11 = vld [vmem:[%s6276_s7 + $0x50] sm:$0xff] }
  0xb2   : > { %2874 = vmatprep.mubr.bf16.mxu0 %v6722_v43  ;;  %v5923_v43 = vld [vmem:[%s7636_s1 + $0x2c0] ss:$8 sps:$4 sm:$0xff]   ;;  %v3058_v53 = vsel %vm6989_vm5, %v5086_v2, %v3057_v17  ;;  %v3002_v2 = vld [vmem:[%s6276_s7 + $0x58] sm:$0x11] }
  0xb3   : > { %1246 = vmatpush1.bf16.msra.mxu1 %v5914_v9  ;;  %v3054_v9 = vsel %vm6989_vm5, %v3052_v55, %v3053_v39  ;;  %v3064_v55 = vrot.slane %v2998_v21, 5  ;;  %v2997_v39 = vld [vmem:[%s6276_s7 + $0x30] sm:$0xee]  ;;  %v5958_v17 = vld [vmem:[%s7636_s1 + $0x120] ss:$8 sps:$4 sm:$0xff]  }
  0xb4   : > { %3384 = vmatpush1.bf16.msra.mxu0 %v5917_v19  ;;  %1247 = vmatprep.subr.bf16.mxu1 %v5922_v35  ;;  %v5942_v19 = vld [vmem:[%s7636_s1 + $0x6f4] ss:$8 sps:$4 sm:$0xff]   ;;  %v5964_v21 = vld [vmem:[%s7636_s1 + $0x130] ss:$8 sps:$4 sm:$0xff]  }
  0xb5   : > { %3385 = vmatprep.subr.bf16.mxu0 %v5925_v40  ;;  %v5945_v35 = vld [vmem:[%s7636_s1 + $0x2f4] ss:$8 sps:$4 sm:$0xff]   ;;  %v5940_v40 = vld [vmem:[%s7636_s1 + $0x6f0] ss:$8 sps:$4 sm:$0xff]  }
  0xb6   : > { %904 = vmatmul.mubr.bf16.gmra.mrb[24].mxu1 %v6742_v56 }
  0xb7   : > { %2875 = vmatmul.mubr.bf16.gmra.mrb[24].mxu0 %v6744_v58  ;;  %1248 = vmatpush1.bf16.msra.mxu1 %v5920_v0  ;;  %v5936_v58 = vld [vmem:[%s7636_s1 + $0x6e4] ss:$8 sps:$4 sm:$0xff]   ;;  %v5126_v0 = vcombine.high %v3051_v7, %v3054_v9 }
  0xb8   : > { %3386 = vmatpush1.bf16.msra.mxu0 %v5923_v43  ;;  %1249 = vmatprep.subr.bf16.mxu1 %v5928_v24  ;;  %v3060_v43 = vrot.slane %v2996_v15, 5  ;;  %v5951_v24 = vld [vmem:[%s7636_s1 + $0x504] ss:$8 sps:$4 sm:$0xff]  }
  0xb9   : > { %3387 = vmatprep.subr.bf16.mxu0 %v5931_v51  ;;  %913 = vmatprep.mubr.bf16.mxu1 %v6622_v32  ;;  %v5946_v51 = vld [vmem:[%s7636_s1 + $0x100] ss:$8 sps:$4 sm:$0xff]   ;;  %v5960_v15 = vld [vmem:[%s7636_s1 + $0x124] ss:$8 sps:$4 sm:$0xff]  }
  0xba   : > { %2884 = vmatprep.mubr.bf16.mxu0 %v5052_v10  ;;  %v5949_v10 = vld [vmem:[%s7636_s1 + $0x500] ss:$8 sps:$4 sm:$0xff]  }
  0xbb   : > { %1250 = vmatpush1.bf16.msra.mxu1 %v5926_v52  ;;  %v5125_v52 = vcombine.low %v3051_v7, %v3054_v9  ;;  %v3066_v7 = vrot.slane %v3064_v55, 4  ;;  %v3067_v9 = vrot.slane %v2999_v59, 5 }
  0xbc   : > { %3388 = vmatpush1.bf16.msra.mxu0 %v5929_v13  ;;  %1251 = vmatprep.subr.bf16.mxu1 %v5936_v58  ;;  %v5954_v13 = vld [vmem:[%s7636_s1 + $0x114] ss:$8 sps:$4 sm:$0xff]  }
  0xbd   : > { %3389 = vmatprep.subr.bf16.mxu0 %v5939_v60  ;;  %v5957_v58 = vld [vmem:[%s7636_s1 + $0x514] ss:$8 sps:$4 sm:$0xff]   ;;  %v5952_v60 = vld [vmem:[%s7636_s1 + $0x110] ss:$8 sps:$4 sm:$0xff]  }
  0xbe   : > { %914 = vmatmul.mubr.bf16.gmra.mrb[28].mxu1 %v6636_v49 }
  0xbf   : > { %2885 = vmatmul.mubr.bf16.gmra.mrb[28].mxu0 %v5051_v50  ;;  %1252 = vmatpush1.bf16.msra.mxu1 %v5934_v61  ;;  %v5087_v50 = vrot.slane %v2997_v39, 9 }
  0xc0   : > { %3390 = vmatpush1.bf16.msra.mxu0 %v5937_v45  ;;  %1253 = vmatprep.subr.bf16.mxu1 %v5942_v19  ;;  %v5955_v45 = vld [vmem:[%s7636_s1 + $0x510] ss:$8 sps:$4 sm:$0xff]  }
  0xc1   : > { %3391 = vmatprep.subr.bf16.mxu0 %v5945_v35  ;;  %1255 = vmatprep.mubr.bf16.mxu1 %v6463_v36  ;;  %v3061_v36 = vsel %vm6989_vm5, %v3059_v3, %v3060_v43  ;;  %v5961_v35 = vld [vmem:[%s7636_s1 + $0x520] ss:$8 sps:$4 sm:$0xff]   ;;  %v5966_v3 = vld [vmem:[%s7636_s1 + $0x134] ss:$8 sps:$4 sm:$0xff]  }
  0xc2   : > { %3393 = vmatprep.mubr.bf16.mxu0 %v5126_v0  ;;  %v7055_v61 = vcombine.high %v3058_v53, %v3061_v36  ;;  %v7073_v19 = vcombine.low %v3058_v53, %v3061_v36  ;;  %v3068_v0 = vsel %vm6989_vm5, %v3066_v7, %v3067_v9  ;;  %v5969_v43 = vld [vmem:[%s7636_s1 + $0x534] ss:$8 sps:$4 sm:$0xff]   ;;  %v5972_v53 = vld [vmem:[%s7636_s1 + $0x144] ss:$8 sps:$4 sm:$0xff]   ;;  %v5970_v36 = vld [vmem:[%s7636_s1 + $0x140] ss:$8 sps:$4 sm:$0xff]  }
  0xc3   : > { %1254 = vmatpush1.bf16.msra.mxu1 %v5940_v40  ;;  %v3065_v40 = vsel %vm6989_vm5, %v5087_v50, %v3064_v55  ;;  %v5973_v55 = vld [vmem:[%s7636_s1 + $0x540] ss:$8 sps:$4 sm:$0xff]   ;;  %v5978_v50 = vld [vmem:[%s7636_s1 + $0x154] ss:$8 sps:$4 sm:$0xff]   ;;  %v5976_v9 = vld [vmem:[%s7636_s1 + $0x150] ss:$8 sps:$4 sm:$0xff]  }
  0xc4   : > { %3392 = vmatpush1.bf16.msra.mxu0 %v5943_v26  ;;  %1914 = vmatprep.subr.bf16.mxu1 %v5948_v23  ;;  %v3000_v26 = vld [vmem:[%s6276_s7 + $0x48] sm:$0xee]  ;;  %v5967_v23 = vld [vmem:[%s7636_s1 + $0x530] ss:$8 sps:$4 sm:$0xff]   ;;  %v7115_v39 = vcombine.low %v3065_v40, %v3068_v0  ;;  %v5981_v7 = vld [vmem:[%s7636_s1 + $0x554] ss:$8 sps:$4 sm:$0xff]  }
  0xc5   : > { %3781 = vmatprep.subr.bf16.mxu0 %v5951_v24  ;;  %v7096_v24 = vcombine.high %v3065_v40, %v3068_v0  ;;  %v3007_v40 = vld [vmem:[%s6276_s7 + $0x80] sm:$0xff] }
  0xc6   : > { %1256 = vmatmul.mubr.bf16.vlgmr.msra.gmra.mrb[0].mxu1 %v6500_v4  ;;  %v5963_v4 = vld [vmem:[%s7636_s1 + $0x524] ss:$8 sps:$4 sm:$0xff]  }
  0xc7   : > { %3394 = vmatmul.mubr.bf16.vlgmr.msra.gmra.mrb[0].mxu0 %v5125_v52  ;;  %1915 = vmatpush1.bf16.msra.mxu1 %v5946_v51  ;;  %v5088_v51 = vrot.slane %v3000_v26, 9  ;;  %v5984_v0 = vld [vmem:[%s7636_s1 + $0x164] ss:$8 sps:$4 sm:$0xff]   ;;  %v5982_v26 = vld [vmem:[%s7636_s1 + $0x160] ss:$8 sps:$4 sm:$0xff]  }
  0xc8   : > { %3782 = vmatpush1.bf16.msra.mxu0 %v5949_v10  ;;  %1916 = vmatprep.subr.bf16.mxu1 %v5954_v13  ;;  %v3074_v10 = vrot.slane %v3002_v2, 5  ;;  %v3004_v13 = vld [vmem:[%s6276_s7 + $0x68] sm:$0xff] }
  0xc9   : > { %3783 = vmatprep.subr.bf16.mxu0 %v5957_v58  ;;  %1265 = vmatprep.mubr.bf16.mxu1 %v6518_v12  ;;  %v3071_v12 = vrot.slane %v3001_v11, 5  ;;  %v5979_v11 = vld [vmem:[%s7636_s1 + $0x550] ss:$8 sps:$4 sm:$0xff]  }
  0xca   : > { %3403 = vmatprep.mubr.bf16.mxu0 %v7055_v61 }
  0xcb   : > { %1917 = vmatpush1.bf16.msra.mxu1 %v5952_v60  ;;  %v3073_v52 = vrot.slane %v3071_v12, 4  ;;  %v3072_v59 = vsel %vm6989_vm5, %v5088_v51, %v3071_v12  ;;  %v3003_v60 = vld [vmem:[%s6276_s7 + $0x60] sm:$0xee]  ;;  %v5990_v51 = vld [vmem:[%s7636_s1 + $0x174] ss:$8 sps:$4 sm:$0xff]  }
  0xcc   : > { %3784 = vmatpush1.bf16.msra.mxu0 %v5955_v45  ;;  %1918 = vmatprep.subr.bf16.mxu1 %v5960_v15  ;;  %v3005_v45 = vld [vmem:[%s6276_s7 + $0x70] sm:$0x11]  ;;  %v5985_v12 = vld [vmem:[%s7636_s1 + $0x560] ss:$8 sps:$4 sm:$0xff]  }
  0xcd   : > { %3785 = vmatprep.subr.bf16.mxu0 %v5963_v4  ;;  %v3075_v58 = vsel %vm6989_vm5, %v3073_v52, %v3074_v10  ;;  %v5089_v4 = vrot.slane %v3003_v60, 9  ;;  %v5993_v52 = vld [vmem:[%s7636_s1 + $0x574] ss:$8 sps:$4 sm:$0xff]  }
  0xce   : > { %1266 = vmatmul.mubr.bf16.gmra.mrb[4].mxu1 %v6561_v46  ;;  %v5975_v46 = vld [vmem:[%s7636_s1 + $0x544] ss:$8 sps:$4 sm:$0xff]   ;;  %v7135_v15 = vcombine.high %v3072_v59, %v3075_v58  ;;  %v7154_v2 = vcombine.low %v3072_v59, %v3075_v58  ;;  %v3010_v59 = vld [vmem:[%s6276_s7 + $0x98] sm:$0xff] }
  0xcf   : > { %3404 = vmatmul.mubr.bf16.gmra.mrb[4].mxu0 %v7073_v19  ;;  %1919 = vmatpush1.bf16.msra.mxu1 %v5958_v17  ;;  %v5999_v58 = vld [vmem:[%s7636_s1 + $0x584] ss:$8 sps:$4 sm:$0xff]  }
  0xd0   : > { %3786 = vmatpush1.bf16.msra.mxu0 %v5961_v35  ;;  %1920 = vmatprep.subr.bf16.mxu1 %v5966_v3  ;;  %v3081_v35 = vrot.slane %v3005_v45, 5 }
  0xd1   : > { %3787 = vmatprep.subr.bf16.mxu0 %v5969_v43  ;;  %1275 = vmatprep.mubr.bf16.mxu1 %v6578_v38  ;;  %v3078_v38 = vrot.slane %v3004_v13, 5 }
  0xd2   : > { %3413 = vmatprep.mubr.bf16.mxu0 %v7096_v24 }
  0xd3   : > { %1921 = vmatpush1.bf16.msra.mxu1 %v5964_v21  ;;  %v3080_v17 = vrot.slane %v3078_v38, 4  ;;  %v3079_v3 = vsel %vm6989_vm5, %v5089_v4, %v3078_v38  ;;  %v3006_v21 = vld [vmem:[%s6276_s7 + $0x78] sm:$0xee] }
  0xd4   : > { %3788 = vmatpush1.bf16.msra.mxu0 %v5967_v23  ;;  %1922 = vmatprep.subr.bf16.mxu1 %v5972_v53  ;;  %v3085_v23 = vrot.slane %v3007_v40, 5  ;;  %v5090_v13 = vrot.slane %v3006_v21, 9  ;;  %v6002_v4 = vld [vmem:[%s7636_s1 + $0x194] ss:$8 sps:$4 sm:$0xff]   ;;  %v6011_v21 = vld [vmem:[%s7636_s1 + $0x5a4] ss:$8 sps:$4 sm:$0xff]  }
  0xd5   : > { %3789 = vmatprep.subr.bf16.mxu0 %v5975_v46  ;;  %v3082_v43 = vsel %vm6989_vm5, %v3080_v17, %v3081_v35  ;;  %v6005_v17 = vld [vmem:[%s7636_s1 + $0x594] ss:$8 sps:$4 sm:$0xff]  }
  0xd6   : > { %1276 = vmatmul.mubr.bf16.gmra.mrb[8].mxu1 %v6595_v14  ;;  %v5987_v14 = vld [vmem:[%s7636_s1 + $0x564] ss:$8 sps:$4 sm:$0xff]   ;;  %v7168_v10 = vcombine.high %v3079_v3, %v3082_v43  ;;  %v3087_v53 = vrot.slane %v3085_v23, 4  ;;  %v7187_v60 = vcombine.low %v3079_v3, %v3082_v43  ;;  %v3086_v38 = vsel %vm6989_vm5, %v5090_v13, %v3085_v23  ;;  %v3013_v3 = vld [vmem:[%s6276_s7 + $0xb0] sm:$0xff] }
  0xd7   : > { %3414 = vmatmul.mubr.bf16.gmra.mrb[8].mxu0 %v7115_v39  ;;  %1923 = vmatpush1.bf16.msra.mxu1 %v5970_v36  ;;  %v5988_v36 = vld [vmem:[%s7636_s1 + $0x170] ss:$8 sps:$4 sm:$0xff]   ;;  %v1432_v43 = vld [vmem:[%s6276_s7] sm:$0xff] }
  0xd8   : > { %3790 = vmatpush1.bf16.msra.mxu0 %v5973_v55  ;;  %1924 = vmatprep.subr.bf16.mxu1 %v5978_v50  ;;  %v5991_v55 = vld [vmem:[%s7636_s1 + $0x570] ss:$8 sps:$4 sm:$0xff]  }
  0xd9   : > { %3791 = vmatprep.subr.bf16.mxu0 %v5981_v7  ;;  %1285 = vmatprep.mubr.bf16.mxu1 %v6629_v34  ;;  %v3008_v34 = vld [vmem:[%s6276_s7 + $0x88] sm:$0x11]  ;;  %v3009_v50 = vld [vmem:[%s6276_s7 + $0x90] sm:$0xee]  ;;  %v3092_v7 = vrot.slane %v3010_v59, 5 }
  0xda   : > { %3423 = vmatprep.mubr.bf16.mxu0 %v7135_v15  ;;  %v3088_v46 = vrot.slane %v3008_v34, 5  ;;  %v5091_v40 = vrot.slane %v3009_v50, 9  ;;  %v6009_v59 = vld [vmem:[%s7636_s1 + $0x5a0] ss:$8 sps:$4 sm:$0xff]  }
  0xdb   : > { %1925 = vmatpush1.bf16.msra.mxu1 %v5976_v9  ;;  %v5994_v9 = vld [vmem:[%s7636_s1 + $0x180] ss:$8 sps:$4 sm:$0xff]  }
  0xdc   : > { %3792 = vmatpush1.bf16.msra.mxu0 %v5979_v11  ;;  %1926 = vmatprep.subr.bf16.mxu1 %v5984_v0  ;;  %v3089_v45 = vsel %vm6989_vm5, %v3087_v53, %v3088_v46  ;;  %v3011_v11 = vld [vmem:[%s6276_s7 + $0xa0] sm:$0x11]  ;;  %v6000_v0 = vld [vmem:[%s7636_s1 + $0x190] ss:$8 sps:$4 sm:$0xff]   ;;  %v3093_v23 = vsel %vm6989_vm5, %v5091_v40, %v3092_v7  ;;  %v3012_v53 = vld [vmem:[%s6276_s7 + $0xa8] sm:$0xee] }
  0xdd   : > { %3793 = vmatprep.subr.bf16.mxu0 %v5987_v14  ;;  %v7207_v35 = vcombine.high %v3086_v38, %v3089_v45  ;;  %v3094_v14 = vrot.slane %v3092_v7, 4  ;;  %v7227_v34 = vcombine.low %v3086_v38, %v3089_v45  ;;  %v3099_v46 = vrot.slane %v3013_v3, 5  ;;  %v6015_v40 = vld [vmem:[%s7636_s1 + $0x5b0] ss:$8 sps:$4 sm:$0xff]  }
  0xde   : > { %1286 = vmatmul.mubr.bf16.gmra.mrb[12].mxu1 %v6654_v62  ;;  %v5996_v62 = vld [vmem:[%s7636_s1 + $0x184] ss:$8 sps:$4 sm:$0xff]   ;;  %v5092_v45 = vrot.slane %v3012_v53, 9 }
  0xdf   : > { %3424 = vmatmul.mubr.bf16.gmra.mrb[12].mxu0 %v7154_v2  ;;  %1927 = vmatpush1.bf16.msra.mxu1 %v5982_v26  ;;  %v3095_v26 = vrot.slane %v3011_v11, 5 }
  0xe0   : > { %3794 = vmatpush1.bf16.msra.mxu0 %v5985_v12  ;;  %1928 = vmatprep.subr.bf16.mxu1 %v5990_v51  ;;  %v6003_v12 = vld [vmem:[%s7636_s1 + $0x590] ss:$8 sps:$4 sm:$0xff]   ;;  %v1475_v51 = vshll.u32 %v6950_v1, 16  ;;  %v3100_v3 = vsel %vm6989_vm5, %v5092_v45, %v3099_v46  ;;  %v6032_v45 = vld [vmem:[%s7636_s1 + $0x1e0] ss:$8 sps:$4 sm:$0xff]  }
  0xe1   : > { %3795 = vmatprep.subr.bf16.mxu0 %v5993_v52  ;;  %1295 = vmatprep.mubr.bf16.mxu1 %v6676_v18  ;;  %v5997_v18 = vld [vmem:[%s7636_s1 + $0x580] ss:$8 sps:$4 sm:$0xff]   ;;  %v1479_v52 = vshrl.u32 %v6950_v1, 16  ;;  %v3096_v13 = vsel %vm6989_vm5, %v3094_v14, %v3095_v26  ;;  %v6014_v1 = vld [vmem:[%s7636_s1 + $0x1b4] ss:$8 sps:$4 sm:$0xff]  }
  0xe2   : > { %3433 = vmatprep.mubr.bf16.mxu0 %v7168_v10  ;;  %v7249_v38 = vcombine.high %v3093_v23, %v3096_v13  ;;  %v1477_v50 = vrot.slane %v1475_v51, 5  ;;  %v6023_v14 = vld [vmem:[%s7636_s1 + $0x5c4] ss:$8 sps:$4 sm:$0xff]   ;;  %v7268_v26 = vcombine.low %v3093_v23, %v3096_v13  ;;  %v6018_v51 = vld [vmem:[%s7636_s1 + $0x1c0] ss:$8 sps:$4 sm:$0xff]  }
  0xe3   : > { %1929 = vmatpush1.bf16.msra.mxu1 %v5988_v36  ;;  %v1466_v36 = vshrl.u32 %v1432_v43, 16  ;;  %v1481_v7 = vrot.slane %v1479_v52, 4  ;;  %v6026_v23 = vld [vmem:[%s7636_s1 + $0x1d4] ss:$8 sps:$4 sm:$0xff]  }
  0xe4   : > { %3796 = vmatpush1.bf16.msra.mxu0 %v5991_v55  ;;  %1930 = vmatprep.subr.bf16.mxu1 %v5996_v62  ;;  %v1469_v55 = vshll.u32 %v1432_v43, 16  ;;  %v3014_v62 = vld [vmem:[%s6276_s7 + $0xb8] sm:$0x11] }
  0xe5   : > { %3797 = vmatprep.subr.bf16.mxu0 %v5999_v58  ;;  %v6017_v58 = vld [vmem:[%s7636_s1 + $0x5b4] ss:$8 sps:$4 sm:$0xff]   ;;  %v1468_v11 = vrot.slane %v1466_v36, 4 }
  0xe6   : > { %1296 = vmatmul.mubr.bf16.gmra.mrb[16].mxu1 %v6698_v31  ;;  %v6008_v31 = vld [vmem:[%s7636_s1 + $0x1a4] ss:$8 sps:$4 sm:$0xff]   ;;  %v6029_v52 = vld [vmem:[%s7636_s1 + $0x5d4] ss:$8 sps:$4 sm:$0xff]  }
  0xe7   : > { %3434 = vmatmul.mubr.bf16.gmra.mrb[16].mxu0 %v7187_v60  ;;  %1931 = vmatpush1.bf16.msra.mxu1 %v5994_v9  ;;  %v3101_v9 = vrot.slane %v3099_v46, 4 }
  0xe8   : > { %3798 = vmatpush1.bf16.msra.mxu0 %v5997_v18  ;;  %1932 = vmatprep.subr.bf16.mxu1 %v6002_v4  ;;  %v3102_v18 = vrot.slane %v3014_v62, 5  ;;  %v1471_v4 = vrot.slane %v1469_v55, 5  ;;  %v6024_v55 = vld [vmem:[%s7636_s1 + $0x1d0] ss:$8 sps:$4 sm:$0xff]  }
  0xe9   : > { %3799 = vmatprep.subr.bf16.mxu0 %v6005_v17  ;;  %1305 = vmatprep.mubr.bf16.mxu1 %v6720_v42  ;;  %v6006_v42 = vld [vmem:[%s7636_s1 + $0x1a0] ss:$8 sps:$4 sm:$0xff]   ;;  %v6012_v17 = vld [vmem:[%s7636_s1 + $0x1b0] ss:$8 sps:$4 sm:$0xff]  }
  0xea   : > { %3443 = vmatprep.mubr.bf16.mxu0 %v7207_v35  ;;  %v3103_v43 = vsel %vm6989_vm5, %v3101_v9, %v3102_v18  ;;  %v6038_v9 = vld [vmem:[%s7636_s1 + $0x1f0] ss:$8 sps:$4 sm:$0xff]  }
  0xeb   : > { %1933 = vmatpush1.bf16.msra.mxu1 %v6000_v0  ;;  %v1434_v0 = vld [vmem:[%s6276_s7 + $0x10] sm:$0x11]  ;;  %v7286_v13 = vcombine.high %v3100_v3, %v3103_v43  ;;  %v7306_v62 = vcombine.low %v3100_v3, %v3103_v43  ;;  %v3016_v43 = vld [vmem:[%s6276_s7 + $0xc8] sm:$0xff] }
  0xec   : > { %3800 = vmatpush1.bf16.msra.mxu0 %v6003_v12  ;;  %1934 = vmatprep.subr.bf16.mxu1 %v6008_v31  ;;  %v1482_v12 = vor.u32 %v1481_v7, %v1477_v50  ;;  %v1472_v31 = vor.u32 %v1471_v4, %v1468_v11  ;;  %v6040_v7 = vld [vmem:[%s7636_s1 + $0x1f4] ss:$8 sps:$4 sm:$0xff]   ;;  %v6041_v18 = vld [vmem:[%s7636_s1 + $0x5f0] ss:$8 sps:$4 sm:$0xff]   ;;  %v6046_v11 = vld [vmem:[%s7636_s1 + $0x804] ss:$8 sps:$4 sm:$0xff]  }
  0xed   : > { %3801 = vmatprep.subr.bf16.mxu0 %v6011_v21  ;;  %v1485_v21 = vshll.u32 %v1434_v0, 16  ;;  %v6052_v4 = vld [vmem:[%s7636_s1 + $0x824] ss:$8 sps:$4 sm:$0xff]   ;;  %v6061_v0 = vld [vmem:[%s7636_s1 + $0x854] ss:$8 sps:$4 sm:$0xff]  }
  0xee   : > { %1306 = vmatmul.mubr.bf16.gmra.mrb[20].mxu1 %v6742_v56  ;;  %v6020_v56 = vld [vmem:[%s7636_s1 + $0x1c4] ss:$8 sps:$4 sm:$0xff]   ;;  %v1473_v53 = vrot.slane %v1472_v31, 4  ;;  %v1483_v46 = vrot.slane %v1482_v12, 4  ;;  %v6073_v3 = vld [vmem:[%s7636_s1 + $0x894] ss:$8 sps:$4 sm:$0xff]  }
  0xef   : > { %3444 = vmatmul.mubr.bf16.gmra.mrb[20].mxu0 %v7227_v34  ;;  %1935 = vmatpush1.bf16.msra.mxu1 %v6006_v42  ;;  %v1487_v36 = vrot.slane %v1485_v21, 5  ;;  %v6027_v42 = vld [vmem:[%s7636_s1 + $0x5d0] ss:$8 sps:$4 sm:$0xff]   ;;  %v6070_v12 = vld [vmem:[%s7636_s1 + $0x884] ss:$8 sps:$4 sm:$0xff]  }
  0xf0   : > { %3802 = vmatpush1.bf16.msra.mxu0 %v6009_v59  ;;  %1936 = vmatprep.subr.bf16.mxu1 %v6014_v1  ;;  %v6037_v59 = vld [vmem:[%s7636_s1 + $0x5e4] ss:$8 sps:$4 sm:$0xff]   ;;  %v1478_v1 = vsel %vm6322_vm2, %v1473_v53, %v1477_v50  ;;  %v6074_v21 = vld [vmem:[%s7636_s1 + $0x8a0] ss:$8 sps:$4 sm:$0xff]  }
  0xf1   : > { %3803 = vmatprep.subr.bf16.mxu0 %v6017_v58  ;;  %1315 = vmatprep.mubr.bf16.mxu1 %v6622_v32  ;;  %v6021_v32 = vld [vmem:[%s7636_s1 + $0x5c0] ss:$8 sps:$4 sm:$0xff]   ;;  %v1488_v58 = vsel %vm6322_vm2, %v1483_v46, %v1487_v36  ;;  %v6076_v31 = vld [vmem:[%s7636_s1 + $0x8a4] ss:$8 sps:$4 sm:$0xff]   ;;  %v6077_v46 = vld [vmem:[%s7636_s1 + $0x8b0] ss:$8 sps:$4 sm:$0xff]  }
  0xf2   : > { %3453 = vmatprep.mubr.bf16.mxu0 %v7249_v38  ;;  %v4906_v50 = vcombine.high %v1478_v1, %v1488_v58  ;;  %v4905_v27 = vcombine.low %v1478_v1, %v1488_v58  ;;  %v6082_v36 = vld [vmem:[%s7636_s1 + $0x8c4] ss:$8 sps:$4 sm:$0xff]  }
  0xf3   : > { %1937 = vmatpush1.bf16.msra.mxu1 %v6012_v17  ;;  %v6055_v17 = vld [vmem:[%s7636_s1 + $0x834] ss:$8 sps:$4 sm:$0xff]   ;;  %v6088_v1 = vld [vmem:[%s7636_s1 + $0x8e4] ss:$8 sps:$4 sm:$0xff]  }
  0xf4   : > { %3804 = vmatpush1.bf16.msra.mxu0 %v6015_v40  ;;  %1938 = vmatprep.subr.bf16.mxu1 %v6020_v56  ;;  %v6058_v40 = vld [vmem:[%s7636_s1 + $0x844] ss:$8 sps:$4 sm:$0xff]  }
  0xf5   : > { %3805 = vmatprep.subr.bf16.mxu0 %v6023_v14  ;;  %v6064_v56 = vld [vmem:[%s7636_s1 + $0x864] ss:$8 sps:$4 sm:$0xff]   ;;  %v6067_v14 = vld [vmem:[%s7636_s1 + $0x874] ss:$8 sps:$4 sm:$0xff]  }
  0xf6   : > { %1316 = vmatmul.mubr.bf16.gmra.mrb[24].mxu1 %v6636_v49  ;;  %v6034_v49 = vld [vmem:[%s7636_s1 + $0x1e4] ss:$8 sps:$4 sm:$0xff]  }
  0xf7   : > { %3454 = vmatmul.mubr.bf16.gmra.mrb[24].mxu0 %v7268_v26  ;;  %1939 = vmatpush1.bf16.msra.mxu1 %v6018_v51  ;;  %v3015_v51 = vld [vmem:[%s6276_s7 + $0xc0] sm:$0xee] }
  0xf8   : > { %3806 = vmatpush1.bf16.msra.mxu0 %v6021_v32  ;;  %1940 = vmatprep.subr.bf16.mxu1 %v6026_v23  ;;  %v3017_v32 = vld [vmem:[%s6276_s7 + $0xd0] sm:$0x11] }
  0xf9   : > { %3807 = vmatprep.subr.bf16.mxu0 %v6029_v52  ;;  %1325 = vmatprep.mubr.bf16.mxu1 %v4840_v33  ;;  %v6035_v33 = vld [vmem:[%s7636_s1 + $0x5e0] ss:$8 sps:$4 sm:$0xff]   ;;  %v6079_v23 = vld [vmem:[%s7636_s1 + $0x8b4] ss:$8 sps:$4 sm:$0xff]   ;;  %v3578_v53 = vrot.slane %v3017_v32, 5 }
  0xfa   : > { %3463 = vmatprep.mubr.bf16.mxu0 %v7286_v13 }
  0xfb   : > { %1941 = vmatpush1.bf16.msra.mxu1 %v6024_v55 }
  0xfc   : > { %3808 = vmatpush1.bf16.msra.mxu0 %v6027_v42  ;;  %1942 = vmatprep.subr.bf16.mxu1 %v6034_v49  ;;  %v6080_v42 = vld [vmem:[%s7636_s1 + $0x8c0] ss:$8 sps:$4 sm:$0xff]  }
  0xfd   : > { %3809 = vmatprep.subr.bf16.mxu0 %v6037_v59  ;;  %v6083_v59 = vld [vmem:[%s7636_s1 + $0x8d0] ss:$8 sps:$4 sm:$0xff]  }
  0xfe   : > { %1326 = vmatmul.mubr.bf16.gmra.mrb[28].mxu1 %v4839_v41  ;;  %v6049_v41 = vld [vmem:[%s7636_s1 + $0x814] ss:$8 sps:$4 sm:$0xff]  }
  0xff   : > { %3464 = vmatmul.mubr.bf16.gmra.mrb[28].mxu0 %v7306_v62  ;;  %1943 = vmatpush1.bf16.msra.mxu1 %v6032_v45  ;;  %v6091_v45 = vld [vmem:[%s7636_s1 + $0x8f4] ss:$8 sps:$4 sm:$0xff]  }
 0x100   : > { %3810 = vmatpush1.bf16.msra.mxu0 %v6035_v33  ;;  %1944 = vmatprep.subr.bf16.mxu1 %v6040_v7  ;;  %v3019_v33 = vld [vmem:[%s6276_s7 + $0xe0] sm:$0xff]  ;;  %v3018_v7 = vld [vmem:[%s6276_s7 + $0xd8] sm:$0xee] }
 0x101   : > { %3811 = vmatprep.subr.bf16.mxu0 %v6043_v8  ;;  %1946 = vmatprep.mubr.bf16.mxu1 %v4906_v50  ;;  %v3020_v8 = vld [vmem:[%s6276_s7 + $0xe8] sm:$0x11]  ;;  %v5240_v50 = vrot.slane %v3018_v7, 9 }
 0x102   : > { %3813 = vmatprep.mubr.bf16.mxu0 %v7055_v61  ;;  %v6047_v61 = vld [vmem:[%s7636_s1 + $0x810] ss:$8 sps:$4 sm:$0xff]  }
 0x103   : > { %1945 = vmatpush1.bf16.msra.mxu1 %v6038_v9 }
 0x104   : > { %3812 = vmatpush1.bf16.msra.mxu0 %v6041_v18  ;;  %5342 = vmatprep.subr.bf16.mxu1 %v6046_v11  ;;  %v3998_v18 = vrot.slane %v3020_v8, 5 }
 0x105   : > { %4201 = vmatprep.subr.bf16.mxu0 %v6046_v11 }
 0x106   : > { %1947 = vmatmul.mubr.bf16.vlgmr.msra.gmra.mrb[0].mxu1 %v4905_v27 }
 0x107   : > { %3814 = vmatmul.mubr.bf16.vlgmr.msra.gmra.mrb[0].mxu0 %v7073_v19  ;;  %5358 = vmatpush1.bf16.msra.mxu1 %v6044_v30  ;;  %v6050_v19 = vld [vmem:[%s7636_s1 + $0x820] ss:$8 sps:$4 sm:$0xff]  }
 0x108   : > { %4202 = vmatpush1.bf16.msra.mxu0 %v6044_v30  ;;  %5343 = vmatprep.subr.bf16.mxu1 %v6049_v41 }
 0x109   : > { %4203 = vmatprep.subr.bf16.mxu0 %v6049_v41  ;;  %1956 = vmatprep.mubr.bf16.mxu1 %v6347_v22  ;;  %v6053_v22 = vld [vmem:[%s7636_s1 + $0x830] ss:$8 sps:$4 sm:$0xff]  }
 0x10a   : > { %3823 = vmatprep.mubr.bf16.mxu0 %v7096_v24 }
 0x10b   : > { %5359 = vmatpush1.bf16.msra.mxu1 %v6047_v61 }
 0x10c   : > { %4204 = vmatpush1.bf16.msra.mxu0 %v6047_v61  ;;  %5344 = vmatprep.subr.bf16.mxu1 %v6052_v4 }
 0x10d   : > { %4205 = vmatprep.subr.bf16.mxu0 %v6052_v4 }
 0x10e   : > { %1957 = vmatmul.mubr.bf16.gmra.mrb[4].mxu1 %v6386_v54  ;;  %v6056_v54 = vld [vmem:[%s7636_s1 + $0x840] ss:$8 sps:$4 sm:$0xff]  }
 0x10f   : > { %3824 = vmatmul.mubr.bf16.gmra.mrb[4].mxu0 %v7115_v39  ;;  %5360 = vmatpush1.bf16.msra.mxu1 %v6050_v19 }
 0x110   : > { %4206 = vmatpush1.bf16.msra.mxu0 %v6050_v19  ;;  %5345 = vmatprep.subr.bf16.mxu1 %v6055_v17 }
 0x111   : > { %4207 = vmatprep.subr.bf16.mxu0 %v6055_v17  ;;  %1966 = vmatprep.mubr.bf16.mxu1 %v6420_v6  ;;  %v6059_v6 = vld [vmem:[%s7636_s1 + $0x850] ss:$8 sps:$4 sm:$0xff]  }
 0x112   : > { %3833 = vmatprep.mubr.bf16.mxu0 %v7135_v15 }
 0x113   : > { %5361 = vmatpush1.bf16.msra.mxu1 %v6053_v22 }
 0x114   : > { %4208 = vmatpush1.bf16.msra.mxu0 %v6053_v22  ;;  %5346 = vmatprep.subr.bf16.mxu1 %v6058_v40 }
 0x115   : > { %4209 = vmatprep.subr.bf16.mxu0 %v6058_v40 }
 0x116   : > { %1967 = vmatmul.mubr.bf16.gmra.mrb[8].mxu1 %v6443_v29  ;;  %v6062_v29 = vld [vmem:[%s7636_s1 + $0x860] ss:$8 sps:$4 sm:$0xff]  }
 0x117   : > { %3834 = vmatmul.mubr.bf16.gmra.mrb[8].mxu0 %v7154_v2  ;;  %5362 = vmatpush1.bf16.msra.mxu1 %v6056_v54 }
 0x118   : > { %4210 = vmatpush1.bf16.msra.mxu0 %v6056_v54  ;;  %5347 = vmatprep.subr.bf16.mxu1 %v6061_v0 }
 0x119   : > { %4211 = vmatprep.subr.bf16.mxu0 %v6061_v0  ;;  %1976 = vmatprep.mubr.bf16.mxu1 %v6471_v44  ;;  %v6065_v44 = vld [vmem:[%s7636_s1 + $0x870] ss:$8 sps:$4 sm:$0xff]  }
 0x11a   : > { %3843 = vmatprep.mubr.bf16.mxu0 %v7168_v10 }
 0x11b   : > { %5363 = vmatpush1.bf16.msra.mxu1 %v6059_v6 }
 0x11c   : > { %4212 = vmatpush1.bf16.msra.mxu0 %v6059_v6  ;;  %5348 = vmatprep.subr.bf16.mxu1 %v6064_v56 }
 0x11d   : > { %4213 = vmatprep.subr.bf16.mxu0 %v6064_v56 }
 0x11e   : > { %1977 = vmatmul.mubr.bf16.gmra.mrb[12].mxu1 %v6502_v5  ;;  %v6068_v5 = vld [vmem:[%s7636_s1 + $0x880] ss:$8 sps:$4 sm:$0xff]  }
 0x11f   : > { %3844 = vmatmul.mubr.bf16.gmra.mrb[12].mxu0 %v7187_v60  ;;  %5364 = vmatpush1.bf16.msra.mxu1 %v6062_v29 }
 0x120   : > { %4214 = vmatpush1.bf16.msra.mxu0 %v6062_v29  ;;  %5349 = vmatprep.subr.bf16.mxu1 %v6067_v14 }
 0x121   : > { %4215 = vmatprep.subr.bf16.mxu0 %v6067_v14  ;;  %1986 = vmatprep.mubr.bf16.mxu1 %v6525_v16  ;;  %v6071_v16 = vld [vmem:[%s7636_s1 + $0x890] ss:$8 sps:$4 sm:$0xff]  }
 0x122   : > { %3853 = vmatprep.mubr.bf16.mxu0 %v7207_v35 }
 0x123   : > { %5365 = vmatpush1.bf16.msra.mxu1 %v6065_v44 }
 0x124   : > { %4216 = vmatpush1.bf16.msra.mxu0 %v6065_v44  ;;  %5350 = vmatprep.subr.bf16.mxu1 %v6070_v12 }
 0x125   : > { %4217 = vmatprep.subr.bf16.mxu0 %v6070_v12 }
 0x126   : > { %1987 = vmatmul.mubr.bf16.gmra.mrb[16].mxu1 %v6563_v47  ;;  %v3575_v47 = vrot.slane %v3016_v43, 5 }
 0x127   : > { %3854 = vmatmul.mubr.bf16.gmra.mrb[16].mxu0 %v7227_v34  ;;  %5366 = vmatpush1.bf16.msra.mxu1 %v6068_v5 }
 0x128   : > { %4218 = vmatpush1.bf16.msra.mxu0 %v6068_v5  ;;  %5351 = vmatprep.subr.bf16.mxu1 %v6073_v3  ;;  %v3577_v52 = vrot.slane %v3575_v47, 4 }
 0x129   : > { %4219 = vmatprep.subr.bf16.mxu0 %v6073_v3  ;;  %1996 = vmatprep.mubr.bf16.mxu1 %v6582_v57  ;;  %v5173_v57 = vrot.slane %v3015_v51, 9 }
 0x12a   : > { %3863 = vmatprep.mubr.bf16.mxu0 %v7249_v38  ;;  %v3579_v55 = vsel %vm6989_vm5, %v3577_v52, %v3578_v53 }
 0x12b   : > { %5367 = vmatpush1.bf16.msra.mxu1 %v6071_v16 }
 0x12c   : > { %4220 = vmatpush1.bf16.msra.mxu0 %v6071_v16  ;;  %5352 = vmatprep.subr.bf16.mxu1 %v6076_v31 }
 0x12d   : > { %4221 = vmatprep.subr.bf16.mxu0 %v6076_v31 }
 0x12e   : > { %1997 = vmatmul.mubr.bf16.gmra.mrb[20].mxu1 %v6611_v25  ;;  %v3576_v25 = vsel %vm6989_vm5, %v5173_v57, %v3575_v47 }
 0x12f   : > { %3864 = vmatmul.mubr.bf16.gmra.mrb[20].mxu0 %v7268_v26  ;;  %5368 = vmatpush1.bf16.msra.mxu1 %v6074_v21  ;;  %v5207_v49 = vcombine.high %v3576_v25, %v3579_v55  ;;  %v5206_v58 = vcombine.low %v3576_v25, %v3579_v55 }
 0x130   : > { %4222 = vmatpush1.bf16.msra.mxu0 %v6074_v21  ;;  %5353 = vmatprep.subr.bf16.mxu1 %v6079_v23 }
 0x131   : > { %4223 = vmatprep.subr.bf16.mxu0 %v6079_v23  ;;  %2006 = vmatprep.mubr.bf16.mxu1 %v6631_v37  ;;  %v6085_v37 = vld [vmem:[%s7636_s1 + $0x8d4] ss:$8 sps:$4 sm:$0xff]  }
 0x132   : > { %3873 = vmatprep.mubr.bf16.mxu0 %v7286_v13 }
 0x133   : > { %5369 = vmatpush1.bf16.msra.mxu1 %v6077_v46 }
 0x134   : > { %4224 = vmatpush1.bf16.msra.mxu0 %v6077_v46  ;;  %5354 = vmatprep.subr.bf16.mxu1 %v6082_v36 }
 0x135   : > { %4225 = vmatprep.subr.bf16.mxu0 %v6082_v36 }
 0x136   : > { %2007 = vmatmul.mubr.bf16.gmra.mrb[24].mxu1 %v6656_v63  ;;  %v6086_v63 = vld [vmem:[%s7636_s1 + $0x8e0] ss:$8 sps:$4 sm:$0xff]  }
 0x137   : > { %3874 = vmatmul.mubr.bf16.gmra.mrb[24].mxu0 %v7306_v62  ;;  %5370 = vmatpush1.bf16.msra.mxu1 %v6080_v42 }
 0x138   : > { %4226 = vmatpush1.bf16.msra.mxu0 %v6080_v42  ;;  %5355 = vmatprep.subr.bf16.mxu1 %v6085_v37 }
 0x139   : > { %4227 = vmatprep.subr.bf16.mxu0 %v6085_v37  ;;  %2016 = vmatprep.mubr.bf16.mxu1 %v6678_v20  ;;  %v6089_v20 = vld [vmem:[%s7636_s1 + $0x8f0] ss:$8 sps:$4 sm:$0xff]  }
 0x13a   : > { %3883 = vmatprep.mubr.bf16.mxu0 %v5207_v49 }
 0x13b   : > { %5371 = vmatpush1.bf16.msra.mxu1 %v6083_v59 }
 0x13c   : > { %4228 = vmatpush1.bf16.msra.mxu0 %v6083_v59  ;;  %5356 = vmatprep.subr.bf16.mxu1 %v6088_v1 }
 0x13d   : > { %4229 = vmatprep.subr.bf16.mxu0 %v6088_v1 }
 0x13e   : > { %2017 = vmatmul.mubr.bf16.gmra.mrb[28].mxu1 %v6700_v28  ;;  %v3995_v28 = vrot.slane %v3019_v33, 5 }
 0x13f   : > { %3884 = vmatmul.mubr.bf16.gmra.mrb[28].mxu0 %v5206_v58  ;;  %5372 = vmatpush1.bf16.msra.mxu1 %v6086_v63 }
 0x140   : > { %4230 = vmatpush1.bf16.msra.mxu0 %v6086_v63  ;;  %5357 = vmatprep.subr.bf16.mxu1 %v6091_v45  ;;  %v3997_v9 = vrot.slane %v3995_v28, 4 }
 0x141   : > { %4231 = vmatprep.subr.bf16.mxu0 %v6091_v45  ;;  %4233 = vmatprep.mubr.bf16.mxu0 %v7096_v24  ;;  %v3996_v24 = vsel %vm6989_vm5, %v5240_v50, %v3995_v28  ;;  %v4444_v45 = vlaneseq }
 0x142   : > { %4273 = vmatprep.mubr.bf16.mxu1 %v7249_v38 }
 0x143   : > { %5373 = vmatpush1.bf16.msra.mxu1 %v6089_v20  ;;  %v4445_v33 = vshrl.u32 %v4444_v45, 7 }
 0x144   : > { %4232 = vmatpush1.bf16.msra.mxu0 %v6089_v20 }
 0x146   : > { %4274 = vmatmul.mubr.bf16.vlgmr.msra.gmra.mrb[32].mxu1 %v7268_v26 }
 0x147   : > { %4234 = vmatmul.mubr.bf16.vlgmr.msra.gmra.mrb[0].mxu0 %v7115_v39  ;;  %4283 = vmatprep.mubr.bf16.mxu1 %v7286_v13  ;;  %v3999_v39 = vsel %vm6989_vm5, %v3997_v9, %v3998_v18 }
 0x148   : > { %4243 = vmatprep.mubr.bf16.mxu0 %v7135_v15  ;;  %v5274_v15 = vcombine.high %v3996_v24, %v3999_v39  ;;  %v5273_v38 = vcombine.low %v3996_v24, %v3999_v39 }
 0x14e   : > { %4284 = vmatmul.mubr.bf16.gmra.mrb[36].mxu1 %v7306_v62 }
 0x14f   : > { %4244 = vmatmul.mubr.bf16.gmra.mrb[4].mxu0 %v7154_v2  ;;  %4293 = vmatprep.mubr.bf16.mxu1 %v5207_v49 }
 0x150   : > { %4253 = vmatprep.mubr.bf16.mxu0 %v7168_v10 }
 0x156   : > { %4294 = vmatmul.mubr.bf16.gmra.mrb[40].mxu1 %v5206_v58 }
 0x157   : > { %4254 = vmatmul.mubr.bf16.gmra.mrb[8].mxu0 %v7187_v60  ;;  %4303 = vmatprep.mubr.bf16.mxu1 %v5274_v15 }
 0x158   : > { %4263 = vmatprep.mubr.bf16.mxu0 %v7207_v35 }
 0x15e   : > { %4304 = vmatmul.mubr.bf16.gmra.mrb[44].mxu1 %v5273_v38 }
 0x15f   : > { %4264 = vmatmul.mubr.bf16.gmra.mrb[12].mxu0 %v7227_v34 }
 0x1d9   : > { %v7484_v2 = vpop.f32.mrb[0].mxu1 }
 0x1da   : > { %v7486_v10 = vpop.f32.mrb[1].mxu1 }
 0x1db   : > { %v7488_v26 = vpop.f32.mrb[2].mxu1 }
 0x1dc   : > { %v7490_v13 = vpop.f32.mrb[3].mxu1 }
 0x1e1   : > { %v7492_v48 = vpop.f32.mrb[4].mxu1 }
 0x1e2   : > { %v7494_v62 = vpop.f32.mrb[5].mxu1 }
 0x1e3   : > { %v7496_v60 = vpop.f32.mrb[6].mxu1 }
 0x1e4   : > { %v7498_v35 = vpop.f32.mrb[7].mxu1 }
 0x1e9   : > { %v7500_v11 = vpop.f32.mrb[8].mxu1 }
 0x1ea   : > { %v7502_v34 = vpop.f32.mrb[9].mxu1 }
 0x1eb   : > { %v7504_v27 = vpop.f32.mrb[10].mxu1 }
 0x1ec   : > { %v7506_v30 = vpop.f32.mrb[11].mxu1 }
 0x1f1   : > { %v7508_v41 = vpop.f32.mrb[12].mxu1 }
 0x1f2   : > { %v7510_v61 = vpop.f32.mrb[13].mxu1 }
 0x1f3   : > { %v7512_v4 = vpop.f32.mrb[14].mxu1 }
 0x1f4   : > { %v7514_v19 = vpop.f32.mrb[15].mxu1 }
 0x1f9   : > { %v1988_v17 = vpop.f32.mrb[16].mxu1 }
 0x1fa   : > { %v3855_v22 = vpop.f32.mrb[16].mxu0  ;;  %v1990_v54 = vpop.f32.mrb[17].mxu1 }
 0x1fb   : > { %v5390_v40 = vadd.f32 %v3855_v22, %v1988_v17  ;;  %v3857_v0 = vpop.f32.mrb[17].mxu0  ;;  %v1992_v56 = vpop.f32.mrb[18].mxu1  ;;  %v4446_v22 = vsub.s32 0, %v4445_v33 }
 0x1fc   : > { %v5392_v6 = vadd.f32 %v3857_v0, %v1990_v54  ;;  %v3859_v29 = vpop.f32.mrb[18].mxu0  ;;  %v1994_v44 = vpop.f32.mrb[19].mxu1  ;;  %v4442_v0 = vld [vmem:[%s7637_s2] sm:$0x3] }
 0x1fd   : > { %v5394_v14 = vadd.f32 %v3859_v29, %v1992_v56  ;;  %v3861_v12 = vpop.f32.mrb[19].mxu0  ;;  %v4450_v56 = vsub.s32 1, %v4445_v33  ;;  %v7545_v29 = vrot.slane %v4442_v0, %v4446_v22 }
 0x1fe   : > { %v7516_v5 = vadd.f32 %v3861_v12, %v1994_v44 }
 0x201   : > { %v1998_v3 = vpop.f32.mrb[20].mxu1 }
 0x202   : > { %v3865_v16 = vpop.f32.mrb[20].mxu0  ;;  %v2000_v31 = vpop.f32.mrb[21].mxu1 }
 0x203   : > { %v7518_v43 = vadd.f32 %v3865_v16, %v1998_v3  ;;  %v3867_v47 = vpop.f32.mrb[21].mxu0  ;;  %v2002_v51 = vpop.f32.mrb[22].mxu1  ;;  %v7547_v3 = vrot.slane %v4442_v0, %v4450_v56 }
 0x204   : > { %v7520_v21 = vadd.f32 %v3867_v47, %v2000_v31  ;;  %v3869_v32 = vpop.f32.mrb[22].mxu0  ;;  %v2004_v57 = vpop.f32.mrb[23].mxu1 }
 0x205   : > { %v7522_v23 = vadd.f32 %v3869_v32, %v2002_v51  ;;  %v3871_v52 = vpop.f32.mrb[23].mxu0 }
 0x206   : > { %v7524_v53 = vadd.f32 %v3871_v52, %v2004_v57 }
 0x209   : > { %v2008_v46 = vpop.f32.mrb[24].mxu1 }
 0x20a   : > { %v3875_v36 = vpop.f32.mrb[24].mxu0  ;;  %v2010_v55 = vpop.f32.mrb[25].mxu1 }
 0x20b   : > { %v7526_v25 = vadd.f32 %v3875_v36, %v2008_v46  ;;  %v3877_v42 = vpop.f32.mrb[25].mxu0  ;;  %v2012_v49 = vpop.f32.mrb[26].mxu1 }
 0x20c   : > { %v7528_v37 = vadd.f32 %v3877_v42, %v2010_v55  ;;  %v3879_v59 = vpop.f32.mrb[26].mxu0  ;;  %v2014_v58 = vpop.f32.mrb[27].mxu1 }
 0x20d   : > { %v7530_v1 = vadd.f32 %v3879_v59, %v2012_v49  ;;  %v3881_v63 = vpop.f32.mrb[27].mxu0 }
 0x20e   : > { %v7532_v20 = vadd.f32 %v3881_v63, %v2014_v58 }
 0x211   : > { %v2018_v28 = vpop.f32.mrb[28].mxu1 }
 0x212   : > { %v3885_v7 = vpop.f32.mrb[28].mxu0  ;;  %v2020_v50 = vpop.f32.mrb[29].mxu1 }
 0x213   : > { %v7534_v8 = vadd.f32 %v3885_v7, %v2018_v28  ;;  %v3887_v9 = vpop.f32.mrb[29].mxu0  ;;  %v2022_v24 = vpop.f32.mrb[30].mxu1 }
 0x214   : > { %v7536_v18 = vadd.f32 %v3887_v9, %v2020_v50  ;;  %v3889_v39 = vpop.f32.mrb[30].mxu0  ;;  %v2024_v38 = vpop.f32.mrb[31].mxu1 }
 0x215   : > { %v7538_v15 = vadd.f32 %v3889_v39, %v2022_v24  ;;  %v3891_v17 = vpop.f32.mrb[31].mxu0 }
 0x216   : > { %v7540_v54 = vadd.f32 %v3891_v17, %v2024_v38 }
 0x219   : > { %v4275_v12 = vpop.f32.mrb[32].mxu1 }
 0x21a   : > { %v4235_v44 = vpop.f32.mrb[0].mxu0  ;;  %v5391_v31 = vadd.f32 %v5390_v40, %v4275_v12  ;;  %v4277_v51 = vpop.f32.mrb[33].mxu1 }
 0x21b   : > { %v5374_v16 = vadd.f32 %v4235_v44, %v7484_v2  ;;  %v4237_v47 = vpop.f32.mrb[1].mxu0  ;;  %v5393_v57 = vadd.f32 %v5392_v6, %v4277_v51  ;;  %v4279_v46 = vpop.f32.mrb[34].mxu1 }
 0x21c   : > { %v5375_v32 = vadd.f32 %v4237_v47, %v7486_v10  ;;  %v4239_v52 = vpop.f32.mrb[2].mxu0  ;;  %v4470_v55 = vadd.f32 %v5391_v31, %v7545_v29  ;;  %v5395_v49 = vadd.f32 %v5394_v14, %v4279_v46  ;;  %v4281_v58 = vpop.f32.mrb[35].mxu1 }
 0x21d   : > { %v4454_v36 = vadd.f32 %v5374_v16, %v7545_v29  ;;  %v5376_v42 = vadd.f32 %v4239_v52, %v7488_v26  ;;  %v4241_v59 = vpop.f32.mrb[3].mxu0  ;;  %v4471_v40 = vadd.f32 %v5393_v57, %v7547_v3  ;;  %v5397_v10 = vadd.f32 %v7516_v5, %v4281_v58 }
 0x21e   : > { %v4455_v2 = vadd.f32 %v5375_v32, %v7547_v3  ;;  %v5377_v63 = vadd.f32 %v4241_v59, %v7490_v13  ;;  %v4502_v45 = vmax.f32 %v4470_v55, 0.0  ;;  %v4472_v28 = vadd.f32 %v5395_v49, %v7545_v29 }
 0x21f   : > { %v4486_v6 = vmax.f32 %v4454_v36, 0.0  ;;  %v4456_v33 = vadd.f32 %v5376_v42, %v7545_v29  ;;  %v4503_v26 = vmax.f32 %v4471_v40, 0.0  ;;  %v4473_v50 = vadd.f32 %v5397_v10, %v7547_v3 }
 0x220   : > { %v4487_v7 = vmax.f32 %v4455_v2, 0.0  ;;  %v4457_v14 = vadd.f32 %v5377_v63, %v7547_v3  ;;  %v4504_v5 = vmax.f32 %v4472_v28, 0.0 }
 0x221   : > { %v4488_v13 = vmax.f32 %v4456_v33, 0.0  ;;  %v5334_v24 = vpack.c.bf16 %v4503_v26, %v4502_v45  ;;  %v4505_v38 = vmax.f32 %v4473_v50, 0.0  ;;  %v4285_v22 = vpop.f32.mrb[36].mxu1 }
 0x222   : > { %v5326_v9 = vpack.c.bf16 %v4487_v7, %v4486_v6  ;;  %v4489_v39 = vmax.f32 %v4457_v14, 0.0  ;;  %v4245_v17 = vpop.f32.mrb[4].mxu0  ;;  %v5399_v56 = vadd.f32 %v7518_v43, %v4285_v22  ;;  %v4287_v12 = vpop.f32.mrb[37].mxu1 }
 0x223   : > { %v5378_v0 = vadd.f32 %v4245_v17, %v7492_v48  ;;  %v4247_v44 = vpop.f32.mrb[5].mxu0  ;;  %4622 = vst [vmem:[%s7566_s17 + $0x40] sm:$0xff] %v5334_v24  ;;  %v5335_v31 = vpack.c.bf16 %v4505_v38, %v4504_v5  ;;  %v5401_v51 = vadd.f32 %v7520_v21, %v4287_v12  ;;  %v4289_v57 = vpop.f32.mrb[38].mxu1 }
 0x224   : > { %4614 = vst [vmem:[%s7566_s17] sm:$0xff] %v5326_v9  ;;  %v5327_v16 = vpack.c.bf16 %v4489_v39, %v4488_v13  ;;  %v5379_v47 = vadd.f32 %v4247_v44, %v7494_v62  ;;  %v4249_v32 = vpop.f32.mrb[6].mxu0  ;;  %v4474_v48 = vadd.f32 %v5399_v56, %v7545_v29  ;;  %v5403_v46 = vadd.f32 %v7522_v23, %v4289_v57  ;;  %v4291_v55 = vpop.f32.mrb[39].mxu1 }
 0x225   : > { %v4458_v52 = vadd.f32 %v5378_v0, %v7545_v29  ;;  %v5380_v43 = vadd.f32 %v4249_v32, %v7496_v60  ;;  %v4251_v36 = vpop.f32.mrb[7].mxu0  ;;  %4623 = vst [vmem:[%s7566_s17 + $0x48] sm:$0xff] %v5335_v31  ;;  %v4475_v62 = vadd.f32 %v5401_v51, %v7547_v3  ;;  %v5405_v49 = vadd.f32 %v7524_v53, %v4291_v55 }
 0x226   : > { %4615 = vst [vmem:[%s7566_s17 + $0x8] sm:$0xff] %v5327_v16  ;;  %v4459_v42 = vadd.f32 %v5379_v47, %v7547_v3  ;;  %v5381_v21 = vadd.f32 %v4251_v36, %v7498_v35  ;;  %v4506_v58 = vmax.f32 %v4474_v48, 0.0  ;;  %v4476_v60 = vadd.f32 %v5403_v46, %v7545_v29 }
 0x227   : > { %v4490_v59 = vmax.f32 %v4458_v52, 0.0  ;;  %v4460_v2 = vadd.f32 %v5380_v43, %v7545_v29  ;;  %v4507_v23 = vmax.f32 %v4475_v62, 0.0  ;;  %v4477_v10 = vadd.f32 %v5405_v49, %v7547_v3 }
 0x228   : > { %v4491_v40 = vmax.f32 %v4459_v42, 0.0  ;;  %v4461_v63 = vadd.f32 %v5381_v21, %v7547_v3  ;;  %v4508_v45 = vmax.f32 %v4476_v60, 0.0 }
 0x229   : > { %v4492_v6 = vmax.f32 %v4460_v2, 0.0  ;;  %v5336_v35 = vpack.c.bf16 %v4507_v23, %v4506_v58  ;;  %v4509_v53 = vmax.f32 %v4477_v10, 0.0  ;;  %v4295_v26 = vpop.f32.mrb[40].mxu1 }
 0x22a   : > { %v5328_v33 = vpack.c.bf16 %v4491_v40, %v4490_v59  ;;  %v4493_v28 = vmax.f32 %v4461_v63, 0.0  ;;  %v4255_v7 = vpop.f32.mrb[8].mxu0  ;;  %v5407_v50 = vadd.f32 %v7526_v25, %v4295_v26  ;;  %v4297_v5 = vpop.f32.mrb[41].mxu1 }
 0x22b   : > { %v5382_v14 = vadd.f32 %v4255_v7, %v7500_v11  ;;  %v4257_v13 = vpop.f32.mrb[9].mxu0  ;;  %4624 = vst [vmem:[%s7566_s17 + $0x50] sm:$0xff] %v5336_v35  ;;  %v5337_v24 = vpack.c.bf16 %v4509_v53, %v4508_v45  ;;  %v5409_v38 = vadd.f32 %v7528_v37, %v4297_v5  ;;  %v4299_v22 = vpop.f32.mrb[42].mxu1 }
 0x22c   : > { %4616 = vst [vmem:[%s7566_s17 + $0x10] sm:$0xff] %v5328_v33  ;;  %v5329_v9 = vpack.c.bf16 %v4493_v28, %v4492_v6  ;;  %v5383_v39 = vadd.f32 %v4257_v13, %v7502_v34  ;;  %v4259_v17 = vpop.f32.mrb[10].mxu0  ;;  %v4478_v11 = vadd.f32 %v5407_v50, %v7545_v29  ;;  %v5411_v56 = vadd.f32 %v7530_v1, %v4299_v22  ;;  %v4301_v12 = vpop.f32.mrb[43].mxu1 }
 0x22d   : > { %v4462_v0 = vadd.f32 %v5382_v14, %v7545_v29  ;;  %v5384_v25 = vadd.f32 %v4259_v17, %v7504_v27  ;;  %v4261_v44 = vpop.f32.mrb[11].mxu0  ;;  %4625 = vst [vmem:[%s7566_s17 + $0x58] sm:$0xff] %v5337_v24  ;;  %v4479_v34 = vadd.f32 %v5409_v38, %v7547_v3  ;;  %v5413_v31 = vadd.f32 %v7532_v20, %v4301_v12 }
 0x22e   : > { %4617 = vst [vmem:[%s7566_s17 + $0x18] sm:$0xff] %v5329_v9  ;;  %v4463_v16 = vadd.f32 %v5383_v39, %v7547_v3  ;;  %v5385_v37 = vadd.f32 %v4261_v44, %v7506_v30  ;;  %v4510_v51 = vmax.f32 %v4478_v11, 0.0  ;;  %v4480_v27 = vadd.f32 %v5411_v56, %v7545_v29 }
 0x22f   : > { %v4494_v47 = vmax.f32 %v4462_v0, 0.0  ;;  %v4464_v32 = vadd.f32 %v5384_v25, %v7545_v29  ;;  %v4511_v1 = vmax.f32 %v4479_v34, 0.0  ;;  %v4481_v48 = vadd.f32 %v5413_v31, %v7547_v3 }
 0x230   : > { %v4495_v57 = vmax.f32 %v4463_v16, 0.0  ;;  %v4465_v52 = vadd.f32 %v5385_v37, %v7547_v3  ;;  %v4512_v46 = vmax.f32 %v4480_v27, 0.0 }
 0x231   : > { %v4496_v43 = vmax.f32 %v4464_v32, 0.0  ;;  %v5338_v30 = vpack.c.bf16 %v4511_v1, %v4510_v51  ;;  %v4513_v20 = vmax.f32 %v4481_v48, 0.0  ;;  %v4305_v62 = vpop.f32.mrb[44].mxu1 }
 0x232   : > { %v5330_v36 = vpack.c.bf16 %v4495_v57, %v4494_v47  ;;  %v4497_v55 = vmax.f32 %v4465_v52, 0.0  ;;  %v4265_v42 = vpop.f32.mrb[12].mxu0  ;;  %v5415_v49 = vadd.f32 %v7534_v8, %v4305_v62  ;;  %v4307_v58 = vpop.f32.mrb[45].mxu1 }
 0x233   : > { %v5386_v21 = vadd.f32 %v4265_v42, %v7508_v41  ;;  %v4267_v59 = vpop.f32.mrb[13].mxu0  ;;  %4626 = vst [vmem:[%s7566_s17 + $0x60] sm:$0xff] %v5338_v30  ;;  %v5339_v60 = vpack.c.bf16 %v4513_v20, %v4512_v46  ;;  %v5417_v23 = vadd.f32 %v7536_v18, %v4307_v58  ;;  %v4309_v10 = vpop.f32.mrb[46].mxu1 }
 0x234   : > { %4618 = vst [vmem:[%s7566_s17 + $0x20] sm:$0xff] %v5330_v36  ;;  %v5331_v2 = vpack.c.bf16 %v4497_v55, %v4496_v43  ;;  %v5387_v40 = vadd.f32 %v4267_v59, %v7510_v61  ;;  %v4269_v63 = vpop.f32.mrb[14].mxu0  ;;  %v4482_v41 = vadd.f32 %v5415_v49, %v7545_v29  ;;  %v5419_v45 = vadd.f32 %v7538_v15, %v4309_v10  ;;  %v4311_v35 = vpop.f32.mrb[47].mxu1 }
 0x235   : > { %v4466_v6 = vadd.f32 %v5386_v21, %v7545_v29  ;;  %v5388_v8 = vadd.f32 %v4269_v63, %v7512_v4  ;;  %v4271_v33 = vpop.f32.mrb[15].mxu0  ;;  %4627 = vst [vmem:[%s7566_s17 + $0x68] sm:$0xff] %v5339_v60  ;;  %v4483_v61 = vadd.f32 %v5417_v23, %v7547_v3  ;;  %v5421_v53 = vadd.f32 %v7540_v54, %v4311_v35 }
 0x236   : > { %4619 = vst [vmem:[%s7566_s17 + $0x28] sm:$0xff] %v5331_v2  ;;  %v4467_v28 = vadd.f32 %v5387_v40, %v7547_v3  ;;  %v5389_v18 = vadd.f32 %v4271_v33, %v7514_v19  ;;  %v4514_v26 = vmax.f32 %v4482_v41, 0.0  ;;  %v4484_v15 = vadd.f32 %v5419_v45, %v7545_v29 }
 0x237   : > { %v4498_v7 = vmax.f32 %v4466_v6, 0.0  ;;  %v4468_v4 = vadd.f32 %v5388_v8, %v7545_v29  ;;  %v4515_v50 = vmax.f32 %v4483_v61, 0.0  ;;  %v4485_v5 = vadd.f32 %v5421_v53, %v7547_v3 }
 0x238   : > { %v4499_v14 = vmax.f32 %v4467_v28, 0.0  ;;  %v4469_v13 = vadd.f32 %v5389_v18, %v7547_v3  ;;  %v4516_v19 = vmax.f32 %v4484_v15, 0.0 }
 0x239   : > { %v4500_v9 = vmax.f32 %v4468_v4, 0.0  ;;  %v5340_v39 = vpack.c.bf16 %v4515_v50, %v4514_v26  ;;  %v4517_v38 = vmax.f32 %v4485_v5, 0.0 }
 0x23a   : > { %v5332_v24 = vpack.c.bf16 %v4499_v14, %v4498_v7  ;;  %v4501_v54 = vmax.f32 %v4469_v13, 0.0 }
 0x23b   : > { %4628 = vst [vmem:[%s7566_s17 + $0x70] sm:$0xff] %v5340_v39  ;;  %v5341_v22 = vpack.c.bf16 %v4517_v38, %v4516_v19 }
 0x23c   : > { %4620 = vst [vmem:[%s7566_s17 + $0x30] sm:$0xff] %v5332_v24  ;;  %v5333_v17 = vpack.c.bf16 %v4501_v54, %v4500_v9 }
 0x23d   : > { %4629 = vst [vmem:[%s7566_s17 + $0x78] sm:$0xff] %v5341_v22 }
 0x23e   : > { %4621 = vst [vmem:[%s7566_s17 + $0x38] sm:$0xff] %v5333_v17 }
 0x23f PF: > { %s13_s12 = sadd.s32 1, %s6098_s12  }
 0x240   : > { %p10_p4 = scmp.ge.s32.totalorder %s13_s12, 6  }
 0x242   :  { %12 = sbr.rel (!%p10_p4) target bundleno = 1 (0x1), region = 70 }

</bundles_post_ra>
